<compile_context>
chip_gen: v6e
topology: v6e:2x2x1
jax: 0.10.0
libtpu: 0.0.40
codegen_flags: <defaults>
</compile_context>

<pallas_src>
import functools

import jax
import jax.numpy as jnp
from jax import lax
from jax.experimental import pallas as pl
from jax.experimental.pallas import tpu as pltpu

LEAKY_SLOPE = 0.2
BN_EPS = 1e-5
LANE_TILE_CAP = 4096   # layer-1 M tile: grid of 4 at 256x256 (2 steps/TC on v7x).
                       # 8192 shaves ~0.7us of step overhead on single-TC v5e;
                       # 4096 is safe and near-optimal on every generation.
BN_TILE_CAP = 1024     # M tile for the BN layers so the patch DMA pipelines.


def _pick_lane_tile(m, cap=LANE_TILE_CAP):
    """Largest lane tile <= cap that divides m and is a multiple of 128;
    falls back to the full extent (block == array dim is always legal)."""
    if m <= cap:
        return m
    t = cap
    while t >= 128:
        if m % t == 0 and t % 128 == 0:
            return t
        t //= 2
    return m


def _pick_bn_tile(m, cap=BN_TILE_CAP):
    """M tile for the fused conv+BN layers (>=2 tiles when M allows it, so the
    per-tile patch DMA double-buffers behind the matmul)."""
    for t in (cap, cap // 2, cap // 4, cap // 8):
        if t >= 128 and m > t and m % t == 0:
            return t
    return m


# ---------------------------------------------------------------------------
# Pallas kernels
# ---------------------------------------------------------------------------
def _conv_act_kernel(w_ref, b_ref, p_ref, o_ref, *, act):
    """One M-tile of out = act(W @ patchesT + b).
       w (O,K)  b (O,1)  p (K,tm)  o (O,tm)  -- lane dim = tm (spatial)."""
    acc = jnp.dot(w_ref[...], p_ref[...], preferred_element_type=jnp.float32)
    acc = acc + b_ref[...]
    if act == "leaky":
        acc = jnp.maximum(acc, LEAKY_SLOPE * acc)
    elif act == "sigmoid":
        acc = 0.5 * (jnp.tanh(0.5 * acc) + 1.0)   # numerically stable sigmoid
    o_ref[...] = acc.astype(o_ref.dtype)


def _conv_bn_leaky_kernel(w_ref, b_ref, g_ref, beta_ref, p_ref, o_ref, *,
                          tm, inv_m, n_tiles):
    """Fused conv + bias + BatchNorm(batch stats) + LeakyReLU, tiled over M.
       Each grid step writes its conv tile into the revisited (O, M) output
       block (which doubles as the accumulator); the BN + activation finalize
       runs once, on the last step, over the VMEM-resident full result."""
    i = pl.program_id(0)
    x = jnp.dot(w_ref[...], p_ref[...], preferred_element_type=jnp.float32)
    x = x + b_ref[...]
    if n_tiles == 1:
        o_ref[...] = x
    else:
        start = pl.multiple_of(i * tm, 128)      # tm is a multiple of 128 here
        o_ref[:, pl.ds(start, tm)] = x

    @pl.when(i == n_tiles - 1)
    def _finalize():
        xa = o_ref[...]                                           # (O, M)
        mean = jnp.sum(xa, axis=1, keepdims=True) * inv_m
        d = xa - mean
        var = jnp.sum(d * d, axis=1, keepdims=True) * inv_m       # biased var
        scale = g_ref[...] * lax.rsqrt(var + BN_EPS)
        y = d * scale + beta_ref[...]
        o_ref[...] = jnp.maximum(y, LEAKY_SLOPE * y)


def _conv_bn_head_kernel(w6_ref, b6_ref, g6_ref, be6_ref, w7_ref, b7_ref,
                         p_ref, o_ref, *, inv_m):
    """Fused tail: layer6 (conv+bias+BN+LeakyReLU, 4x4 output) + layer7
       (4x4 full-coverage conv == weighted reduction) + sigmoid -> (1,1)."""
    x = jnp.dot(w6_ref[...], p_ref[...], preferred_element_type=jnp.float32)
    x = x + b6_ref[...]                                           # (O6, 16)
    mean = jnp.sum(x, axis=1, keepdims=True) * inv_m
    d = x - mean
    var = jnp.sum(d * d, axis=1, keepdims=True) * inv_m
    y = d * (g6_ref[...] * lax.rsqrt(var + BN_EPS)) + be6_ref[...]
    y = jnp.maximum(y, LEAKY_SLOPE * y)                           # layer-6 act
    t = jnp.sum(w7_ref[...] * y, axis=1, keepdims=True)           # (O6, 1)
    logit = jnp.sum(t, axis=0, keepdims=True) + b7_ref[...]       # (1, 1)
    o_ref[...] = 0.5 * (jnp.tanh(0.5 * logit) + 1.0)


# ---------------------------------------------------------------------------
# pallas_call wrappers
# ---------------------------------------------------------------------------
def conv_act(pT, w2, b, act):
    """act(W @ patchesT + b), tiled over the lane (M) axis, parallel grid."""
    K, M = pT.shape
    O = w2.shape[0]
    tm = _pick_lane_tile(M)
    kern = functools.partial(_conv_act_kernel, act=act)
    return pl.pallas_call(
        kern,
        out_shape=jax.ShapeDtypeStruct((O, M), jnp.float32),
        grid=(M // tm,),
        in_specs=[
            pl.BlockSpec((O, K), lambda i: (0, 0)),
            pl.BlockSpec((O, 1), lambda i: (0, 0)),
            pl.BlockSpec((K, tm), lambda i: (0, i)),
        ],
        out_specs=pl.BlockSpec((O, tm), lambda i: (0, i)),
        compiler_params=pltpu.CompilerParams(dimension_semantics=("parallel",)),
    )(w2, b.reshape(O, 1), pT)


def conv_bn_leaky(pT, w2, b, gamma, beta):
    """Fused conv + bias + BN(batch stats) + LeakyReLU, M-tiled so the patch
    DMA pipelines; output block is revisited and finalized on the last step."""
    K, M = pT.shape
    O = w2.shape[0]
    tm = _pick_bn_tile(M)
    n_tiles = M // tm
    kern = functools.partial(_conv_bn_leaky_kernel,
                             tm=tm, inv_m=1.0 / M, n_tiles=n_tiles)
    return pl.pallas_call(
        kern,
        out_shape=jax.ShapeDtypeStruct((O, M), jnp.float32),
        grid=(n_tiles,),
        in_specs=[
            pl.BlockSpec((O, K), lambda i: (0, 0)),
            pl.BlockSpec((O, 1), lambda i: (0, 0)),
            pl.BlockSpec((O, 1), lambda i: (0, 0)),
            pl.BlockSpec((O, 1), lambda i: (0, 0)),
            pl.BlockSpec((K, tm), lambda i: (0, i)),
        ],
        out_specs=pl.BlockSpec((O, M), lambda i: (0, 0)),
        compiler_params=pltpu.CompilerParams(dimension_semantics=("arbitrary",)),
    )(w2, b.reshape(O, 1), gamma.reshape(O, 1), beta.reshape(O, 1), pT)


def conv_bn_head(p6T, w6, b6, g6, be6, w7r, b7):
    """Fused layers 6+7: one launch, one (1,1) output, no tiny masked stores."""
    K6, M6 = p6T.shape
    O6 = w6.shape[0]
    kern = functools.partial(_conv_bn_head_kernel, inv_m=1.0 / M6)
    return pl.pallas_call(
        kern,
        out_shape=jax.ShapeDtypeStruct((1, 1), jnp.float32),
        grid=(1,),
        in_specs=[
            pl.BlockSpec((O6, K6), lambda i: (0, 0)),
            pl.BlockSpec((O6, 1), lambda i: (0, 0)),
            pl.BlockSpec((O6, 1), lambda i: (0, 0)),
            pl.BlockSpec((O6, 1), lambda i: (0, 0)),
            pl.BlockSpec((O6, M6), lambda i: (0, 0)),
            pl.BlockSpec((1, 1), lambda i: (0, 0)),
            pl.BlockSpec((K6, M6), lambda i: (0, 0)),
        ],
        out_specs=pl.BlockSpec((1, 1), lambda i: (0, 0)),
        compiler_params=pltpu.CompilerParams(dimension_semantics=("arbitrary",)),
    )(w6, b6.reshape(O6, 1), g6.reshape(O6, 1), be6.reshape(O6, 1),
      w7r, b7.reshape(1, 1), p6T)


# ---------------------------------------------------------------------------
# im2col (transposed layout) + per-layer driver
# ---------------------------------------------------------------------------
def _im2col_T(x, stride, pad):
    """patchesT[K, M]: rows (c, kh, kw)-major (matches w.reshape(O, C*KH*KW)),
       columns (b, oh, ow)-major.  One XLA op; the reshape is free for B == 1."""
    B, C, H, W = x.shape
    KH = KW = 4
    OH = (H + 2 * pad - KH) // stride + 1
    OW = (W + 2 * pad - KW) // stride + 1
    patches = lax.conv_general_dilated_patches(
        x, (KH, KW), (stride, stride), [(pad, pad), (pad, pad)],
        dimension_numbers=("NCHW", "OIHW", "NCHW"))           # (B, K, OH, OW)
    K = C * KH * KW
    M = B * OH * OW
    pT = patches.transpose(1, 0, 2, 3).reshape(K, M)
    return pT, OH, OW


def _to_nchw(outT, B, OH, OW):
    O = outT.shape[0]
    return outT.reshape(O, B, OH, OW).transpose(1, 0, 2, 3)


def discriminator_r_forward(x, params):
    B = x.shape[0]

    # ---- layer 1: conv + bias + LeakyReLU (no BN), M-tiled, parallel grid
    w1, b1, _ = params[0]
    pT, OH, OW = _im2col_T(x, stride=2, pad=1)
    out = _to_nchw(conv_act(pT, w1.reshape(w1.shape[0], -1), b1, "leaky"),
                   B, OH, OW)

    # ---- layers 2..5: fused conv + bias + BN(batch stats) + LeakyReLU
    for li in range(1, 5):
        w, b, bn = params[li]
        gamma, beta = bn
        pT, OH, OW = _im2col_T(out, stride=2, pad=1)
        out = _to_nchw(
            conv_bn_leaky(pT, w.reshape(w.shape[0], -1), b, gamma, beta),
            B, OH, OW)

    # ---- layers 6 + 7: fused VMEM-resident head (canonical 256x256, B=1 case)
    w6, b6, bn6 = params[5]
    g6, be6 = bn6
    w7, b7, _ = params[6]
    pT6, OH6, OW6 = _im2col_T(out, stride=2, pad=1)
    if B == 1 and OH6 == 4 and OW6 == 4:
        head = conv_bn_head(pT6, w6.reshape(w6.shape[0], -1), b6, g6, be6,
                            w7.reshape(w7.shape[1], -1), b7)
        return head.reshape(1, 1, 1, 1)

    # general fallback: separate layer-6 and layer-7 calls
    out = _to_nchw(conv_bn_leaky(pT6, w6.reshape(w6.shape[0], -1), b6, g6, be6),
                   B, OH6, OW6)
    pT7, OH7, OW7 = _im2col_T(out, stride=1, pad=0)
    return _to_nchw(conv_act(pT7, w7.reshape(w7.shape[0], -1), b7, "sigmoid"),
                    B, OH7, OW7)


# ---------------------------------------------------------------------------
# Parameters / pure-JAX reference
# ---------------------------------------------------------------------------
def init_params(key, input_nc, output_nc, ndf):
    specs = [
        (input_nc + output_nc, ndf, False),
        (ndf, ndf * 2, True),
        (ndf * 2, ndf * 4, True),
        (ndf * 4, ndf * 8, True),
        (ndf * 8, ndf * 8, True),
        (ndf * 8, ndf * 8, True),
        (ndf * 8, 1, False),
    ]
    params = []
    for (cin, cout, has_bn) in specs:
        key, kw, kb = jax.random.split(key, 3)
        bound = 1.0 / jnp.sqrt(cin * 16.0)
        w = jax.random.uniform(kw, (cout, cin, 4, 4), jnp.float32, -bound, bound)
        b = jax.random.uniform(kb, (cout,), jnp.float32, -bound, bound)
        bn = (jnp.ones((cout,), jnp.float32),
              jnp.zeros((cout,), jnp.float32)) if has_bn else None
        params.append((w, b, bn))
    return params


def reference_forward(x, params):
    """Pure-JAX reference (XLA conv) for correctness checking."""
    strides = [2, 2, 2, 2, 2, 2, 1]
    pads = [1, 1, 1, 1, 1, 1, 0]
    out = x
    for idx, ((w, b, bn), s, p) in enumerate(zip(params, strides, pads)):
        out = lax.conv_general_dilated(
            out, w, (s, s), [(p, p), (p, p)],
            dimension_numbers=("NCHW", "OIHW", "NCHW"))
        out = out + b.reshape(1, -1, 1, 1)
        if bn is not None:
            gamma, beta = bn
            mean = jnp.mean(out, axis=(0, 2, 3), keepdims=True)
            var = jnp.mean((out - mean) ** 2, axis=(0, 2, 3), keepdims=True)
            out = (out - mean) / jnp.sqrt(var + BN_EPS)
            out = out * gamma.reshape(1, -1, 1, 1) + beta.reshape(1, -1, 1, 1)
        if idx < 6:
            out = jnp.where(out >= 0.0, out, LEAKY_SLOPE * out)
        else:
            out = jax.nn.sigmoid(out)
    return out


if __name__ == "__main__":
    # 70x70-style PatchGAN stack: spatial must be 256 so layer7 (4x4, no pad)
    # is valid and produces the canonical (1, 1, 1, 1) output.
    input_nc, output_nc, ndf = 3, 3, 8
    B, H, W = 1, 256, 256

    key = jax.random.PRNGKey(0)
    kx, kp = jax.random.split(key)
    x = jax.random.normal(kx, (B, input_nc + output_nc, H, W), jnp.float32)
    params = init_params(kp, input_nc, output_nc, ndf)

    fwd = jax.jit(discriminator_r_forward)
    out = jax.block_until_ready(fwd(x, params))

    assert out.shape == (B, 1, 1, 1), out.shape
    ref = jax.block_until_ready(jax.jit(reference_forward)(x, params))
    assert jnp.allclose(out, ref, rtol=1e-3, atol=1e-3), (out, ref)

    print("KERNEL_OK")
</pallas_src>

<mosaic_0001>
module attributes {stable_mosaic.version = 11 : i64} {
  func.func @_conv_act_kernel(%arg0: i32, %arg1: memref<8x96xf32, #tpu.memory_space<vmem>>, %arg2: memref<8x1xf32, #tpu.memory_space<vmem>>, %arg3: memref<96x4096xf32, #tpu.memory_space<vmem>>, %arg4: memref<8x4096xf32, #tpu.memory_space<vmem>>) attributes {dimension_semantics = [#tpu.dimension_semantics<parallel>], iteration_bounds = array<i64: 4>, scalar_prefetch = 0 : i64, scratch_operands = 0 : i64, tpu.core_type = #tpu.core_type<tc>, window_params = [{pipeline_mode = #tpu.pipeline_mode<synchronous>, transform_indices = @transform_0, window_bounds = array<i64: 8, 96>}, {pipeline_mode = #tpu.pipeline_mode<synchronous>, transform_indices = @transform_1, window_bounds = array<i64: 8, 1>}, {transform_indices = @transform_2, window_bounds = array<i64: 96, 4096>}, {transform_indices = @transform_3, window_bounds = array<i64: 8, 4096>}]} {
    %c0 = arith.constant 0 : index
    %c0_0 = arith.constant 0 : index
    %0 = vector.load %arg1[%c0, %c0_0] : memref<8x96xf32, #tpu.memory_space<vmem>>, vector<8x96xf32>
    %c0_1 = arith.constant 0 : index
    %c0_2 = arith.constant 0 : index
    %1 = vector.load %arg3[%c0_1, %c0_2] : memref<96x4096xf32, #tpu.memory_space<vmem>>, vector<96x4096xf32>
    %cst = arith.constant dense<0.000000e+00> : vector<8x4096xf32>
    %2 = tpu.matmul %0, %1, %cst {dimension_numbers = #tpu.dot_dimension_numbers<[1], [0], [0], [1], [0, 0, 1, 1], [], []>} : vector<8x96xf32>, vector<96x4096xf32>, vector<8x4096xf32> -> vector<8x4096xf32>
    %c0_3 = arith.constant 0 : index
    %c0_4 = arith.constant 0 : index
    %3 = vector.load %arg2[%c0_3, %c0_4] : memref<8x1xf32, #tpu.memory_space<vmem>>, vector<8x1xf32>
    %4 = vector.broadcast %3 : vector<8x1xf32> to vector<8x4096xf32>
    %5 = arith.addf %2, %4 : vector<8x4096xf32>
    %cst_5 = arith.constant 2.000000e-01 : f32
    %6 = vector.broadcast %cst_5 : f32 to vector<8x4096xf32>
    %7 = arith.mulf %6, %5 : vector<8x4096xf32>
    %8 = arith.maximumf %5, %7 : vector<8x4096xf32>
    %c0_6 = arith.constant 0 : index
    %c0_7 = arith.constant 0 : index
    %9 = vector.load %arg4[%c0_6, %c0_7] : memref<8x4096xf32, #tpu.memory_space<vmem>>, vector<8x4096xf32>
    tpu.vector_store %arg4[%c0_6, %c0_7], %8 {strides = array<i32>} : memref<8x4096xf32, #tpu.memory_space<vmem>>, vector<8x4096xf32>,
    return
  }
  func.func @transform_0(%arg0: i32) -> (i32, i32) {
    %c0_i32 = arith.constant 0 : i32
    %c0_i32_0 = arith.constant 0 : i32
    %c0_i32_1 = arith.constant 0 : i32
    return %c0_i32, %c0_i32_0 : i32, i32
  }
  func.func @transform_1(%arg0: i32) -> (i32, i32) {
    %c0_i32 = arith.constant 0 : i32
    %c0_i32_0 = arith.constant 0 : i32
    %c0_i32_1 = arith.constant 0 : i32
    return %c0_i32, %c0_i32_0 : i32, i32
  }
  func.func @transform_2(%arg0: i32) -> (i32, i32) {
    %c0_i32 = arith.constant 0 : i32
    %c0_i32_0 = arith.constant 0 : i32
    return %c0_i32, %arg0 : i32, i32
  }
  func.func @transform_3(%arg0: i32) -> (i32, i32) {
    %c0_i32 = arith.constant 0 : i32
    %c0_i32_0 = arith.constant 0 : i32
    return %c0_i32, %arg0 : i32, i32
  }
}

module attributes {stable_mosaic.version = 11 : i64} {
  func.func @_conv_bn_leaky_kernel(%arg0: i32, %arg1: memref<16x128xf32, #tpu.memory_space<vmem>>, %arg2: memref<16x1xf32, #tpu.memory_space<vmem>>, %arg3: memref<16x1xf32, #tpu.memory_space<vmem>>, %arg4: memref<16x1xf32, #tpu.memory_space<vmem>>, %arg5: memref<128x1024xf32, #tpu.memory_space<vmem>>, %arg6: memref<16x4096xf32, #tpu.memory_space<vmem>>) attributes {dimension_semantics = [#tpu.dimension_semantics<arbitrary>], iteration_bounds = array<i64: 4>, scalar_prefetch = 0 : i64, scratch_operands = 0 : i64, tpu.core_type = #tpu.core_type<tc>, window_params = [{pipeline_mode = #tpu.pipeline_mode<synchronous>, transform_indices = @transform_0, window_bounds = array<i64: 16, 128>}, {pipeline_mode = #tpu.pipeline_mode<synchronous>, transform_indices = @transform_1, window_bounds = array<i64: 16, 1>}, {pipeline_mode = #tpu.pipeline_mode<synchronous>, transform_indices = @transform_2, window_bounds = array<i64: 16, 1>}, {pipeline_mode = #tpu.pipeline_mode<synchronous>, transform_indices = @transform_3, window_bounds = array<i64: 16, 1>}, {transform_indices = @transform_4, window_bounds = array<i64: 128, 1024>}, {pipeline_mode = #tpu.pipeline_mode<synchronous>, transform_indices = @transform_5, window_bounds = array<i64: 16, 4096>}]} {
    %c0 = arith.constant 0 : index
    %c0_0 = arith.constant 0 : index
    %0 = vector.load %arg1[%c0, %c0_0] : memref<16x128xf32, #tpu.memory_space<vmem>>, vector<16x128xf32>
    %c0_1 = arith.constant 0 : index
    %c0_2 = arith.constant 0 : index
    %1 = vector.load %arg5[%c0_1, %c0_2] : memref<128x1024xf32, #tpu.memory_space<vmem>>, vector<128x1024xf32>
    %cst = arith.constant dense<0.000000e+00> : vector<16x1024xf32>
    %2 = tpu.matmul %0, %1, %cst {dimension_numbers = #tpu.dot_dimension_numbers<[1], [0], [0], [1], [0, 0, 1, 1], [], []>} : vector<16x128xf32>, vector<128x1024xf32>, vector<16x1024xf32> -> vector<16x1024xf32>
    %c0_3 = arith.constant 0 : index
    %c0_4 = arith.constant 0 : index
    %3 = vector.load %arg2[%c0_3, %c0_4] : memref<16x1xf32, #tpu.memory_space<vmem>>, vector<16x1xf32>
    %4 = vector.broadcast %3 : vector<16x1xf32> to vector<16x1024xf32>
    %5 = arith.addf %2, %4 : vector<16x1024xf32>
    %c1024_i32 = arith.constant 1024 : i32
    %6 = arith.muli %arg0, %c1024_i32 : i32
    %7 = tpu.assume_multiple %6, 128 : i32
    %c0_5 = arith.constant 0 : index
    %8 = arith.index_cast %7 : i32 to index
    %9 = vector.load %arg6[%c0_5, %8] : memref<16x4096xf32, #tpu.memory_space<vmem>>, vector<16x1024xf32>
    tpu.vector_store %arg6[%c0_5, %8], %5 {strides = array<i32>} : memref<16x4096xf32, #tpu.memory_space<vmem>>, vector<16x1024xf32>,
    %c3_i32 = arith.constant 3 : i32
    %10 = arith.cmpi eq, %arg0, %c3_i32 : i32
    %11 = arith.extui %10 : i1 to i32
    %c0_i32 = arith.constant 0 : i32
    %12 = arith.cmpi ne, %11, %c0_i32 : i32
    scf.if %12 {
      %c0_6 = arith.constant 0 : index
      %c0_7 = arith.constant 0 : index
      %13 = vector.load %arg6[%c0_6, %c0_7] : memref<16x4096xf32, #tpu.memory_space<vmem>>, vector<16x4096xf32>
      %cst_8 = arith.constant dense<0.000000e+00> : vector<16xf32>
      %14 = vector.multi_reduction <add>, %13, %cst_8 [1] : vector<16x4096xf32> to vector<16xf32>
      %15 = vector.shape_cast %14 : vector<16xf32> to vector<16x1xf32>
      %cst_9 = arith.constant 2.44140625E-4 : f32
      %16 = vector.broadcast %cst_9 : f32 to vector<16x1xf32>
      %17 = arith.mulf %15, %16 : vector<16x1xf32>
      %18 = vector.broadcast %17 : vector<16x1xf32> to vector<16x4096xf32>
      %19 = arith.subf %13, %18 : vector<16x4096xf32>
      %20 = arith.mulf %19, %19 : vector<16x4096xf32>
      %cst_10 = arith.constant dense<0.000000e+00> : vector<16xf32>
      %21 = vector.multi_reduction <add>, %20, %cst_10 [1] : vector<16x4096xf32> to vector<16xf32>
      %22 = vector.shape_cast %21 : vector<16xf32> to vector<16x1xf32>
      %cst_11 = arith.constant 2.44140625E-4 : f32
      %23 = vector.broadcast %cst_11 : f32 to vector<16x1xf32>
      %24 = arith.mulf %22, %23 : vector<16x1xf32>
      %c0_12 = arith.constant 0 : index
      %c0_13 = arith.constant 0 : index
      %25 = vector.load %arg3[%c0_12, %c0_13] : memref<16x1xf32, #tpu.memory_space<vmem>>, vector<16x1xf32>
      %cst_14 = arith.constant 9.99999974E-6 : f32
      %26 = vector.broadcast %cst_14 : f32 to vector<16x1xf32>
      %27 = arith.addf %24, %26 : vector<16x1xf32>
      %28 = math.rsqrt %27 : vector<16x1xf32>
      %29 = arith.mulf %25, %28 : vector<16x1xf32>
      %30 = vector.broadcast %29 : vector<16x1xf32> to vector<16x4096xf32>
      %31 = arith.mulf %19, %30 : vector<16x4096xf32>
      %c0_15 = arith.constant 0 : index
      %c0_16 = arith.constant 0 : index
      %32 = vector.load %arg4[%c0_15, %c0_16] : memref<16x1xf32, #tpu.memory_space<vmem>>, vector<16x1xf32>
      %33 = vector.broadcast %32 : vector<16x1xf32> to vector<16x4096xf32>
      %34 = arith.addf %31, %33 : vector<16x4096xf32>
      %cst_17 = arith.constant 2.000000e-01 : f32
      %35 = vector.broadcast %cst_17 : f32 to vector<16x4096xf32>
      %36 = arith.mulf %35, %34 : vector<16x4096xf32>
      %37 = arith.maximumf %34, %36 : vector<16x4096xf32>
      %c0_18 = arith.constant 0 : index
      %c0_19 = arith.constant 0 : index
      %38 = vector.load %arg6[%c0_18, %c0_19] : memref<16x4096xf32, #tpu.memory_space<vmem>>, vector<16x4096xf32>
      tpu.vector_store %arg6[%c0_18, %c0_19], %37 {strides = array<i32>} : memref<16x4096xf32, #tpu.memory_space<vmem>>, vector<16x4096xf32>,
    } else {
    }
    return
  }
  func.func @transform_0(%arg0: i32) -> (i32, i32) {
    %c0_i32 = arith.constant 0 : i32
    %c0_i32_0 = arith.constant 0 : i32
    %c0_i32_1 = arith.constant 0 : i32
    return %c0_i32, %c0_i32_0 : i32, i32
  }
  func.func @transform_1(%arg0: i32) -> (i32, i32) {
    %c0_i32 = arith.constant 0 : i32
    %c0_i32_0 = arith.constant 0 : i32
    %c0_i32_1 = arith.constant 0 : i32
    return %c0_i32, %c0_i32_0 : i32, i32
  }
  func.func @transform_2(%arg0: i32) -> (i32, i32) {
    %c0_i32 = arith.constant 0 : i32
    %c0_i32_0 = arith.constant 0 : i32
    %c0_i32_1 = arith.constant 0 : i32
    return %c0_i32, %c0_i32_0 : i32, i32
  }
  func.func @transform_3(%arg0: i32) -> (i32, i32) {
    %c0_i32 = arith.constant 0 : i32
    %c0_i32_0 = arith.constant 0 : i32
    %c0_i32_1 = arith.constant 0 : i32
    return %c0_i32, %c0_i32_0 : i32, i32
  }
  func.func @transform_4(%arg0: i32) -> (i32, i32) {
    %c0_i32 = arith.constant 0 : i32
    %c0_i32_0 = arith.constant 0 : i32
    return %c0_i32, %arg0 : i32, i32
  }
  func.func @transform_5(%arg0: i32) -> (i32, i32) {
    %c0_i32 = arith.constant 0 : i32
    %c0_i32_0 = arith.constant 0 : i32
    %c0_i32_1 = arith.constant 0 : i32
    return %c0_i32, %c0_i32_0 : i32, i32
  }
}

module attributes {stable_mosaic.version = 11 : i64} {
  func.func @_conv_bn_leaky_kernel(%arg0: i32, %arg1: memref<32x256xf32, #tpu.memory_space<vmem>>, %arg2: memref<32x1xf32, #tpu.memory_space<vmem>>, %arg3: memref<32x1xf32, #tpu.memory_space<vmem>>, %arg4: memref<32x1xf32, #tpu.memory_space<vmem>>, %arg5: memref<256x512xf32, #tpu.memory_space<vmem>>, %arg6: memref<32x1024xf32, #tpu.memory_space<vmem>>) attributes {dimension_semantics = [#tpu.dimension_semantics<arbitrary>], iteration_bounds = array<i64: 2>, scalar_prefetch = 0 : i64, scratch_operands = 0 : i64, tpu.core_type = #tpu.core_type<tc>, window_params = [{pipeline_mode = #tpu.pipeline_mode<synchronous>, transform_indices = @transform_0, window_bounds = array<i64: 32, 256>}, {pipeline_mode = #tpu.pipeline_mode<synchronous>, transform_indices = @transform_1, window_bounds = array<i64: 32, 1>}, {pipeline_mode = #tpu.pipeline_mode<synchronous>, transform_indices = @transform_2, window_bounds = array<i64: 32, 1>}, {pipeline_mode = #tpu.pipeline_mode<synchronous>, transform_indices = @transform_3, window_bounds = array<i64: 32, 1>}, {transform_indices = @transform_4, window_bounds = array<i64: 256, 512>}, {pipeline_mode = #tpu.pipeline_mode<synchronous>, transform_indices = @transform_5, window_bounds = array<i64: 32, 1024>}]} {
    %c0 = arith.constant 0 : index
    %c0_0 = arith.constant 0 : index
    %0 = vector.load %arg1[%c0, %c0_0] : memref<32x256xf32, #tpu.memory_space<vmem>>, vector<32x256xf32>
    %c0_1 = arith.constant 0 : index
    %c0_2 = arith.constant 0 : index
    %1 = vector.load %arg5[%c0_1, %c0_2] : memref<256x512xf32, #tpu.memory_space<vmem>>, vector<256x512xf32>
    %cst = arith.constant dense<0.000000e+00> : vector<32x512xf32>
    %2 = tpu.matmul %0, %1, %cst {dimension_numbers = #tpu.dot_dimension_numbers<[1], [0], [0], [1], [0, 0, 1, 1], [], []>} : vector<32x256xf32>, vector<256x512xf32>, vector<32x512xf32> -> vector<32x512xf32>
    %c0_3 = arith.constant 0 : index
    %c0_4 = arith.constant 0 : index
    %3 = vector.load %arg2[%c0_3, %c0_4] : memref<32x1xf32, #tpu.memory_space<vmem>>, vector<32x1xf32>
    %4 = vector.broadcast %3 : vector<32x1xf32> to vector<32x512xf32>
    %5 = arith.addf %2, %4 : vector<32x512xf32>
    %c512_i32 = arith.constant 512 : i32
    %6 = arith.muli %arg0, %c512_i32 : i32
    %7 = tpu.assume_multiple %6, 128 : i32
    %c0_5 = arith.constant 0 : index
    %8 = arith.index_cast %7 : i32 to index
    %9 = vector.load %arg6[%c0_5, %8] : memref<32x1024xf32, #tpu.memory_space<vmem>>, vector<32x512xf32>
    tpu.vector_store %arg6[%c0_5, %8], %5 {strides = array<i32>} : memref<32x1024xf32, #tpu.memory_space<vmem>>, vector<32x512xf32>,
    %c1_i32 = arith.constant 1 : i32
    %10 = arith.cmpi eq, %arg0, %c1_i32 : i32
    %11 = arith.extui %10 : i1 to i32
    %c0_i32 = arith.constant 0 : i32
    %12 = arith.cmpi ne, %11, %c0_i32 : i32
    scf.if %12 {
      %c0_6 = arith.constant 0 : index
      %c0_7 = arith.constant 0 : index
      %13 = vector.load %arg6[%c0_6, %c0_7] : memref<32x1024xf32, #tpu.memory_space<vmem>>, vector<32x1024xf32>
      %cst_8 = arith.constant dense<0.000000e+00> : vector<32xf32>
      %14 = vector.multi_reduction <add>, %13, %cst_8 [1] : vector<32x1024xf32> to vector<32xf32>
      %15 = vector.shape_cast %14 : vector<32xf32> to vector<32x1xf32>
      %cst_9 = arith.constant 9.765625E-4 : f32
      %16 = vector.broadcast %cst_9 : f32 to vector<32x1xf32>
      %17 = arith.mulf %15, %16 : vector<32x1xf32>
      %18 = vector.broadcast %17 : vector<32x1xf32> to vector<32x1024xf32>
      %19 = arith.subf %13, %18 : vector<32x1024xf32>
      %20 = arith.mulf %19, %19 : vector<32x1024xf32>
      %cst_10 = arith.constant dense<0.000000e+00> : vector<32xf32>
      %21 = vector.multi_reduction <add>, %20, %cst_10 [1] : vector<32x1024xf32> to vector<32xf32>
      %22 = vector.shape_cast %21 : vector<32xf32> to vector<32x1xf32>
      %cst_11 = arith.constant 9.765625E-4 : f32
      %23 = vector.broadcast %cst_11 : f32 to vector<32x1xf32>
      %24 = arith.mulf %22, %23 : vector<32x1xf32>
      %c0_12 = arith.constant 0 : index
      %c0_13 = arith.constant 0 : index
      %25 = vector.load %arg3[%c0_12, %c0_13] : memref<32x1xf32, #tpu.memory_space<vmem>>, vector<32x1xf32>
      %cst_14 = arith.constant 9.99999974E-6 : f32
      %26 = vector.broadcast %cst_14 : f32 to vector<32x1xf32>
      %27 = arith.addf %24, %26 : vector<32x1xf32>
      %28 = math.rsqrt %27 : vector<32x1xf32>
      %29 = arith.mulf %25, %28 : vector<32x1xf32>
      %30 = vector.broadcast %29 : vector<32x1xf32> to vector<32x1024xf32>
      %31 = arith.mulf %19, %30 : vector<32x1024xf32>
      %c0_15 = arith.constant 0 : index
      %c0_16 = arith.constant 0 : index
      %32 = vector.load %arg4[%c0_15, %c0_16] : memref<32x1xf32, #tpu.memory_space<vmem>>, vector<32x1xf32>
      %33 = vector.broadcast %32 : vector<32x1xf32> to vector<32x1024xf32>
      %34 = arith.addf %31, %33 : vector<32x1024xf32>
      %cst_17 = arith.constant 2.000000e-01 : f32
      %35 = vector.broadcast %cst_17 : f32 to vector<32x1024xf32>
      %36 = arith.mulf %35, %34 : vector<32x1024xf32>
      %37 = arith.maximumf %34, %36 : vector<32x1024xf32>
      %c0_18 = arith.constant 0 : index
      %c0_19 = arith.constant 0 : index
      %38 = vector.load %arg6[%c0_18, %c0_19] : memref<32x1024xf32, #tpu.memory_space<vmem>>, vector<32x1024xf32>
      tpu.vector_store %arg6[%c0_18, %c0_19], %37 {strides = array<i32>} : memref<32x1024xf32, #tpu.memory_space<vmem>>, vector<32x1024xf32>,
    } else {
    }
    return
  }
  func.func @transform_0(%arg0: i32) -> (i32, i32) {
    %c0_i32 = arith.constant 0 : i32
    %c0_i32_0 = arith.constant 0 : i32
    %c0_i32_1 = arith.constant 0 : i32
    return %c0_i32, %c0_i32_0 : i32, i32
  }
  func.func @transform_1(%arg0: i32) -> (i32, i32) {
    %c0_i32 = arith.constant 0 : i32
    %c0_i32_0 = arith.constant 0 : i32
    %c0_i32_1 = arith.constant 0 : i32
    return %c0_i32, %c0_i32_0 : i32, i32
  }
  func.func @transform_2(%arg0: i32) -> (i32, i32) {
    %c0_i32 = arith.constant 0 : i32
    %c0_i32_0 = arith.constant 0 : i32
    %c0_i32_1 = arith.constant 0 : i32
    return %c0_i32, %c0_i32_0 : i32, i32
  }
  func.func @transform_3(%arg0: i32) -> (i32, i32) {
    %c0_i32 = arith.constant 0 : i32
    %c0_i32_0 = arith.constant 0 : i32
    %c0_i32_1 = arith.constant 0 : i32
    return %c0_i32, %c0_i32_0 : i32, i32
  }
  func.func @transform_4(%arg0: i32) -> (i32, i32) {
    %c0_i32 = arith.constant 0 : i32
    %c0_i32_0 = arith.constant 0 : i32
    return %c0_i32, %arg0 : i32, i32
  }
  func.func @transform_5(%arg0: i32) -> (i32, i32) {
    %c0_i32 = arith.constant 0 : i32
    %c0_i32_0 = arith.constant 0 : i32
    %c0_i32_1 = arith.constant 0 : i32
    return %c0_i32, %c0_i32_0 : i32, i32
  }
}

module attributes {stable_mosaic.version = 11 : i64} {
  func.func @_conv_bn_leaky_kernel(%arg0: i32, %arg1: memref<64x512xf32, #tpu.memory_space<vmem>>, %arg2: memref<64x1xf32, #tpu.memory_space<vmem>>, %arg3: memref<64x1xf32, #tpu.memory_space<vmem>>, %arg4: memref<64x1xf32, #tpu.memory_space<vmem>>, %arg5: memref<512x128xf32, #tpu.memory_space<vmem>>, %arg6: memref<64x256xf32, #tpu.memory_space<vmem>>) attributes {dimension_semantics = [#tpu.dimension_semantics<arbitrary>], iteration_bounds = array<i64: 2>, scalar_prefetch = 0 : i64, scratch_operands = 0 : i64, tpu.core_type = #tpu.core_type<tc>, window_params = [{pipeline_mode = #tpu.pipeline_mode<synchronous>, transform_indices = @transform_0, window_bounds = array<i64: 64, 512>}, {pipeline_mode = #tpu.pipeline_mode<synchronous>, transform_indices = @transform_1, window_bounds = array<i64: 64, 1>}, {pipeline_mode = #tpu.pipeline_mode<synchronous>, transform_indices = @transform_2, window_bounds = array<i64: 64, 1>}, {pipeline_mode = #tpu.pipeline_mode<synchronous>, transform_indices = @transform_3, window_bounds = array<i64: 64, 1>}, {transform_indices = @transform_4, window_bounds = array<i64: 512, 128>}, {pipeline_mode = #tpu.pipeline_mode<synchronous>, transform_indices = @transform_5, window_bounds = array<i64: 64, 256>}]} {
    %c0 = arith.constant 0 : index
    %c0_0 = arith.constant 0 : index
    %0 = vector.load %arg1[%c0, %c0_0] : memref<64x512xf32, #tpu.memory_space<vmem>>, vector<64x512xf32>
    %c0_1 = arith.constant 0 : index
    %c0_2 = arith.constant 0 : index
    %1 = vector.load %arg5[%c0_1, %c0_2] : memref<512x128xf32, #tpu.memory_space<vmem>>, vector<512x128xf32>
    %cst = arith.constant dense<0.000000e+00> : vector<64x128xf32>
    %2 = tpu.matmul %0, %1, %cst {dimension_numbers = #tpu.dot_dimension_numbers<[1], [0], [0], [1], [0, 0, 1, 1], [], []>} : vector<64x512xf32>, vector<512x128xf32>, vector<64x128xf32> -> vector<64x128xf32>
    %c0_3 = arith.constant 0 : index
    %c0_4 = arith.constant 0 : index
    %3 = vector.load %arg2[%c0_3, %c0_4] : memref<64x1xf32, #tpu.memory_space<vmem>>, vector<64x1xf32>
    %4 = vector.broadcast %3 : vector<64x1xf32> to vector<64x128xf32>
    %5 = arith.addf %2, %4 : vector<64x128xf32>
    %c128_i32 = arith.constant 128 : i32
    %6 = arith.muli %arg0, %c128_i32 : i32
    %7 = tpu.assume_multiple %6, 128 : i32
    %c0_5 = arith.constant 0 : index
    %8 = arith.index_cast %7 : i32 to index
    %9 = vector.load %arg6[%c0_5, %8] : memref<64x256xf32, #tpu.memory_space<vmem>>, vector<64x128xf32>
    tpu.vector_store %arg6[%c0_5, %8], %5 {strides = array<i32>} : memref<64x256xf32, #tpu.memory_space<vmem>>, vector<64x128xf32>,
    %c1_i32 = arith.constant 1 : i32
    %10 = arith.cmpi eq, %arg0, %c1_i32 : i32
    %11 = arith.extui %10 : i1 to i32
    %c0_i32 = arith.constant 0 : i32
    %12 = arith.cmpi ne, %11, %c0_i32 : i32
    scf.if %12 {
      %c0_6 = arith.constant 0 : index
      %c0_7 = arith.constant 0 : index
      %13 = vector.load %arg6[%c0_6, %c0_7] : memref<64x256xf32, #tpu.memory_space<vmem>>, vector<64x256xf32>
      %cst_8 = arith.constant dense<0.000000e+00> : vector<64xf32>
      %14 = vector.multi_reduction <add>, %13, %cst_8 [1] : vector<64x256xf32> to vector<64xf32>
      %15 = vector.shape_cast %14 : vector<64xf32> to vector<64x1xf32>
      %cst_9 = arith.constant 3.906250e-03 : f32
      %16 = vector.broadcast %cst_9 : f32 to vector<64x1xf32>
      %17 = arith.mulf %15, %16 : vector<64x1xf32>
      %18 = vector.broadcast %17 : vector<64x1xf32> to vector<64x256xf32>
      %19 = arith.subf %13, %18 : vector<64x256xf32>
      %20 = arith.mulf %19, %19 : vector<64x256xf32>
      %cst_10 = arith.constant dense<0.000000e+00> : vector<64xf32>
      %21 = vector.multi_reduction <add>, %20, %cst_10 [1] : vector<64x256xf32> to vector<64xf32>
      %22 = vector.shape_cast %21 : vector<64xf32> to vector<64x1xf32>
      %cst_11 = arith.constant 3.906250e-03 : f32
      %23 = vector.broadcast %cst_11 : f32 to vector<64x1xf32>
      %24 = arith.mulf %22, %23 : vector<64x1xf32>
      %c0_12 = arith.constant 0 : index
      %c0_13 = arith.constant 0 : index
      %25 = vector.load %arg3[%c0_12, %c0_13] : memref<64x1xf32, #tpu.memory_space<vmem>>, vector<64x1xf32>
      %cst_14 = arith.constant 9.99999974E-6 : f32
      %26 = vector.broadcast %cst_14 : f32 to vector<64x1xf32>
      %27 = arith.addf %24, %26 : vector<64x1xf32>
      %28 = math.rsqrt %27 : vector<64x1xf32>
      %29 = arith.mulf %25, %28 : vector<64x1xf32>
      %30 = vector.broadcast %29 : vector<64x1xf32> to vector<64x256xf32>
      %31 = arith.mulf %19, %30 : vector<64x256xf32>
      %c0_15 = arith.constant 0 : index
      %c0_16 = arith.constant 0 : index
      %32 = vector.load %arg4[%c0_15, %c0_16] : memref<64x1xf32, #tpu.memory_space<vmem>>, vector<64x1xf32>
      %33 = vector.broadcast %32 : vector<64x1xf32> to vector<64x256xf32>
      %34 = arith.addf %31, %33 : vector<64x256xf32>
      %cst_17 = arith.constant 2.000000e-01 : f32
      %35 = vector.broadcast %cst_17 : f32 to vector<64x256xf32>
      %36 = arith.mulf %35, %34 : vector<64x256xf32>
      %37 = arith.maximumf %34, %36 : vector<64x256xf32>
      %c0_18 = arith.constant 0 : index
      %c0_19 = arith.constant 0 : index
      %38 = vector.load %arg6[%c0_18, %c0_19] : memref<64x256xf32, #tpu.memory_space<vmem>>, vector<64x256xf32>
      tpu.vector_store %arg6[%c0_18, %c0_19], %37 {strides = array<i32>} : memref<64x256xf32, #tpu.memory_space<vmem>>, vector<64x256xf32>,
    } else {
    }
    return
  }
  func.func @transform_0(%arg0: i32) -> (i32, i32) {
    %c0_i32 = arith.constant 0 : i32
    %c0_i32_0 = arith.constant 0 : i32
    %c0_i32_1 = arith.constant 0 : i32
    return %c0_i32, %c0_i32_0 : i32, i32
  }
  func.func @transform_1(%arg0: i32) -> (i32, i32) {
    %c0_i32 = arith.constant 0 : i32
    %c0_i32_0 = arith.constant 0 : i32
    %c0_i32_1 = arith.constant 0 : i32
    return %c0_i32, %c0_i32_0 : i32, i32
  }
  func.func @transform_2(%arg0: i32) -> (i32, i32) {
    %c0_i32 = arith.constant 0 : i32
    %c0_i32_0 = arith.constant 0 : i32
    %c0_i32_1 = arith.constant 0 : i32
    return %c0_i32, %c0_i32_0 : i32, i32
  }
  func.func @transform_3(%arg0: i32) -> (i32, i32) {
    %c0_i32 = arith.constant 0 : i32
    %c0_i32_0 = arith.constant 0 : i32
    %c0_i32_1 = arith.constant 0 : i32
    return %c0_i32, %c0_i32_0 : i32, i32
  }
  func.func @transform_4(%arg0: i32) -> (i32, i32) {
    %c0_i32 = arith.constant 0 : i32
    %c0_i32_0 = arith.constant 0 : i32
    return %c0_i32, %arg0 : i32, i32
  }
  func.func @transform_5(%arg0: i32) -> (i32, i32) {
    %c0_i32 = arith.constant 0 : i32
    %c0_i32_0 = arith.constant 0 : i32
    %c0_i32_1 = arith.constant 0 : i32
    return %c0_i32, %c0_i32_0 : i32, i32
  }
}

module attributes {stable_mosaic.version = 11 : i64} {
  func.func @_conv_bn_leaky_kernel(%arg0: i32, %arg1: memref<64x1024xf32, #tpu.memory_space<vmem>>, %arg2: memref<64x1xf32, #tpu.memory_space<vmem>>, %arg3: memref<64x1xf32, #tpu.memory_space<vmem>>, %arg4: memref<64x1xf32, #tpu.memory_space<vmem>>, %arg5: memref<1024x64xf32, #tpu.memory_space<vmem>>, %arg6: memref<64x64xf32, #tpu.memory_space<vmem>>) attributes {dimension_semantics = [#tpu.dimension_semantics<arbitrary>], iteration_bounds = array<i64: 1>, scalar_prefetch = 0 : i64, scratch_operands = 0 : i64, tpu.core_type = #tpu.core_type<tc>, window_params = [{pipeline_mode = #tpu.pipeline_mode<synchronous>, transform_indices = @transform_0, window_bounds = array<i64: 64, 1024>}, {pipeline_mode = #tpu.pipeline_mode<synchronous>, transform_indices = @transform_1, window_bounds = array<i64: 64, 1>}, {pipeline_mode = #tpu.pipeline_mode<synchronous>, transform_indices = @transform_2, window_bounds = array<i64: 64, 1>}, {pipeline_mode = #tpu.pipeline_mode<synchronous>, transform_indices = @transform_3, window_bounds = array<i64: 64, 1>}, {transform_indices = @transform_4, window_bounds = array<i64: 1024, 64>}, {pipeline_mode = #tpu.pipeline_mode<synchronous>, transform_indices = @transform_5, window_bounds = array<i64: 64, 64>}]} {
    %c0 = arith.constant 0 : index
    %c0_0 = arith.constant 0 : index
    %0 = vector.load %arg1[%c0, %c0_0] : memref<64x1024xf32, #tpu.memory_space<vmem>>, vector<64x1024xf32>
    %c0_1 = arith.constant 0 : index
    %c0_2 = arith.constant 0 : index
    %1 = vector.load %arg5[%c0_1, %c0_2] : memref<1024x64xf32, #tpu.memory_space<vmem>>, vector<1024x64xf32>
    %cst = arith.constant dense<0.000000e+00> : vector<64x64xf32>
    %2 = tpu.matmul %0, %1, %cst {dimension_numbers = #tpu.dot_dimension_numbers<[1], [0], [0], [1], [0, 0, 1, 1], [], []>} : vector<64x1024xf32>, vector<1024x64xf32>, vector<64x64xf32> -> vector<64x64xf32>
    %c0_3 = arith.constant 0 : index
    %c0_4 = arith.constant 0 : index
    %3 = vector.load %arg2[%c0_3, %c0_4] : memref<64x1xf32, #tpu.memory_space<vmem>>, vector<64x1xf32>
    %4 = vector.broadcast %3 : vector<64x1xf32> to vector<64x64xf32>
    %5 = arith.addf %2, %4 : vector<64x64xf32>
    %c0_5 = arith.constant 0 : index
    %c0_6 = arith.constant 0 : index
    %6 = vector.load %arg6[%c0_5, %c0_6] : memref<64x64xf32, #tpu.memory_space<vmem>>, vector<64x64xf32>
    tpu.vector_store %arg6[%c0_5, %c0_6], %5 {strides = array<i32>} : memref<64x64xf32, #tpu.memory_space<vmem>>, vector<64x64xf32>,
    %c0_i32 = arith.constant 0 : i32
    %7 = arith.cmpi eq, %arg0, %c0_i32 : i32
    %8 = arith.extui %7 : i1 to i32
    %c0_i32_7 = arith.constant 0 : i32
    %9 = arith.cmpi ne, %8, %c0_i32_7 : i32
    scf.if %9 {
      %c0_8 = arith.constant 0 : index
      %c0_9 = arith.constant 0 : index
      %10 = vector.load %arg6[%c0_8, %c0_9] : memref<64x64xf32, #tpu.memory_space<vmem>>, vector<64x64xf32>
      %cst_10 = arith.constant dense<0.000000e+00> : vector<64xf32>
      %11 = vector.multi_reduction <add>, %10, %cst_10 [1] : vector<64x64xf32> to vector<64xf32>
      %12 = vector.shape_cast %11 : vector<64xf32> to vector<64x1xf32>
      %cst_11 = arith.constant 1.562500e-02 : f32
      %13 = vector.broadcast %cst_11 : f32 to vector<64x1xf32>
      %14 = arith.mulf %12, %13 : vector<64x1xf32>
      %15 = vector.broadcast %14 : vector<64x1xf32> to vector<64x64xf32>
      %16 = arith.subf %10, %15 : vector<64x64xf32>
      %17 = arith.mulf %16, %16 : vector<64x64xf32>
      %cst_12 = arith.constant dense<0.000000e+00> : vector<64xf32>
      %18 = vector.multi_reduction <add>, %17, %cst_12 [1] : vector<64x64xf32> to vector<64xf32>
      %19 = vector.shape_cast %18 : vector<64xf32> to vector<64x1xf32>
      %cst_13 = arith.constant 1.562500e-02 : f32
      %20 = vector.broadcast %cst_13 : f32 to vector<64x1xf32>
      %21 = arith.mulf %19, %20 : vector<64x1xf32>
      %c0_14 = arith.constant 0 : index
      %c0_15 = arith.constant 0 : index
      %22 = vector.load %arg3[%c0_14, %c0_15] : memref<64x1xf32, #tpu.memory_space<vmem>>, vector<64x1xf32>
      %cst_16 = arith.constant 9.99999974E-6 : f32
      %23 = vector.broadcast %cst_16 : f32 to vector<64x1xf32>
      %24 = arith.addf %21, %23 : vector<64x1xf32>
      %25 = math.rsqrt %24 : vector<64x1xf32>
      %26 = arith.mulf %22, %25 : vector<64x1xf32>
      %27 = vector.broadcast %26 : vector<64x1xf32> to vector<64x64xf32>
      %28 = arith.mulf %16, %27 : vector<64x64xf32>
      %c0_17 = arith.constant 0 : index
      %c0_18 = arith.constant 0 : index
      %29 = vector.load %arg4[%c0_17, %c0_18] : memref<64x1xf32, #tpu.memory_space<vmem>>, vector<64x1xf32>
      %30 = vector.broadcast %29 : vector<64x1xf32> to vector<64x64xf32>
      %31 = arith.addf %28, %30 : vector<64x64xf32>
      %cst_19 = arith.constant 2.000000e-01 : f32
      %32 = vector.broadcast %cst_19 : f32 to vector<64x64xf32>
      %33 = arith.mulf %32, %31 : vector<64x64xf32>
      %34 = arith.maximumf %31, %33 : vector<64x64xf32>
      %c0_20 = arith.constant 0 : index
      %c0_21 = arith.constant 0 : index
      %35 = vector.load %arg6[%c0_20, %c0_21] : memref<64x64xf32, #tpu.memory_space<vmem>>, vector<64x64xf32>
      tpu.vector_store %arg6[%c0_20, %c0_21], %34 {strides = array<i32>} : memref<64x64xf32, #tpu.memory_space<vmem>>, vector<64x64xf32>,
    } else {
    }
    return
  }
  func.func @transform_0(%arg0: i32) -> (i32, i32) {
    %c0_i32 = arith.constant 0 : i32
    %c0_i32_0 = arith.constant 0 : i32
    %c0_i32_1 = arith.constant 0 : i32
    return %c0_i32, %c0_i32_0 : i32, i32
  }
  func.func @transform_1(%arg0: i32) -> (i32, i32) {
    %c0_i32 = arith.constant 0 : i32
    %c0_i32_0 = arith.constant 0 : i32
    %c0_i32_1 = arith.constant 0 : i32
    return %c0_i32, %c0_i32_0 : i32, i32
  }
  func.func @transform_2(%arg0: i32) -> (i32, i32) {
    %c0_i32 = arith.constant 0 : i32
    %c0_i32_0 = arith.constant 0 : i32
    %c0_i32_1 = arith.constant 0 : i32
    return %c0_i32, %c0_i32_0 : i32, i32
  }
  func.func @transform_3(%arg0: i32) -> (i32, i32) {
    %c0_i32 = arith.constant 0 : i32
    %c0_i32_0 = arith.constant 0 : i32
    %c0_i32_1 = arith.constant 0 : i32
    return %c0_i32, %c0_i32_0 : i32, i32
  }
  func.func @transform_4(%arg0: i32) -> (i32, i32) {
    %c0_i32 = arith.constant 0 : i32
    %c0_i32_0 = arith.constant 0 : i32
    return %c0_i32, %arg0 : i32, i32
  }
  func.func @transform_5(%arg0: i32) -> (i32, i32) {
    %c0_i32 = arith.constant 0 : i32
    %c0_i32_0 = arith.constant 0 : i32
    %c0_i32_1 = arith.constant 0 : i32
    return %c0_i32, %c0_i32_0 : i32, i32
  }
}

module attributes {stable_mosaic.version = 11 : i64} {
  func.func @_conv_bn_head_kernel(%arg0: i32, %arg1: memref<64x1024xf32, #tpu.memory_space<vmem>>, %arg2: memref<64x1xf32, #tpu.memory_space<vmem>>, %arg3: memref<64x1xf32, #tpu.memory_space<vmem>>, %arg4: memref<64x1xf32, #tpu.memory_space<vmem>>, %arg5: memref<64x16xf32, #tpu.memory_space<vmem>>, %arg6: memref<1x1xf32, #tpu.memory_space<vmem>>, %arg7: memref<1024x16xf32, #tpu.memory_space<vmem>>, %arg8: memref<1x1xf32, #tpu.memory_space<vmem>>) attributes {dimension_semantics = [#tpu.dimension_semantics<arbitrary>], iteration_bounds = array<i64: 1>, scalar_prefetch = 0 : i64, scratch_operands = 0 : i64, tpu.core_type = #tpu.core_type<tc>, window_params = [{pipeline_mode = #tpu.pipeline_mode<synchronous>, transform_indices = @transform_0, window_bounds = array<i64: 64, 1024>}, {pipeline_mode = #tpu.pipeline_mode<synchronous>, transform_indices = @transform_1, window_bounds = array<i64: 64, 1>}, {pipeline_mode = #tpu.pipeline_mode<synchronous>, transform_indices = @transform_2, window_bounds = array<i64: 64, 1>}, {pipeline_mode = #tpu.pipeline_mode<synchronous>, transform_indices = @transform_3, window_bounds = array<i64: 64, 1>}, {pipeline_mode = #tpu.pipeline_mode<synchronous>, transform_indices = @transform_4, window_bounds = array<i64: 64, 16>}, {pipeline_mode = #tpu.pipeline_mode<synchronous>, transform_indices = @transform_5, window_bounds = array<i64: 1, 1>}, {pipeline_mode = #tpu.pipeline_mode<synchronous>, transform_indices = @transform_6, window_bounds = array<i64: 1024, 16>}, {pipeline_mode = #tpu.pipeline_mode<synchronous>, transform_indices = @transform_7, window_bounds = array<i64: 1, 1>}]} {
    %c0 = arith.constant 0 : index
    %c0_0 = arith.constant 0 : index
    %0 = vector.load %arg1[%c0, %c0_0] : memref<64x1024xf32, #tpu.memory_space<vmem>>, vector<64x1024xf32>
    %c0_1 = arith.constant 0 : index
    %c0_2 = arith.constant 0 : index
    %1 = vector.load %arg7[%c0_1, %c0_2] : memref<1024x16xf32, #tpu.memory_space<vmem>>, vector<1024x16xf32>
    %cst = arith.constant dense<0.000000e+00> : vector<64x16xf32>
    %2 = tpu.matmul %0, %1, %cst {dimension_numbers = #tpu.dot_dimension_numbers<[1], [0], [0], [1], [0, 0, 1, 1], [], []>} : vector<64x1024xf32>, vector<1024x16xf32>, vector<64x16xf32> -> vector<64x16xf32>
    %c0_3 = arith.constant 0 : index
    %c0_4 = arith.constant 0 : index
    %3 = vector.load %arg2[%c0_3, %c0_4] : memref<64x1xf32, #tpu.memory_space<vmem>>, vector<64x1xf32>
    %4 = vector.broadcast %3 : vector<64x1xf32> to vector<64x16xf32>
    %5 = arith.addf %2, %4 : vector<64x16xf32>
    %cst_5 = arith.constant dense<0.000000e+00> : vector<64xf32>
    %6 = vector.multi_reduction <add>, %5, %cst_5 [1] : vector<64x16xf32> to vector<64xf32>
    %7 = vector.shape_cast %6 : vector<64xf32> to vector<64x1xf32>
    %cst_6 = arith.constant 6.250000e-02 : f32
    %8 = vector.broadcast %cst_6 : f32 to vector<64x1xf32>
    %9 = arith.mulf %7, %8 : vector<64x1xf32>
    %10 = vector.broadcast %9 : vector<64x1xf32> to vector<64x16xf32>
    %11 = arith.subf %5, %10 : vector<64x16xf32>
    %12 = arith.mulf %11, %11 : vector<64x16xf32>
    %cst_7 = arith.constant dense<0.000000e+00> : vector<64xf32>
    %13 = vector.multi_reduction <add>, %12, %cst_7 [1] : vector<64x16xf32> to vector<64xf32>
    %14 = vector.shape_cast %13 : vector<64xf32> to vector<64x1xf32>
    %cst_8 = arith.constant 6.250000e-02 : f32
    %15 = vector.broadcast %cst_8 : f32 to vector<64x1xf32>
    %16 = arith.mulf %14, %15 : vector<64x1xf32>
    %c0_9 = arith.constant 0 : index
    %c0_10 = arith.constant 0 : index
    %17 = vector.load %arg3[%c0_9, %c0_10] : memref<64x1xf32, #tpu.memory_space<vmem>>, vector<64x1xf32>
    %cst_11 = arith.constant 9.99999974E-6 : f32
    %18 = vector.broadcast %cst_11 : f32 to vector<64x1xf32>
    %19 = arith.addf %16, %18 : vector<64x1xf32>
    %20 = math.rsqrt %19 : vector<64x1xf32>
    %21 = arith.mulf %17, %20 : vector<64x1xf32>
    %22 = vector.broadcast %21 : vector<64x1xf32> to vector<64x16xf32>
    %23 = arith.mulf %11, %22 : vector<64x16xf32>
    %c0_12 = arith.constant 0 : index
    %c0_13 = arith.constant 0 : index
    %24 = vector.load %arg4[%c0_12, %c0_13] : memref<64x1xf32, #tpu.memory_space<vmem>>, vector<64x1xf32>
    %25 = vector.broadcast %24 : vector<64x1xf32> to vector<64x16xf32>
    %26 = arith.addf %23, %25 : vector<64x16xf32>
    %cst_14 = arith.constant 2.000000e-01 : f32
    %27 = vector.broadcast %cst_14 : f32 to vector<64x16xf32>
    %28 = arith.mulf %27, %26 : vector<64x16xf32>
    %29 = arith.maximumf %26, %28 : vector<64x16xf32>
    %c0_15 = arith.constant 0 : index
    %c0_16 = arith.constant 0 : index
    %30 = vector.load %arg5[%c0_15, %c0_16] : memref<64x16xf32, #tpu.memory_space<vmem>>, vector<64x16xf32>
    %31 = arith.mulf %30, %29 : vector<64x16xf32>
    %cst_17 = arith.constant dense<0.000000e+00> : vector<64xf32>
    %32 = vector.multi_reduction <add>, %31, %cst_17 [1] : vector<64x16xf32> to vector<64xf32>
    %33 = vector.shape_cast %32 : vector<64xf32> to vector<64x1xf32>
    %cst_18 = arith.constant dense<0.000000e+00> : vector<1xf32>
    %34 = vector.multi_reduction <add>, %33, %cst_18 [0] : vector<64x1xf32> to vector<1xf32>
    %35 = vector.shape_cast %34 : vector<1xf32> to vector<1x1xf32>
    %c0_19 = arith.constant 0 : index
    %c0_20 = arith.constant 0 : index
    %36 = vector.load %arg6[%c0_19, %c0_20] : memref<1x1xf32, #tpu.memory_space<vmem>>, vector<1x1xf32>
    %37 = arith.addf %35, %36 : vector<1x1xf32>
    %cst_21 = arith.constant 5.000000e-01 : f32
    %38 = vector.broadcast %cst_21 : f32 to vector<1x1xf32>
    %39 = arith.mulf %38, %37 : vector<1x1xf32>
    %40 = math.tanh %39 : vector<1x1xf32>
    %cst_22 = arith.constant 1.000000e+00 : f32
    %41 = vector.broadcast %cst_22 : f32 to vector<1x1xf32>
    %42 = arith.addf %40, %41 : vector<1x1xf32>
    %cst_23 = arith.constant 5.000000e-01 : f32
    %43 = vector.broadcast %cst_23 : f32 to vector<1x1xf32>
    %44 = arith.mulf %43, %42 : vector<1x1xf32>
    %c0_24 = arith.constant 0 : index
    %c0_25 = arith.constant 0 : index
    %45 = vector.load %arg8[%c0_24, %c0_25] : memref<1x1xf32, #tpu.memory_space<vmem>>, vector<1x1xf32>
    tpu.vector_store %arg8[%c0_24, %c0_25], %44 {strides = array<i32>} : memref<1x1xf32, #tpu.memory_space<vmem>>, vector<1x1xf32>,
    return
  }
  func.func @transform_0(%arg0: i32) -> (i32, i32) {
    %c0_i32 = arith.constant 0 : i32
    %c0_i32_0 = arith.constant 0 : i32
    %c0_i32_1 = arith.constant 0 : i32
    return %c0_i32, %c0_i32_0 : i32, i32
  }
  func.func @transform_1(%arg0: i32) -> (i32, i32) {
    %c0_i32 = arith.constant 0 : i32
    %c0_i32_0 = arith.constant 0 : i32
    %c0_i32_1 = arith.constant 0 : i32
    return %c0_i32, %c0_i32_0 : i32, i32
  }
  func.func @transform_2(%arg0: i32) -> (i32, i32) {
    %c0_i32 = arith.constant 0 : i32
    %c0_i32_0 = arith.constant 0 : i32
    %c0_i32_1 = arith.constant 0 : i32
    return %c0_i32, %c0_i32_0 : i32, i32
  }
  func.func @transform_3(%arg0: i32) -> (i32, i32) {
    %c0_i32 = arith.constant 0 : i32
    %c0_i32_0 = arith.constant 0 : i32
    %c0_i32_1 = arith.constant 0 : i32
    return %c0_i32, %c0_i32_0 : i32, i32
  }
  func.func @transform_4(%arg0: i32) -> (i32, i32) {
    %c0_i32 = arith.constant 0 : i32
    %c0_i32_0 = arith.constant 0 : i32
    %c0_i32_1 = arith.constant 0 : i32
    return %c0_i32, %c0_i32_0 : i32, i32
  }
  func.func @transform_5(%arg0: i32) -> (i32, i32) {
    %c0_i32 = arith.constant 0 : i32
    %c0_i32_0 = arith.constant 0 : i32
    %c0_i32_1 = arith.constant 0 : i32
    return %c0_i32, %c0_i32_0 : i32, i32
  }
  func.func @transform_6(%arg0: i32) -> (i32, i32) {
    %c0_i32 = arith.constant 0 : i32
    %c0_i32_0 = arith.constant 0 : i32
    %c0_i32_1 = arith.constant 0 : i32
    return %c0_i32, %c0_i32_0 : i32, i32
  }
  func.func @transform_7(%arg0: i32) -> (i32, i32) {
    %c0_i32 = arith.constant 0 : i32
    %c0_i32_0 = arith.constant 0 : i32
    %c0_i32_1 = arith.constant 0 : i32
    return %c0_i32, %c0_i32_0 : i32, i32
  }
}

</mosaic_0001>

<bundles_post_ra>
// kernel: discriminator_r_forward.6
= control target key start
LH: loop header
LB: loop body
LE: loop exit
PB: predicated region body
PF: predicated region fallthrough
CT: control target
= control target key end

     0   :  { %s2752_s12 = smov 0   ;;  %s2754_s13 = smov 0   ;;  %s4091_s0 = inlined_call_operand.vmem [shape: f32[8,96], index: 0, kind: input, shape index: {}]   ;;  %s4092_s1 = inlined_call_operand.vmem [shape: f32[8,1], index: 1, kind: input, shape index: {}]   ;;  %s4093_s2 = inlined_call_operand.vmem [shape: f32[96,16384], index: 2, kind: input, shape index: {}]   ;;  %s4094_s3 = inlined_call_operand.vmem [shape: f32[8,16384], index: 3, kind: output, shape index: {}]  }
   0x1   :  { %s2756_s14 = smov 0  }
   0x2 LB: > { %s2648_s15 = sadd.s32 4294967295, %s2728_s14   ;;  %s2769_s16 = sadd.s32 1, %s2728_s14   ;;  %s2728_s14 = sphi %s2756_s14, %s4097_s14   ;;  %s2724_s13 = sphi %s2754_s13, %s4096_s13   ;;  %s2720_s12 = sphi %s2752_s12, %s4095_s12  }
   0x3   : > { %s59_s17 = ssub.s32 %s2728_s14, %s2769_s16  ;;  %s62_s18 = sadd.s32 1, %s2724_s13 }
   0x4   : > { %p60_p0 = scmp.eq.s32.totalorder %s59_s17, 0  ;;  %p69_p1 = scmp.ne.s32.totalorder %s2724_s13, %s2720_s12 }
   0x5   : > { %p70_p2 = scmp.eq.s32.totalorder %s2728_s14, 0  ;;  %p2651_p4 = scmp.ge.s32.totalorder %s2728_s14, 4 }
   0x6   : > { %s2778_s19 = scalar_select %p60_p0, %s2724_s13, %s62_s18  }
   0x7   : > { %p71_p3 = por %p70_p2, %p69_p1  ;;  %127 = sbr.rel (%p2651_p4) target bundleno = 209 (0xd1), region = 24 }
   0xc   : > { %130 = sbr.rel (!%p71_p3) target bundleno = 209 (0xd1), region = 28  ;;  %s132_s20 = sand.u32 (%p71_p3), 1, %s2724_s13  }
   0xd   : > { %s2675_s21 = sshll.u32 (%p71_p3), %s2728_s14, 8  ;;  %s2676_s22 = smul.u32 (%p71_p3), 3072, %s132_s20 }
   0xe   : > { %s2786_s25 = scalar_lea.vmem (%p71_p3), %s4093_s2, %s2675_s21 }
   0xf   : > { %v150_v0 = vld [vmem:[%s2786_s25] sm:$0xff] (%p71_p3)  ;;  %v152_v1 = vld [vmem:[%s2786_s25 + $0x8] sm:$0xff] (%p71_p3)  ;;  %v154_v2 = vld [vmem:[%s2786_s25 + $0x10] sm:$0xff] (%p71_p3)  ;;  %s2794_s26 = scalar_lea.vmem (%p71_p3), [#allocation2], %s2676_s22 }
  0x10   : > { %v156_v3 = vld [vmem:[%s2786_s25 + $0x18] sm:$0xff] (%p71_p3)  ;;  %v158_v4 = vld [vmem:[%s2786_s25 + $0x20] sm:$0xff] (%p71_p3)  ;;  %v160_v5 = vld [vmem:[%s2786_s25 + $0x28] sm:$0xff] (%p71_p3)  ;;  %151 = vst [vmem:[%s2794_s26] sm:$0xff] (%p71_p3), %v150_v0 }
  0x11   : > { %153 = vst [vmem:[%s2794_s26 + $0x8] sm:$0xff] %v152_v1  ;;  %155 = vst [vmem:[%s2794_s26 + $0x10] sm:$0xff] %v154_v2  ;;  %v162_v6 = vld [vmem:[%s2786_s25 + $0x30] sm:$0xff]  ;;  %v164_v7 = vld [vmem:[%s2786_s25 + $0x38] sm:$0xff] }
  0x12   : > { %157 = vst [vmem:[%s2794_s26 + $0x18] sm:$0xff] %v156_v3  ;;  %159 = vst [vmem:[%s2794_s26 + $0x20] sm:$0xff] %v158_v4  ;;  %v166_v8 = vld [vmem:[%s2786_s25 + $0x40] sm:$0xff]  ;;  %v168_v9 = vld [vmem:[%s2786_s25 + $0x48] sm:$0xff] }
  0x13   : > { %161 = vst [vmem:[%s2794_s26 + $0x28] sm:$0xff] %v160_v5  ;;  %163 = vst [vmem:[%s2794_s26 + $0x30] sm:$0xff] %v162_v6  ;;  %v170_v10 = vld [vmem:[%s2786_s25 + $0x50] sm:$0xff]  ;;  %v172_v11 = vld [vmem:[%s2786_s25 + $0x58] sm:$0xff] }
  0x14   : > { %165 = vst [vmem:[%s2794_s26 + $0x38] sm:$0xff] %v164_v7  ;;  %167 = vst [vmem:[%s2794_s26 + $0x40] sm:$0xff] %v166_v8  ;;  %v174_v12 = vld [vmem:[%s2786_s25 + $0x60] sm:$0xff]  ;;  %v176_v13 = vld [vmem:[%s2786_s25 + $0x68] sm:$0xff] }
  0x15   : > { %169 = vst [vmem:[%s2794_s26 + $0x48] sm:$0xff] %v168_v9  ;;  %171 = vst [vmem:[%s2794_s26 + $0x50] sm:$0xff] %v170_v10  ;;  %v178_v14 = vld [vmem:[%s2786_s25 + $0x70] sm:$0xff]  ;;  %v180_v15 = vld [vmem:[%s2786_s25 + $0x78] sm:$0xff] }
  0x16   : > { %173 = vst [vmem:[%s2794_s26 + $0x58] sm:$0xff] %v172_v11  ;;  %175 = vst [vmem:[%s2794_s26 + $0x60] sm:$0xff] %v174_v12  ;;  %v182_v16 = vld [vmem:[%s2786_s25 + $0x80] sm:$0xff]  ;;  %v184_v17 = vld [vmem:[%s2786_s25 + $0x88] sm:$0xff] }
  0x17   : > { %177 = vst [vmem:[%s2794_s26 + $0x68] sm:$0xff] %v176_v13  ;;  %179 = vst [vmem:[%s2794_s26 + $0x70] sm:$0xff] %v178_v14  ;;  %v186_v18 = vld [vmem:[%s2786_s25 + $0x90] sm:$0xff]  ;;  %v188_v19 = vld [vmem:[%s2786_s25 + $0x98] sm:$0xff] }
  0x18   : > { %181 = vst [vmem:[%s2794_s26 + $0x78] sm:$0xff] %v180_v15  ;;  %183 = vst [vmem:[%s2794_s26 + $0x80] sm:$0xff] %v182_v16  ;;  %v190_v20 = vld [vmem:[%s2786_s25 + $0xa0] sm:$0xff]  ;;  %v192_v21 = vld [vmem:[%s2786_s25 + $0xa8] sm:$0xff] }
  0x19   : > { %185 = vst [vmem:[%s2794_s26 + $0x88] sm:$0xff] %v184_v17  ;;  %187 = vst [vmem:[%s2794_s26 + $0x90] sm:$0xff] %v186_v18  ;;  %v194_v22 = vld [vmem:[%s2786_s25 + $0xb0] sm:$0xff]  ;;  %v196_v23 = vld [vmem:[%s2786_s25 + $0xb8] sm:$0xff] }
  0x1a   : > { %189 = vst [vmem:[%s2794_s26 + $0x98] sm:$0xff] %v188_v19  ;;  %191 = vst [vmem:[%s2794_s26 + $0xa0] sm:$0xff] %v190_v20  ;;  %v198_v24 = vld [vmem:[%s2786_s25 + $0xc0] sm:$0xff]  ;;  %v200_v25 = vld [vmem:[%s2786_s25 + $0xc8] sm:$0xff] }
  0x1b   : > { %193 = vst [vmem:[%s2794_s26 + $0xa8] sm:$0xff] %v192_v21  ;;  %195 = vst [vmem:[%s2794_s26 + $0xb0] sm:$0xff] %v194_v22  ;;  %v202_v26 = vld [vmem:[%s2786_s25 + $0xd0] sm:$0xff]  ;;  %v204_v27 = vld [vmem:[%s2786_s25 + $0xd8] sm:$0xff] }
  0x1c   : > { %197 = vst [vmem:[%s2794_s26 + $0xb8] sm:$0xff] %v196_v23  ;;  %199 = vst [vmem:[%s2794_s26 + $0xc0] sm:$0xff] %v198_v24  ;;  %v206_v28 = vld [vmem:[%s2786_s25 + $0xe0] sm:$0xff]  ;;  %v208_v29 = vld [vmem:[%s2786_s25 + $0xe8] sm:$0xff] }
  0x1d   : > { %201 = vst [vmem:[%s2794_s26 + $0xc8] sm:$0xff] %v200_v25  ;;  %203 = vst [vmem:[%s2794_s26 + $0xd0] sm:$0xff] %v202_v26  ;;  %v210_v30 = vld [vmem:[%s2786_s25 + $0xf0] sm:$0xff]  ;;  %v212_v31 = vld [vmem:[%s2786_s25 + $0xf8] sm:$0xff] }
  0x1e   : > { %205 = vst [vmem:[%s2794_s26 + $0xd8] sm:$0xff] %v204_v27  ;;  %207 = vst [vmem:[%s2794_s26 + $0xe0] sm:$0xff] %v206_v28  ;;  %v214_v32 = vld [vmem:[%s2786_s25 + $0x400] sm:$0xff]  ;;  %v216_v33 = vld [vmem:[%s2786_s25 + $0x408] sm:$0xff] }
  0x1f   : > { %209 = vst [vmem:[%s2794_s26 + $0xe8] sm:$0xff] %v208_v29  ;;  %211 = vst [vmem:[%s2794_s26 + $0xf0] sm:$0xff] %v210_v30  ;;  %v218_v34 = vld [vmem:[%s2786_s25 + $0x410] sm:$0xff]  ;;  %v220_v35 = vld [vmem:[%s2786_s25 + $0x418] sm:$0xff] }
  0x20   : > { %213 = vst [vmem:[%s2794_s26 + $0xf8] sm:$0xff] %v212_v31  ;;  %215 = vst [vmem:[%s2794_s26 + $0x100] sm:$0xff] %v214_v32  ;;  %v222_v36 = vld [vmem:[%s2786_s25 + $0x420] sm:$0xff]  ;;  %v224_v37 = vld [vmem:[%s2786_s25 + $0x428] sm:$0xff] }
  0x21   : > { %217 = vst [vmem:[%s2794_s26 + $0x108] sm:$0xff] %v216_v33  ;;  %219 = vst [vmem:[%s2794_s26 + $0x110] sm:$0xff] %v218_v34  ;;  %v226_v38 = vld [vmem:[%s2786_s25 + $0x430] sm:$0xff]  ;;  %v228_v39 = vld [vmem:[%s2786_s25 + $0x438] sm:$0xff] }
  0x22   : > { %221 = vst [vmem:[%s2794_s26 + $0x118] sm:$0xff] %v220_v35  ;;  %223 = vst [vmem:[%s2794_s26 + $0x120] sm:$0xff] %v222_v36  ;;  %v230_v40 = vld [vmem:[%s2786_s25 + $0x440] sm:$0xff]  ;;  %v232_v41 = vld [vmem:[%s2786_s25 + $0x448] sm:$0xff] }
  0x23   : > { %225 = vst [vmem:[%s2794_s26 + $0x128] sm:$0xff] %v224_v37  ;;  %227 = vst [vmem:[%s2794_s26 + $0x130] sm:$0xff] %v226_v38  ;;  %v234_v42 = vld [vmem:[%s2786_s25 + $0x450] sm:$0xff]  ;;  %v236_v43 = vld [vmem:[%s2786_s25 + $0x458] sm:$0xff] }
  0x24   : > { %229 = vst [vmem:[%s2794_s26 + $0x138] sm:$0xff] %v228_v39  ;;  %231 = vst [vmem:[%s2794_s26 + $0x140] sm:$0xff] %v230_v40  ;;  %v238_v44 = vld [vmem:[%s2786_s25 + $0x460] sm:$0xff]  ;;  %v240_v45 = vld [vmem:[%s2786_s25 + $0x468] sm:$0xff] }
  0x25   : > { %233 = vst [vmem:[%s2794_s26 + $0x148] sm:$0xff] %v232_v41  ;;  %235 = vst [vmem:[%s2794_s26 + $0x150] sm:$0xff] %v234_v42  ;;  %v242_v46 = vld [vmem:[%s2786_s25 + $0x470] sm:$0xff]  ;;  %v244_v47 = vld [vmem:[%s2786_s25 + $0x478] sm:$0xff] }
  0x26   : > { %237 = vst [vmem:[%s2794_s26 + $0x158] sm:$0xff] %v236_v43  ;;  %239 = vst [vmem:[%s2794_s26 + $0x160] sm:$0xff] %v238_v44  ;;  %v246_v48 = vld [vmem:[%s2786_s25 + $0x480] sm:$0xff]  ;;  %v248_v49 = vld [vmem:[%s2786_s25 + $0x488] sm:$0xff] }
  0x27   : > { %241 = vst [vmem:[%s2794_s26 + $0x168] sm:$0xff] %v240_v45  ;;  %243 = vst [vmem:[%s2794_s26 + $0x170] sm:$0xff] %v242_v46  ;;  %v250_v50 = vld [vmem:[%s2786_s25 + $0x490] sm:$0xff]  ;;  %v252_v51 = vld [vmem:[%s2786_s25 + $0x498] sm:$0xff] }
  0x28   : > { %245 = vst [vmem:[%s2794_s26 + $0x178] sm:$0xff] %v244_v47  ;;  %247 = vst [vmem:[%s2794_s26 + $0x180] sm:$0xff] %v246_v48  ;;  %v254_v52 = vld [vmem:[%s2786_s25 + $0x4a0] sm:$0xff]  ;;  %v256_v53 = vld [vmem:[%s2786_s25 + $0x4a8] sm:$0xff] }
  0x29   : > { %249 = vst [vmem:[%s2794_s26 + $0x188] sm:$0xff] %v248_v49  ;;  %251 = vst [vmem:[%s2794_s26 + $0x190] sm:$0xff] %v250_v50  ;;  %v258_v54 = vld [vmem:[%s2786_s25 + $0x4b0] sm:$0xff]  ;;  %v260_v55 = vld [vmem:[%s2786_s25 + $0x4b8] sm:$0xff] }
  0x2a   : > { %253 = vst [vmem:[%s2794_s26 + $0x198] sm:$0xff] %v252_v51  ;;  %255 = vst [vmem:[%s2794_s26 + $0x1a0] sm:$0xff] %v254_v52  ;;  %v262_v56 = vld [vmem:[%s2786_s25 + $0x4c0] sm:$0xff]  ;;  %v264_v57 = vld [vmem:[%s2786_s25 + $0x4c8] sm:$0xff] }
  0x2b   : > { %257 = vst [vmem:[%s2794_s26 + $0x1a8] sm:$0xff] %v256_v53  ;;  %259 = vst [vmem:[%s2794_s26 + $0x1b0] sm:$0xff] %v258_v54  ;;  %v266_v58 = vld [vmem:[%s2786_s25 + $0x4d0] sm:$0xff]  ;;  %v268_v59 = vld [vmem:[%s2786_s25 + $0x4d8] sm:$0xff] }
  0x2c   : > { %261 = vst [vmem:[%s2794_s26 + $0x1b8] sm:$0xff] %v260_v55  ;;  %263 = vst [vmem:[%s2794_s26 + $0x1c0] sm:$0xff] %v262_v56  ;;  %v270_v60 = vld [vmem:[%s2786_s25 + $0x4e0] sm:$0xff]  ;;  %v272_v61 = vld [vmem:[%s2786_s25 + $0x4e8] sm:$0xff] }
  0x2d   : > { %265 = vst [vmem:[%s2794_s26 + $0x1c8] sm:$0xff] %v264_v57  ;;  %267 = vst [vmem:[%s2794_s26 + $0x1d0] sm:$0xff] %v266_v58  ;;  %v274_v62 = vld [vmem:[%s2786_s25 + $0x4f0] sm:$0xff]  ;;  %v276_v63 = vld [vmem:[%s2786_s25 + $0x4f8] sm:$0xff] }
  0x2e   : > { %269 = vst [vmem:[%s2794_s26 + $0x1d8] sm:$0xff] %v268_v59  ;;  %271 = vst [vmem:[%s2794_s26 + $0x1e0] sm:$0xff] %v270_v60  ;;  %v278_v0 = vld [vmem:[%s2786_s25 + $0x800] sm:$0xff]  ;;  %v280_v1 = vld [vmem:[%s2786_s25 + $0x808] sm:$0xff] }
  0x2f   : > { %273 = vst [vmem:[%s2794_s26 + $0x1e8] sm:$0xff] %v272_v61  ;;  %275 = vst [vmem:[%s2794_s26 + $0x1f0] sm:$0xff] %v274_v62  ;;  %v282_v2 = vld [vmem:[%s2786_s25 + $0x810] sm:$0xff]  ;;  %v284_v3 = vld [vmem:[%s2786_s25 + $0x818] sm:$0xff] }
  0x30   : > { %277 = vst [vmem:[%s2794_s26 + $0x1f8] sm:$0xff] %v276_v63  ;;  %279 = vst [vmem:[%s2794_s26 + $0x200] sm:$0xff] %v278_v0  ;;  %v286_v4 = vld [vmem:[%s2786_s25 + $0x820] sm:$0xff]  ;;  %v288_v5 = vld [vmem:[%s2786_s25 + $0x828] sm:$0xff] }
  0x31   : > { %281 = vst [vmem:[%s2794_s26 + $0x208] sm:$0xff] %v280_v1  ;;  %283 = vst [vmem:[%s2794_s26 + $0x210] sm:$0xff] %v282_v2  ;;  %v290_v6 = vld [vmem:[%s2786_s25 + $0x830] sm:$0xff]  ;;  %v292_v7 = vld [vmem:[%s2786_s25 + $0x838] sm:$0xff] }
  0x32   : > { %285 = vst [vmem:[%s2794_s26 + $0x218] sm:$0xff] %v284_v3  ;;  %287 = vst [vmem:[%s2794_s26 + $0x220] sm:$0xff] %v286_v4  ;;  %v294_v8 = vld [vmem:[%s2786_s25 + $0x840] sm:$0xff]  ;;  %v296_v9 = vld [vmem:[%s2786_s25 + $0x848] sm:$0xff] }
  0x33   : > { %289 = vst [vmem:[%s2794_s26 + $0x228] sm:$0xff] %v288_v5  ;;  %291 = vst [vmem:[%s2794_s26 + $0x230] sm:$0xff] %v290_v6  ;;  %v298_v10 = vld [vmem:[%s2786_s25 + $0x850] sm:$0xff]  ;;  %v300_v11 = vld [vmem:[%s2786_s25 + $0x858] sm:$0xff] }
  0x34   : > { %293 = vst [vmem:[%s2794_s26 + $0x238] sm:$0xff] %v292_v7  ;;  %295 = vst [vmem:[%s2794_s26 + $0x240] sm:$0xff] %v294_v8  ;;  %v302_v12 = vld [vmem:[%s2786_s25 + $0x860] sm:$0xff]  ;;  %v304_v13 = vld [vmem:[%s2786_s25 + $0x868] sm:$0xff] }
  0x35   : > { %297 = vst [vmem:[%s2794_s26 + $0x248] sm:$0xff] %v296_v9  ;;  %299 = vst [vmem:[%s2794_s26 + $0x250] sm:$0xff] %v298_v10  ;;  %v306_v14 = vld [vmem:[%s2786_s25 + $0x870] sm:$0xff]  ;;  %v308_v15 = vld [vmem:[%s2786_s25 + $0x878] sm:$0xff] }
  0x36   : > { %301 = vst [vmem:[%s2794_s26 + $0x258] sm:$0xff] %v300_v11  ;;  %303 = vst [vmem:[%s2794_s26 + $0x260] sm:$0xff] %v302_v12  ;;  %v310_v16 = vld [vmem:[%s2786_s25 + $0x880] sm:$0xff]  ;;  %v312_v17 = vld [vmem:[%s2786_s25 + $0x888] sm:$0xff] }
  0x37   : > { %305 = vst [vmem:[%s2794_s26 + $0x268] sm:$0xff] %v304_v13  ;;  %307 = vst [vmem:[%s2794_s26 + $0x270] sm:$0xff] %v306_v14  ;;  %v314_v18 = vld [vmem:[%s2786_s25 + $0x890] sm:$0xff]  ;;  %v316_v19 = vld [vmem:[%s2786_s25 + $0x898] sm:$0xff] }
  0x38   : > { %309 = vst [vmem:[%s2794_s26 + $0x278] sm:$0xff] %v308_v15  ;;  %311 = vst [vmem:[%s2794_s26 + $0x280] sm:$0xff] %v310_v16  ;;  %v318_v20 = vld [vmem:[%s2786_s25 + $0x8a0] sm:$0xff]  ;;  %v320_v21 = vld [vmem:[%s2786_s25 + $0x8a8] sm:$0xff] }
  0x39   : > { %313 = vst [vmem:[%s2794_s26 + $0x288] sm:$0xff] %v312_v17  ;;  %315 = vst [vmem:[%s2794_s26 + $0x290] sm:$0xff] %v314_v18  ;;  %v322_v22 = vld [vmem:[%s2786_s25 + $0x8b0] sm:$0xff]  ;;  %v324_v23 = vld [vmem:[%s2786_s25 + $0x8b8] sm:$0xff] }
  0x3a   : > { %317 = vst [vmem:[%s2794_s26 + $0x298] sm:$0xff] %v316_v19  ;;  %319 = vst [vmem:[%s2794_s26 + $0x2a0] sm:$0xff] %v318_v20  ;;  %v326_v24 = vld [vmem:[%s2786_s25 + $0x8c0] sm:$0xff]  ;;  %v328_v25 = vld [vmem:[%s2786_s25 + $0x8c8] sm:$0xff] }
  0x3b   : > { %321 = vst [vmem:[%s2794_s26 + $0x2a8] sm:$0xff] %v320_v21  ;;  %323 = vst [vmem:[%s2794_s26 + $0x2b0] sm:$0xff] %v322_v22  ;;  %v330_v26 = vld [vmem:[%s2786_s25 + $0x8d0] sm:$0xff]  ;;  %v332_v27 = vld [vmem:[%s2786_s25 + $0x8d8] sm:$0xff] }
  0x3c   : > { %325 = vst [vmem:[%s2794_s26 + $0x2b8] sm:$0xff] %v324_v23  ;;  %327 = vst [vmem:[%s2794_s26 + $0x2c0] sm:$0xff] %v326_v24  ;;  %v334_v28 = vld [vmem:[%s2786_s25 + $0x8e0] sm:$0xff]  ;;  %v336_v29 = vld [vmem:[%s2786_s25 + $0x8e8] sm:$0xff] }
  0x3d   : > { %329 = vst [vmem:[%s2794_s26 + $0x2c8] sm:$0xff] %v328_v25  ;;  %331 = vst [vmem:[%s2794_s26 + $0x2d0] sm:$0xff] %v330_v26  ;;  %v338_v30 = vld [vmem:[%s2786_s25 + $0x8f0] sm:$0xff]  ;;  %v340_v31 = vld [vmem:[%s2786_s25 + $0x8f8] sm:$0xff] }
  0x3e   : > { %333 = vst [vmem:[%s2794_s26 + $0x2d8] sm:$0xff] %v332_v27  ;;  %335 = vst [vmem:[%s2794_s26 + $0x2e0] sm:$0xff] %v334_v28  ;;  %v342_v32 = vld [vmem:[%s2786_s25 + $0xc00] sm:$0xff]  ;;  %v344_v33 = vld [vmem:[%s2786_s25 + $0xc08] sm:$0xff] }
  0x3f   : > { %337 = vst [vmem:[%s2794_s26 + $0x2e8] sm:$0xff] %v336_v29  ;;  %339 = vst [vmem:[%s2794_s26 + $0x2f0] sm:$0xff] %v338_v30  ;;  %v346_v34 = vld [vmem:[%s2786_s25 + $0xc10] sm:$0xff]  ;;  %v348_v35 = vld [vmem:[%s2786_s25 + $0xc18] sm:$0xff] }
  0x40   : > { %341 = vst [vmem:[%s2794_s26 + $0x2f8] sm:$0xff] %v340_v31  ;;  %343 = vst [vmem:[%s2794_s26 + $0x300] sm:$0xff] %v342_v32  ;;  %v350_v36 = vld [vmem:[%s2786_s25 + $0xc20] sm:$0xff]  ;;  %v352_v37 = vld [vmem:[%s2786_s25 + $0xc28] sm:$0xff] }
  0x41   : > { %345 = vst [vmem:[%s2794_s26 + $0x308] sm:$0xff] %v344_v33  ;;  %347 = vst [vmem:[%s2794_s26 + $0x310] sm:$0xff] %v346_v34  ;;  %v354_v38 = vld [vmem:[%s2786_s25 + $0xc30] sm:$0xff]  ;;  %v356_v39 = vld [vmem:[%s2786_s25 + $0xc38] sm:$0xff] }
  0x42   : > { %349 = vst [vmem:[%s2794_s26 + $0x318] sm:$0xff] %v348_v35  ;;  %351 = vst [vmem:[%s2794_s26 + $0x320] sm:$0xff] %v350_v36  ;;  %v358_v40 = vld [vmem:[%s2786_s25 + $0xc40] sm:$0xff]  ;;  %v360_v41 = vld [vmem:[%s2786_s25 + $0xc48] sm:$0xff] }
  0x43   : > { %353 = vst [vmem:[%s2794_s26 + $0x328] sm:$0xff] %v352_v37  ;;  %355 = vst [vmem:[%s2794_s26 + $0x330] sm:$0xff] %v354_v38  ;;  %v362_v42 = vld [vmem:[%s2786_s25 + $0xc50] sm:$0xff]  ;;  %v364_v43 = vld [vmem:[%s2786_s25 + $0xc58] sm:$0xff] }
  0x44   : > { %357 = vst [vmem:[%s2794_s26 + $0x338] sm:$0xff] %v356_v39  ;;  %359 = vst [vmem:[%s2794_s26 + $0x340] sm:$0xff] %v358_v40  ;;  %v366_v44 = vld [vmem:[%s2786_s25 + $0xc60] sm:$0xff]  ;;  %v368_v45 = vld [vmem:[%s2786_s25 + $0xc68] sm:$0xff] }
  0x45   : > { %361 = vst [vmem:[%s2794_s26 + $0x348] sm:$0xff] %v360_v41  ;;  %363 = vst [vmem:[%s2794_s26 + $0x350] sm:$0xff] %v362_v42  ;;  %v370_v46 = vld [vmem:[%s2786_s25 + $0xc70] sm:$0xff]  ;;  %v372_v47 = vld [vmem:[%s2786_s25 + $0xc78] sm:$0xff] }
  0x46   : > { %365 = vst [vmem:[%s2794_s26 + $0x358] sm:$0xff] %v364_v43  ;;  %367 = vst [vmem:[%s2794_s26 + $0x360] sm:$0xff] %v366_v44  ;;  %v374_v48 = vld [vmem:[%s2786_s25 + $0xc80] sm:$0xff]  ;;  %v376_v49 = vld [vmem:[%s2786_s25 + $0xc88] sm:$0xff] }
  0x47   : > { %369 = vst [vmem:[%s2794_s26 + $0x368] sm:$0xff] %v368_v45  ;;  %371 = vst [vmem:[%s2794_s26 + $0x370] sm:$0xff] %v370_v46  ;;  %v378_v50 = vld [vmem:[%s2786_s25 + $0xc90] sm:$0xff]  ;;  %v380_v51 = vld [vmem:[%s2786_s25 + $0xc98] sm:$0xff] }
  0x48   : > { %373 = vst [vmem:[%s2794_s26 + $0x378] sm:$0xff] %v372_v47  ;;  %375 = vst [vmem:[%s2794_s26 + $0x380] sm:$0xff] %v374_v48  ;;  %v382_v52 = vld [vmem:[%s2786_s25 + $0xca0] sm:$0xff]  ;;  %v384_v53 = vld [vmem:[%s2786_s25 + $0xca8] sm:$0xff] }
  0x49   : > { %377 = vst [vmem:[%s2794_s26 + $0x388] sm:$0xff] %v376_v49  ;;  %379 = vst [vmem:[%s2794_s26 + $0x390] sm:$0xff] %v378_v50  ;;  %v386_v54 = vld [vmem:[%s2786_s25 + $0xcb0] sm:$0xff]  ;;  %v388_v55 = vld [vmem:[%s2786_s25 + $0xcb8] sm:$0xff] }
  0x4a   : > { %381 = vst [vmem:[%s2794_s26 + $0x398] sm:$0xff] %v380_v51  ;;  %383 = vst [vmem:[%s2794_s26 + $0x3a0] sm:$0xff] %v382_v52  ;;  %v390_v56 = vld [vmem:[%s2786_s25 + $0xcc0] sm:$0xff]  ;;  %v392_v57 = vld [vmem:[%s2786_s25 + $0xcc8] sm:$0xff] }
  0x4b   : > { %385 = vst [vmem:[%s2794_s26 + $0x3a8] sm:$0xff] %v384_v53  ;;  %387 = vst [vmem:[%s2794_s26 + $0x3b0] sm:$0xff] %v386_v54  ;;  %v394_v58 = vld [vmem:[%s2786_s25 + $0xcd0] sm:$0xff]  ;;  %v396_v59 = vld [vmem:[%s2786_s25 + $0xcd8] sm:$0xff] }
  0x4c   : > { %389 = vst [vmem:[%s2794_s26 + $0x3b8] sm:$0xff] %v388_v55  ;;  %391 = vst [vmem:[%s2794_s26 + $0x3c0] sm:$0xff] %v390_v56  ;;  %v398_v60 = vld [vmem:[%s2786_s25 + $0xce0] sm:$0xff]  ;;  %v400_v61 = vld [vmem:[%s2786_s25 + $0xce8] sm:$0xff] }
  0x4d   : > { %393 = vst [vmem:[%s2794_s26 + $0x3c8] sm:$0xff] %v392_v57  ;;  %395 = vst [vmem:[%s2794_s26 + $0x3d0] sm:$0xff] %v394_v58  ;;  %v402_v62 = vld [vmem:[%s2786_s25 + $0xcf0] sm:$0xff]  ;;  %v404_v63 = vld [vmem:[%s2786_s25 + $0xcf8] sm:$0xff] }
  0x4e   : > { %397 = vst [vmem:[%s2794_s26 + $0x3d8] sm:$0xff] %v396_v59  ;;  %399 = vst [vmem:[%s2794_s26 + $0x3e0] sm:$0xff] %v398_v60  ;;  %v406_v0 = vld [vmem:[%s2786_s25 + $0x1000] sm:$0xff]  ;;  %v408_v1 = vld [vmem:[%s2786_s25 + $0x1008] sm:$0xff] }
  0x4f   : > { %401 = vst [vmem:[%s2794_s26 + $0x3e8] sm:$0xff] %v400_v61  ;;  %403 = vst [vmem:[%s2794_s26 + $0x3f0] sm:$0xff] %v402_v62  ;;  %v410_v2 = vld [vmem:[%s2786_s25 + $0x1010] sm:$0xff]  ;;  %v412_v3 = vld [vmem:[%s2786_s25 + $0x1018] sm:$0xff] }
  0x50   : > { %405 = vst [vmem:[%s2794_s26 + $0x3f8] sm:$0xff] %v404_v63  ;;  %407 = vst [vmem:[%s2794_s26 + $0x400] sm:$0xff] %v406_v0  ;;  %v414_v4 = vld [vmem:[%s2786_s25 + $0x1020] sm:$0xff]  ;;  %v416_v5 = vld [vmem:[%s2786_s25 + $0x1028] sm:$0xff] }
  0x51   : > { %409 = vst [vmem:[%s2794_s26 + $0x408] sm:$0xff] %v408_v1  ;;  %411 = vst [vmem:[%s2794_s26 + $0x410] sm:$0xff] %v410_v2  ;;  %v418_v6 = vld [vmem:[%s2786_s25 + $0x1030] sm:$0xff]  ;;  %v420_v7 = vld [vmem:[%s2786_s25 + $0x1038] sm:$0xff] }
  0x52   : > { %413 = vst [vmem:[%s2794_s26 + $0x418] sm:$0xff] %v412_v3  ;;  %415 = vst [vmem:[%s2794_s26 + $0x420] sm:$0xff] %v414_v4  ;;  %v422_v8 = vld [vmem:[%s2786_s25 + $0x1040] sm:$0xff]  ;;  %v424_v9 = vld [vmem:[%s2786_s25 + $0x1048] sm:$0xff] }
  0x53   : > { %417 = vst [vmem:[%s2794_s26 + $0x428] sm:$0xff] %v416_v5  ;;  %419 = vst [vmem:[%s2794_s26 + $0x430] sm:$0xff] %v418_v6  ;;  %v426_v10 = vld [vmem:[%s2786_s25 + $0x1050] sm:$0xff]  ;;  %v428_v11 = vld [vmem:[%s2786_s25 + $0x1058] sm:$0xff] }
  0x54   : > { %421 = vst [vmem:[%s2794_s26 + $0x438] sm:$0xff] %v420_v7  ;;  %423 = vst [vmem:[%s2794_s26 + $0x440] sm:$0xff] %v422_v8  ;;  %v430_v12 = vld [vmem:[%s2786_s25 + $0x1060] sm:$0xff]  ;;  %v432_v13 = vld [vmem:[%s2786_s25 + $0x1068] sm:$0xff] }
  0x55   : > { %425 = vst [vmem:[%s2794_s26 + $0x448] sm:$0xff] %v424_v9  ;;  %427 = vst [vmem:[%s2794_s26 + $0x450] sm:$0xff] %v426_v10  ;;  %v434_v14 = vld [vmem:[%s2786_s25 + $0x1070] sm:$0xff]  ;;  %v436_v15 = vld [vmem:[%s2786_s25 + $0x1078] sm:$0xff] }
  0x56   : > { %429 = vst [vmem:[%s2794_s26 + $0x458] sm:$0xff] %v428_v11  ;;  %431 = vst [vmem:[%s2794_s26 + $0x460] sm:$0xff] %v430_v12  ;;  %v438_v16 = vld [vmem:[%s2786_s25 + $0x1080] sm:$0xff]  ;;  %v440_v17 = vld [vmem:[%s2786_s25 + $0x1088] sm:$0xff] }
  0x57   : > { %433 = vst [vmem:[%s2794_s26 + $0x468] sm:$0xff] %v432_v13  ;;  %435 = vst [vmem:[%s2794_s26 + $0x470] sm:$0xff] %v434_v14  ;;  %v442_v18 = vld [vmem:[%s2786_s25 + $0x1090] sm:$0xff]  ;;  %v444_v19 = vld [vmem:[%s2786_s25 + $0x1098] sm:$0xff] }
  0x58   : > { %437 = vst [vmem:[%s2794_s26 + $0x478] sm:$0xff] %v436_v15  ;;  %439 = vst [vmem:[%s2794_s26 + $0x480] sm:$0xff] %v438_v16  ;;  %v446_v20 = vld [vmem:[%s2786_s25 + $0x10a0] sm:$0xff]  ;;  %v448_v21 = vld [vmem:[%s2786_s25 + $0x10a8] sm:$0xff] }
  0x59   : > { %441 = vst [vmem:[%s2794_s26 + $0x488] sm:$0xff] %v440_v17  ;;  %443 = vst [vmem:[%s2794_s26 + $0x490] sm:$0xff] %v442_v18  ;;  %v450_v22 = vld [vmem:[%s2786_s25 + $0x10b0] sm:$0xff]  ;;  %v452_v23 = vld [vmem:[%s2786_s25 + $0x10b8] sm:$0xff] }
  0x5a   : > { %445 = vst [vmem:[%s2794_s26 + $0x498] sm:$0xff] %v444_v19  ;;  %447 = vst [vmem:[%s2794_s26 + $0x4a0] sm:$0xff] %v446_v20  ;;  %v454_v24 = vld [vmem:[%s2786_s25 + $0x10c0] sm:$0xff]  ;;  %v456_v25 = vld [vmem:[%s2786_s25 + $0x10c8] sm:$0xff] }
  0x5b   : > { %449 = vst [vmem:[%s2794_s26 + $0x4a8] sm:$0xff] %v448_v21  ;;  %451 = vst [vmem:[%s2794_s26 + $0x4b0] sm:$0xff] %v450_v22  ;;  %v458_v26 = vld [vmem:[%s2786_s25 + $0x10d0] sm:$0xff]  ;;  %v460_v27 = vld [vmem:[%s2786_s25 + $0x10d8] sm:$0xff] }
  0x5c   : > { %453 = vst [vmem:[%s2794_s26 + $0x4b8] sm:$0xff] %v452_v23  ;;  %455 = vst [vmem:[%s2794_s26 + $0x4c0] sm:$0xff] %v454_v24  ;;  %v462_v28 = vld [vmem:[%s2786_s25 + $0x10e0] sm:$0xff]  ;;  %v464_v29 = vld [vmem:[%s2786_s25 + $0x10e8] sm:$0xff] }
  0x5d   : > { %457 = vst [vmem:[%s2794_s26 + $0x4c8] sm:$0xff] %v456_v25  ;;  %459 = vst [vmem:[%s2794_s26 + $0x4d0] sm:$0xff] %v458_v26  ;;  %v466_v30 = vld [vmem:[%s2786_s25 + $0x10f0] sm:$0xff]  ;;  %v468_v31 = vld [vmem:[%s2786_s25 + $0x10f8] sm:$0xff] }
  0x5e   : > { %461 = vst [vmem:[%s2794_s26 + $0x4d8] sm:$0xff] %v460_v27  ;;  %463 = vst [vmem:[%s2794_s26 + $0x4e0] sm:$0xff] %v462_v28  ;;  %v470_v32 = vld [vmem:[%s2786_s25 + $0x1400] sm:$0xff]  ;;  %v472_v33 = vld [vmem:[%s2786_s25 + $0x1408] sm:$0xff] }
  0x5f   : > { %465 = vst [vmem:[%s2794_s26 + $0x4e8] sm:$0xff] %v464_v29  ;;  %467 = vst [vmem:[%s2794_s26 + $0x4f0] sm:$0xff] %v466_v30  ;;  %v474_v34 = vld [vmem:[%s2786_s25 + $0x1410] sm:$0xff]  ;;  %v476_v35 = vld [vmem:[%s2786_s25 + $0x1418] sm:$0xff] }
  0x60   : > { %469 = vst [vmem:[%s2794_s26 + $0x4f8] sm:$0xff] %v468_v31  ;;  %471 = vst [vmem:[%s2794_s26 + $0x500] sm:$0xff] %v470_v32  ;;  %v478_v36 = vld [vmem:[%s2786_s25 + $0x1420] sm:$0xff]  ;;  %v480_v37 = vld [vmem:[%s2786_s25 + $0x1428] sm:$0xff] }
  0x61   : > { %473 = vst [vmem:[%s2794_s26 + $0x508] sm:$0xff] %v472_v33  ;;  %475 = vst [vmem:[%s2794_s26 + $0x510] sm:$0xff] %v474_v34  ;;  %v482_v38 = vld [vmem:[%s2786_s25 + $0x1430] sm:$0xff]  ;;  %v484_v39 = vld [vmem:[%s2786_s25 + $0x1438] sm:$0xff] }
  0x62   : > { %477 = vst [vmem:[%s2794_s26 + $0x518] sm:$0xff] %v476_v35  ;;  %479 = vst [vmem:[%s2794_s26 + $0x520] sm:$0xff] %v478_v36  ;;  %v486_v40 = vld [vmem:[%s2786_s25 + $0x1440] sm:$0xff]  ;;  %v488_v41 = vld [vmem:[%s2786_s25 + $0x1448] sm:$0xff] }
  0x63   : > { %481 = vst [vmem:[%s2794_s26 + $0x528] sm:$0xff] %v480_v37  ;;  %483 = vst [vmem:[%s2794_s26 + $0x530] sm:$0xff] %v482_v38  ;;  %v490_v42 = vld [vmem:[%s2786_s25 + $0x1450] sm:$0xff]  ;;  %v492_v43 = vld [vmem:[%s2786_s25 + $0x1458] sm:$0xff] }
  0x64   : > { %485 = vst [vmem:[%s2794_s26 + $0x538] sm:$0xff] %v484_v39  ;;  %487 = vst [vmem:[%s2794_s26 + $0x540] sm:$0xff] %v486_v40  ;;  %v494_v44 = vld [vmem:[%s2786_s25 + $0x1460] sm:$0xff]  ;;  %v496_v45 = vld [vmem:[%s2786_s25 + $0x1468] sm:$0xff] }
  0x65   : > { %489 = vst [vmem:[%s2794_s26 + $0x548] sm:$0xff] %v488_v41  ;;  %491 = vst [vmem:[%s2794_s26 + $0x550] sm:$0xff] %v490_v42  ;;  %v498_v46 = vld [vmem:[%s2786_s25 + $0x1470] sm:$0xff]  ;;  %v500_v47 = vld [vmem:[%s2786_s25 + $0x1478] sm:$0xff] }
  0x66   : > { %493 = vst [vmem:[%s2794_s26 + $0x558] sm:$0xff] %v492_v43  ;;  %495 = vst [vmem:[%s2794_s26 + $0x560] sm:$0xff] %v494_v44  ;;  %v502_v48 = vld [vmem:[%s2786_s25 + $0x1480] sm:$0xff]  ;;  %v504_v49 = vld [vmem:[%s2786_s25 + $0x1488] sm:$0xff] }
  0x67   : > { %497 = vst [vmem:[%s2794_s26 + $0x568] sm:$0xff] %v496_v45  ;;  %499 = vst [vmem:[%s2794_s26 + $0x570] sm:$0xff] %v498_v46  ;;  %v506_v50 = vld [vmem:[%s2786_s25 + $0x1490] sm:$0xff]  ;;  %v508_v51 = vld [vmem:[%s2786_s25 + $0x1498] sm:$0xff] }
  0x68   : > { %501 = vst [vmem:[%s2794_s26 + $0x578] sm:$0xff] %v500_v47  ;;  %503 = vst [vmem:[%s2794_s26 + $0x580] sm:$0xff] %v502_v48  ;;  %v510_v52 = vld [vmem:[%s2786_s25 + $0x14a0] sm:$0xff]  ;;  %v512_v53 = vld [vmem:[%s2786_s25 + $0x14a8] sm:$0xff] }
  0x69   : > { %505 = vst [vmem:[%s2794_s26 + $0x588] sm:$0xff] %v504_v49  ;;  %507 = vst [vmem:[%s2794_s26 + $0x590] sm:$0xff] %v506_v50  ;;  %v514_v54 = vld [vmem:[%s2786_s25 + $0x14b0] sm:$0xff]  ;;  %v516_v55 = vld [vmem:[%s2786_s25 + $0x14b8] sm:$0xff] }
  0x6a   : > { %509 = vst [vmem:[%s2794_s26 + $0x598] sm:$0xff] %v508_v51  ;;  %511 = vst [vmem:[%s2794_s26 + $0x5a0] sm:$0xff] %v510_v52  ;;  %v518_v56 = vld [vmem:[%s2786_s25 + $0x14c0] sm:$0xff]  ;;  %v520_v57 = vld [vmem:[%s2786_s25 + $0x14c8] sm:$0xff] }
  0x6b   : > { %513 = vst [vmem:[%s2794_s26 + $0x5a8] sm:$0xff] %v512_v53  ;;  %515 = vst [vmem:[%s2794_s26 + $0x5b0] sm:$0xff] %v514_v54  ;;  %v522_v58 = vld [vmem:[%s2786_s25 + $0x14d0] sm:$0xff]  ;;  %v524_v59 = vld [vmem:[%s2786_s25 + $0x14d8] sm:$0xff] }
  0x6c   : > { %517 = vst [vmem:[%s2794_s26 + $0x5b8] sm:$0xff] %v516_v55  ;;  %519 = vst [vmem:[%s2794_s26 + $0x5c0] sm:$0xff] %v518_v56  ;;  %v526_v60 = vld [vmem:[%s2786_s25 + $0x14e0] sm:$0xff]  ;;  %v528_v61 = vld [vmem:[%s2786_s25 + $0x14e8] sm:$0xff] }
  0x6d   : > { %521 = vst [vmem:[%s2794_s26 + $0x5c8] sm:$0xff] %v520_v57  ;;  %523 = vst [vmem:[%s2794_s26 + $0x5d0] sm:$0xff] %v522_v58  ;;  %v530_v62 = vld [vmem:[%s2786_s25 + $0x14f0] sm:$0xff]  ;;  %v532_v63 = vld [vmem:[%s2786_s25 + $0x14f8] sm:$0xff] }
  0x6e   : > { %525 = vst [vmem:[%s2794_s26 + $0x5d8] sm:$0xff] %v524_v59  ;;  %527 = vst [vmem:[%s2794_s26 + $0x5e0] sm:$0xff] %v526_v60  ;;  %v534_v0 = vld [vmem:[%s2786_s25 + $0x1800] sm:$0xff]  ;;  %v536_v1 = vld [vmem:[%s2786_s25 + $0x1808] sm:$0xff] }
  0x6f   : > { %529 = vst [vmem:[%s2794_s26 + $0x5e8] sm:$0xff] %v528_v61  ;;  %531 = vst [vmem:[%s2794_s26 + $0x5f0] sm:$0xff] %v530_v62  ;;  %v538_v2 = vld [vmem:[%s2786_s25 + $0x1810] sm:$0xff]  ;;  %v540_v3 = vld [vmem:[%s2786_s25 + $0x1818] sm:$0xff] }
  0x70   : > { %533 = vst [vmem:[%s2794_s26 + $0x5f8] sm:$0xff] %v532_v63  ;;  %535 = vst [vmem:[%s2794_s26 + $0x600] sm:$0xff] %v534_v0  ;;  %v542_v4 = vld [vmem:[%s2786_s25 + $0x1820] sm:$0xff]  ;;  %v544_v5 = vld [vmem:[%s2786_s25 + $0x1828] sm:$0xff] }
  0x71   : > { %537 = vst [vmem:[%s2794_s26 + $0x608] sm:$0xff] %v536_v1  ;;  %539 = vst [vmem:[%s2794_s26 + $0x610] sm:$0xff] %v538_v2  ;;  %v546_v6 = vld [vmem:[%s2786_s25 + $0x1830] sm:$0xff]  ;;  %v548_v7 = vld [vmem:[%s2786_s25 + $0x1838] sm:$0xff] }
  0x72   : > { %541 = vst [vmem:[%s2794_s26 + $0x618] sm:$0xff] %v540_v3  ;;  %543 = vst [vmem:[%s2794_s26 + $0x620] sm:$0xff] %v542_v4  ;;  %v550_v8 = vld [vmem:[%s2786_s25 + $0x1840] sm:$0xff]  ;;  %v552_v9 = vld [vmem:[%s2786_s25 + $0x1848] sm:$0xff] }
  0x73   : > { %545 = vst [vmem:[%s2794_s26 + $0x628] sm:$0xff] %v544_v5  ;;  %547 = vst [vmem:[%s2794_s26 + $0x630] sm:$0xff] %v546_v6  ;;  %v554_v10 = vld [vmem:[%s2786_s25 + $0x1850] sm:$0xff]  ;;  %v556_v11 = vld [vmem:[%s2786_s25 + $0x1858] sm:$0xff] }
  0x74   : > { %549 = vst [vmem:[%s2794_s26 + $0x638] sm:$0xff] %v548_v7  ;;  %551 = vst [vmem:[%s2794_s26 + $0x640] sm:$0xff] %v550_v8  ;;  %v558_v12 = vld [vmem:[%s2786_s25 + $0x1860] sm:$0xff]  ;;  %v560_v13 = vld [vmem:[%s2786_s25 + $0x1868] sm:$0xff] }
  0x75   : > { %553 = vst [vmem:[%s2794_s26 + $0x648] sm:$0xff] %v552_v9  ;;  %555 = vst [vmem:[%s2794_s26 + $0x650] sm:$0xff] %v554_v10  ;;  %v562_v14 = vld [vmem:[%s2786_s25 + $0x1870] sm:$0xff]  ;;  %v564_v15 = vld [vmem:[%s2786_s25 + $0x1878] sm:$0xff] }
  0x76   : > { %557 = vst [vmem:[%s2794_s26 + $0x658] sm:$0xff] %v556_v11  ;;  %559 = vst [vmem:[%s2794_s26 + $0x660] sm:$0xff] %v558_v12  ;;  %v566_v16 = vld [vmem:[%s2786_s25 + $0x1880] sm:$0xff]  ;;  %v568_v17 = vld [vmem:[%s2786_s25 + $0x1888] sm:$0xff] }
  0x77   : > { %561 = vst [vmem:[%s2794_s26 + $0x668] sm:$0xff] %v560_v13  ;;  %563 = vst [vmem:[%s2794_s26 + $0x670] sm:$0xff] %v562_v14  ;;  %v570_v18 = vld [vmem:[%s2786_s25 + $0x1890] sm:$0xff]  ;;  %v572_v19 = vld [vmem:[%s2786_s25 + $0x1898] sm:$0xff] }
  0x78   : > { %565 = vst [vmem:[%s2794_s26 + $0x678] sm:$0xff] %v564_v15  ;;  %567 = vst [vmem:[%s2794_s26 + $0x680] sm:$0xff] %v566_v16  ;;  %v574_v20 = vld [vmem:[%s2786_s25 + $0x18a0] sm:$0xff]  ;;  %v576_v21 = vld [vmem:[%s2786_s25 + $0x18a8] sm:$0xff] }
  0x79   : > { %569 = vst [vmem:[%s2794_s26 + $0x688] sm:$0xff] %v568_v17  ;;  %571 = vst [vmem:[%s2794_s26 + $0x690] sm:$0xff] %v570_v18  ;;  %v578_v22 = vld [vmem:[%s2786_s25 + $0x18b0] sm:$0xff]  ;;  %v580_v23 = vld [vmem:[%s2786_s25 + $0x18b8] sm:$0xff] }
  0x7a   : > { %573 = vst [vmem:[%s2794_s26 + $0x698] sm:$0xff] %v572_v19  ;;  %575 = vst [vmem:[%s2794_s26 + $0x6a0] sm:$0xff] %v574_v20  ;;  %v582_v24 = vld [vmem:[%s2786_s25 + $0x18c0] sm:$0xff]  ;;  %v584_v25 = vld [vmem:[%s2786_s25 + $0x18c8] sm:$0xff] }
  0x7b   : > { %577 = vst [vmem:[%s2794_s26 + $0x6a8] sm:$0xff] %v576_v21  ;;  %579 = vst [vmem:[%s2794_s26 + $0x6b0] sm:$0xff] %v578_v22  ;;  %v586_v26 = vld [vmem:[%s2786_s25 + $0x18d0] sm:$0xff]  ;;  %v588_v27 = vld [vmem:[%s2786_s25 + $0x18d8] sm:$0xff] }
  0x7c   : > { %581 = vst [vmem:[%s2794_s26 + $0x6b8] sm:$0xff] %v580_v23  ;;  %583 = vst [vmem:[%s2794_s26 + $0x6c0] sm:$0xff] %v582_v24  ;;  %v590_v28 = vld [vmem:[%s2786_s25 + $0x18e0] sm:$0xff]  ;;  %v592_v29 = vld [vmem:[%s2786_s25 + $0x18e8] sm:$0xff] }
  0x7d   : > { %585 = vst [vmem:[%s2794_s26 + $0x6c8] sm:$0xff] %v584_v25  ;;  %587 = vst [vmem:[%s2794_s26 + $0x6d0] sm:$0xff] %v586_v26  ;;  %v594_v30 = vld [vmem:[%s2786_s25 + $0x18f0] sm:$0xff]  ;;  %v596_v31 = vld [vmem:[%s2786_s25 + $0x18f8] sm:$0xff] }
  0x7e   : > { %589 = vst [vmem:[%s2794_s26 + $0x6d8] sm:$0xff] %v588_v27  ;;  %591 = vst [vmem:[%s2794_s26 + $0x6e0] sm:$0xff] %v590_v28  ;;  %v598_v32 = vld [vmem:[%s2786_s25 + $0x1c00] sm:$0xff]  ;;  %v600_v33 = vld [vmem:[%s2786_s25 + $0x1c08] sm:$0xff] }
  0x7f   : > { %593 = vst [vmem:[%s2794_s26 + $0x6e8] sm:$0xff] %v592_v29  ;;  %595 = vst [vmem:[%s2794_s26 + $0x6f0] sm:$0xff] %v594_v30  ;;  %v602_v34 = vld [vmem:[%s2786_s25 + $0x1c10] sm:$0xff]  ;;  %v604_v35 = vld [vmem:[%s2786_s25 + $0x1c18] sm:$0xff] }
  0x80   : > { %597 = vst [vmem:[%s2794_s26 + $0x6f8] sm:$0xff] %v596_v31  ;;  %599 = vst [vmem:[%s2794_s26 + $0x700] sm:$0xff] %v598_v32  ;;  %v606_v36 = vld [vmem:[%s2786_s25 + $0x1c20] sm:$0xff]  ;;  %v608_v37 = vld [vmem:[%s2786_s25 + $0x1c28] sm:$0xff] }
  0x81   : > { %601 = vst [vmem:[%s2794_s26 + $0x708] sm:$0xff] %v600_v33  ;;  %603 = vst [vmem:[%s2794_s26 + $0x710] sm:$0xff] %v602_v34  ;;  %v610_v38 = vld [vmem:[%s2786_s25 + $0x1c30] sm:$0xff]  ;;  %v612_v39 = vld [vmem:[%s2786_s25 + $0x1c38] sm:$0xff] }
  0x82   : > { %605 = vst [vmem:[%s2794_s26 + $0x718] sm:$0xff] %v604_v35  ;;  %607 = vst [vmem:[%s2794_s26 + $0x720] sm:$0xff] %v606_v36  ;;  %v614_v40 = vld [vmem:[%s2786_s25 + $0x1c40] sm:$0xff]  ;;  %v616_v41 = vld [vmem:[%s2786_s25 + $0x1c48] sm:$0xff] }
  0x83   : > { %609 = vst [vmem:[%s2794_s26 + $0x728] sm:$0xff] %v608_v37  ;;  %611 = vst [vmem:[%s2794_s26 + $0x730] sm:$0xff] %v610_v38  ;;  %v618_v42 = vld [vmem:[%s2786_s25 + $0x1c50] sm:$0xff]  ;;  %v620_v43 = vld [vmem:[%s2786_s25 + $0x1c58] sm:$0xff] }
  0x84   : > { %613 = vst [vmem:[%s2794_s26 + $0x738] sm:$0xff] %v612_v39  ;;  %615 = vst [vmem:[%s2794_s26 + $0x740] sm:$0xff] %v614_v40  ;;  %v622_v44 = vld [vmem:[%s2786_s25 + $0x1c60] sm:$0xff]  ;;  %v624_v45 = vld [vmem:[%s2786_s25 + $0x1c68] sm:$0xff] }
  0x85   : > { %617 = vst [vmem:[%s2794_s26 + $0x748] sm:$0xff] %v616_v41  ;;  %619 = vst [vmem:[%s2794_s26 + $0x750] sm:$0xff] %v618_v42  ;;  %v626_v46 = vld [vmem:[%s2786_s25 + $0x1c70] sm:$0xff]  ;;  %v628_v47 = vld [vmem:[%s2786_s25 + $0x1c78] sm:$0xff] }
  0x86   : > { %621 = vst [vmem:[%s2794_s26 + $0x758] sm:$0xff] %v620_v43  ;;  %623 = vst [vmem:[%s2794_s26 + $0x760] sm:$0xff] %v622_v44  ;;  %v630_v48 = vld [vmem:[%s2786_s25 + $0x1c80] sm:$0xff]  ;;  %v632_v49 = vld [vmem:[%s2786_s25 + $0x1c88] sm:$0xff] }
  0x87   : > { %625 = vst [vmem:[%s2794_s26 + $0x768] sm:$0xff] %v624_v45  ;;  %627 = vst [vmem:[%s2794_s26 + $0x770] sm:$0xff] %v626_v46  ;;  %v634_v50 = vld [vmem:[%s2786_s25 + $0x1c90] sm:$0xff]  ;;  %v636_v51 = vld [vmem:[%s2786_s25 + $0x1c98] sm:$0xff] }
  0x88   : > { %629 = vst [vmem:[%s2794_s26 + $0x778] sm:$0xff] %v628_v47  ;;  %631 = vst [vmem:[%s2794_s26 + $0x780] sm:$0xff] %v630_v48  ;;  %v638_v52 = vld [vmem:[%s2786_s25 + $0x1ca0] sm:$0xff]  ;;  %v640_v53 = vld [vmem:[%s2786_s25 + $0x1ca8] sm:$0xff] }
  0x89   : > { %633 = vst [vmem:[%s2794_s26 + $0x788] sm:$0xff] %v632_v49  ;;  %635 = vst [vmem:[%s2794_s26 + $0x790] sm:$0xff] %v634_v50  ;;  %v642_v54 = vld [vmem:[%s2786_s25 + $0x1cb0] sm:$0xff]  ;;  %v644_v55 = vld [vmem:[%s2786_s25 + $0x1cb8] sm:$0xff] }
  0x8a   : > { %637 = vst [vmem:[%s2794_s26 + $0x798] sm:$0xff] %v636_v51  ;;  %639 = vst [vmem:[%s2794_s26 + $0x7a0] sm:$0xff] %v638_v52  ;;  %v646_v56 = vld [vmem:[%s2786_s25 + $0x1cc0] sm:$0xff]  ;;  %v648_v57 = vld [vmem:[%s2786_s25 + $0x1cc8] sm:$0xff] }
  0x8b   : > { %641 = vst [vmem:[%s2794_s26 + $0x7a8] sm:$0xff] %v640_v53  ;;  %643 = vst [vmem:[%s2794_s26 + $0x7b0] sm:$0xff] %v642_v54  ;;  %v650_v58 = vld [vmem:[%s2786_s25 + $0x1cd0] sm:$0xff]  ;;  %v652_v59 = vld [vmem:[%s2786_s25 + $0x1cd8] sm:$0xff] }
  0x8c   : > { %645 = vst [vmem:[%s2794_s26 + $0x7b8] sm:$0xff] %v644_v55  ;;  %647 = vst [vmem:[%s2794_s26 + $0x7c0] sm:$0xff] %v646_v56  ;;  %v654_v60 = vld [vmem:[%s2786_s25 + $0x1ce0] sm:$0xff]  ;;  %v656_v61 = vld [vmem:[%s2786_s25 + $0x1ce8] sm:$0xff] }
  0x8d   : > { %649 = vst [vmem:[%s2794_s26 + $0x7c8] sm:$0xff] %v648_v57  ;;  %651 = vst [vmem:[%s2794_s26 + $0x7d0] sm:$0xff] %v650_v58  ;;  %v658_v62 = vld [vmem:[%s2786_s25 + $0x1cf0] sm:$0xff]  ;;  %v660_v63 = vld [vmem:[%s2786_s25 + $0x1cf8] sm:$0xff] }
  0x8e   : > { %653 = vst [vmem:[%s2794_s26 + $0x7d8] sm:$0xff] %v652_v59  ;;  %655 = vst [vmem:[%s2794_s26 + $0x7e0] sm:$0xff] %v654_v60  ;;  %v662_v0 = vld [vmem:[%s2786_s25 + $0x2000] sm:$0xff]  ;;  %v664_v1 = vld [vmem:[%s2786_s25 + $0x2008] sm:$0xff] }
  0x8f   : > { %657 = vst [vmem:[%s2794_s26 + $0x7e8] sm:$0xff] %v656_v61  ;;  %659 = vst [vmem:[%s2794_s26 + $0x7f0] sm:$0xff] %v658_v62  ;;  %v666_v2 = vld [vmem:[%s2786_s25 + $0x2010] sm:$0xff]  ;;  %v668_v3 = vld [vmem:[%s2786_s25 + $0x2018] sm:$0xff] }
  0x90   : > { %661 = vst [vmem:[%s2794_s26 + $0x7f8] sm:$0xff] %v660_v63  ;;  %663 = vst [vmem:[%s2794_s26 + $0x800] sm:$0xff] %v662_v0  ;;  %v670_v4 = vld [vmem:[%s2786_s25 + $0x2020] sm:$0xff]  ;;  %v672_v5 = vld [vmem:[%s2786_s25 + $0x2028] sm:$0xff] }
  0x91   : > { %665 = vst [vmem:[%s2794_s26 + $0x808] sm:$0xff] %v664_v1  ;;  %667 = vst [vmem:[%s2794_s26 + $0x810] sm:$0xff] %v666_v2  ;;  %v674_v6 = vld [vmem:[%s2786_s25 + $0x2030] sm:$0xff]  ;;  %v676_v7 = vld [vmem:[%s2786_s25 + $0x2038] sm:$0xff] }
  0x92   : > { %669 = vst [vmem:[%s2794_s26 + $0x818] sm:$0xff] %v668_v3  ;;  %671 = vst [vmem:[%s2794_s26 + $0x820] sm:$0xff] %v670_v4  ;;  %v678_v8 = vld [vmem:[%s2786_s25 + $0x2040] sm:$0xff]  ;;  %v680_v9 = vld [vmem:[%s2786_s25 + $0x2048] sm:$0xff] }
  0x93   : > { %673 = vst [vmem:[%s2794_s26 + $0x828] sm:$0xff] %v672_v5  ;;  %675 = vst [vmem:[%s2794_s26 + $0x830] sm:$0xff] %v674_v6  ;;  %v682_v10 = vld [vmem:[%s2786_s25 + $0x2050] sm:$0xff]  ;;  %v684_v11 = vld [vmem:[%s2786_s25 + $0x2058] sm:$0xff] }
  0x94   : > { %677 = vst [vmem:[%s2794_s26 + $0x838] sm:$0xff] %v676_v7  ;;  %679 = vst [vmem:[%s2794_s26 + $0x840] sm:$0xff] %v678_v8  ;;  %v686_v12 = vld [vmem:[%s2786_s25 + $0x2060] sm:$0xff]  ;;  %v688_v13 = vld [vmem:[%s2786_s25 + $0x2068] sm:$0xff] }
  0x95   : > { %681 = vst [vmem:[%s2794_s26 + $0x848] sm:$0xff] %v680_v9  ;;  %683 = vst [vmem:[%s2794_s26 + $0x850] sm:$0xff] %v682_v10  ;;  %v690_v14 = vld [vmem:[%s2786_s25 + $0x2070] sm:$0xff]  ;;  %v692_v15 = vld [vmem:[%s2786_s25 + $0x2078] sm:$0xff] }
  0x96   : > { %685 = vst [vmem:[%s2794_s26 + $0x858] sm:$0xff] %v684_v11  ;;  %687 = vst [vmem:[%s2794_s26 + $0x860] sm:$0xff] %v686_v12  ;;  %v694_v16 = vld [vmem:[%s2786_s25 + $0x2080] sm:$0xff]  ;;  %v696_v17 = vld [vmem:[%s2786_s25 + $0x2088] sm:$0xff] }
  0x97   : > { %689 = vst [vmem:[%s2794_s26 + $0x868] sm:$0xff] %v688_v13  ;;  %691 = vst [vmem:[%s2794_s26 + $0x870] sm:$0xff] %v690_v14  ;;  %v698_v18 = vld [vmem:[%s2786_s25 + $0x2090] sm:$0xff]  ;;  %v700_v19 = vld [vmem:[%s2786_s25 + $0x2098] sm:$0xff] }
  0x98   : > { %693 = vst [vmem:[%s2794_s26 + $0x878] sm:$0xff] %v692_v15  ;;  %695 = vst [vmem:[%s2794_s26 + $0x880] sm:$0xff] %v694_v16  ;;  %v702_v20 = vld [vmem:[%s2786_s25 + $0x20a0] sm:$0xff]  ;;  %v704_v21 = vld [vmem:[%s2786_s25 + $0x20a8] sm:$0xff] }
  0x99   : > { %697 = vst [vmem:[%s2794_s26 + $0x888] sm:$0xff] %v696_v17  ;;  %699 = vst [vmem:[%s2794_s26 + $0x890] sm:$0xff] %v698_v18  ;;  %v706_v22 = vld [vmem:[%s2786_s25 + $0x20b0] sm:$0xff]  ;;  %v708_v23 = vld [vmem:[%s2786_s25 + $0x20b8] sm:$0xff] }
  0x9a   : > { %701 = vst [vmem:[%s2794_s26 + $0x898] sm:$0xff] %v700_v19  ;;  %703 = vst [vmem:[%s2794_s26 + $0x8a0] sm:$0xff] %v702_v20  ;;  %v710_v24 = vld [vmem:[%s2786_s25 + $0x20c0] sm:$0xff]  ;;  %v712_v25 = vld [vmem:[%s2786_s25 + $0x20c8] sm:$0xff] }
  0x9b   : > { %705 = vst [vmem:[%s2794_s26 + $0x8a8] sm:$0xff] %v704_v21  ;;  %707 = vst [vmem:[%s2794_s26 + $0x8b0] sm:$0xff] %v706_v22  ;;  %v714_v26 = vld [vmem:[%s2786_s25 + $0x20d0] sm:$0xff]  ;;  %v716_v27 = vld [vmem:[%s2786_s25 + $0x20d8] sm:$0xff] }
  0x9c   : > { %709 = vst [vmem:[%s2794_s26 + $0x8b8] sm:$0xff] %v708_v23  ;;  %711 = vst [vmem:[%s2794_s26 + $0x8c0] sm:$0xff] %v710_v24  ;;  %v718_v28 = vld [vmem:[%s2786_s25 + $0x20e0] sm:$0xff]  ;;  %v720_v29 = vld [vmem:[%s2786_s25 + $0x20e8] sm:$0xff] }
  0x9d   : > { %713 = vst [vmem:[%s2794_s26 + $0x8c8] sm:$0xff] %v712_v25  ;;  %715 = vst [vmem:[%s2794_s26 + $0x8d0] sm:$0xff] %v714_v26  ;;  %v722_v30 = vld [vmem:[%s2786_s25 + $0x20f0] sm:$0xff]  ;;  %v724_v31 = vld [vmem:[%s2786_s25 + $0x20f8] sm:$0xff] }
  0x9e   : > { %717 = vst [vmem:[%s2794_s26 + $0x8d8] sm:$0xff] %v716_v27  ;;  %719 = vst [vmem:[%s2794_s26 + $0x8e0] sm:$0xff] %v718_v28  ;;  %v726_v32 = vld [vmem:[%s2786_s25 + $0x2400] sm:$0xff]  ;;  %v728_v33 = vld [vmem:[%s2786_s25 + $0x2408] sm:$0xff] }
  0x9f   : > { %721 = vst [vmem:[%s2794_s26 + $0x8e8] sm:$0xff] %v720_v29  ;;  %723 = vst [vmem:[%s2794_s26 + $0x8f0] sm:$0xff] %v722_v30  ;;  %v730_v34 = vld [vmem:[%s2786_s25 + $0x2410] sm:$0xff]  ;;  %v732_v35 = vld [vmem:[%s2786_s25 + $0x2418] sm:$0xff] }
  0xa0   : > { %725 = vst [vmem:[%s2794_s26 + $0x8f8] sm:$0xff] %v724_v31  ;;  %727 = vst [vmem:[%s2794_s26 + $0x900] sm:$0xff] %v726_v32  ;;  %v734_v36 = vld [vmem:[%s2786_s25 + $0x2420] sm:$0xff]  ;;  %v736_v37 = vld [vmem:[%s2786_s25 + $0x2428] sm:$0xff] }
  0xa1   : > { %729 = vst [vmem:[%s2794_s26 + $0x908] sm:$0xff] %v728_v33  ;;  %731 = vst [vmem:[%s2794_s26 + $0x910] sm:$0xff] %v730_v34  ;;  %v738_v38 = vld [vmem:[%s2786_s25 + $0x2430] sm:$0xff]  ;;  %v740_v39 = vld [vmem:[%s2786_s25 + $0x2438] sm:$0xff] }
  0xa2   : > { %733 = vst [vmem:[%s2794_s26 + $0x918] sm:$0xff] %v732_v35  ;;  %735 = vst [vmem:[%s2794_s26 + $0x920] sm:$0xff] %v734_v36  ;;  %v742_v40 = vld [vmem:[%s2786_s25 + $0x2440] sm:$0xff]  ;;  %v744_v41 = vld [vmem:[%s2786_s25 + $0x2448] sm:$0xff] }
  0xa3   : > { %737 = vst [vmem:[%s2794_s26 + $0x928] sm:$0xff] %v736_v37  ;;  %739 = vst [vmem:[%s2794_s26 + $0x930] sm:$0xff] %v738_v38  ;;  %v746_v42 = vld [vmem:[%s2786_s25 + $0x2450] sm:$0xff]  ;;  %v748_v43 = vld [vmem:[%s2786_s25 + $0x2458] sm:$0xff] }
  0xa4   : > { %741 = vst [vmem:[%s2794_s26 + $0x938] sm:$0xff] %v740_v39  ;;  %743 = vst [vmem:[%s2794_s26 + $0x940] sm:$0xff] %v742_v40  ;;  %v750_v44 = vld [vmem:[%s2786_s25 + $0x2460] sm:$0xff]  ;;  %v752_v45 = vld [vmem:[%s2786_s25 + $0x2468] sm:$0xff] }
  0xa5   : > { %745 = vst [vmem:[%s2794_s26 + $0x948] sm:$0xff] %v744_v41  ;;  %747 = vst [vmem:[%s2794_s26 + $0x950] sm:$0xff] %v746_v42  ;;  %v754_v46 = vld [vmem:[%s2786_s25 + $0x2470] sm:$0xff]  ;;  %v756_v47 = vld [vmem:[%s2786_s25 + $0x2478] sm:$0xff] }
  0xa6   : > { %749 = vst [vmem:[%s2794_s26 + $0x958] sm:$0xff] %v748_v43  ;;  %751 = vst [vmem:[%s2794_s26 + $0x960] sm:$0xff] %v750_v44  ;;  %v758_v48 = vld [vmem:[%s2786_s25 + $0x2480] sm:$0xff]  ;;  %v760_v49 = vld [vmem:[%s2786_s25 + $0x2488] sm:$0xff] }
  0xa7   : > { %753 = vst [vmem:[%s2794_s26 + $0x968] sm:$0xff] %v752_v45  ;;  %755 = vst [vmem:[%s2794_s26 + $0x970] sm:$0xff] %v754_v46  ;;  %v762_v50 = vld [vmem:[%s2786_s25 + $0x2490] sm:$0xff]  ;;  %v764_v51 = vld [vmem:[%s2786_s25 + $0x2498] sm:$0xff] }
  0xa8   : > { %757 = vst [vmem:[%s2794_s26 + $0x978] sm:$0xff] %v756_v47  ;;  %759 = vst [vmem:[%s2794_s26 + $0x980] sm:$0xff] %v758_v48  ;;  %v766_v52 = vld [vmem:[%s2786_s25 + $0x24a0] sm:$0xff]  ;;  %v768_v53 = vld [vmem:[%s2786_s25 + $0x24a8] sm:$0xff] }
  0xa9   : > { %761 = vst [vmem:[%s2794_s26 + $0x988] sm:$0xff] %v760_v49  ;;  %763 = vst [vmem:[%s2794_s26 + $0x990] sm:$0xff] %v762_v50  ;;  %v770_v54 = vld [vmem:[%s2786_s25 + $0x24b0] sm:$0xff]  ;;  %v772_v55 = vld [vmem:[%s2786_s25 + $0x24b8] sm:$0xff] }
  0xaa   : > { %765 = vst [vmem:[%s2794_s26 + $0x998] sm:$0xff] %v764_v51  ;;  %767 = vst [vmem:[%s2794_s26 + $0x9a0] sm:$0xff] %v766_v52  ;;  %v774_v56 = vld [vmem:[%s2786_s25 + $0x24c0] sm:$0xff]  ;;  %v776_v57 = vld [vmem:[%s2786_s25 + $0x24c8] sm:$0xff] }
  0xab   : > { %769 = vst [vmem:[%s2794_s26 + $0x9a8] sm:$0xff] %v768_v53  ;;  %771 = vst [vmem:[%s2794_s26 + $0x9b0] sm:$0xff] %v770_v54  ;;  %v778_v58 = vld [vmem:[%s2786_s25 + $0x24d0] sm:$0xff]  ;;  %v780_v59 = vld [vmem:[%s2786_s25 + $0x24d8] sm:$0xff] }
  0xac   : > { %773 = vst [vmem:[%s2794_s26 + $0x9b8] sm:$0xff] %v772_v55  ;;  %775 = vst [vmem:[%s2794_s26 + $0x9c0] sm:$0xff] %v774_v56  ;;  %v782_v60 = vld [vmem:[%s2786_s25 + $0x24e0] sm:$0xff]  ;;  %v784_v61 = vld [vmem:[%s2786_s25 + $0x24e8] sm:$0xff] }
  0xad   : > { %777 = vst [vmem:[%s2794_s26 + $0x9c8] sm:$0xff] %v776_v57  ;;  %779 = vst [vmem:[%s2794_s26 + $0x9d0] sm:$0xff] %v778_v58  ;;  %v786_v62 = vld [vmem:[%s2786_s25 + $0x24f0] sm:$0xff]  ;;  %v788_v63 = vld [vmem:[%s2786_s25 + $0x24f8] sm:$0xff] }
  0xae   : > { %781 = vst [vmem:[%s2794_s26 + $0x9d8] sm:$0xff] %v780_v59  ;;  %783 = vst [vmem:[%s2794_s26 + $0x9e0] sm:$0xff] %v782_v60  ;;  %v790_v0 = vld [vmem:[%s2786_s25 + $0x2800] sm:$0xff]  ;;  %v792_v1 = vld [vmem:[%s2786_s25 + $0x2808] sm:$0xff] }
  0xaf   : > { %785 = vst [vmem:[%s2794_s26 + $0x9e8] sm:$0xff] %v784_v61  ;;  %787 = vst [vmem:[%s2794_s26 + $0x9f0] sm:$0xff] %v786_v62  ;;  %v794_v2 = vld [vmem:[%s2786_s25 + $0x2810] sm:$0xff]  ;;  %v796_v3 = vld [vmem:[%s2786_s25 + $0x2818] sm:$0xff] }
  0xb0   : > { %789 = vst [vmem:[%s2794_s26 + $0x9f8] sm:$0xff] %v788_v63  ;;  %791 = vst [vmem:[%s2794_s26 + $0xa00] sm:$0xff] %v790_v0  ;;  %v798_v4 = vld [vmem:[%s2786_s25 + $0x2820] sm:$0xff]  ;;  %v800_v5 = vld [vmem:[%s2786_s25 + $0x2828] sm:$0xff] }
  0xb1   : > { %793 = vst [vmem:[%s2794_s26 + $0xa08] sm:$0xff] %v792_v1  ;;  %795 = vst [vmem:[%s2794_s26 + $0xa10] sm:$0xff] %v794_v2  ;;  %v802_v6 = vld [vmem:[%s2786_s25 + $0x2830] sm:$0xff]  ;;  %v804_v7 = vld [vmem:[%s2786_s25 + $0x2838] sm:$0xff] }
  0xb2   : > { %797 = vst [vmem:[%s2794_s26 + $0xa18] sm:$0xff] %v796_v3  ;;  %799 = vst [vmem:[%s2794_s26 + $0xa20] sm:$0xff] %v798_v4  ;;  %v806_v8 = vld [vmem:[%s2786_s25 + $0x2840] sm:$0xff]  ;;  %v808_v9 = vld [vmem:[%s2786_s25 + $0x2848] sm:$0xff] }
  0xb3   : > { %801 = vst [vmem:[%s2794_s26 + $0xa28] sm:$0xff] %v800_v5  ;;  %803 = vst [vmem:[%s2794_s26 + $0xa30] sm:$0xff] %v802_v6  ;;  %v810_v10 = vld [vmem:[%s2786_s25 + $0x2850] sm:$0xff]  ;;  %v812_v11 = vld [vmem:[%s2786_s25 + $0x2858] sm:$0xff] }
  0xb4   : > { %805 = vst [vmem:[%s2794_s26 + $0xa38] sm:$0xff] %v804_v7  ;;  %807 = vst [vmem:[%s2794_s26 + $0xa40] sm:$0xff] %v806_v8  ;;  %v814_v12 = vld [vmem:[%s2786_s25 + $0x2860] sm:$0xff]  ;;  %v816_v13 = vld [vmem:[%s2786_s25 + $0x2868] sm:$0xff] }
  0xb5   : > { %809 = vst [vmem:[%s2794_s26 + $0xa48] sm:$0xff] %v808_v9  ;;  %811 = vst [vmem:[%s2794_s26 + $0xa50] sm:$0xff] %v810_v10  ;;  %v818_v14 = vld [vmem:[%s2786_s25 + $0x2870] sm:$0xff]  ;;  %v820_v15 = vld [vmem:[%s2786_s25 + $0x2878] sm:$0xff] }
  0xb6   : > { %813 = vst [vmem:[%s2794_s26 + $0xa58] sm:$0xff] %v812_v11  ;;  %815 = vst [vmem:[%s2794_s26 + $0xa60] sm:$0xff] %v814_v12  ;;  %v822_v16 = vld [vmem:[%s2786_s25 + $0x2880] sm:$0xff]  ;;  %v824_v17 = vld [vmem:[%s2786_s25 + $0x2888] sm:$0xff] }
  0xb7   : > { %817 = vst [vmem:[%s2794_s26 + $0xa68] sm:$0xff] %v816_v13  ;;  %819 = vst [vmem:[%s2794_s26 + $0xa70] sm:$0xff] %v818_v14  ;;  %v826_v18 = vld [vmem:[%s2786_s25 + $0x2890] sm:$0xff]  ;;  %v828_v19 = vld [vmem:[%s2786_s25 + $0x2898] sm:$0xff] }
  0xb8   : > { %821 = vst [vmem:[%s2794_s26 + $0xa78] sm:$0xff] %v820_v15  ;;  %823 = vst [vmem:[%s2794_s26 + $0xa80] sm:$0xff] %v822_v16  ;;  %v830_v20 = vld [vmem:[%s2786_s25 + $0x28a0] sm:$0xff]  ;;  %v832_v21 = vld [vmem:[%s2786_s25 + $0x28a8] sm:$0xff] }
  0xb9   : > { %825 = vst [vmem:[%s2794_s26 + $0xa88] sm:$0xff] %v824_v17  ;;  %827 = vst [vmem:[%s2794_s26 + $0xa90] sm:$0xff] %v826_v18  ;;  %v834_v22 = vld [vmem:[%s2786_s25 + $0x28b0] sm:$0xff]  ;;  %v836_v23 = vld [vmem:[%s2786_s25 + $0x28b8] sm:$0xff] }
  0xba   : > { %829 = vst [vmem:[%s2794_s26 + $0xa98] sm:$0xff] %v828_v19  ;;  %831 = vst [vmem:[%s2794_s26 + $0xaa0] sm:$0xff] %v830_v20  ;;  %v838_v24 = vld [vmem:[%s2786_s25 + $0x28c0] sm:$0xff]  ;;  %v840_v25 = vld [vmem:[%s2786_s25 + $0x28c8] sm:$0xff] }
  0xbb   : > { %833 = vst [vmem:[%s2794_s26 + $0xaa8] sm:$0xff] %v832_v21  ;;  %835 = vst [vmem:[%s2794_s26 + $0xab0] sm:$0xff] %v834_v22  ;;  %v842_v26 = vld [vmem:[%s2786_s25 + $0x28d0] sm:$0xff]  ;;  %v844_v27 = vld [vmem:[%s2786_s25 + $0x28d8] sm:$0xff] }
  0xbc   : > { %837 = vst [vmem:[%s2794_s26 + $0xab8] sm:$0xff] %v836_v23  ;;  %839 = vst [vmem:[%s2794_s26 + $0xac0] sm:$0xff] %v838_v24  ;;  %v846_v28 = vld [vmem:[%s2786_s25 + $0x28e0] sm:$0xff]  ;;  %v848_v29 = vld [vmem:[%s2786_s25 + $0x28e8] sm:$0xff] }
  0xbd   : > { %841 = vst [vmem:[%s2794_s26 + $0xac8] sm:$0xff] %v840_v25  ;;  %843 = vst [vmem:[%s2794_s26 + $0xad0] sm:$0xff] %v842_v26  ;;  %v850_v30 = vld [vmem:[%s2786_s25 + $0x28f0] sm:$0xff]  ;;  %v852_v31 = vld [vmem:[%s2786_s25 + $0x28f8] sm:$0xff] }
  0xbe   : > { %845 = vst [vmem:[%s2794_s26 + $0xad8] sm:$0xff] %v844_v27  ;;  %847 = vst [vmem:[%s2794_s26 + $0xae0] sm:$0xff] %v846_v28  ;;  %v854_v32 = vld [vmem:[%s2786_s25 + $0x2c00] sm:$0xff]  ;;  %v856_v33 = vld [vmem:[%s2786_s25 + $0x2c08] sm:$0xff] }
  0xbf   : > { %849 = vst [vmem:[%s2794_s26 + $0xae8] sm:$0xff] %v848_v29  ;;  %851 = vst [vmem:[%s2794_s26 + $0xaf0] sm:$0xff] %v850_v30  ;;  %v858_v34 = vld [vmem:[%s2786_s25 + $0x2c10] sm:$0xff]  ;;  %v860_v35 = vld [vmem:[%s2786_s25 + $0x2c18] sm:$0xff] }
  0xc0   : > { %853 = vst [vmem:[%s2794_s26 + $0xaf8] sm:$0xff] %v852_v31  ;;  %855 = vst [vmem:[%s2794_s26 + $0xb00] sm:$0xff] %v854_v32  ;;  %v862_v36 = vld [vmem:[%s2786_s25 + $0x2c20] sm:$0xff]  ;;  %v864_v37 = vld [vmem:[%s2786_s25 + $0x2c28] sm:$0xff] }
  0xc1   : > { %857 = vst [vmem:[%s2794_s26 + $0xb08] sm:$0xff] %v856_v33  ;;  %859 = vst [vmem:[%s2794_s26 + $0xb10] sm:$0xff] %v858_v34  ;;  %v866_v38 = vld [vmem:[%s2786_s25 + $0x2c30] sm:$0xff]  ;;  %v868_v39 = vld [vmem:[%s2786_s25 + $0x2c38] sm:$0xff] }
  0xc2   : > { %861 = vst [vmem:[%s2794_s26 + $0xb18] sm:$0xff] %v860_v35  ;;  %863 = vst [vmem:[%s2794_s26 + $0xb20] sm:$0xff] %v862_v36  ;;  %v870_v40 = vld [vmem:[%s2786_s25 + $0x2c40] sm:$0xff]  ;;  %v872_v41 = vld [vmem:[%s2786_s25 + $0x2c48] sm:$0xff] }
  0xc3   : > { %865 = vst [vmem:[%s2794_s26 + $0xb28] sm:$0xff] %v864_v37  ;;  %867 = vst [vmem:[%s2794_s26 + $0xb30] sm:$0xff] %v866_v38  ;;  %v874_v42 = vld [vmem:[%s2786_s25 + $0x2c50] sm:$0xff]  ;;  %v876_v43 = vld [vmem:[%s2786_s25 + $0x2c58] sm:$0xff] }
  0xc4   : > { %869 = vst [vmem:[%s2794_s26 + $0xb38] sm:$0xff] %v868_v39  ;;  %871 = vst [vmem:[%s2794_s26 + $0xb40] sm:$0xff] %v870_v40  ;;  %v878_v44 = vld [vmem:[%s2786_s25 + $0x2c60] sm:$0xff]  ;;  %v880_v45 = vld [vmem:[%s2786_s25 + $0x2c68] sm:$0xff] }
  0xc5   : > { %873 = vst [vmem:[%s2794_s26 + $0xb48] sm:$0xff] %v872_v41  ;;  %875 = vst [vmem:[%s2794_s26 + $0xb50] sm:$0xff] %v874_v42  ;;  %v882_v46 = vld [vmem:[%s2786_s25 + $0x2c70] sm:$0xff]  ;;  %v884_v47 = vld [vmem:[%s2786_s25 + $0x2c78] sm:$0xff] }
  0xc6   : > { %877 = vst [vmem:[%s2794_s26 + $0xb58] sm:$0xff] %v876_v43  ;;  %879 = vst [vmem:[%s2794_s26 + $0xb60] sm:$0xff] %v878_v44  ;;  %v886_v48 = vld [vmem:[%s2786_s25 + $0x2c80] sm:$0xff]  ;;  %v888_v49 = vld [vmem:[%s2786_s25 + $0x2c88] sm:$0xff] }
  0xc7   : > { %881 = vst [vmem:[%s2794_s26 + $0xb68] sm:$0xff] %v880_v45  ;;  %883 = vst [vmem:[%s2794_s26 + $0xb70] sm:$0xff] %v882_v46  ;;  %v890_v50 = vld [vmem:[%s2786_s25 + $0x2c90] sm:$0xff]  ;;  %v892_v51 = vld [vmem:[%s2786_s25 + $0x2c98] sm:$0xff] }
  0xc8   : > { %885 = vst [vmem:[%s2794_s26 + $0xb78] sm:$0xff] %v884_v47  ;;  %887 = vst [vmem:[%s2794_s26 + $0xb80] sm:$0xff] %v886_v48  ;;  %v894_v52 = vld [vmem:[%s2786_s25 + $0x2ca0] sm:$0xff]  ;;  %v896_v53 = vld [vmem:[%s2786_s25 + $0x2ca8] sm:$0xff] }
  0xc9   : > { %889 = vst [vmem:[%s2794_s26 + $0xb88] sm:$0xff] %v888_v49  ;;  %891 = vst [vmem:[%s2794_s26 + $0xb90] sm:$0xff] %v890_v50  ;;  %v898_v54 = vld [vmem:[%s2786_s25 + $0x2cb0] sm:$0xff]  ;;  %v900_v55 = vld [vmem:[%s2786_s25 + $0x2cb8] sm:$0xff] }
  0xca   : > { %893 = vst [vmem:[%s2794_s26 + $0xb98] sm:$0xff] %v892_v51  ;;  %895 = vst [vmem:[%s2794_s26 + $0xba0] sm:$0xff] %v894_v52  ;;  %v902_v56 = vld [vmem:[%s2786_s25 + $0x2cc0] sm:$0xff]  ;;  %v904_v57 = vld [vmem:[%s2786_s25 + $0x2cc8] sm:$0xff] }
  0xcb   : > { %897 = vst [vmem:[%s2794_s26 + $0xba8] sm:$0xff] %v896_v53  ;;  %899 = vst [vmem:[%s2794_s26 + $0xbb0] sm:$0xff] %v898_v54  ;;  %v906_v58 = vld [vmem:[%s2786_s25 + $0x2cd0] sm:$0xff]  ;;  %v908_v59 = vld [vmem:[%s2786_s25 + $0x2cd8] sm:$0xff] }
  0xcc   : > { %901 = vst [vmem:[%s2794_s26 + $0xbb8] sm:$0xff] %v900_v55  ;;  %903 = vst [vmem:[%s2794_s26 + $0xbc0] sm:$0xff] %v902_v56  ;;  %v910_v60 = vld [vmem:[%s2786_s25 + $0x2ce0] sm:$0xff]  ;;  %v912_v61 = vld [vmem:[%s2786_s25 + $0x2ce8] sm:$0xff] }
  0xcd   : > { %905 = vst [vmem:[%s2794_s26 + $0xbc8] sm:$0xff] %v904_v57  ;;  %907 = vst [vmem:[%s2794_s26 + $0xbd0] sm:$0xff] %v906_v58  ;;  %v914_v62 = vld [vmem:[%s2786_s25 + $0x2cf0] sm:$0xff]  ;;  %v916_v63 = vld [vmem:[%s2786_s25 + $0x2cf8] sm:$0xff] }
  0xce   : > { %909 = vst [vmem:[%s2794_s26 + $0xbd8] sm:$0xff] %v908_v59  ;;  %911 = vst [vmem:[%s2794_s26 + $0xbe0] sm:$0xff] %v910_v60 }
  0xcf   : > { %913 = vst [vmem:[%s2794_s26 + $0xbe8] sm:$0xff] %v912_v61  ;;  %915 = vst [vmem:[%s2794_s26 + $0xbf0] sm:$0xff] %v914_v62 }
  0xd0   : > { %917 = vst [vmem:[%s2794_s26 + $0xbf8] sm:$0xff] %v916_v63 }
  0xd1 PF: > { %p2654_p5 = scmp.ge.s32.totalorder %s2728_s14, 1  ;;  %p922_p6 = scmp.lt.s32.totalorder %s2728_s14, 5 }
  0xd3   : > { %p923_p7 = pnand %p2654_p5, %p922_p6 }
  0xd4   : > { %s929_s27 = sand.u32 (!%p923_p7), 1, %s2720_s12   ;;  %s2655_s9 = sshll.u32 (!%p923_p7), %s2648_s15, 5 }
  0xd5   : > { %926 = sbr.rel (%p923_p7) target bundleno = 629 (0x275), region = 51  ;;  %p954_p8 = scmp.lt.s32.totalorder (!%p923_p7), %s2655_s9, 127 }
  0xd6   : > { %s2677_s30 = smul.u32 (!%p923_p7), 3072, %s929_s27 }
  0xd8   : > { %s3566_s4 = scalar_lea.vmem (!%p923_p7), [#allocation2], %s2677_s30 }
  0xda   : > { %v1344_v0 = vld [vmem:[%s4092_s1] sm:$0xff]  ;;  %v2730_v1 = vmov 0.0   ;;  %v2731_v2 = vmov 0   ;;  %v1313_v3 = vld [vmem:[%s3566_s4 + $0xb08] sm:$0xff]  ;;  %v1315_v4 = vld [vmem:[%s3566_s4 + $0xb18] sm:$0xff]  ;;  %vm1350_vm0 = vcmask 785408  }
  0xdb   : > { %1418 = vmatprep.mubr.f32.mxu0 %v2730_v1  ;;  %1489 = vmatprep.mubr.f32.mxu1 %v2730_v1  ;;  %v1312_v5 = vld [vmem:[%s3566_s4 + $0xb00] sm:$0xff]  ;;  %v1314_v6 = vld [vmem:[%s3566_s4 + $0xb10] sm:$0xff]  ;;  %v1281_v7 = vld [vmem:[%s3566_s4 + $0xa08] sm:$0xff]  ;;  %s4099_s9 = smov (!%p954_p8, %s2655_s9), 127 }
  0xdc   : > { %2704 = vset.pattern.permute.xlu0 %v2731_v2  ;;  %1362 = vmatprep.subr.mxu0 %v1313_v3  ;;  %v1283_v8 = vld [vmem:[%s3566_s4 + $0xa18] sm:$0xff]  ;;  %v1280_v9 = vld [vmem:[%s3566_s4 + $0xa00] sm:$0xff]  ;;  %v1282_v10 = vld [vmem:[%s3566_s4 + $0xa10] sm:$0xff]  ;;  %s2656_s10 = sshll.u32 %s4099_s9, 3 }
  0xdd   : > { %1347 = vperm.xlu0 %2704, %v1344_v0   ;;  %1433 = vmatprep.subr.mxu1 %v1315_v4  ;;  %v1249_v11 = vld [vmem:[%s3566_s4 + $0x908] sm:$0xff]  ;;  %v1251_v12 = vld [vmem:[%s3566_s4 + $0x918] sm:$0xff]  ;;  %v1248_v13 = vld [vmem:[%s3566_s4 + $0x900] sm:$0xff]  ;;  %s4019_s14 = scalar_lea.vmem %s4094_s3, %s2656_s10 }
  0xde   : > { %1363 = vmatpush1.msra.mxu0 %v1312_v5  ;;  %1434 = vmatpush1.msra.mxu1 %v1314_v6  ;;  %v1250_v14 = vld [vmem:[%s3566_s4 + $0x910] sm:$0xff]  ;;  %v1217_v15 = vld [vmem:[%s3566_s4 + $0x808] sm:$0xff]  ;;  %v1219_v16 = vld [vmem:[%s3566_s4 + $0x818] sm:$0xff] }
  0xdf   : > { %1364 = vmatprep.subr.mxu0 %v1281_v7  ;;  %1435 = vmatprep.subr.mxu1 %v1283_v8  ;;  %v1216_v17 = vld [vmem:[%s3566_s4 + $0x800] sm:$0xff]  ;;  %v1218_v18 = vld [vmem:[%s3566_s4 + $0x810] sm:$0xff]  ;;  %v1185_v19 = vld [vmem:[%s3566_s4 + $0x708] sm:$0xff] }
  0xe0   : > { %1365 = vmatpush1.msra.mxu0 %v1280_v9  ;;  %1436 = vmatpush1.msra.mxu1 %v1282_v10  ;;  %v1187_v20 = vld [vmem:[%s3566_s4 + $0x718] sm:$0xff]  ;;  %v1184_v21 = vld [vmem:[%s3566_s4 + $0x700] sm:$0xff]  ;;  %v1186_v22 = vld [vmem:[%s3566_s4 + $0x710] sm:$0xff] }
  0xe1   : > { %1366 = vmatprep.subr.mxu0 %v1249_v11  ;;  %1437 = vmatprep.subr.mxu1 %v1251_v12  ;;  %v1153_v23 = vld [vmem:[%s3566_s4 + $0x608] sm:$0xff]  ;;  %v1155_v24 = vld [vmem:[%s3566_s4 + $0x618] sm:$0xff]  ;;  %v1152_v25 = vld [vmem:[%s3566_s4 + $0x600] sm:$0xff] }
  0xe2   : > { %1367 = vmatpush1.msra.mxu0 %v1248_v13  ;;  %1438 = vmatpush1.msra.mxu1 %v1250_v14  ;;  %v1154_v26 = vld [vmem:[%s3566_s4 + $0x610] sm:$0xff]  ;;  %v1121_v27 = vld [vmem:[%s3566_s4 + $0x508] sm:$0xff]  ;;  %v1123_v28 = vld [vmem:[%s3566_s4 + $0x518] sm:$0xff] }
  0xe3   : > { %1368 = vmatprep.subr.mxu0 %v1217_v15  ;;  %1439 = vmatprep.subr.mxu1 %v1219_v16  ;;  %v1120_v29 = vld [vmem:[%s3566_s4 + $0x500] sm:$0xff]  ;;  %v1122_v30 = vld [vmem:[%s3566_s4 + $0x510] sm:$0xff]  ;;  %v1089_v31 = vld [vmem:[%s3566_s4 + $0x408] sm:$0xff] }
  0xe4   : > { %1369 = vmatpush1.msra.mxu0 %v1216_v17  ;;  %1440 = vmatpush1.msra.mxu1 %v1218_v18  ;;  %v1091_v32 = vld [vmem:[%s3566_s4 + $0x418] sm:$0xff]  ;;  %v1088_v33 = vld [vmem:[%s3566_s4 + $0x400] sm:$0xff]  ;;  %v1090_v34 = vld [vmem:[%s3566_s4 + $0x410] sm:$0xff] }
  0xe5   : > { %1370 = vmatprep.subr.mxu0 %v1185_v19  ;;  %1441 = vmatprep.subr.mxu1 %v1187_v20  ;;  %v1057_v35 = vld [vmem:[%s3566_s4 + $0x308] sm:$0xff]  ;;  %v1059_v36 = vld [vmem:[%s3566_s4 + $0x318] sm:$0xff]  ;;  %v1056_v37 = vld [vmem:[%s3566_s4 + $0x300] sm:$0xff] }
  0xe6   : > { %1371 = vmatpush1.msra.mxu0 %v1184_v21  ;;  %1442 = vmatpush1.msra.mxu1 %v1186_v22  ;;  %v1058_v38 = vld [vmem:[%s3566_s4 + $0x310] sm:$0xff]  ;;  %v1025_v39 = vld [vmem:[%s3566_s4 + $0x208] sm:$0xff]  ;;  %v1027_v40 = vld [vmem:[%s3566_s4 + $0x218] sm:$0xff] }
  0xe7   : > { %1372 = vmatprep.subr.mxu0 %v1153_v23  ;;  %1443 = vmatprep.subr.mxu1 %v1155_v24  ;;  %v1024_v41 = vld [vmem:[%s3566_s4 + $0x200] sm:$0xff]  ;;  %v1026_v42 = vld [vmem:[%s3566_s4 + $0x210] sm:$0xff]  ;;  %v993_v43 = vld [vmem:[%s3566_s4 + $0x108] sm:$0xff] }
  0xe8   : > { %1373 = vmatpush1.msra.mxu0 %v1152_v25  ;;  %1444 = vmatpush1.msra.mxu1 %v1154_v26  ;;  %v995_v44 = vld [vmem:[%s3566_s4 + $0x118] sm:$0xff]  ;;  %v992_v45 = vld [vmem:[%s3566_s4 + $0x100] sm:$0xff]  ;;  %v994_v46 = vld [vmem:[%s3566_s4 + $0x110] sm:$0xff] }
  0xe9   : > { %1374 = vmatprep.subr.mxu0 %v1121_v27  ;;  %1445 = vmatprep.subr.mxu1 %v1123_v28  ;;  %v961_v47 = vld [vmem:[%s3566_s4 + $0x8] sm:$0xff]  ;;  %v963_v48 = vld [vmem:[%s3566_s4 + $0x18] sm:$0xff]  ;;  %v960_v49 = vld [vmem:[%s3566_s4] sm:$0xff] }
  0xea   : > { %1375 = vmatpush1.msra.mxu0 %v1120_v29  ;;  %1446 = vmatpush1.msra.mxu1 %v1122_v30  ;;  %v962_v50 = vld [vmem:[%s3566_s4 + $0x10] sm:$0xff]  ;;  %v3619_v51 = vld [vmem:[%s4091_s0] sm:$0xff]  ;;  %v1317_v52 = vld [vmem:[%s3566_s4 + $0xb28] sm:$0xff] }
  0xeb   : > { %1376 = vmatprep.subr.mxu0 %v1089_v31  ;;  %1447 = vmatprep.subr.mxu1 %v1091_v32  ;;  %v1319_v53 = vld [vmem:[%s3566_s4 + $0xb38] sm:$0xff]  ;;  %v1316_v54 = vld [vmem:[%s3566_s4 + $0xb20] sm:$0xff]  ;;  %v1318_v55 = vld [vmem:[%s3566_s4 + $0xb30] sm:$0xff] }
  0xec   : > { %1377 = vmatpush1.msra.mxu0 %v1088_v33  ;;  %1448 = vmatpush1.msra.mxu1 %v1090_v34  ;;  %v1285_v56 = vld [vmem:[%s3566_s4 + $0xa28] sm:$0xff]  ;;  %v1287_v57 = vld [vmem:[%s3566_s4 + $0xa38] sm:$0xff]  ;;  %v1284_v58 = vld [vmem:[%s3566_s4 + $0xa20] sm:$0xff] }
  0xed   : > { %1378 = vmatprep.subr.mxu0 %v1057_v35  ;;  %1449 = vmatprep.subr.mxu1 %v1059_v36  ;;  %v1286_v59 = vld [vmem:[%s3566_s4 + $0xa30] sm:$0xff]  ;;  %v1253_v60 = vld [vmem:[%s3566_s4 + $0x928] sm:$0xff]  ;;  %v1255_v61 = vld [vmem:[%s3566_s4 + $0x938] sm:$0xff] }
  0xee   : > { %1379 = vmatpush1.msra.mxu0 %v1056_v37  ;;  %1450 = vmatpush1.msra.mxu1 %v1058_v38  ;;  %v1252_v62 = vld [vmem:[%s3566_s4 + $0x920] sm:$0xff]  ;;  %v1254_v63 = vld [vmem:[%s3566_s4 + $0x930] sm:$0xff]  ;;  %v1221_v0 = vld [vmem:[%s3566_s4 + $0x828] sm:$0xff] }
  0xef   : > { %1380 = vmatprep.subr.mxu0 %v1025_v39  ;;  %1451 = vmatprep.subr.mxu1 %v1027_v40  ;;  %v1223_v2 = vld [vmem:[%s3566_s4 + $0x838] sm:$0xff]  ;;  %v1220_v3 = vld [vmem:[%s3566_s4 + $0x820] sm:$0xff]  ;;  %v1222_v4 = vld [vmem:[%s3566_s4 + $0x830] sm:$0xff] }
  0xf0   : > { %1381 = vmatpush1.msra.mxu0 %v1024_v41  ;;  %1452 = vmatpush1.msra.mxu1 %v1026_v42  ;;  %v1189_v5 = vld [vmem:[%s3566_s4 + $0x728] sm:$0xff]  ;;  %v1191_v6 = vld [vmem:[%s3566_s4 + $0x738] sm:$0xff]  ;;  %v1188_v7 = vld [vmem:[%s3566_s4 + $0x720] sm:$0xff] }
  0xf1   : > { %1382 = vmatprep.subr.mxu0 %v993_v43  ;;  %1453 = vmatprep.subr.mxu1 %v995_v44  ;;  %v1190_v8 = vld [vmem:[%s3566_s4 + $0x730] sm:$0xff]  ;;  %v1157_v9 = vld [vmem:[%s3566_s4 + $0x628] sm:$0xff]  ;;  %v1159_v10 = vld [vmem:[%s3566_s4 + $0x638] sm:$0xff] }
  0xf2   : > { %1383 = vmatpush1.msra.mxu0 %v992_v45  ;;  %1454 = vmatpush1.msra.mxu1 %v994_v46  ;;  %v1156_v11 = vld [vmem:[%s3566_s4 + $0x620] sm:$0xff]  ;;  %v1158_v12 = vld [vmem:[%s3566_s4 + $0x630] sm:$0xff]  ;;  %v1125_v13 = vld [vmem:[%s3566_s4 + $0x528] sm:$0xff] }
  0xf3   : > { %1384 = vmatprep.subr.mxu0 %v961_v47  ;;  %1455 = vmatprep.subr.mxu1 %v963_v48  ;;  %v1127_v14 = vld [vmem:[%s3566_s4 + $0x538] sm:$0xff]  ;;  %v1124_v15 = vld [vmem:[%s3566_s4 + $0x520] sm:$0xff]  ;;  %v1126_v16 = vld [vmem:[%s3566_s4 + $0x530] sm:$0xff] }
  0xf4   : > { %1385 = vmatpush1.msra.mxu0 %v960_v49  ;;  %1456 = vmatpush1.msra.mxu1 %v962_v50  ;;  %v1093_v17 = vld [vmem:[%s3566_s4 + $0x428] sm:$0xff]  ;;  %v1095_v18 = vld [vmem:[%s3566_s4 + $0x438] sm:$0xff]  ;;  %v1092_v19 = vld [vmem:[%s3566_s4 + $0x420] sm:$0xff] }
  0xf5   : > { %2657 = vmatmul.mubr.msk.f32.vlgmr.msra.gmra.mxu0 %vm1350_vm0, %v3619_v51  ;;  %2658 = vmatmul.mubr.msk.f32.vlgmr.msra.gmra.mxu1 %vm1350_vm0, %v3619_v51  ;;  %v1094_v20 = vld [vmem:[%s3566_s4 + $0x430] sm:$0xff]  ;;  %v1061_v21 = vld [vmem:[%s3566_s4 + $0x328] sm:$0xff]  ;;  %v1063_v22 = vld [vmem:[%s3566_s4 + $0x338] sm:$0xff] }
  0xf6   : > { %1504 = vmatprep.subr.mxu0 %v1317_v52  ;;  %1575 = vmatprep.subr.mxu1 %v1319_v53  ;;  %v1060_v23 = vld [vmem:[%s3566_s4 + $0x320] sm:$0xff]  ;;  %v1062_v24 = vld [vmem:[%s3566_s4 + $0x330] sm:$0xff]  ;;  %v1029_v25 = vld [vmem:[%s3566_s4 + $0x228] sm:$0xff] }
  0xf7   : > { %1505 = vmatpush1.msra.mxu0 %v1316_v54  ;;  %1576 = vmatpush1.msra.mxu1 %v1318_v55  ;;  %v1031_v26 = vld [vmem:[%s3566_s4 + $0x238] sm:$0xff]  ;;  %v1028_v27 = vld [vmem:[%s3566_s4 + $0x220] sm:$0xff]  ;;  %v1030_v28 = vld [vmem:[%s3566_s4 + $0x230] sm:$0xff] }
  0xf8   : > { %1506 = vmatprep.subr.mxu0 %v1285_v56  ;;  %1577 = vmatprep.subr.mxu1 %v1287_v57  ;;  %v997_v29 = vld [vmem:[%s3566_s4 + $0x128] sm:$0xff]  ;;  %v999_v30 = vld [vmem:[%s3566_s4 + $0x138] sm:$0xff]  ;;  %v996_v31 = vld [vmem:[%s3566_s4 + $0x120] sm:$0xff] }
  0xf9   : > { %1507 = vmatpush1.msra.mxu0 %v1284_v58  ;;  %1578 = vmatpush1.msra.mxu1 %v1286_v59  ;;  %v998_v32 = vld [vmem:[%s3566_s4 + $0x130] sm:$0xff]  ;;  %v965_v33 = vld [vmem:[%s3566_s4 + $0x28] sm:$0xff]  ;;  %v967_v34 = vld [vmem:[%s3566_s4 + $0x38] sm:$0xff] }
  0xfa   : > { %1508 = vmatprep.subr.mxu0 %v1253_v60  ;;  %1579 = vmatprep.subr.mxu1 %v1255_v61  ;;  %v964_v35 = vld [vmem:[%s3566_s4 + $0x20] sm:$0xff]  ;;  %v966_v36 = vld [vmem:[%s3566_s4 + $0x30] sm:$0xff]  ;;  %v1321_v37 = vld [vmem:[%s3566_s4 + $0xb48] sm:$0xff] }
  0xfb   : > { %1509 = vmatpush1.msra.mxu0 %v1252_v62  ;;  %1580 = vmatpush1.msra.mxu1 %v1254_v63  ;;  %v1323_v38 = vld [vmem:[%s3566_s4 + $0xb58] sm:$0xff]  ;;  %v1320_v39 = vld [vmem:[%s3566_s4 + $0xb40] sm:$0xff]  ;;  %v1322_v40 = vld [vmem:[%s3566_s4 + $0xb50] sm:$0xff] }
  0xfc   : > { %1510 = vmatprep.subr.mxu0 %v1221_v0  ;;  %1581 = vmatprep.subr.mxu1 %v1223_v2  ;;  %v1289_v41 = vld [vmem:[%s3566_s4 + $0xa48] sm:$0xff]  ;;  %v1291_v42 = vld [vmem:[%s3566_s4 + $0xa58] sm:$0xff]  ;;  %v1288_v43 = vld [vmem:[%s3566_s4 + $0xa40] sm:$0xff] }
  0xfd   : > { %1511 = vmatpush1.msra.mxu0 %v1220_v3  ;;  %1582 = vmatpush1.msra.mxu1 %v1222_v4  ;;  %v1290_v44 = vld [vmem:[%s3566_s4 + $0xa50] sm:$0xff]  ;;  %v1257_v45 = vld [vmem:[%s3566_s4 + $0x948] sm:$0xff]  ;;  %v1259_v46 = vld [vmem:[%s3566_s4 + $0x958] sm:$0xff] }
  0xfe   : > { %1512 = vmatprep.subr.mxu0 %v1189_v5  ;;  %1583 = vmatprep.subr.mxu1 %v1191_v6  ;;  %v1256_v47 = vld [vmem:[%s3566_s4 + $0x940] sm:$0xff]  ;;  %v1258_v48 = vld [vmem:[%s3566_s4 + $0x950] sm:$0xff]  ;;  %v1225_v49 = vld [vmem:[%s3566_s4 + $0x848] sm:$0xff] }
  0xff   : > { %1513 = vmatpush1.msra.mxu0 %v1188_v7  ;;  %1584 = vmatpush1.msra.mxu1 %v1190_v8  ;;  %v1227_v50 = vld [vmem:[%s3566_s4 + $0x858] sm:$0xff]  ;;  %v1224_v52 = vld [vmem:[%s3566_s4 + $0x840] sm:$0xff]  ;;  %v1226_v53 = vld [vmem:[%s3566_s4 + $0x850] sm:$0xff] }
 0x100   : > { %1514 = vmatprep.subr.mxu0 %v1157_v9  ;;  %1585 = vmatprep.subr.mxu1 %v1159_v10  ;;  %v1193_v54 = vld [vmem:[%s3566_s4 + $0x748] sm:$0xff]  ;;  %v1195_v55 = vld [vmem:[%s3566_s4 + $0x758] sm:$0xff]  ;;  %v1192_v56 = vld [vmem:[%s3566_s4 + $0x740] sm:$0xff] }
 0x101   : > { %1515 = vmatpush1.msra.mxu0 %v1156_v11  ;;  %1586 = vmatpush1.msra.mxu1 %v1158_v12  ;;  %v1194_v57 = vld [vmem:[%s3566_s4 + $0x750] sm:$0xff]  ;;  %v1161_v58 = vld [vmem:[%s3566_s4 + $0x648] sm:$0xff]  ;;  %v1163_v59 = vld [vmem:[%s3566_s4 + $0x658] sm:$0xff] }
 0x102   : > { %1516 = vmatprep.subr.mxu0 %v1125_v13  ;;  %1587 = vmatprep.subr.mxu1 %v1127_v14  ;;  %v1160_v60 = vld [vmem:[%s3566_s4 + $0x640] sm:$0xff]  ;;  %v1162_v61 = vld [vmem:[%s3566_s4 + $0x650] sm:$0xff]  ;;  %v1129_v62 = vld [vmem:[%s3566_s4 + $0x548] sm:$0xff] }
 0x103   : > { %1517 = vmatpush1.msra.mxu0 %v1124_v15  ;;  %1588 = vmatpush1.msra.mxu1 %v1126_v16  ;;  %v1131_v63 = vld [vmem:[%s3566_s4 + $0x558] sm:$0xff]  ;;  %v1128_v0 = vld [vmem:[%s3566_s4 + $0x540] sm:$0xff]  ;;  %v1130_v2 = vld [vmem:[%s3566_s4 + $0x550] sm:$0xff] }
 0x104   : > { %1518 = vmatprep.subr.mxu0 %v1093_v17  ;;  %1589 = vmatprep.subr.mxu1 %v1095_v18  ;;  %v1097_v3 = vld [vmem:[%s3566_s4 + $0x448] sm:$0xff]  ;;  %v1099_v4 = vld [vmem:[%s3566_s4 + $0x458] sm:$0xff]  ;;  %v1096_v5 = vld [vmem:[%s3566_s4 + $0x440] sm:$0xff] }
 0x105   : > { %1519 = vmatpush1.msra.mxu0 %v1092_v19  ;;  %1590 = vmatpush1.msra.mxu1 %v1094_v20  ;;  %v1098_v6 = vld [vmem:[%s3566_s4 + $0x450] sm:$0xff]  ;;  %v1065_v7 = vld [vmem:[%s3566_s4 + $0x348] sm:$0xff]  ;;  %v1067_v8 = vld [vmem:[%s3566_s4 + $0x358] sm:$0xff] }
 0x106   : > { %1520 = vmatprep.subr.mxu0 %v1061_v21  ;;  %1591 = vmatprep.subr.mxu1 %v1063_v22  ;;  %v1064_v9 = vld [vmem:[%s3566_s4 + $0x340] sm:$0xff]  ;;  %v1066_v10 = vld [vmem:[%s3566_s4 + $0x350] sm:$0xff]  ;;  %v1033_v11 = vld [vmem:[%s3566_s4 + $0x248] sm:$0xff] }
 0x107   : > { %1521 = vmatpush1.msra.mxu0 %v1060_v23  ;;  %1592 = vmatpush1.msra.mxu1 %v1062_v24  ;;  %v1035_v12 = vld [vmem:[%s3566_s4 + $0x258] sm:$0xff]  ;;  %v1032_v13 = vld [vmem:[%s3566_s4 + $0x240] sm:$0xff]  ;;  %v1034_v14 = vld [vmem:[%s3566_s4 + $0x250] sm:$0xff] }
 0x108   : > { %1522 = vmatprep.subr.mxu0 %v1029_v25  ;;  %1593 = vmatprep.subr.mxu1 %v1031_v26  ;;  %v1001_v15 = vld [vmem:[%s3566_s4 + $0x148] sm:$0xff]  ;;  %v1003_v16 = vld [vmem:[%s3566_s4 + $0x158] sm:$0xff]  ;;  %v1000_v17 = vld [vmem:[%s3566_s4 + $0x140] sm:$0xff] }
 0x109   : > { %1523 = vmatpush1.msra.mxu0 %v1028_v27  ;;  %1594 = vmatpush1.msra.mxu1 %v1030_v28  ;;  %v1002_v18 = vld [vmem:[%s3566_s4 + $0x150] sm:$0xff]  ;;  %v969_v19 = vld [vmem:[%s3566_s4 + $0x48] sm:$0xff]  ;;  %v971_v20 = vld [vmem:[%s3566_s4 + $0x58] sm:$0xff] }
 0x10a   : > { %1524 = vmatprep.subr.mxu0 %v997_v29  ;;  %1595 = vmatprep.subr.mxu1 %v999_v30  ;;  %v968_v21 = vld [vmem:[%s3566_s4 + $0x40] sm:$0xff]  ;;  %v970_v22 = vld [vmem:[%s3566_s4 + $0x50] sm:$0xff]  ;;  %v1325_v23 = vld [vmem:[%s3566_s4 + $0xb68] sm:$0xff] }
 0x10b   : > { %1525 = vmatpush1.msra.mxu0 %v996_v31  ;;  %1596 = vmatpush1.msra.mxu1 %v998_v32  ;;  %v1327_v24 = vld [vmem:[%s3566_s4 + $0xb78] sm:$0xff]  ;;  %v1324_v25 = vld [vmem:[%s3566_s4 + $0xb60] sm:$0xff]  ;;  %v1326_v26 = vld [vmem:[%s3566_s4 + $0xb70] sm:$0xff] }
 0x10c   : > { %1526 = vmatprep.subr.mxu0 %v965_v33  ;;  %1597 = vmatprep.subr.mxu1 %v967_v34  ;;  %v1293_v27 = vld [vmem:[%s3566_s4 + $0xa68] sm:$0xff]  ;;  %v1295_v28 = vld [vmem:[%s3566_s4 + $0xa78] sm:$0xff]  ;;  %v1292_v29 = vld [vmem:[%s3566_s4 + $0xa60] sm:$0xff] }
 0x10d   : > { %1527 = vmatpush1.msra.mxu0 %v964_v35  ;;  %1560 = vmatprep.mubr.f32.mxu0 %v2730_v1  ;;  %v1294_v30 = vld [vmem:[%s3566_s4 + $0xa70] sm:$0xff]  ;;  %v1261_v31 = vld [vmem:[%s3566_s4 + $0x968] sm:$0xff]  ;;  %v1263_v32 = vld [vmem:[%s3566_s4 + $0x978] sm:$0xff] }
 0x10e   : > { %1598 = vmatpush1.msra.mxu1 %v966_v36  ;;  %1631 = vmatprep.mubr.f32.mxu1 %v2730_v1  ;;  %v1260_v33 = vld [vmem:[%s3566_s4 + $0x960] sm:$0xff]  ;;  %v1262_v34 = vld [vmem:[%s3566_s4 + $0x970] sm:$0xff]  ;;  %v1229_v35 = vld [vmem:[%s3566_s4 + $0x868] sm:$0xff] }
 0x10f   : > { %2659 = vmatmul.mubr.msk.f32.vlgmr.msra.gmra.mxu0 %vm1350_vm0, %v3619_v51  ;;  %2660 = vmatmul.mubr.msk.f32.vlgmr.msra.gmra.mxu1 %vm1350_vm0, %v3619_v51  ;;  %v1231_v36 = vld [vmem:[%s3566_s4 + $0x878] sm:$0xff] }
 0x110   : > { %1646 = vmatprep.subr.mxu0 %v1321_v37  ;;  %1717 = vmatprep.subr.mxu1 %v1323_v38  ;;  %v1228_v37 = vld [vmem:[%s3566_s4 + $0x860] sm:$0xff]  ;;  %v1230_v38 = vld [vmem:[%s3566_s4 + $0x870] sm:$0xff] }
 0x111   : > { %1647 = vmatpush1.msra.mxu0 %v1320_v39  ;;  %1718 = vmatpush1.msra.mxu1 %v1322_v40  ;;  %v1197_v39 = vld [vmem:[%s3566_s4 + $0x768] sm:$0xff]  ;;  %v1199_v40 = vld [vmem:[%s3566_s4 + $0x778] sm:$0xff] }
 0x112   : > { %1648 = vmatprep.subr.mxu0 %v1289_v41  ;;  %1719 = vmatprep.subr.mxu1 %v1291_v42  ;;  %v1196_v41 = vld [vmem:[%s3566_s4 + $0x760] sm:$0xff]  ;;  %v1198_v42 = vld [vmem:[%s3566_s4 + $0x770] sm:$0xff] }
 0x113   : > { %1649 = vmatpush1.msra.mxu0 %v1288_v43  ;;  %1720 = vmatpush1.msra.mxu1 %v1290_v44  ;;  %v1165_v43 = vld [vmem:[%s3566_s4 + $0x668] sm:$0xff]  ;;  %v1167_v44 = vld [vmem:[%s3566_s4 + $0x678] sm:$0xff] }
 0x114   : > { %1650 = vmatprep.subr.mxu0 %v1257_v45  ;;  %1721 = vmatprep.subr.mxu1 %v1259_v46  ;;  %v1164_v45 = vld [vmem:[%s3566_s4 + $0x660] sm:$0xff]  ;;  %v1166_v46 = vld [vmem:[%s3566_s4 + $0x670] sm:$0xff] }
 0x115   : > { %1651 = vmatpush1.msra.mxu0 %v1256_v47  ;;  %1722 = vmatpush1.msra.mxu1 %v1258_v48  ;;  %v1133_v47 = vld [vmem:[%s3566_s4 + $0x568] sm:$0xff]  ;;  %v1135_v48 = vld [vmem:[%s3566_s4 + $0x578] sm:$0xff] }
 0x116   : > { %1652 = vmatprep.subr.mxu0 %v1225_v49  ;;  %1723 = vmatprep.subr.mxu1 %v1227_v50  ;;  %v1132_v49 = vld [vmem:[%s3566_s4 + $0x560] sm:$0xff]  ;;  %v1134_v50 = vld [vmem:[%s3566_s4 + $0x570] sm:$0xff] }
 0x117   : > { %1653 = vmatpush1.msra.mxu0 %v1224_v52  ;;  %1724 = vmatpush1.msra.mxu1 %v1226_v53  ;;  %v1101_v52 = vld [vmem:[%s3566_s4 + $0x468] sm:$0xff]  ;;  %v1103_v53 = vld [vmem:[%s3566_s4 + $0x478] sm:$0xff] }
 0x118   : > { %1654 = vmatprep.subr.mxu0 %v1193_v54  ;;  %1725 = vmatprep.subr.mxu1 %v1195_v55  ;;  %v1100_v54 = vld [vmem:[%s3566_s4 + $0x460] sm:$0xff]  ;;  %v1102_v55 = vld [vmem:[%s3566_s4 + $0x470] sm:$0xff] }
 0x119   : > { %1655 = vmatpush1.msra.mxu0 %v1192_v56  ;;  %1726 = vmatpush1.msra.mxu1 %v1194_v57  ;;  %v1069_v56 = vld [vmem:[%s3566_s4 + $0x368] sm:$0xff]  ;;  %v1071_v57 = vld [vmem:[%s3566_s4 + $0x378] sm:$0xff] }
 0x11a   : > { %1656 = vmatprep.subr.mxu0 %v1161_v58  ;;  %1727 = vmatprep.subr.mxu1 %v1163_v59  ;;  %v1068_v58 = vld [vmem:[%s3566_s4 + $0x360] sm:$0xff]  ;;  %v1070_v59 = vld [vmem:[%s3566_s4 + $0x370] sm:$0xff] }
 0x11b   : > { %1657 = vmatpush1.msra.mxu0 %v1160_v60  ;;  %1728 = vmatpush1.msra.mxu1 %v1162_v61  ;;  %v1037_v60 = vld [vmem:[%s3566_s4 + $0x268] sm:$0xff]  ;;  %v1039_v61 = vld [vmem:[%s3566_s4 + $0x278] sm:$0xff] }
 0x11c   : > { %1658 = vmatprep.subr.mxu0 %v1129_v62  ;;  %1729 = vmatprep.subr.mxu1 %v1131_v63  ;;  %v1036_v62 = vld [vmem:[%s3566_s4 + $0x260] sm:$0xff]  ;;  %v1038_v63 = vld [vmem:[%s3566_s4 + $0x270] sm:$0xff] }
 0x11d   : > { %1659 = vmatpush1.msra.mxu0 %v1128_v0  ;;  %1730 = vmatpush1.msra.mxu1 %v1130_v2  ;;  %v1005_v0 = vld [vmem:[%s3566_s4 + $0x168] sm:$0xff]  ;;  %v1007_v2 = vld [vmem:[%s3566_s4 + $0x178] sm:$0xff] }
 0x11e   : > { %1660 = vmatprep.subr.mxu0 %v1097_v3  ;;  %1731 = vmatprep.subr.mxu1 %v1099_v4  ;;  %v1004_v3 = vld [vmem:[%s3566_s4 + $0x160] sm:$0xff]  ;;  %v1006_v4 = vld [vmem:[%s3566_s4 + $0x170] sm:$0xff] }
 0x11f   : > { %1661 = vmatpush1.msra.mxu0 %v1096_v5  ;;  %1732 = vmatpush1.msra.mxu1 %v1098_v6  ;;  %v973_v5 = vld [vmem:[%s3566_s4 + $0x68] sm:$0xff]  ;;  %v975_v6 = vld [vmem:[%s3566_s4 + $0x78] sm:$0xff] }
 0x120   : > { %1662 = vmatprep.subr.mxu0 %v1065_v7  ;;  %1733 = vmatprep.subr.mxu1 %v1067_v8  ;;  %v972_v7 = vld [vmem:[%s3566_s4 + $0x60] sm:$0xff]  ;;  %v974_v8 = vld [vmem:[%s3566_s4 + $0x70] sm:$0xff] }
 0x121   : > { %1663 = vmatpush1.msra.mxu0 %v1064_v9  ;;  %1734 = vmatpush1.msra.mxu1 %v1066_v10  ;;  %v1329_v9 = vld [vmem:[%s3566_s4 + $0xb88] sm:$0xff]  ;;  %v1331_v10 = vld [vmem:[%s3566_s4 + $0xb98] sm:$0xff] }
 0x122   : > { %1664 = vmatprep.subr.mxu0 %v1033_v11  ;;  %1735 = vmatprep.subr.mxu1 %v1035_v12  ;;  %v1328_v11 = vld [vmem:[%s3566_s4 + $0xb80] sm:$0xff]  ;;  %v1330_v12 = vld [vmem:[%s3566_s4 + $0xb90] sm:$0xff] }
 0x123   : > { %1665 = vmatpush1.msra.mxu0 %v1032_v13  ;;  %1736 = vmatpush1.msra.mxu1 %v1034_v14  ;;  %v1297_v13 = vld [vmem:[%s3566_s4 + $0xa88] sm:$0xff]  ;;  %v1299_v14 = vld [vmem:[%s3566_s4 + $0xa98] sm:$0xff] }
 0x124   : > { %1666 = vmatprep.subr.mxu0 %v1001_v15  ;;  %1737 = vmatprep.subr.mxu1 %v1003_v16  ;;  %v1296_v15 = vld [vmem:[%s3566_s4 + $0xa80] sm:$0xff]  ;;  %v1298_v16 = vld [vmem:[%s3566_s4 + $0xa90] sm:$0xff] }
 0x125   : > { %1667 = vmatpush1.msra.mxu0 %v1000_v17  ;;  %1738 = vmatpush1.msra.mxu1 %v1002_v18  ;;  %v1265_v17 = vld [vmem:[%s3566_s4 + $0x988] sm:$0xff]  ;;  %v1267_v18 = vld [vmem:[%s3566_s4 + $0x998] sm:$0xff] }
 0x126   : > { %1668 = vmatprep.subr.mxu0 %v969_v19  ;;  %1739 = vmatprep.subr.mxu1 %v971_v20  ;;  %v1264_v19 = vld [vmem:[%s3566_s4 + $0x980] sm:$0xff]  ;;  %v1266_v20 = vld [vmem:[%s3566_s4 + $0x990] sm:$0xff] }
 0x127   : > { %1669 = vmatpush1.msra.mxu0 %v968_v21  ;;  %1702 = vmatprep.mubr.f32.mxu0 %v2730_v1  ;;  %v1233_v21 = vld [vmem:[%s3566_s4 + $0x888] sm:$0xff] }
 0x128   : > { %1740 = vmatpush1.msra.mxu1 %v970_v22  ;;  %1773 = vmatprep.mubr.f32.mxu1 %v2730_v1  ;;  %v1235_v22 = vld [vmem:[%s3566_s4 + $0x898] sm:$0xff] }
 0x129   : > { %2661 = vmatmul.mubr.msk.f32.vlgmr.msra.gmra.mxu0 %vm1350_vm0, %v3619_v51  ;;  %2662 = vmatmul.mubr.msk.f32.vlgmr.msra.gmra.mxu1 %vm1350_vm0, %v3619_v51 }
 0x12a   : > { %1788 = vmatprep.subr.mxu0 %v1325_v23  ;;  %1859 = vmatprep.subr.mxu1 %v1327_v24  ;;  %v1232_v23 = vld [vmem:[%s3566_s4 + $0x880] sm:$0xff]  ;;  %v1234_v24 = vld [vmem:[%s3566_s4 + $0x890] sm:$0xff] }
 0x12b   : > { %1789 = vmatpush1.msra.mxu0 %v1324_v25  ;;  %1860 = vmatpush1.msra.mxu1 %v1326_v26  ;;  %v1201_v25 = vld [vmem:[%s3566_s4 + $0x788] sm:$0xff]  ;;  %v1203_v26 = vld [vmem:[%s3566_s4 + $0x798] sm:$0xff] }
 0x12c   : > { %1790 = vmatprep.subr.mxu0 %v1293_v27  ;;  %1861 = vmatprep.subr.mxu1 %v1295_v28  ;;  %v1200_v27 = vld [vmem:[%s3566_s4 + $0x780] sm:$0xff]  ;;  %v1202_v28 = vld [vmem:[%s3566_s4 + $0x790] sm:$0xff] }
 0x12d   : > { %1791 = vmatpush1.msra.mxu0 %v1292_v29  ;;  %1862 = vmatpush1.msra.mxu1 %v1294_v30  ;;  %v1169_v29 = vld [vmem:[%s3566_s4 + $0x688] sm:$0xff]  ;;  %v1171_v30 = vld [vmem:[%s3566_s4 + $0x698] sm:$0xff] }
 0x12e   : > { %1792 = vmatprep.subr.mxu0 %v1261_v31  ;;  %1863 = vmatprep.subr.mxu1 %v1263_v32  ;;  %v1168_v31 = vld [vmem:[%s3566_s4 + $0x680] sm:$0xff]  ;;  %v1170_v32 = vld [vmem:[%s3566_s4 + $0x690] sm:$0xff] }
 0x12f   : > { %1793 = vmatpush1.msra.mxu0 %v1260_v33  ;;  %1864 = vmatpush1.msra.mxu1 %v1262_v34  ;;  %v1137_v33 = vld [vmem:[%s3566_s4 + $0x588] sm:$0xff]  ;;  %v1139_v34 = vld [vmem:[%s3566_s4 + $0x598] sm:$0xff] }
 0x130   : > { %1794 = vmatprep.subr.mxu0 %v1229_v35  ;;  %1865 = vmatprep.subr.mxu1 %v1231_v36  ;;  %v1136_v35 = vld [vmem:[%s3566_s4 + $0x580] sm:$0xff]  ;;  %v1138_v36 = vld [vmem:[%s3566_s4 + $0x590] sm:$0xff] }
 0x131   : > { %1795 = vmatpush1.msra.mxu0 %v1228_v37  ;;  %1866 = vmatpush1.msra.mxu1 %v1230_v38  ;;  %v1105_v37 = vld [vmem:[%s3566_s4 + $0x488] sm:$0xff]  ;;  %v1107_v38 = vld [vmem:[%s3566_s4 + $0x498] sm:$0xff] }
 0x132   : > { %1796 = vmatprep.subr.mxu0 %v1197_v39  ;;  %1867 = vmatprep.subr.mxu1 %v1199_v40  ;;  %v1104_v39 = vld [vmem:[%s3566_s4 + $0x480] sm:$0xff]  ;;  %v1106_v40 = vld [vmem:[%s3566_s4 + $0x490] sm:$0xff] }
 0x133   : > { %1797 = vmatpush1.msra.mxu0 %v1196_v41  ;;  %1868 = vmatpush1.msra.mxu1 %v1198_v42  ;;  %v1073_v41 = vld [vmem:[%s3566_s4 + $0x388] sm:$0xff]  ;;  %v1075_v42 = vld [vmem:[%s3566_s4 + $0x398] sm:$0xff] }
 0x134   : > { %1798 = vmatprep.subr.mxu0 %v1165_v43  ;;  %1869 = vmatprep.subr.mxu1 %v1167_v44  ;;  %v1072_v43 = vld [vmem:[%s3566_s4 + $0x380] sm:$0xff]  ;;  %v1074_v44 = vld [vmem:[%s3566_s4 + $0x390] sm:$0xff] }
 0x135   : > { %1799 = vmatpush1.msra.mxu0 %v1164_v45  ;;  %1870 = vmatpush1.msra.mxu1 %v1166_v46  ;;  %v1041_v45 = vld [vmem:[%s3566_s4 + $0x288] sm:$0xff]  ;;  %v1043_v46 = vld [vmem:[%s3566_s4 + $0x298] sm:$0xff] }
 0x136   : > { %1800 = vmatprep.subr.mxu0 %v1133_v47  ;;  %1871 = vmatprep.subr.mxu1 %v1135_v48  ;;  %v1040_v47 = vld [vmem:[%s3566_s4 + $0x280] sm:$0xff]  ;;  %v1042_v48 = vld [vmem:[%s3566_s4 + $0x290] sm:$0xff] }
 0x137   : > { %1801 = vmatpush1.msra.mxu0 %v1132_v49  ;;  %1872 = vmatpush1.msra.mxu1 %v1134_v50  ;;  %v1009_v49 = vld [vmem:[%s3566_s4 + $0x188] sm:$0xff]  ;;  %v1011_v50 = vld [vmem:[%s3566_s4 + $0x198] sm:$0xff] }
 0x138   : > { %1802 = vmatprep.subr.mxu0 %v1101_v52  ;;  %1873 = vmatprep.subr.mxu1 %v1103_v53  ;;  %v1008_v52 = vld [vmem:[%s3566_s4 + $0x180] sm:$0xff]  ;;  %v1010_v53 = vld [vmem:[%s3566_s4 + $0x190] sm:$0xff] }
 0x139   : > { %1803 = vmatpush1.msra.mxu0 %v1100_v54  ;;  %1874 = vmatpush1.msra.mxu1 %v1102_v55  ;;  %v977_v54 = vld [vmem:[%s3566_s4 + $0x88] sm:$0xff]  ;;  %v979_v55 = vld [vmem:[%s3566_s4 + $0x98] sm:$0xff] }
 0x13a   : > { %1804 = vmatprep.subr.mxu0 %v1069_v56  ;;  %1875 = vmatprep.subr.mxu1 %v1071_v57  ;;  %v976_v56 = vld [vmem:[%s3566_s4 + $0x80] sm:$0xff]  ;;  %v978_v57 = vld [vmem:[%s3566_s4 + $0x90] sm:$0xff] }
 0x13b   : > { %1805 = vmatpush1.msra.mxu0 %v1068_v58  ;;  %1876 = vmatpush1.msra.mxu1 %v1070_v59  ;;  %v1333_v58 = vld [vmem:[%s3566_s4 + $0xba8] sm:$0xff]  ;;  %v1335_v59 = vld [vmem:[%s3566_s4 + $0xbb8] sm:$0xff] }
 0x13c   : > { %1806 = vmatprep.subr.mxu0 %v1037_v60  ;;  %1877 = vmatprep.subr.mxu1 %v1039_v61  ;;  %v1332_v60 = vld [vmem:[%s3566_s4 + $0xba0] sm:$0xff]  ;;  %v1334_v61 = vld [vmem:[%s3566_s4 + $0xbb0] sm:$0xff] }
 0x13d   : > { %1807 = vmatpush1.msra.mxu0 %v1036_v62  ;;  %1878 = vmatpush1.msra.mxu1 %v1038_v63  ;;  %v1301_v62 = vld [vmem:[%s3566_s4 + $0xaa8] sm:$0xff]  ;;  %v1303_v63 = vld [vmem:[%s3566_s4 + $0xab8] sm:$0xff] }
 0x13e   : > { %1808 = vmatprep.subr.mxu0 %v1005_v0  ;;  %1879 = vmatprep.subr.mxu1 %v1007_v2  ;;  %v1300_v0 = vld [vmem:[%s3566_s4 + $0xaa0] sm:$0xff]  ;;  %v1302_v2 = vld [vmem:[%s3566_s4 + $0xab0] sm:$0xff] }
 0x13f   : > { %1809 = vmatpush1.msra.mxu0 %v1004_v3  ;;  %1880 = vmatpush1.msra.mxu1 %v1006_v4  ;;  %v1269_v3 = vld [vmem:[%s3566_s4 + $0x9a8] sm:$0xff]  ;;  %v1271_v4 = vld [vmem:[%s3566_s4 + $0x9b8] sm:$0xff] }
 0x140   : > { %1810 = vmatprep.subr.mxu0 %v973_v5  ;;  %1881 = vmatprep.subr.mxu1 %v975_v6  ;;  %v1268_v5 = vld [vmem:[%s3566_s4 + $0x9a0] sm:$0xff]  ;;  %v1270_v6 = vld [vmem:[%s3566_s4 + $0x9b0] sm:$0xff] }
 0x141   : > { %1811 = vmatpush1.msra.mxu0 %v972_v7  ;;  %1844 = vmatprep.mubr.f32.mxu0 %v2730_v1  ;;  %v1237_v7 = vld [vmem:[%s3566_s4 + $0x8a8] sm:$0xff] }
 0x142   : > { %1882 = vmatpush1.msra.mxu1 %v974_v8  ;;  %1915 = vmatprep.mubr.f32.mxu1 %v2730_v1  ;;  %v1239_v8 = vld [vmem:[%s3566_s4 + $0x8b8] sm:$0xff] }
 0x143   : > { %2663 = vmatmul.mubr.msk.f32.vlgmr.msra.gmra.mxu0 %vm1350_vm0, %v3619_v51  ;;  %2664 = vmatmul.mubr.msk.f32.vlgmr.msra.gmra.mxu1 %vm1350_vm0, %v3619_v51 }
 0x144   : > { %1930 = vmatprep.subr.mxu0 %v1329_v9  ;;  %2001 = vmatprep.subr.mxu1 %v1331_v10  ;;  %v1236_v9 = vld [vmem:[%s3566_s4 + $0x8a0] sm:$0xff]  ;;  %v1238_v10 = vld [vmem:[%s3566_s4 + $0x8b0] sm:$0xff] }
 0x145   : > { %1931 = vmatpush1.msra.mxu0 %v1328_v11  ;;  %2002 = vmatpush1.msra.mxu1 %v1330_v12  ;;  %v1205_v11 = vld [vmem:[%s3566_s4 + $0x7a8] sm:$0xff]  ;;  %v1207_v12 = vld [vmem:[%s3566_s4 + $0x7b8] sm:$0xff] }
 0x146   : > { %1932 = vmatprep.subr.mxu0 %v1297_v13  ;;  %2003 = vmatprep.subr.mxu1 %v1299_v14  ;;  %v1204_v13 = vld [vmem:[%s3566_s4 + $0x7a0] sm:$0xff]  ;;  %v1206_v14 = vld [vmem:[%s3566_s4 + $0x7b0] sm:$0xff] }
 0x147   : > { %1933 = vmatpush1.msra.mxu0 %v1296_v15  ;;  %2004 = vmatpush1.msra.mxu1 %v1298_v16  ;;  %v1173_v15 = vld [vmem:[%s3566_s4 + $0x6a8] sm:$0xff]  ;;  %v1175_v16 = vld [vmem:[%s3566_s4 + $0x6b8] sm:$0xff] }
 0x148   : > { %1934 = vmatprep.subr.mxu0 %v1265_v17  ;;  %2005 = vmatprep.subr.mxu1 %v1267_v18  ;;  %v1172_v17 = vld [vmem:[%s3566_s4 + $0x6a0] sm:$0xff]  ;;  %v1174_v18 = vld [vmem:[%s3566_s4 + $0x6b0] sm:$0xff] }
 0x149   : > { %1935 = vmatpush1.msra.mxu0 %v1264_v19  ;;  %2006 = vmatpush1.msra.mxu1 %v1266_v20  ;;  %v1141_v19 = vld [vmem:[%s3566_s4 + $0x5a8] sm:$0xff]  ;;  %v1143_v20 = vld [vmem:[%s3566_s4 + $0x5b8] sm:$0xff] }
 0x14a   : > { %1936 = vmatprep.subr.mxu0 %v1233_v21  ;;  %2007 = vmatprep.subr.mxu1 %v1235_v22  ;;  %v1140_v21 = vld [vmem:[%s3566_s4 + $0x5a0] sm:$0xff]  ;;  %v1142_v22 = vld [vmem:[%s3566_s4 + $0x5b0] sm:$0xff] }
 0x14b   : > { %1937 = vmatpush1.msra.mxu0 %v1232_v23  ;;  %2008 = vmatpush1.msra.mxu1 %v1234_v24  ;;  %v1109_v23 = vld [vmem:[%s3566_s4 + $0x4a8] sm:$0xff]  ;;  %v1111_v24 = vld [vmem:[%s3566_s4 + $0x4b8] sm:$0xff] }
 0x14c   : > { %1938 = vmatprep.subr.mxu0 %v1201_v25  ;;  %2009 = vmatprep.subr.mxu1 %v1203_v26  ;;  %v1108_v25 = vld [vmem:[%s3566_s4 + $0x4a0] sm:$0xff]  ;;  %v1110_v26 = vld [vmem:[%s3566_s4 + $0x4b0] sm:$0xff] }
 0x14d   : > { %1939 = vmatpush1.msra.mxu0 %v1200_v27  ;;  %2010 = vmatpush1.msra.mxu1 %v1202_v28  ;;  %v1077_v27 = vld [vmem:[%s3566_s4 + $0x3a8] sm:$0xff]  ;;  %v1079_v28 = vld [vmem:[%s3566_s4 + $0x3b8] sm:$0xff] }
 0x14e   : > { %1940 = vmatprep.subr.mxu0 %v1169_v29  ;;  %2011 = vmatprep.subr.mxu1 %v1171_v30  ;;  %v1076_v29 = vld [vmem:[%s3566_s4 + $0x3a0] sm:$0xff]  ;;  %v1078_v30 = vld [vmem:[%s3566_s4 + $0x3b0] sm:$0xff] }
 0x14f   : > { %1941 = vmatpush1.msra.mxu0 %v1168_v31  ;;  %2012 = vmatpush1.msra.mxu1 %v1170_v32  ;;  %v1045_v31 = vld [vmem:[%s3566_s4 + $0x2a8] sm:$0xff]  ;;  %v1047_v32 = vld [vmem:[%s3566_s4 + $0x2b8] sm:$0xff] }
 0x150   : > { %1942 = vmatprep.subr.mxu0 %v1137_v33  ;;  %2013 = vmatprep.subr.mxu1 %v1139_v34  ;;  %v1044_v33 = vld [vmem:[%s3566_s4 + $0x2a0] sm:$0xff]  ;;  %v1046_v34 = vld [vmem:[%s3566_s4 + $0x2b0] sm:$0xff] }
 0x151   : > { %1943 = vmatpush1.msra.mxu0 %v1136_v35  ;;  %2014 = vmatpush1.msra.mxu1 %v1138_v36  ;;  %v1013_v35 = vld [vmem:[%s3566_s4 + $0x1a8] sm:$0xff]  ;;  %v1015_v36 = vld [vmem:[%s3566_s4 + $0x1b8] sm:$0xff] }
 0x152   : > { %1944 = vmatprep.subr.mxu0 %v1105_v37  ;;  %2015 = vmatprep.subr.mxu1 %v1107_v38  ;;  %v1012_v37 = vld [vmem:[%s3566_s4 + $0x1a0] sm:$0xff]  ;;  %v1014_v38 = vld [vmem:[%s3566_s4 + $0x1b0] sm:$0xff] }
 0x153   : > { %1945 = vmatpush1.msra.mxu0 %v1104_v39  ;;  %2016 = vmatpush1.msra.mxu1 %v1106_v40  ;;  %v981_v39 = vld [vmem:[%s3566_s4 + $0xa8] sm:$0xff]  ;;  %v983_v40 = vld [vmem:[%s3566_s4 + $0xb8] sm:$0xff] }
 0x154   : > { %1946 = vmatprep.subr.mxu0 %v1073_v41  ;;  %2017 = vmatprep.subr.mxu1 %v1075_v42  ;;  %v980_v41 = vld [vmem:[%s3566_s4 + $0xa0] sm:$0xff]  ;;  %v982_v42 = vld [vmem:[%s3566_s4 + $0xb0] sm:$0xff] }
 0x155   : > { %1947 = vmatpush1.msra.mxu0 %v1072_v43  ;;  %2018 = vmatpush1.msra.mxu1 %v1074_v44  ;;  %v1337_v43 = vld [vmem:[%s3566_s4 + $0xbc8] sm:$0xff]  ;;  %v1339_v44 = vld [vmem:[%s3566_s4 + $0xbd8] sm:$0xff] }
 0x156   : > { %1948 = vmatprep.subr.mxu0 %v1041_v45  ;;  %2019 = vmatprep.subr.mxu1 %v1043_v46  ;;  %v1336_v45 = vld [vmem:[%s3566_s4 + $0xbc0] sm:$0xff]  ;;  %v1338_v46 = vld [vmem:[%s3566_s4 + $0xbd0] sm:$0xff] }
 0x157   : > { %1949 = vmatpush1.msra.mxu0 %v1040_v47  ;;  %2020 = vmatpush1.msra.mxu1 %v1042_v48  ;;  %v1305_v47 = vld [vmem:[%s3566_s4 + $0xac8] sm:$0xff]  ;;  %v1307_v48 = vld [vmem:[%s3566_s4 + $0xad8] sm:$0xff] }
 0x158   : > { %1950 = vmatprep.subr.mxu0 %v1009_v49  ;;  %2021 = vmatprep.subr.mxu1 %v1011_v50  ;;  %v1304_v49 = vld [vmem:[%s3566_s4 + $0xac0] sm:$0xff]  ;;  %v1306_v50 = vld [vmem:[%s3566_s4 + $0xad0] sm:$0xff] }
 0x159   : > { %1951 = vmatpush1.msra.mxu0 %v1008_v52  ;;  %2022 = vmatpush1.msra.mxu1 %v1010_v53  ;;  %v1273_v52 = vld [vmem:[%s3566_s4 + $0x9c8] sm:$0xff]  ;;  %v1275_v53 = vld [vmem:[%s3566_s4 + $0x9d8] sm:$0xff] }
 0x15a   : > { %1952 = vmatprep.subr.mxu0 %v977_v54  ;;  %2023 = vmatprep.subr.mxu1 %v979_v55  ;;  %v1272_v54 = vld [vmem:[%s3566_s4 + $0x9c0] sm:$0xff]  ;;  %v1241_v55 = vld [vmem:[%s3566_s4 + $0x8c8] sm:$0xff] }
 0x15b   : > { %1953 = vmatpush1.msra.mxu0 %v976_v56  ;;  %1986 = vmatprep.mubr.f32.mxu0 %v2730_v1  ;;  %v1243_v56 = vld [vmem:[%s3566_s4 + $0x8d8] sm:$0xff] }
 0x15c   : > { %2024 = vmatpush1.msra.mxu1 %v978_v57  ;;  %2057 = vmatprep.mubr.f32.mxu1 %v2730_v1  ;;  %v1240_v57 = vld [vmem:[%s3566_s4 + $0x8c0] sm:$0xff] }
 0x15d   : > { %2665 = vmatmul.mubr.msk.f32.vlgmr.msra.gmra.mxu0 %vm1350_vm0, %v3619_v51  ;;  %2666 = vmatmul.mubr.msk.f32.vlgmr.msra.gmra.mxu1 %vm1350_vm0, %v3619_v51 }
 0x15e   : > { %2072 = vmatprep.subr.mxu0 %v1333_v58  ;;  %2143 = vmatprep.subr.mxu1 %v1335_v59  ;;  %v1242_v58 = vld [vmem:[%s3566_s4 + $0x8d0] sm:$0xff]  ;;  %v1209_v59 = vld [vmem:[%s3566_s4 + $0x7c8] sm:$0xff] }
 0x15f   : > { %2073 = vmatpush1.msra.mxu0 %v1332_v60  ;;  %2144 = vmatpush1.msra.mxu1 %v1334_v61  ;;  %v1211_v60 = vld [vmem:[%s3566_s4 + $0x7d8] sm:$0xff]  ;;  %v1208_v61 = vld [vmem:[%s3566_s4 + $0x7c0] sm:$0xff] }
 0x160   : > { %2074 = vmatprep.subr.mxu0 %v1301_v62  ;;  %2145 = vmatprep.subr.mxu1 %v1303_v63  ;;  %v1210_v62 = vld [vmem:[%s3566_s4 + $0x7d0] sm:$0xff]  ;;  %v1177_v63 = vld [vmem:[%s3566_s4 + $0x6c8] sm:$0xff] }
 0x161   : > { %2075 = vmatpush1.msra.mxu0 %v1300_v0  ;;  %2146 = vmatpush1.msra.mxu1 %v1302_v2  ;;  %v1179_v0 = vld [vmem:[%s3566_s4 + $0x6d8] sm:$0xff]  ;;  %v1176_v2 = vld [vmem:[%s3566_s4 + $0x6c0] sm:$0xff] }
 0x162   : > { %2076 = vmatprep.subr.mxu0 %v1269_v3  ;;  %2147 = vmatprep.subr.mxu1 %v1271_v4  ;;  %v1178_v3 = vld [vmem:[%s3566_s4 + $0x6d0] sm:$0xff]  ;;  %v1145_v4 = vld [vmem:[%s3566_s4 + $0x5c8] sm:$0xff] }
 0x163   : > { %2077 = vmatpush1.msra.mxu0 %v1268_v5  ;;  %2148 = vmatpush1.msra.mxu1 %v1270_v6  ;;  %v1147_v5 = vld [vmem:[%s3566_s4 + $0x5d8] sm:$0xff]  ;;  %v1144_v6 = vld [vmem:[%s3566_s4 + $0x5c0] sm:$0xff] }
 0x164   : > { %2078 = vmatprep.subr.mxu0 %v1237_v7  ;;  %2149 = vmatprep.subr.mxu1 %v1239_v8  ;;  %v1146_v7 = vld [vmem:[%s3566_s4 + $0x5d0] sm:$0xff]  ;;  %v1113_v8 = vld [vmem:[%s3566_s4 + $0x4c8] sm:$0xff] }
 0x165   : > { %2079 = vmatpush1.msra.mxu0 %v1236_v9  ;;  %2150 = vmatpush1.msra.mxu1 %v1238_v10  ;;  %v1115_v9 = vld [vmem:[%s3566_s4 + $0x4d8] sm:$0xff]  ;;  %v1112_v10 = vld [vmem:[%s3566_s4 + $0x4c0] sm:$0xff] }
 0x166   : > { %2080 = vmatprep.subr.mxu0 %v1205_v11  ;;  %2151 = vmatprep.subr.mxu1 %v1207_v12  ;;  %v1114_v11 = vld [vmem:[%s3566_s4 + $0x4d0] sm:$0xff]  ;;  %v1081_v12 = vld [vmem:[%s3566_s4 + $0x3c8] sm:$0xff] }
 0x167   : > { %2081 = vmatpush1.msra.mxu0 %v1204_v13  ;;  %2152 = vmatpush1.msra.mxu1 %v1206_v14  ;;  %v1083_v13 = vld [vmem:[%s3566_s4 + $0x3d8] sm:$0xff]  ;;  %v1080_v14 = vld [vmem:[%s3566_s4 + $0x3c0] sm:$0xff] }
 0x168   : > { %2082 = vmatprep.subr.mxu0 %v1173_v15  ;;  %2153 = vmatprep.subr.mxu1 %v1175_v16  ;;  %v1082_v15 = vld [vmem:[%s3566_s4 + $0x3d0] sm:$0xff]  ;;  %v1049_v16 = vld [vmem:[%s3566_s4 + $0x2c8] sm:$0xff] }
 0x169   : > { %2083 = vmatpush1.msra.mxu0 %v1172_v17  ;;  %2154 = vmatpush1.msra.mxu1 %v1174_v18  ;;  %v1051_v17 = vld [vmem:[%s3566_s4 + $0x2d8] sm:$0xff]  ;;  %v1048_v18 = vld [vmem:[%s3566_s4 + $0x2c0] sm:$0xff] }
 0x16a   : > { %2084 = vmatprep.subr.mxu0 %v1141_v19  ;;  %2155 = vmatprep.subr.mxu1 %v1143_v20  ;;  %v1050_v19 = vld [vmem:[%s3566_s4 + $0x2d0] sm:$0xff]  ;;  %v1017_v20 = vld [vmem:[%s3566_s4 + $0x1c8] sm:$0xff] }
 0x16b   : > { %2085 = vmatpush1.msra.mxu0 %v1140_v21  ;;  %2156 = vmatpush1.msra.mxu1 %v1142_v22  ;;  %v1019_v21 = vld [vmem:[%s3566_s4 + $0x1d8] sm:$0xff]  ;;  %v1016_v22 = vld [vmem:[%s3566_s4 + $0x1c0] sm:$0xff] }
 0x16c   : > { %2086 = vmatprep.subr.mxu0 %v1109_v23  ;;  %2157 = vmatprep.subr.mxu1 %v1111_v24  ;;  %v1018_v23 = vld [vmem:[%s3566_s4 + $0x1d0] sm:$0xff]  ;;  %v985_v24 = vld [vmem:[%s3566_s4 + $0xc8] sm:$0xff] }
 0x16d   : > { %2087 = vmatpush1.msra.mxu0 %v1108_v25  ;;  %2158 = vmatpush1.msra.mxu1 %v1110_v26  ;;  %v987_v25 = vld [vmem:[%s3566_s4 + $0xd8] sm:$0xff]  ;;  %v984_v26 = vld [vmem:[%s3566_s4 + $0xc0] sm:$0xff] }
 0x16e   : > { %2088 = vmatprep.subr.mxu0 %v1077_v27  ;;  %2159 = vmatprep.subr.mxu1 %v1079_v28  ;;  %v986_v27 = vld [vmem:[%s3566_s4 + $0xd0] sm:$0xff]  ;;  %v1341_v28 = vld [vmem:[%s3566_s4 + $0xbe8] sm:$0xff] }
 0x16f   : > { %2089 = vmatpush1.msra.mxu0 %v1076_v29  ;;  %2160 = vmatpush1.msra.mxu1 %v1078_v30  ;;  %v1343_v29 = vld [vmem:[%s3566_s4 + $0xbf8] sm:$0xff]  ;;  %v1340_v30 = vld [vmem:[%s3566_s4 + $0xbe0] sm:$0xff] }
 0x170   : > { %2090 = vmatprep.subr.mxu0 %v1045_v31  ;;  %2161 = vmatprep.subr.mxu1 %v1047_v32  ;;  %v1342_v31 = vld [vmem:[%s3566_s4 + $0xbf0] sm:$0xff]  ;;  %v3952_v32 = vld [vmem:[%s4091_s0] sm:$0xff] }
 0x171   : > { %2091 = vmatpush1.msra.mxu0 %v1044_v33  ;;  %2162 = vmatpush1.msra.mxu1 %v1046_v34  ;;  %v1309_v33 = vld [vmem:[%s3566_s4 + $0xae8] sm:$0xff]  ;;  %v1311_v34 = vld [vmem:[%s3566_s4 + $0xaf8] sm:$0xff] }
 0x172   : > { %2092 = vmatprep.subr.mxu0 %v1013_v35  ;;  %2163 = vmatprep.subr.mxu1 %v1015_v36  ;;  %v1308_v35 = vld [vmem:[%s3566_s4 + $0xae0] sm:$0xff]  ;;  %v1310_v36 = vld [vmem:[%s3566_s4 + $0xaf0] sm:$0xff] }
 0x173   : > { %2093 = vmatpush1.msra.mxu0 %v1012_v37  ;;  %2164 = vmatpush1.msra.mxu1 %v1014_v38  ;;  %v1277_v37 = vld [vmem:[%s3566_s4 + $0x9e8] sm:$0xff]  ;;  %v1279_v38 = vld [vmem:[%s3566_s4 + $0x9f8] sm:$0xff] }
 0x174   : > { %2094 = vmatprep.subr.mxu0 %v981_v39  ;;  %2165 = vmatprep.subr.mxu1 %v983_v40  ;;  %v1276_v39 = vld [vmem:[%s3566_s4 + $0x9e0] sm:$0xff]  ;;  %v1278_v40 = vld [vmem:[%s3566_s4 + $0x9f0] sm:$0xff] }
 0x175   : > { %2095 = vmatpush1.msra.mxu0 %v980_v41  ;;  %2128 = vmatprep.mubr.f32.mxu0 %v2730_v1  ;;  %v1245_v41 = vld [vmem:[%s3566_s4 + $0x8e8] sm:$0xff] }
 0x176   : > { %2166 = vmatpush1.msra.mxu1 %v982_v42  ;;  %2199 = vmatprep.mubr.f32.mxu1 %v2730_v1  ;;  %v1247_v42 = vld [vmem:[%s3566_s4 + $0x8f8] sm:$0xff] }
 0x177   : > { %2667 = vmatmul.mubr.msk.f32.vlgmr.msra.gmra.mxu0 %vm1350_vm0, %v3619_v51  ;;  %2668 = vmatmul.mubr.msk.f32.vlgmr.msra.gmra.mxu1 %vm1350_vm0, %v3619_v51  ;;  %v1274_v51 = vld [vmem:[%s3566_s4 + $0x9d0] sm:$0xff] }
 0x178   : > { %2214 = vmatprep.subr.mxu0 %v1337_v43  ;;  %2285 = vmatprep.subr.mxu1 %v1339_v44  ;;  %v1244_v43 = vld [vmem:[%s3566_s4 + $0x8e0] sm:$0xff]  ;;  %v1246_v44 = vld [vmem:[%s3566_s4 + $0x8f0] sm:$0xff] }
 0x179   : > { %2215 = vmatpush1.msra.mxu0 %v1336_v45  ;;  %2286 = vmatpush1.msra.mxu1 %v1338_v46  ;;  %v1213_v45 = vld [vmem:[%s3566_s4 + $0x7e8] sm:$0xff]  ;;  %v1215_v46 = vld [vmem:[%s3566_s4 + $0x7f8] sm:$0xff] }
 0x17a   : > { %2216 = vmatprep.subr.mxu0 %v1305_v47  ;;  %2287 = vmatprep.subr.mxu1 %v1307_v48  ;;  %v1212_v47 = vld [vmem:[%s3566_s4 + $0x7e0] sm:$0xff]  ;;  %v1214_v48 = vld [vmem:[%s3566_s4 + $0x7f0] sm:$0xff] }
 0x17b   : > { %2217 = vmatpush1.msra.mxu0 %v1304_v49  ;;  %2288 = vmatpush1.msra.mxu1 %v1306_v50  ;;  %v1181_v49 = vld [vmem:[%s3566_s4 + $0x6e8] sm:$0xff]  ;;  %v1183_v50 = vld [vmem:[%s3566_s4 + $0x6f8] sm:$0xff] }
 0x17c   : > { %2218 = vmatprep.subr.mxu0 %v1273_v52  ;;  %2289 = vmatprep.subr.mxu1 %v1275_v53  ;;  %v1180_v52 = vld [vmem:[%s3566_s4 + $0x6e0] sm:$0xff]  ;;  %v1182_v53 = vld [vmem:[%s3566_s4 + $0x6f0] sm:$0xff] }
 0x17d   : > { %2219 = vmatpush1.msra.mxu0 %v1272_v54  ;;  %2290 = vmatpush1.msra.mxu1 %v1274_v51  ;;  %v1149_v54 = vld [vmem:[%s3566_s4 + $0x5e8] sm:$0xff]  ;;  %v1151_v51 = vld [vmem:[%s3566_s4 + $0x5f8] sm:$0xff] }
 0x17e   : > { %2220 = vmatprep.subr.mxu0 %v1241_v55  ;;  %2291 = vmatprep.subr.mxu1 %v1243_v56  ;;  %v1148_v55 = vld [vmem:[%s3566_s4 + $0x5e0] sm:$0xff]  ;;  %v1150_v56 = vld [vmem:[%s3566_s4 + $0x5f0] sm:$0xff] }
 0x17f   : > { %2221 = vmatpush1.msra.mxu0 %v1240_v57  ;;  %2292 = vmatpush1.msra.mxu1 %v1242_v58  ;;  %v1117_v57 = vld [vmem:[%s3566_s4 + $0x4e8] sm:$0xff]  ;;  %v1119_v58 = vld [vmem:[%s3566_s4 + $0x4f8] sm:$0xff] }
 0x180   : > { %2222 = vmatprep.subr.mxu0 %v1209_v59  ;;  %2293 = vmatprep.subr.mxu1 %v1211_v60  ;;  %v1116_v59 = vld [vmem:[%s3566_s4 + $0x4e0] sm:$0xff]  ;;  %v1118_v60 = vld [vmem:[%s3566_s4 + $0x4f0] sm:$0xff] }
 0x181   : > { %2223 = vmatpush1.msra.mxu0 %v1208_v61  ;;  %2294 = vmatpush1.msra.mxu1 %v1210_v62  ;;  %v1085_v61 = vld [vmem:[%s3566_s4 + $0x3e8] sm:$0xff]  ;;  %v1087_v62 = vld [vmem:[%s3566_s4 + $0x3f8] sm:$0xff] }
 0x182   : > { %2224 = vmatprep.subr.mxu0 %v1177_v63  ;;  %2295 = vmatprep.subr.mxu1 %v1179_v0  ;;  %v1084_v63 = vld [vmem:[%s3566_s4 + $0x3e0] sm:$0xff]  ;;  %v1086_v0 = vld [vmem:[%s3566_s4 + $0x3f0] sm:$0xff] }
 0x183   : > { %2225 = vmatpush1.msra.mxu0 %v1176_v2  ;;  %2296 = vmatpush1.msra.mxu1 %v1178_v3  ;;  %v1053_v2 = vld [vmem:[%s3566_s4 + $0x2e8] sm:$0xff]  ;;  %v1055_v3 = vld [vmem:[%s3566_s4 + $0x2f8] sm:$0xff] }
 0x184   : > { %2226 = vmatprep.subr.mxu0 %v1145_v4  ;;  %2297 = vmatprep.subr.mxu1 %v1147_v5  ;;  %v1052_v4 = vld [vmem:[%s3566_s4 + $0x2e0] sm:$0xff]  ;;  %v1054_v5 = vld [vmem:[%s3566_s4 + $0x2f0] sm:$0xff] }
 0x185   : > { %2227 = vmatpush1.msra.mxu0 %v1144_v6  ;;  %2298 = vmatpush1.msra.mxu1 %v1146_v7  ;;  %v1021_v6 = vld [vmem:[%s3566_s4 + $0x1e8] sm:$0xff]  ;;  %v1023_v7 = vld [vmem:[%s3566_s4 + $0x1f8] sm:$0xff] }
 0x186   : > { %2228 = vmatprep.subr.mxu0 %v1113_v8  ;;  %2299 = vmatprep.subr.mxu1 %v1115_v9  ;;  %v1020_v8 = vld [vmem:[%s3566_s4 + $0x1e0] sm:$0xff]  ;;  %v1022_v9 = vld [vmem:[%s3566_s4 + $0x1f0] sm:$0xff] }
 0x187   : > { %2229 = vmatpush1.msra.mxu0 %v1112_v10  ;;  %2300 = vmatpush1.msra.mxu1 %v1114_v11  ;;  %v989_v10 = vld [vmem:[%s3566_s4 + $0xe8] sm:$0xff]  ;;  %v991_v11 = vld [vmem:[%s3566_s4 + $0xf8] sm:$0xff] }
 0x188   : > { %2230 = vmatprep.subr.mxu0 %v1081_v12  ;;  %2301 = vmatprep.subr.mxu1 %v1083_v13  ;;  %v988_v12 = vld [vmem:[%s3566_s4 + $0xe0] sm:$0xff]  ;;  %v990_v13 = vld [vmem:[%s3566_s4 + $0xf0] sm:$0xff] }
 0x189   : > { %2231 = vmatpush1.msra.mxu0 %v1080_v14  ;;  %2302 = vmatpush1.msra.mxu1 %v1082_v15  ;;  %v4010_v14 = vpop.permute.xlu0 %1347 }
 0x18a   : > { %2232 = vmatprep.subr.mxu0 %v1049_v16  ;;  %2303 = vmatprep.subr.mxu1 %v1051_v17 }
 0x18b   : > { %2233 = vmatpush1.msra.mxu0 %v1048_v18  ;;  %2304 = vmatpush1.msra.mxu1 %v1050_v19 }
 0x18c   : > { %2234 = vmatprep.subr.mxu0 %v1017_v20  ;;  %2305 = vmatprep.subr.mxu1 %v1019_v21 }
 0x18d   : > { %2235 = vmatpush1.msra.mxu0 %v1016_v22  ;;  %2306 = vmatpush1.msra.mxu1 %v1018_v23 }
 0x18e   : > { %2236 = vmatprep.subr.mxu0 %v985_v24  ;;  %2307 = vmatprep.subr.mxu1 %v987_v25 }
 0x18f   : > { %2237 = vmatpush1.msra.mxu0 %v984_v26  ;;  %2270 = vmatprep.mubr.f32.mxu0 %v2730_v1 }
 0x190   : > { %2308 = vmatpush1.msra.mxu1 %v986_v27  ;;  %2341 = vmatprep.mubr.f32.mxu1 %v2730_v1 }
 0x191   : > { %2669 = vmatmul.mubr.msk.f32.vlgmr.msra.gmra.mxu0 %vm1350_vm0, %v3952_v32  ;;  %2670 = vmatmul.mubr.msk.f32.vlgmr.msra.gmra.mxu1 %vm1350_vm0, %v3952_v32 }
 0x192   : > { %2356 = vmatprep.subr.mxu0 %v1341_v28  ;;  %2427 = vmatprep.subr.mxu1 %v1343_v29 }
 0x193   : > { %2357 = vmatpush1.msra.mxu0 %v1340_v30  ;;  %2428 = vmatpush1.msra.mxu1 %v1342_v31 }
 0x194   : > { %2358 = vmatprep.subr.mxu0 %v1309_v33  ;;  %2429 = vmatprep.subr.mxu1 %v1311_v34 }
 0x195   : > { %2359 = vmatpush1.msra.mxu0 %v1308_v35  ;;  %2430 = vmatpush1.msra.mxu1 %v1310_v36 }
 0x196   : > { %2360 = vmatprep.subr.mxu0 %v1277_v37  ;;  %2431 = vmatprep.subr.mxu1 %v1279_v38 }
 0x197   : > { %2361 = vmatpush1.msra.mxu0 %v1276_v39  ;;  %2432 = vmatpush1.msra.mxu1 %v1278_v40 }
 0x198   : > { %2362 = vmatprep.subr.mxu0 %v1245_v41  ;;  %2433 = vmatprep.subr.mxu1 %v1247_v42 }
 0x199   : > { %2363 = vmatpush1.msra.mxu0 %v1244_v43  ;;  %2434 = vmatpush1.msra.mxu1 %v1246_v44 }
 0x19a   : > { %2364 = vmatprep.subr.mxu0 %v1213_v45  ;;  %2435 = vmatprep.subr.mxu1 %v1215_v46 }
 0x19b   : > { %2365 = vmatpush1.msra.mxu0 %v1212_v47  ;;  %2436 = vmatpush1.msra.mxu1 %v1214_v48 }
 0x19c   : > { %2366 = vmatprep.subr.mxu0 %v1181_v49  ;;  %2437 = vmatprep.subr.mxu1 %v1183_v50 }
 0x19d   : > { %2367 = vmatpush1.msra.mxu0 %v1180_v52  ;;  %2438 = vmatpush1.msra.mxu1 %v1182_v53 }
 0x19e   : > { %2368 = vmatprep.subr.mxu0 %v1149_v54  ;;  %2439 = vmatprep.subr.mxu1 %v1151_v51 }
 0x19f   : > { %2369 = vmatpush1.msra.mxu0 %v1148_v55  ;;  %2440 = vmatpush1.msra.mxu1 %v1150_v56 }
 0x1a0   : > { %2370 = vmatprep.subr.mxu0 %v1117_v57  ;;  %2441 = vmatprep.subr.mxu1 %v1119_v58 }
 0x1a1   : > { %2371 = vmatpush1.msra.mxu0 %v1116_v59  ;;  %2442 = vmatpush1.msra.mxu1 %v1118_v60 }
 0x1a2   : > { %2372 = vmatprep.subr.mxu0 %v1085_v61  ;;  %2443 = vmatprep.subr.mxu1 %v1087_v62 }
 0x1a3   : > { %2373 = vmatpush1.msra.mxu0 %v1084_v63  ;;  %2444 = vmatpush1.msra.mxu1 %v1086_v0 }
 0x1a4   : > { %2374 = vmatprep.subr.mxu0 %v1053_v2  ;;  %2445 = vmatprep.subr.mxu1 %v1055_v3 }
 0x1a5   : > { %2375 = vmatpush1.msra.mxu0 %v1052_v4  ;;  %2446 = vmatpush1.msra.mxu1 %v1054_v5 }
 0x1a6   : > { %2376 = vmatprep.subr.mxu0 %v1021_v6  ;;  %2447 = vmatprep.subr.mxu1 %v1023_v7 }
 0x1a7   : > { %2377 = vmatpush1.msra.mxu0 %v1020_v8  ;;  %2448 = vmatpush1.msra.mxu1 %v1022_v9 }
 0x1a8   : > { %2378 = vmatprep.subr.mxu0 %v989_v10  ;;  %2449 = vmatprep.subr.mxu1 %v991_v11 }
 0x1a9   : > { %2379 = vmatpush1.msra.mxu0 %v988_v12  ;;  %2412 = vmatprep.mubr.f32.mxu0 %v2730_v1 }
 0x1aa   : > { %2450 = vmatpush1.msra.mxu1 %v990_v13  ;;  %2483 = vmatprep.mubr.f32.mxu1 %v2730_v1 }
 0x1ab   : > { %2671 = vmatmul.mubr.msk.f32.vlgmr.msra.gmra.mxu0 %vm1350_vm0, %v3952_v32  ;;  %2672 = vmatmul.mubr.msk.f32.vlgmr.msra.gmra.mxu1 %vm1350_vm0, %v3952_v32 }
 0x1b5   : > { %v1420_v15 = vpop.f32.mrf.mxu0  ;;  %v1491_v16 = vpop.f32.mrf.mxu1 }
 0x1b6   : > { %v1421_v17 = vadd.f32 %v1420_v15, %v4010_v14  ;;  %v1492_v18 = vadd.f32 %v1491_v16, %v4010_v14 }
 0x1b7   : > { %v1422_v1 = vpop.f32.mrf.mxu0  ;;  %v1493_v19 = vpop.f32.mrf.mxu1 }
 0x1b8   : > { %v2490_v20 = vmul.f32 0.2, %v1421_v17  ;;  %v2492_v21 = vmul.f32 0.2, %v1492_v18  ;;  %v1423_v22 = vadd.f32 %v1422_v1, %v4010_v14  ;;  %v1494_v23 = vadd.f32 %v1493_v19, %v4010_v14 }
 0x1ba   : > { %v2522_v24 = vmax.f32 %v1421_v17, %v2490_v20  ;;  %v2524_v25 = vmax.f32 %v1492_v18, %v2492_v21  ;;  %v2491_v26 = vmul.f32 0.2, %v1423_v22  ;;  %v2493_v27 = vmul.f32 0.2, %v1494_v23 }
 0x1bc   : > { %2554 = vst [vmem:[%s4019_s14] sm:$0xff] %v2522_v24  ;;  %2556 = vst [vmem:[%s4019_s14 + $0x10] sm:$0xff] %v2524_v25  ;;  %v2523_v28 = vmax.f32 %v1423_v22, %v2491_v26  ;;  %v2525_v29 = vmax.f32 %v1494_v23, %v2493_v27 }
 0x1be   : > { %2555 = vst [vmem:[%s4019_s14 + $0x8] sm:$0xff] %v2523_v28  ;;  %2557 = vst [vmem:[%s4019_s14 + $0x18] sm:$0xff] %v2525_v29 }
 0x1cf   : > { %v1562_v30 = vpop.f32.mrf.mxu0  ;;  %v1633_v31 = vpop.f32.mrf.mxu1 }
 0x1d0   : > { %v1563_v32 = vadd.f32 %v1562_v30, %v4010_v14  ;;  %v1634_v33 = vadd.f32 %v1633_v31, %v4010_v14 }
 0x1d1   : > { %v1564_v34 = vpop.f32.mrf.mxu0  ;;  %v1635_v35 = vpop.f32.mrf.mxu1 }
 0x1d2   : > { %v2494_v36 = vmul.f32 0.2, %v1563_v32  ;;  %v2496_v37 = vmul.f32 0.2, %v1634_v33  ;;  %v1565_v38 = vadd.f32 %v1564_v34, %v4010_v14  ;;  %v1636_v39 = vadd.f32 %v1635_v35, %v4010_v14 }
 0x1d4   : > { %v2526_v40 = vmax.f32 %v1563_v32, %v2494_v36  ;;  %v2528_v41 = vmax.f32 %v1634_v33, %v2496_v37  ;;  %v2495_v42 = vmul.f32 0.2, %v1565_v38  ;;  %v2497_v43 = vmul.f32 0.2, %v1636_v39 }
 0x1d6   : > { %2558 = vst [vmem:[%s4019_s14 + $0x20] sm:$0xff] %v2526_v40  ;;  %2560 = vst [vmem:[%s4019_s14 + $0x30] sm:$0xff] %v2528_v41  ;;  %v2527_v44 = vmax.f32 %v1565_v38, %v2495_v42  ;;  %v2529_v45 = vmax.f32 %v1636_v39, %v2497_v43 }
 0x1d8   : > { %2559 = vst [vmem:[%s4019_s14 + $0x28] sm:$0xff] %v2527_v44  ;;  %2561 = vst [vmem:[%s4019_s14 + $0x38] sm:$0xff] %v2529_v45 }
 0x1e9   : > { %v1704_v46 = vpop.f32.mrf.mxu0  ;;  %v1775_v47 = vpop.f32.mrf.mxu1 }
 0x1ea   : > { %v1705_v48 = vadd.f32 %v1704_v46, %v4010_v14  ;;  %v1776_v49 = vadd.f32 %v1775_v47, %v4010_v14 }
 0x1eb   : > { %v1706_v50 = vpop.f32.mrf.mxu0  ;;  %v1777_v52 = vpop.f32.mrf.mxu1 }
 0x1ec   : > { %v2498_v53 = vmul.f32 0.2, %v1705_v48  ;;  %v2500_v54 = vmul.f32 0.2, %v1776_v49  ;;  %v1707_v51 = vadd.f32 %v1706_v50, %v4010_v14  ;;  %v1778_v55 = vadd.f32 %v1777_v52, %v4010_v14 }
 0x1ee   : > { %v2530_v56 = vmax.f32 %v1705_v48, %v2498_v53  ;;  %v2532_v57 = vmax.f32 %v1776_v49, %v2500_v54  ;;  %v2499_v58 = vmul.f32 0.2, %v1707_v51  ;;  %v2501_v59 = vmul.f32 0.2, %v1778_v55 }
 0x1f0   : > { %2562 = vst [vmem:[%s4019_s14 + $0x40] sm:$0xff] %v2530_v56  ;;  %2564 = vst [vmem:[%s4019_s14 + $0x50] sm:$0xff] %v2532_v57  ;;  %v2531_v60 = vmax.f32 %v1707_v51, %v2499_v58  ;;  %v2533_v61 = vmax.f32 %v1778_v55, %v2501_v59 }
 0x1f2   : > { %2563 = vst [vmem:[%s4019_s14 + $0x48] sm:$0xff] %v2531_v60  ;;  %2565 = vst [vmem:[%s4019_s14 + $0x58] sm:$0xff] %v2533_v61 }
 0x203   : > { %v1846_v62 = vpop.f32.mrf.mxu0  ;;  %v1917_v63 = vpop.f32.mrf.mxu1 }
 0x204   : > { %v1847_v0 = vadd.f32 %v1846_v62, %v4010_v14  ;;  %v1918_v2 = vadd.f32 %v1917_v63, %v4010_v14 }
 0x205   : > { %v1848_v3 = vpop.f32.mrf.mxu0  ;;  %v1919_v4 = vpop.f32.mrf.mxu1 }
 0x206   : > { %v2502_v5 = vmul.f32 0.2, %v1847_v0  ;;  %v2504_v6 = vmul.f32 0.2, %v1918_v2  ;;  %v1849_v7 = vadd.f32 %v1848_v3, %v4010_v14  ;;  %v1920_v8 = vadd.f32 %v1919_v4, %v4010_v14 }
 0x208   : > { %v2534_v9 = vmax.f32 %v1847_v0, %v2502_v5  ;;  %v2536_v10 = vmax.f32 %v1918_v2, %v2504_v6  ;;  %v2503_v11 = vmul.f32 0.2, %v1849_v7  ;;  %v2505_v12 = vmul.f32 0.2, %v1920_v8 }
 0x20a   : > { %2566 = vst [vmem:[%s4019_s14 + $0x60] sm:$0xff] %v2534_v9  ;;  %2568 = vst [vmem:[%s4019_s14 + $0x70] sm:$0xff] %v2536_v10  ;;  %v2535_v13 = vmax.f32 %v1849_v7, %v2503_v11  ;;  %v2537_v15 = vmax.f32 %v1920_v8, %v2505_v12 }
 0x20c   : > { %2567 = vst [vmem:[%s4019_s14 + $0x68] sm:$0xff] %v2535_v13  ;;  %2569 = vst [vmem:[%s4019_s14 + $0x78] sm:$0xff] %v2537_v15 }
 0x21d   : > { %v1988_v16 = vpop.f32.mrf.mxu0  ;;  %v2059_v17 = vpop.f32.mrf.mxu1 }
 0x21e   : > { %v1989_v18 = vadd.f32 %v1988_v16, %v4010_v14  ;;  %v2060_v1 = vadd.f32 %v2059_v17, %v4010_v14 }
 0x21f   : > { %v1990_v19 = vpop.f32.mrf.mxu0  ;;  %v2061_v20 = vpop.f32.mrf.mxu1 }
 0x220   : > { %v2506_v21 = vmul.f32 0.2, %v1989_v18  ;;  %v2508_v22 = vmul.f32 0.2, %v2060_v1  ;;  %v1991_v23 = vadd.f32 %v1990_v19, %v4010_v14  ;;  %v2062_v24 = vadd.f32 %v2061_v20, %v4010_v14 }
 0x222   : > { %v2538_v25 = vmax.f32 %v1989_v18, %v2506_v21  ;;  %v2540_v26 = vmax.f32 %v2060_v1, %v2508_v22  ;;  %v2507_v27 = vmul.f32 0.2, %v1991_v23  ;;  %v2509_v28 = vmul.f32 0.2, %v2062_v24 }
 0x224   : > { %2570 = vst [vmem:[%s4019_s14 + $0x80] sm:$0xff] %v2538_v25  ;;  %2572 = vst [vmem:[%s4019_s14 + $0x90] sm:$0xff] %v2540_v26  ;;  %v2539_v29 = vmax.f32 %v1991_v23, %v2507_v27  ;;  %v2541_v30 = vmax.f32 %v2062_v24, %v2509_v28 }
 0x226   : > { %2571 = vst [vmem:[%s4019_s14 + $0x88] sm:$0xff] %v2539_v29  ;;  %2573 = vst [vmem:[%s4019_s14 + $0x98] sm:$0xff] %v2541_v30 }
 0x237   : > { %v2130_v31 = vpop.f32.mrf.mxu0  ;;  %v2201_v32 = vpop.f32.mrf.mxu1 }
 0x238   : > { %v2131_v33 = vadd.f32 %v2130_v31, %v4010_v14  ;;  %v2202_v34 = vadd.f32 %v2201_v32, %v4010_v14 }
 0x239   : > { %v2132_v35 = vpop.f32.mrf.mxu0  ;;  %v2203_v36 = vpop.f32.mrf.mxu1 }
 0x23a   : > { %v2510_v37 = vmul.f32 0.2, %v2131_v33  ;;  %v2512_v38 = vmul.f32 0.2, %v2202_v34  ;;  %v2133_v39 = vadd.f32 %v2132_v35, %v4010_v14  ;;  %v2204_v40 = vadd.f32 %v2203_v36, %v4010_v14 }
 0x23c   : > { %v2542_v41 = vmax.f32 %v2131_v33, %v2510_v37  ;;  %v2544_v42 = vmax.f32 %v2202_v34, %v2512_v38  ;;  %v2511_v43 = vmul.f32 0.2, %v2133_v39  ;;  %v2513_v44 = vmul.f32 0.2, %v2204_v40 }
 0x23e   : > { %2574 = vst [vmem:[%s4019_s14 + $0xa0] sm:$0xff] %v2542_v41  ;;  %2576 = vst [vmem:[%s4019_s14 + $0xb0] sm:$0xff] %v2544_v42  ;;  %v2543_v45 = vmax.f32 %v2133_v39, %v2511_v43  ;;  %v2545_v46 = vmax.f32 %v2204_v40, %v2513_v44 }
 0x240   : > { %2575 = vst [vmem:[%s4019_s14 + $0xa8] sm:$0xff] %v2543_v45  ;;  %2577 = vst [vmem:[%s4019_s14 + $0xb8] sm:$0xff] %v2545_v46 }
 0x251   : > { %v2272_v47 = vpop.f32.mrf.mxu0  ;;  %v2343_v48 = vpop.f32.mrf.mxu1 }
 0x252   : > { %v2273_v49 = vadd.f32 %v2272_v47, %v4010_v14  ;;  %v2344_v50 = vadd.f32 %v2343_v48, %v4010_v14 }
 0x253   : > { %v2274_v52 = vpop.f32.mrf.mxu0  ;;  %v2345_v53 = vpop.f32.mrf.mxu1 }
 0x254   : > { %v2514_v54 = vmul.f32 0.2, %v2273_v49  ;;  %v2516_v51 = vmul.f32 0.2, %v2344_v50  ;;  %v2275_v55 = vadd.f32 %v2274_v52, %v4010_v14  ;;  %v2346_v56 = vadd.f32 %v2345_v53, %v4010_v14 }
 0x256   : > { %v2546_v57 = vmax.f32 %v2273_v49, %v2514_v54  ;;  %v2548_v58 = vmax.f32 %v2344_v50, %v2516_v51  ;;  %v2515_v59 = vmul.f32 0.2, %v2275_v55  ;;  %v2517_v60 = vmul.f32 0.2, %v2346_v56 }
 0x258   : > { %2578 = vst [vmem:[%s4019_s14 + $0xc0] sm:$0xff] %v2546_v57  ;;  %2580 = vst [vmem:[%s4019_s14 + $0xd0] sm:$0xff] %v2548_v58  ;;  %v2547_v61 = vmax.f32 %v2275_v55, %v2515_v59  ;;  %v2549_v62 = vmax.f32 %v2346_v56, %v2517_v60 }
 0x25a   : > { %2579 = vst [vmem:[%s4019_s14 + $0xc8] sm:$0xff] %v2547_v61  ;;  %2581 = vst [vmem:[%s4019_s14 + $0xd8] sm:$0xff] %v2549_v62 }
 0x26b   : > { %v2414_v63 = vpop.f32.mrf.mxu0  ;;  %v2485_v0 = vpop.f32.mrf.mxu1 }
 0x26c   : > { %v2415_v2 = vadd.f32 %v2414_v63, %v4010_v14  ;;  %v2486_v3 = vadd.f32 %v2485_v0, %v4010_v14 }
 0x26d   : > { %v2416_v4 = vpop.f32.mrf.mxu0  ;;  %v2487_v5 = vpop.f32.mrf.mxu1 }
 0x26e   : > { %v2518_v6 = vmul.f32 0.2, %v2415_v2  ;;  %v2520_v7 = vmul.f32 0.2, %v2486_v3  ;;  %v2417_v8 = vadd.f32 %v2416_v4, %v4010_v14  ;;  %v2488_v9 = vadd.f32 %v2487_v5, %v4010_v14 }
 0x270   : > { %v2550_v10 = vmax.f32 %v2415_v2, %v2518_v6  ;;  %v2552_v11 = vmax.f32 %v2486_v3, %v2520_v7  ;;  %v2519_v12 = vmul.f32 0.2, %v2417_v8  ;;  %v2521_v13 = vmul.f32 0.2, %v2488_v9 }
 0x272   : > { %2582 = vst [vmem:[%s4019_s14 + $0xe0] sm:$0xff] %v2550_v10  ;;  %2584 = vst [vmem:[%s4019_s14 + $0xf0] sm:$0xff] %v2552_v11  ;;  %v2551_v15 = vmax.f32 %v2417_v8, %v2519_v12  ;;  %v2553_v16 = vmax.f32 %v2488_v9, %v2521_v13 }
 0x274   : > { %2583 = vst [vmem:[%s4019_s14 + $0xe8] sm:$0xff] %v2551_v15  ;;  %2585 = vst [vmem:[%s4019_s14 + $0xf8] sm:$0xff] %v2553_v16 }
 0x275 PF: > { %p10_p9 = scmp.ge.s32.totalorder %s2769_s16, 6   ;;  %s4095_s12 = smov %s2724_s13 }
 0x276   : > { %s4096_s13 = smov %s2778_s19  ;;  %s4097_s14 = smov %s2769_s16 }
 0x277   :  { %12 = sbr.rel (!%p10_p9) target bundleno = 2 (0x2), region = 90 }

// kernel: discriminator_r_forward.7
= control target key start
LH: loop header
LB: loop body
LE: loop exit
PB: predicated region body
PF: predicated region fallthrough
CT: control target
= control target key end

     0   :  { %s1779_s18 = smov 0   ;;  %s1781_s19 = smov 0   ;;  %s3531_s0 = inlined_call_operand.vmem [shape: f32[16,128], index: 0, kind: input, shape index: {}]   ;;  %s3532_s1 = inlined_call_operand.vmem [shape: f32[16,1], index: 1, kind: input, shape index: {}]   ;;  %s3533_s2 = inlined_call_operand.vmem [shape: f32[16,1], index: 2, kind: input, shape index: {}]   ;;  %s3534_s3 = inlined_call_operand.vmem [shape: f32[16,1], index: 3, kind: input, shape index: {}]   ;;  %s3535_s4 = inlined_call_operand.vmem [shape: f32[128,4096], index: 4, kind: input, shape index: {}]   ;;  %s3536_s5 = inlined_call_operand.vmem [shape: f32[16,4096], index: 5, kind: output, shape index: {}]  }
   0x1   :  { %s1783_s20 = smov 0  }
   0x2 LB: > { %s1674_s21 = sadd.s32 4294967295, %s1744_s20   ;;  %s1796_s22 = sadd.s32 1, %s1744_s20   ;;  %s1744_s20 = sphi %s1783_s20, %s3650_s20   ;;  %s1740_s19 = sphi %s1781_s19, %s3649_s19   ;;  %s1736_s18 = sphi %s1779_s18, %s3648_s18  }
   0x3   : > { %s103_s23 = ssub.s32 %s1744_s20, %s1796_s22  ;;  %s106_s24 = sadd.s32 1, %s1740_s19 }
   0x4   : > { %p104_p0 = scmp.eq.s32.totalorder %s103_s23, 0  ;;  %p113_p1 = scmp.ne.s32.totalorder %s1740_s19, %s1736_s18 }
   0x5   : > { %p114_p2 = scmp.eq.s32.totalorder %s1744_s20, 0  ;;  %p1676_p4 = scmp.ge.s32.totalorder %s1744_s20, 4 }
   0x6   : > { %s1805_s25 = scalar_select %p104_p0, %s1740_s19, %s106_s24  }
   0x7   : > { %p115_p3 = por %p114_p2, %p113_p1  ;;  %172 = sbr.rel (%p1676_p4) target bundleno = 80 (0x50), region = 32 }
   0xc   : > { %175 = sbr.rel (!%p115_p3) target bundleno = 80 (0x50), region = 36  ;;  %s177_s26 = sand.u32 (%p115_p3), 1, %s1740_s19  }
   0xd   : > { %s1687_s27 = sshll.u32 (%p115_p3), %s1744_s20, 6  ;;  %s1677_s28 = sshll.u32 (%p115_p3), %s177_s26, 10 }
   0xe   : > { %s1813_s6 = scalar_lea.vmem (%p115_p3), %s3535_s4, %s1687_s27  ;;  %s1818_s7 = scalar_lea.vmem (%p115_p3), [#allocation2], %s1677_s28 }
   0xf   : > { %v195_v0 = vld [vmem:[%s1813_s6] sm:$0xff] (%p115_p3)  ;;  %v197_v1 = vld [vmem:[%s1813_s6 + $0x8] sm:$0xff] (%p115_p3)  ;;  %v199_v2 = vld [vmem:[%s1813_s6 + $0x10] sm:$0xff] (%p115_p3) }
  0x10   : > { %196 = vst [vmem:[%s1818_s7] sm:$0xff] (%p115_p3), %v195_v0  ;;  %198 = vst [vmem:[%s1818_s7 + $0x8] sm:$0xff] (%p115_p3), %v197_v1  ;;  %v201_v3 = vld [vmem:[%s1813_s6 + $0x18] sm:$0xff] (%p115_p3)  ;;  %v203_v4 = vld [vmem:[%s1813_s6 + $0x20] sm:$0xff] (%p115_p3) }
  0x11   : > { %200 = vst [vmem:[%s1818_s7 + $0x10] sm:$0xff] %v199_v2  ;;  %v205_v5 = vld [vmem:[%s1813_s6 + $0x28] sm:$0xff]  ;;  %202 = vst [vmem:[%s1818_s7 + $0x18] sm:$0xff] %v201_v3  ;;  %v207_v6 = vld [vmem:[%s1813_s6 + $0x30] sm:$0xff] }
  0x12   : > { %204 = vst [vmem:[%s1818_s7 + $0x20] sm:$0xff] %v203_v4  ;;  %206 = vst [vmem:[%s1818_s7 + $0x28] sm:$0xff] %v205_v5  ;;  %v209_v7 = vld [vmem:[%s1813_s6 + $0x38] sm:$0xff]  ;;  %v211_v8 = vld [vmem:[%s1813_s6 + $0x100] sm:$0xff] }
  0x13   : > { %208 = vst [vmem:[%s1818_s7 + $0x30] sm:$0xff] %v207_v6  ;;  %210 = vst [vmem:[%s1818_s7 + $0x38] sm:$0xff] %v209_v7  ;;  %v213_v9 = vld [vmem:[%s1813_s6 + $0x108] sm:$0xff]  ;;  %v215_v10 = vld [vmem:[%s1813_s6 + $0x110] sm:$0xff] }
  0x14   : > { %212 = vst [vmem:[%s1818_s7 + $0x40] sm:$0xff] %v211_v8  ;;  %v217_v11 = vld [vmem:[%s1813_s6 + $0x118] sm:$0xff]  ;;  %214 = vst [vmem:[%s1818_s7 + $0x48] sm:$0xff] %v213_v9  ;;  %v219_v12 = vld [vmem:[%s1813_s6 + $0x120] sm:$0xff] }
  0x15   : > { %216 = vst [vmem:[%s1818_s7 + $0x50] sm:$0xff] %v215_v10  ;;  %218 = vst [vmem:[%s1818_s7 + $0x58] sm:$0xff] %v217_v11  ;;  %v221_v13 = vld [vmem:[%s1813_s6 + $0x128] sm:$0xff]  ;;  %v223_v14 = vld [vmem:[%s1813_s6 + $0x130] sm:$0xff] }
  0x16   : > { %220 = vst [vmem:[%s1818_s7 + $0x60] sm:$0xff] %v219_v12  ;;  %222 = vst [vmem:[%s1818_s7 + $0x68] sm:$0xff] %v221_v13  ;;  %v225_v15 = vld [vmem:[%s1813_s6 + $0x138] sm:$0xff]  ;;  %v227_v16 = vld [vmem:[%s1813_s6 + $0x200] sm:$0xff] }
  0x17   : > { %224 = vst [vmem:[%s1818_s7 + $0x70] sm:$0xff] %v223_v14  ;;  %v229_v17 = vld [vmem:[%s1813_s6 + $0x208] sm:$0xff]  ;;  %226 = vst [vmem:[%s1818_s7 + $0x78] sm:$0xff] %v225_v15  ;;  %v231_v18 = vld [vmem:[%s1813_s6 + $0x210] sm:$0xff] }
  0x18   : > { %228 = vst [vmem:[%s1818_s7 + $0x80] sm:$0xff] %v227_v16  ;;  %230 = vst [vmem:[%s1818_s7 + $0x88] sm:$0xff] %v229_v17  ;;  %v233_v19 = vld [vmem:[%s1813_s6 + $0x218] sm:$0xff]  ;;  %v235_v20 = vld [vmem:[%s1813_s6 + $0x220] sm:$0xff] }
  0x19   : > { %232 = vst [vmem:[%s1818_s7 + $0x90] sm:$0xff] %v231_v18  ;;  %234 = vst [vmem:[%s1818_s7 + $0x98] sm:$0xff] %v233_v19  ;;  %v237_v21 = vld [vmem:[%s1813_s6 + $0x228] sm:$0xff]  ;;  %v239_v22 = vld [vmem:[%s1813_s6 + $0x230] sm:$0xff] }
  0x1a   : > { %236 = vst [vmem:[%s1818_s7 + $0xa0] sm:$0xff] %v235_v20  ;;  %v241_v23 = vld [vmem:[%s1813_s6 + $0x238] sm:$0xff]  ;;  %238 = vst [vmem:[%s1818_s7 + $0xa8] sm:$0xff] %v237_v21  ;;  %v243_v24 = vld [vmem:[%s1813_s6 + $0x300] sm:$0xff] }
  0x1b   : > { %240 = vst [vmem:[%s1818_s7 + $0xb0] sm:$0xff] %v239_v22  ;;  %242 = vst [vmem:[%s1818_s7 + $0xb8] sm:$0xff] %v241_v23  ;;  %v245_v25 = vld [vmem:[%s1813_s6 + $0x308] sm:$0xff]  ;;  %v247_v26 = vld [vmem:[%s1813_s6 + $0x310] sm:$0xff] }
  0x1c   : > { %244 = vst [vmem:[%s1818_s7 + $0xc0] sm:$0xff] %v243_v24  ;;  %246 = vst [vmem:[%s1818_s7 + $0xc8] sm:$0xff] %v245_v25  ;;  %v249_v27 = vld [vmem:[%s1813_s6 + $0x318] sm:$0xff]  ;;  %v251_v28 = vld [vmem:[%s1813_s6 + $0x320] sm:$0xff] }
  0x1d   : > { %248 = vst [vmem:[%s1818_s7 + $0xd0] sm:$0xff] %v247_v26  ;;  %v253_v29 = vld [vmem:[%s1813_s6 + $0x328] sm:$0xff]  ;;  %250 = vst [vmem:[%s1818_s7 + $0xd8] sm:$0xff] %v249_v27  ;;  %v255_v30 = vld [vmem:[%s1813_s6 + $0x330] sm:$0xff] }
  0x1e   : > { %252 = vst [vmem:[%s1818_s7 + $0xe0] sm:$0xff] %v251_v28  ;;  %254 = vst [vmem:[%s1818_s7 + $0xe8] sm:$0xff] %v253_v29  ;;  %v257_v31 = vld [vmem:[%s1813_s6 + $0x338] sm:$0xff]  ;;  %v259_v32 = vld [vmem:[%s1813_s6 + $0x400] sm:$0xff] }
  0x1f   : > { %256 = vst [vmem:[%s1818_s7 + $0xf0] sm:$0xff] %v255_v30  ;;  %258 = vst [vmem:[%s1818_s7 + $0xf8] sm:$0xff] %v257_v31  ;;  %v261_v33 = vld [vmem:[%s1813_s6 + $0x408] sm:$0xff]  ;;  %v263_v34 = vld [vmem:[%s1813_s6 + $0x410] sm:$0xff] }
  0x20   : > { %260 = vst [vmem:[%s1818_s7 + $0x100] sm:$0xff] %v259_v32  ;;  %v265_v35 = vld [vmem:[%s1813_s6 + $0x418] sm:$0xff]  ;;  %262 = vst [vmem:[%s1818_s7 + $0x108] sm:$0xff] %v261_v33  ;;  %v267_v36 = vld [vmem:[%s1813_s6 + $0x420] sm:$0xff] }
  0x21   : > { %264 = vst [vmem:[%s1818_s7 + $0x110] sm:$0xff] %v263_v34  ;;  %266 = vst [vmem:[%s1818_s7 + $0x118] sm:$0xff] %v265_v35  ;;  %v269_v37 = vld [vmem:[%s1813_s6 + $0x428] sm:$0xff]  ;;  %v271_v38 = vld [vmem:[%s1813_s6 + $0x430] sm:$0xff] }
  0x22   : > { %268 = vst [vmem:[%s1818_s7 + $0x120] sm:$0xff] %v267_v36  ;;  %270 = vst [vmem:[%s1818_s7 + $0x128] sm:$0xff] %v269_v37  ;;  %v273_v39 = vld [vmem:[%s1813_s6 + $0x438] sm:$0xff]  ;;  %v275_v40 = vld [vmem:[%s1813_s6 + $0x500] sm:$0xff] }
  0x23   : > { %272 = vst [vmem:[%s1818_s7 + $0x130] sm:$0xff] %v271_v38  ;;  %v277_v41 = vld [vmem:[%s1813_s6 + $0x508] sm:$0xff]  ;;  %274 = vst [vmem:[%s1818_s7 + $0x138] sm:$0xff] %v273_v39  ;;  %v279_v42 = vld [vmem:[%s1813_s6 + $0x510] sm:$0xff] }
  0x24   : > { %276 = vst [vmem:[%s1818_s7 + $0x140] sm:$0xff] %v275_v40  ;;  %278 = vst [vmem:[%s1818_s7 + $0x148] sm:$0xff] %v277_v41  ;;  %v281_v43 = vld [vmem:[%s1813_s6 + $0x518] sm:$0xff]  ;;  %v283_v44 = vld [vmem:[%s1813_s6 + $0x520] sm:$0xff] }
  0x25   : > { %280 = vst [vmem:[%s1818_s7 + $0x150] sm:$0xff] %v279_v42  ;;  %282 = vst [vmem:[%s1818_s7 + $0x158] sm:$0xff] %v281_v43  ;;  %v285_v45 = vld [vmem:[%s1813_s6 + $0x528] sm:$0xff]  ;;  %v287_v46 = vld [vmem:[%s1813_s6 + $0x530] sm:$0xff] }
  0x26   : > { %284 = vst [vmem:[%s1818_s7 + $0x160] sm:$0xff] %v283_v44  ;;  %v289_v47 = vld [vmem:[%s1813_s6 + $0x538] sm:$0xff]  ;;  %286 = vst [vmem:[%s1818_s7 + $0x168] sm:$0xff] %v285_v45  ;;  %v291_v48 = vld [vmem:[%s1813_s6 + $0x600] sm:$0xff] }
  0x27   : > { %288 = vst [vmem:[%s1818_s7 + $0x170] sm:$0xff] %v287_v46  ;;  %290 = vst [vmem:[%s1818_s7 + $0x178] sm:$0xff] %v289_v47  ;;  %v293_v49 = vld [vmem:[%s1813_s6 + $0x608] sm:$0xff]  ;;  %v295_v50 = vld [vmem:[%s1813_s6 + $0x610] sm:$0xff] }
  0x28   : > { %292 = vst [vmem:[%s1818_s7 + $0x180] sm:$0xff] %v291_v48  ;;  %294 = vst [vmem:[%s1818_s7 + $0x188] sm:$0xff] %v293_v49  ;;  %v297_v51 = vld [vmem:[%s1813_s6 + $0x618] sm:$0xff]  ;;  %v299_v52 = vld [vmem:[%s1813_s6 + $0x620] sm:$0xff] }
  0x29   : > { %296 = vst [vmem:[%s1818_s7 + $0x190] sm:$0xff] %v295_v50  ;;  %v301_v53 = vld [vmem:[%s1813_s6 + $0x628] sm:$0xff]  ;;  %298 = vst [vmem:[%s1818_s7 + $0x198] sm:$0xff] %v297_v51  ;;  %v303_v54 = vld [vmem:[%s1813_s6 + $0x630] sm:$0xff] }
  0x2a   : > { %300 = vst [vmem:[%s1818_s7 + $0x1a0] sm:$0xff] %v299_v52  ;;  %302 = vst [vmem:[%s1818_s7 + $0x1a8] sm:$0xff] %v301_v53  ;;  %v305_v55 = vld [vmem:[%s1813_s6 + $0x638] sm:$0xff]  ;;  %v307_v56 = vld [vmem:[%s1813_s6 + $0x700] sm:$0xff] }
  0x2b   : > { %304 = vst [vmem:[%s1818_s7 + $0x1b0] sm:$0xff] %v303_v54  ;;  %306 = vst [vmem:[%s1818_s7 + $0x1b8] sm:$0xff] %v305_v55  ;;  %v309_v57 = vld [vmem:[%s1813_s6 + $0x708] sm:$0xff]  ;;  %v311_v58 = vld [vmem:[%s1813_s6 + $0x710] sm:$0xff] }
  0x2c   : > { %308 = vst [vmem:[%s1818_s7 + $0x1c0] sm:$0xff] %v307_v56  ;;  %v313_v59 = vld [vmem:[%s1813_s6 + $0x718] sm:$0xff]  ;;  %310 = vst [vmem:[%s1818_s7 + $0x1c8] sm:$0xff] %v309_v57  ;;  %v315_v60 = vld [vmem:[%s1813_s6 + $0x720] sm:$0xff] }
  0x2d   : > { %312 = vst [vmem:[%s1818_s7 + $0x1d0] sm:$0xff] %v311_v58  ;;  %314 = vst [vmem:[%s1818_s7 + $0x1d8] sm:$0xff] %v313_v59  ;;  %v317_v61 = vld [vmem:[%s1813_s6 + $0x728] sm:$0xff]  ;;  %v319_v62 = vld [vmem:[%s1813_s6 + $0x730] sm:$0xff] }
  0x2e   : > { %316 = vst [vmem:[%s1818_s7 + $0x1e0] sm:$0xff] %v315_v60  ;;  %318 = vst [vmem:[%s1818_s7 + $0x1e8] sm:$0xff] %v317_v61  ;;  %v321_v63 = vld [vmem:[%s1813_s6 + $0x738] sm:$0xff]  ;;  %v323_v0 = vld [vmem:[%s1813_s6 + $0x800] sm:$0xff] }
  0x2f   : > { %320 = vst [vmem:[%s1818_s7 + $0x1f0] sm:$0xff] %v319_v62  ;;  %v325_v1 = vld [vmem:[%s1813_s6 + $0x808] sm:$0xff]  ;;  %322 = vst [vmem:[%s1818_s7 + $0x1f8] sm:$0xff] %v321_v63  ;;  %v327_v2 = vld [vmem:[%s1813_s6 + $0x810] sm:$0xff] }
  0x30   : > { %324 = vst [vmem:[%s1818_s7 + $0x200] sm:$0xff] %v323_v0  ;;  %326 = vst [vmem:[%s1818_s7 + $0x208] sm:$0xff] %v325_v1  ;;  %v329_v3 = vld [vmem:[%s1813_s6 + $0x818] sm:$0xff]  ;;  %v331_v4 = vld [vmem:[%s1813_s6 + $0x820] sm:$0xff] }
  0x31   : > { %328 = vst [vmem:[%s1818_s7 + $0x210] sm:$0xff] %v327_v2  ;;  %330 = vst [vmem:[%s1818_s7 + $0x218] sm:$0xff] %v329_v3  ;;  %v333_v5 = vld [vmem:[%s1813_s6 + $0x828] sm:$0xff]  ;;  %v335_v6 = vld [vmem:[%s1813_s6 + $0x830] sm:$0xff] }
  0x32   : > { %332 = vst [vmem:[%s1818_s7 + $0x220] sm:$0xff] %v331_v4  ;;  %v337_v7 = vld [vmem:[%s1813_s6 + $0x838] sm:$0xff]  ;;  %334 = vst [vmem:[%s1818_s7 + $0x228] sm:$0xff] %v333_v5  ;;  %v339_v8 = vld [vmem:[%s1813_s6 + $0x900] sm:$0xff] }
  0x33   : > { %336 = vst [vmem:[%s1818_s7 + $0x230] sm:$0xff] %v335_v6  ;;  %338 = vst [vmem:[%s1818_s7 + $0x238] sm:$0xff] %v337_v7  ;;  %v341_v9 = vld [vmem:[%s1813_s6 + $0x908] sm:$0xff]  ;;  %v343_v10 = vld [vmem:[%s1813_s6 + $0x910] sm:$0xff] }
  0x34   : > { %340 = vst [vmem:[%s1818_s7 + $0x240] sm:$0xff] %v339_v8  ;;  %342 = vst [vmem:[%s1818_s7 + $0x248] sm:$0xff] %v341_v9  ;;  %v345_v11 = vld [vmem:[%s1813_s6 + $0x918] sm:$0xff]  ;;  %v347_v12 = vld [vmem:[%s1813_s6 + $0x920] sm:$0xff] }
  0x35   : > { %344 = vst [vmem:[%s1818_s7 + $0x250] sm:$0xff] %v343_v10  ;;  %v349_v13 = vld [vmem:[%s1813_s6 + $0x928] sm:$0xff]  ;;  %346 = vst [vmem:[%s1818_s7 + $0x258] sm:$0xff] %v345_v11  ;;  %v351_v14 = vld [vmem:[%s1813_s6 + $0x930] sm:$0xff] }
  0x36   : > { %348 = vst [vmem:[%s1818_s7 + $0x260] sm:$0xff] %v347_v12  ;;  %350 = vst [vmem:[%s1818_s7 + $0x268] sm:$0xff] %v349_v13  ;;  %v353_v15 = vld [vmem:[%s1813_s6 + $0x938] sm:$0xff]  ;;  %v355_v16 = vld [vmem:[%s1813_s6 + $0xa00] sm:$0xff] }
  0x37   : > { %352 = vst [vmem:[%s1818_s7 + $0x270] sm:$0xff] %v351_v14  ;;  %354 = vst [vmem:[%s1818_s7 + $0x278] sm:$0xff] %v353_v15  ;;  %v357_v17 = vld [vmem:[%s1813_s6 + $0xa08] sm:$0xff]  ;;  %v359_v18 = vld [vmem:[%s1813_s6 + $0xa10] sm:$0xff] }
  0x38   : > { %356 = vst [vmem:[%s1818_s7 + $0x280] sm:$0xff] %v355_v16  ;;  %v361_v19 = vld [vmem:[%s1813_s6 + $0xa18] sm:$0xff]  ;;  %358 = vst [vmem:[%s1818_s7 + $0x288] sm:$0xff] %v357_v17  ;;  %v363_v20 = vld [vmem:[%s1813_s6 + $0xa20] sm:$0xff] }
  0x39   : > { %360 = vst [vmem:[%s1818_s7 + $0x290] sm:$0xff] %v359_v18  ;;  %362 = vst [vmem:[%s1818_s7 + $0x298] sm:$0xff] %v361_v19  ;;  %v365_v21 = vld [vmem:[%s1813_s6 + $0xa28] sm:$0xff]  ;;  %v367_v22 = vld [vmem:[%s1813_s6 + $0xa30] sm:$0xff] }
  0x3a   : > { %364 = vst [vmem:[%s1818_s7 + $0x2a0] sm:$0xff] %v363_v20  ;;  %366 = vst [vmem:[%s1818_s7 + $0x2a8] sm:$0xff] %v365_v21  ;;  %v369_v23 = vld [vmem:[%s1813_s6 + $0xa38] sm:$0xff]  ;;  %v371_v24 = vld [vmem:[%s1813_s6 + $0xb00] sm:$0xff] }
  0x3b   : > { %368 = vst [vmem:[%s1818_s7 + $0x2b0] sm:$0xff] %v367_v22  ;;  %v373_v25 = vld [vmem:[%s1813_s6 + $0xb08] sm:$0xff]  ;;  %370 = vst [vmem:[%s1818_s7 + $0x2b8] sm:$0xff] %v369_v23  ;;  %v375_v26 = vld [vmem:[%s1813_s6 + $0xb10] sm:$0xff] }
  0x3c   : > { %372 = vst [vmem:[%s1818_s7 + $0x2c0] sm:$0xff] %v371_v24  ;;  %374 = vst [vmem:[%s1818_s7 + $0x2c8] sm:$0xff] %v373_v25  ;;  %v377_v27 = vld [vmem:[%s1813_s6 + $0xb18] sm:$0xff]  ;;  %v379_v28 = vld [vmem:[%s1813_s6 + $0xb20] sm:$0xff] }
  0x3d   : > { %376 = vst [vmem:[%s1818_s7 + $0x2d0] sm:$0xff] %v375_v26  ;;  %378 = vst [vmem:[%s1818_s7 + $0x2d8] sm:$0xff] %v377_v27  ;;  %v381_v29 = vld [vmem:[%s1813_s6 + $0xb28] sm:$0xff]  ;;  %v383_v30 = vld [vmem:[%s1813_s6 + $0xb30] sm:$0xff] }
  0x3e   : > { %380 = vst [vmem:[%s1818_s7 + $0x2e0] sm:$0xff] %v379_v28  ;;  %v385_v31 = vld [vmem:[%s1813_s6 + $0xb38] sm:$0xff]  ;;  %382 = vst [vmem:[%s1818_s7 + $0x2e8] sm:$0xff] %v381_v29  ;;  %v387_v32 = vld [vmem:[%s1813_s6 + $0xc00] sm:$0xff] }
  0x3f   : > { %384 = vst [vmem:[%s1818_s7 + $0x2f0] sm:$0xff] %v383_v30  ;;  %386 = vst [vmem:[%s1818_s7 + $0x2f8] sm:$0xff] %v385_v31  ;;  %v389_v33 = vld [vmem:[%s1813_s6 + $0xc08] sm:$0xff]  ;;  %v391_v34 = vld [vmem:[%s1813_s6 + $0xc10] sm:$0xff] }
  0x40   : > { %388 = vst [vmem:[%s1818_s7 + $0x300] sm:$0xff] %v387_v32  ;;  %390 = vst [vmem:[%s1818_s7 + $0x308] sm:$0xff] %v389_v33  ;;  %v393_v35 = vld [vmem:[%s1813_s6 + $0xc18] sm:$0xff]  ;;  %v395_v36 = vld [vmem:[%s1813_s6 + $0xc20] sm:$0xff] }
  0x41   : > { %392 = vst [vmem:[%s1818_s7 + $0x310] sm:$0xff] %v391_v34  ;;  %v397_v37 = vld [vmem:[%s1813_s6 + $0xc28] sm:$0xff]  ;;  %394 = vst [vmem:[%s1818_s7 + $0x318] sm:$0xff] %v393_v35  ;;  %v399_v38 = vld [vmem:[%s1813_s6 + $0xc30] sm:$0xff] }
  0x42   : > { %396 = vst [vmem:[%s1818_s7 + $0x320] sm:$0xff] %v395_v36  ;;  %398 = vst [vmem:[%s1818_s7 + $0x328] sm:$0xff] %v397_v37  ;;  %v401_v39 = vld [vmem:[%s1813_s6 + $0xc38] sm:$0xff]  ;;  %v403_v40 = vld [vmem:[%s1813_s6 + $0xd00] sm:$0xff] }
  0x43   : > { %400 = vst [vmem:[%s1818_s7 + $0x330] sm:$0xff] %v399_v38  ;;  %402 = vst [vmem:[%s1818_s7 + $0x338] sm:$0xff] %v401_v39  ;;  %v405_v41 = vld [vmem:[%s1813_s6 + $0xd08] sm:$0xff]  ;;  %v407_v42 = vld [vmem:[%s1813_s6 + $0xd10] sm:$0xff] }
  0x44   : > { %404 = vst [vmem:[%s1818_s7 + $0x340] sm:$0xff] %v403_v40  ;;  %v409_v43 = vld [vmem:[%s1813_s6 + $0xd18] sm:$0xff]  ;;  %406 = vst [vmem:[%s1818_s7 + $0x348] sm:$0xff] %v405_v41  ;;  %v411_v44 = vld [vmem:[%s1813_s6 + $0xd20] sm:$0xff] }
  0x45   : > { %408 = vst [vmem:[%s1818_s7 + $0x350] sm:$0xff] %v407_v42  ;;  %410 = vst [vmem:[%s1818_s7 + $0x358] sm:$0xff] %v409_v43  ;;  %v413_v45 = vld [vmem:[%s1813_s6 + $0xd28] sm:$0xff]  ;;  %v415_v46 = vld [vmem:[%s1813_s6 + $0xd30] sm:$0xff] }
  0x46   : > { %412 = vst [vmem:[%s1818_s7 + $0x360] sm:$0xff] %v411_v44  ;;  %414 = vst [vmem:[%s1818_s7 + $0x368] sm:$0xff] %v413_v45  ;;  %v417_v47 = vld [vmem:[%s1813_s6 + $0xd38] sm:$0xff]  ;;  %v419_v48 = vld [vmem:[%s1813_s6 + $0xe00] sm:$0xff] }
  0x47   : > { %416 = vst [vmem:[%s1818_s7 + $0x370] sm:$0xff] %v415_v46  ;;  %v421_v49 = vld [vmem:[%s1813_s6 + $0xe08] sm:$0xff]  ;;  %418 = vst [vmem:[%s1818_s7 + $0x378] sm:$0xff] %v417_v47  ;;  %v423_v50 = vld [vmem:[%s1813_s6 + $0xe10] sm:$0xff] }
  0x48   : > { %420 = vst [vmem:[%s1818_s7 + $0x380] sm:$0xff] %v419_v48  ;;  %422 = vst [vmem:[%s1818_s7 + $0x388] sm:$0xff] %v421_v49  ;;  %v425_v51 = vld [vmem:[%s1813_s6 + $0xe18] sm:$0xff]  ;;  %v427_v52 = vld [vmem:[%s1813_s6 + $0xe20] sm:$0xff] }
  0x49   : > { %424 = vst [vmem:[%s1818_s7 + $0x390] sm:$0xff] %v423_v50  ;;  %426 = vst [vmem:[%s1818_s7 + $0x398] sm:$0xff] %v425_v51  ;;  %v429_v53 = vld [vmem:[%s1813_s6 + $0xe28] sm:$0xff]  ;;  %v431_v54 = vld [vmem:[%s1813_s6 + $0xe30] sm:$0xff] }
  0x4a   : > { %428 = vst [vmem:[%s1818_s7 + $0x3a0] sm:$0xff] %v427_v52  ;;  %v433_v55 = vld [vmem:[%s1813_s6 + $0xe38] sm:$0xff]  ;;  %430 = vst [vmem:[%s1818_s7 + $0x3a8] sm:$0xff] %v429_v53  ;;  %v435_v56 = vld [vmem:[%s1813_s6 + $0xf00] sm:$0xff] }
  0x4b   : > { %432 = vst [vmem:[%s1818_s7 + $0x3b0] sm:$0xff] %v431_v54  ;;  %434 = vst [vmem:[%s1818_s7 + $0x3b8] sm:$0xff] %v433_v55  ;;  %v437_v57 = vld [vmem:[%s1813_s6 + $0xf08] sm:$0xff]  ;;  %v439_v58 = vld [vmem:[%s1813_s6 + $0xf10] sm:$0xff] }
  0x4c   : > { %436 = vst [vmem:[%s1818_s7 + $0x3c0] sm:$0xff] %v435_v56  ;;  %438 = vst [vmem:[%s1818_s7 + $0x3c8] sm:$0xff] %v437_v57  ;;  %v441_v59 = vld [vmem:[%s1813_s6 + $0xf18] sm:$0xff]  ;;  %v443_v60 = vld [vmem:[%s1813_s6 + $0xf20] sm:$0xff] }
  0x4d   : > { %440 = vst [vmem:[%s1818_s7 + $0x3d0] sm:$0xff] %v439_v58  ;;  %v445_v61 = vld [vmem:[%s1813_s6 + $0xf28] sm:$0xff]  ;;  %442 = vst [vmem:[%s1818_s7 + $0x3d8] sm:$0xff] %v441_v59  ;;  %v447_v62 = vld [vmem:[%s1813_s6 + $0xf30] sm:$0xff] }
  0x4e   : > { %444 = vst [vmem:[%s1818_s7 + $0x3e0] sm:$0xff] %v443_v60  ;;  %446 = vst [vmem:[%s1818_s7 + $0x3e8] sm:$0xff] %v445_v61  ;;  %v449_v63 = vld [vmem:[%s1813_s6 + $0xf38] sm:$0xff] }
  0x4f   : > { %448 = vst [vmem:[%s1818_s7 + $0x3f0] sm:$0xff] %v447_v62  ;;  %450 = vst [vmem:[%s1818_s7 + $0x3f8] sm:$0xff] %v449_v63 }
  0x50 PF: > { %p1680_p5 = scmp.ge.s32.totalorder %s1744_s20, 1  ;;  %p455_p6 = scmp.lt.s32.totalorder %s1744_s20, 5 }
  0x52   : > { %p456_p7 = pnand %p1680_p5, %p455_p6 }
  0x53   : > { %s462_s8 = sand.u32 (!%p456_p7), 1, %s1736_s18   ;;  %s1682_s23 = sshll.u32 (!%p456_p7), %s1674_s21, 10 }
  0x54   : > { %459 = sbr.rel (%p456_p7) target bundleno = 995 (0x3e3), region = 59  ;;  %s1681_s11 = sshll.u32 (!%p456_p7), %s462_s8, 10 }
  0x55   : > { %s2081_s12 = scalar_lea.vmem (!%p456_p7), [#allocation2], %s1681_s11  ;;  %s936_s24 = sshra.s32 (!%p456_p7), %s1682_s23, 7 }
  0x56   : > { %s1683_s26 = sshll.u32 (!%p456_p7), %s936_s24, 3  ;;  %p1684_p8 = scmp.ne.s32.totalorder (!%p456_p7), %s1674_s21, 3 }
  0x57   : > { %s2237_s29 = scalar_lea.vmem (!%p456_p7), %s3536_s5, %s1683_s26 }
  0x59   : > { %v615_v0 = vld [vmem:[%s3532_s1] sm:$0xff]  ;;  %v1746_v1 = vmov 0.0   ;;  %v1747_v2 = vmov 0   ;;  %v608_v3 = vld [vmem:[%s2081_s12 + $0x3c8] sm:$0xff]  ;;  %v610_v4 = vld [vmem:[%s2081_s12 + $0x3d8] sm:$0xff] }
  0x5a   : > { %691 = vmatprep.mubr.f32.mxu0 %v1746_v1  ;;  %768 = vmatprep.mubr.f32.mxu1 %v1746_v1  ;;  %v607_v5 = vld [vmem:[%s2081_s12 + $0x3c0] sm:$0xff]  ;;  %v609_v6 = vld [vmem:[%s2081_s12 + $0x3d0] sm:$0xff]  ;;  %v600_v7 = vld [vmem:[%s2081_s12 + $0x388] sm:$0xff] }
  0x5b   : > { %1715 = vset.pattern.permute.xlu0 %v1747_v2  ;;  %627 = vmatprep.subr.mxu0 %v608_v3  ;;  %v602_v8 = vld [vmem:[%s2081_s12 + $0x398] sm:$0xff]  ;;  %v599_v9 = vld [vmem:[%s2081_s12 + $0x380] sm:$0xff]  ;;  %v601_v10 = vld [vmem:[%s2081_s12 + $0x390] sm:$0xff] }
  0x5c   : > { %619 = vperm.xlu0 %1715, %v615_v0   ;;  %704 = vmatprep.subr.mxu1 %v610_v4  ;;  %v592_v11 = vld [vmem:[%s2081_s12 + $0x348] sm:$0xff]  ;;  %v594_v12 = vld [vmem:[%s2081_s12 + $0x358] sm:$0xff]  ;;  %v591_v13 = vld [vmem:[%s2081_s12 + $0x340] sm:$0xff] }
  0x5d   : > { %628 = vmatpush1.msra.mxu0 %v607_v5  ;;  %705 = vmatpush1.msra.mxu1 %v609_v6  ;;  %v593_v14 = vld [vmem:[%s2081_s12 + $0x350] sm:$0xff]  ;;  %v584_v15 = vld [vmem:[%s2081_s12 + $0x308] sm:$0xff]  ;;  %v586_v16 = vld [vmem:[%s2081_s12 + $0x318] sm:$0xff] }
  0x5e   : > { %629 = vmatprep.subr.mxu0 %v600_v7  ;;  %706 = vmatprep.subr.mxu1 %v602_v8  ;;  %v583_v17 = vld [vmem:[%s2081_s12 + $0x300] sm:$0xff]  ;;  %v585_v18 = vld [vmem:[%s2081_s12 + $0x310] sm:$0xff]  ;;  %v576_v19 = vld [vmem:[%s2081_s12 + $0x2c8] sm:$0xff] }
  0x5f   : > { %630 = vmatpush1.msra.mxu0 %v599_v9  ;;  %707 = vmatpush1.msra.mxu1 %v601_v10  ;;  %v578_v20 = vld [vmem:[%s2081_s12 + $0x2d8] sm:$0xff]  ;;  %v575_v21 = vld [vmem:[%s2081_s12 + $0x2c0] sm:$0xff]  ;;  %v577_v22 = vld [vmem:[%s2081_s12 + $0x2d0] sm:$0xff] }
  0x60   : > { %631 = vmatprep.subr.mxu0 %v592_v11  ;;  %708 = vmatprep.subr.mxu1 %v594_v12  ;;  %v568_v23 = vld [vmem:[%s2081_s12 + $0x288] sm:$0xff]  ;;  %v570_v24 = vld [vmem:[%s2081_s12 + $0x298] sm:$0xff]  ;;  %v567_v25 = vld [vmem:[%s2081_s12 + $0x280] sm:$0xff] }
  0x61   : > { %632 = vmatpush1.msra.mxu0 %v591_v13  ;;  %709 = vmatpush1.msra.mxu1 %v593_v14  ;;  %v569_v26 = vld [vmem:[%s2081_s12 + $0x290] sm:$0xff]  ;;  %v560_v27 = vld [vmem:[%s2081_s12 + $0x248] sm:$0xff]  ;;  %v562_v28 = vld [vmem:[%s2081_s12 + $0x258] sm:$0xff] }
  0x62   : > { %633 = vmatprep.subr.mxu0 %v584_v15  ;;  %710 = vmatprep.subr.mxu1 %v586_v16  ;;  %v559_v29 = vld [vmem:[%s2081_s12 + $0x240] sm:$0xff]  ;;  %v561_v30 = vld [vmem:[%s2081_s12 + $0x250] sm:$0xff]  ;;  %v552_v31 = vld [vmem:[%s2081_s12 + $0x208] sm:$0xff] }
  0x63   : > { %634 = vmatpush1.msra.mxu0 %v583_v17  ;;  %711 = vmatpush1.msra.mxu1 %v585_v18  ;;  %v554_v32 = vld [vmem:[%s2081_s12 + $0x218] sm:$0xff]  ;;  %v551_v33 = vld [vmem:[%s2081_s12 + $0x200] sm:$0xff]  ;;  %v553_v34 = vld [vmem:[%s2081_s12 + $0x210] sm:$0xff] }
  0x64   : > { %635 = vmatprep.subr.mxu0 %v576_v19  ;;  %712 = vmatprep.subr.mxu1 %v578_v20  ;;  %v544_v35 = vld [vmem:[%s2081_s12 + $0x1c8] sm:$0xff]  ;;  %v546_v36 = vld [vmem:[%s2081_s12 + $0x1d8] sm:$0xff]  ;;  %v543_v37 = vld [vmem:[%s2081_s12 + $0x1c0] sm:$0xff] }
  0x65   : > { %636 = vmatpush1.msra.mxu0 %v575_v21  ;;  %713 = vmatpush1.msra.mxu1 %v577_v22  ;;  %v545_v38 = vld [vmem:[%s2081_s12 + $0x1d0] sm:$0xff]  ;;  %v536_v39 = vld [vmem:[%s2081_s12 + $0x188] sm:$0xff]  ;;  %v538_v40 = vld [vmem:[%s2081_s12 + $0x198] sm:$0xff] }
  0x66   : > { %637 = vmatprep.subr.mxu0 %v568_v23  ;;  %714 = vmatprep.subr.mxu1 %v570_v24  ;;  %v535_v41 = vld [vmem:[%s2081_s12 + $0x180] sm:$0xff]  ;;  %v537_v42 = vld [vmem:[%s2081_s12 + $0x190] sm:$0xff]  ;;  %v528_v43 = vld [vmem:[%s2081_s12 + $0x148] sm:$0xff] }
  0x67   : > { %638 = vmatpush1.msra.mxu0 %v567_v25  ;;  %715 = vmatpush1.msra.mxu1 %v569_v26  ;;  %v530_v44 = vld [vmem:[%s2081_s12 + $0x158] sm:$0xff]  ;;  %v527_v45 = vld [vmem:[%s2081_s12 + $0x140] sm:$0xff]  ;;  %v529_v46 = vld [vmem:[%s2081_s12 + $0x150] sm:$0xff] }
  0x68   : > { %639 = vmatprep.subr.mxu0 %v560_v27  ;;  %716 = vmatprep.subr.mxu1 %v562_v28  ;;  %v520_v47 = vld [vmem:[%s2081_s12 + $0x108] sm:$0xff]  ;;  %v522_v48 = vld [vmem:[%s2081_s12 + $0x118] sm:$0xff]  ;;  %v519_v49 = vld [vmem:[%s2081_s12 + $0x100] sm:$0xff] }
  0x69   : > { %640 = vmatpush1.msra.mxu0 %v559_v29  ;;  %717 = vmatpush1.msra.mxu1 %v561_v30  ;;  %v521_v50 = vld [vmem:[%s2081_s12 + $0x110] sm:$0xff]  ;;  %v512_v51 = vld [vmem:[%s2081_s12 + $0xc8] sm:$0xff]  ;;  %v514_v52 = vld [vmem:[%s2081_s12 + $0xd8] sm:$0xff] }
  0x6a   : > { %641 = vmatprep.subr.mxu0 %v552_v31  ;;  %718 = vmatprep.subr.mxu1 %v554_v32  ;;  %v511_v53 = vld [vmem:[%s2081_s12 + $0xc0] sm:$0xff]  ;;  %v513_v54 = vld [vmem:[%s2081_s12 + $0xd0] sm:$0xff]  ;;  %v504_v55 = vld [vmem:[%s2081_s12 + $0x88] sm:$0xff] }
  0x6b   : > { %642 = vmatpush1.msra.mxu0 %v551_v33  ;;  %719 = vmatpush1.msra.mxu1 %v553_v34  ;;  %v506_v56 = vld [vmem:[%s2081_s12 + $0x98] sm:$0xff]  ;;  %v503_v57 = vld [vmem:[%s2081_s12 + $0x80] sm:$0xff]  ;;  %v505_v58 = vld [vmem:[%s2081_s12 + $0x90] sm:$0xff] }
  0x6c   : > { %643 = vmatprep.subr.mxu0 %v544_v35  ;;  %720 = vmatprep.subr.mxu1 %v546_v36  ;;  %v496_v59 = vld [vmem:[%s2081_s12 + $0x48] sm:$0xff]  ;;  %v498_v60 = vld [vmem:[%s2081_s12 + $0x58] sm:$0xff]  ;;  %v495_v61 = vld [vmem:[%s2081_s12 + $0x40] sm:$0xff] }
  0x6d   : > { %644 = vmatpush1.msra.mxu0 %v543_v37  ;;  %721 = vmatpush1.msra.mxu1 %v545_v38  ;;  %v497_v62 = vld [vmem:[%s2081_s12 + $0x50] sm:$0xff]  ;;  %v488_v63 = vld [vmem:[%s2081_s12 + $0x8] sm:$0xff]  ;;  %v490_v0 = vld [vmem:[%s2081_s12 + $0x18] sm:$0xff] }
  0x6e   : > { %645 = vmatprep.subr.mxu0 %v536_v39  ;;  %722 = vmatprep.subr.mxu1 %v538_v40  ;;  %v487_v2 = vld [vmem:[%s2081_s12] sm:$0xff]  ;;  %v489_v3 = vld [vmem:[%s2081_s12 + $0x10] sm:$0xff]  ;;  %v612_v5 = vld [vmem:[%s2081_s12 + $0x3e8] sm:$0xff] }
  0x6f   : > { %646 = vmatpush1.msra.mxu0 %v535_v41  ;;  %723 = vmatpush1.msra.mxu1 %v537_v42  ;;  %v2150_v4 = vld [vmem:[%s3531_s0] sm:$0xff]  ;;  %v614_v6 = vld [vmem:[%s2081_s12 + $0x3f8] sm:$0xff]  ;;  %v613_v8 = vld [vmem:[%s2081_s12 + $0x3f0] sm:$0xff] }
  0x70   : > { %647 = vmatprep.subr.mxu0 %v528_v43  ;;  %724 = vmatprep.subr.mxu1 %v530_v44  ;;  %v611_v7 = vld [vmem:[%s2081_s12 + $0x3e0] sm:$0xff]  ;;  %v604_v9 = vld [vmem:[%s2081_s12 + $0x3a8] sm:$0xff]  ;;  %v606_v10 = vld [vmem:[%s2081_s12 + $0x3b8] sm:$0xff] }
  0x71   : > { %648 = vmatpush1.msra.mxu0 %v527_v45  ;;  %725 = vmatpush1.msra.mxu1 %v529_v46  ;;  %v603_v11 = vld [vmem:[%s2081_s12 + $0x3a0] sm:$0xff]  ;;  %v605_v12 = vld [vmem:[%s2081_s12 + $0x3b0] sm:$0xff]  ;;  %v596_v13 = vld [vmem:[%s2081_s12 + $0x368] sm:$0xff] }
  0x72   : > { %649 = vmatprep.subr.mxu0 %v520_v47  ;;  %726 = vmatprep.subr.mxu1 %v522_v48  ;;  %v598_v14 = vld [vmem:[%s2081_s12 + $0x378] sm:$0xff]  ;;  %v595_v15 = vld [vmem:[%s2081_s12 + $0x360] sm:$0xff]  ;;  %v597_v16 = vld [vmem:[%s2081_s12 + $0x370] sm:$0xff] }
  0x73   : > { %650 = vmatpush1.msra.mxu0 %v519_v49  ;;  %727 = vmatpush1.msra.mxu1 %v521_v50  ;;  %v588_v17 = vld [vmem:[%s2081_s12 + $0x328] sm:$0xff]  ;;  %v590_v18 = vld [vmem:[%s2081_s12 + $0x338] sm:$0xff]  ;;  %v587_v19 = vld [vmem:[%s2081_s12 + $0x320] sm:$0xff] }
  0x74   : > { %651 = vmatprep.subr.mxu0 %v512_v51  ;;  %728 = vmatprep.subr.mxu1 %v514_v52  ;;  %v589_v20 = vld [vmem:[%s2081_s12 + $0x330] sm:$0xff]  ;;  %v580_v21 = vld [vmem:[%s2081_s12 + $0x2e8] sm:$0xff]  ;;  %v582_v22 = vld [vmem:[%s2081_s12 + $0x2f8] sm:$0xff] }
  0x75   : > { %652 = vmatpush1.msra.mxu0 %v511_v53  ;;  %729 = vmatpush1.msra.mxu1 %v513_v54  ;;  %v579_v23 = vld [vmem:[%s2081_s12 + $0x2e0] sm:$0xff]  ;;  %v581_v24 = vld [vmem:[%s2081_s12 + $0x2f0] sm:$0xff]  ;;  %v572_v25 = vld [vmem:[%s2081_s12 + $0x2a8] sm:$0xff] }
  0x76   : > { %653 = vmatprep.subr.mxu0 %v504_v55  ;;  %730 = vmatprep.subr.mxu1 %v506_v56  ;;  %v574_v26 = vld [vmem:[%s2081_s12 + $0x2b8] sm:$0xff]  ;;  %v571_v27 = vld [vmem:[%s2081_s12 + $0x2a0] sm:$0xff]  ;;  %v573_v28 = vld [vmem:[%s2081_s12 + $0x2b0] sm:$0xff] }
  0x77   : > { %654 = vmatpush1.msra.mxu0 %v503_v57  ;;  %731 = vmatpush1.msra.mxu1 %v505_v58  ;;  %v564_v29 = vld [vmem:[%s2081_s12 + $0x268] sm:$0xff]  ;;  %v566_v30 = vld [vmem:[%s2081_s12 + $0x278] sm:$0xff]  ;;  %v563_v31 = vld [vmem:[%s2081_s12 + $0x260] sm:$0xff] }
  0x78   : > { %655 = vmatprep.subr.mxu0 %v496_v59  ;;  %732 = vmatprep.subr.mxu1 %v498_v60  ;;  %v565_v32 = vld [vmem:[%s2081_s12 + $0x270] sm:$0xff]  ;;  %v556_v33 = vld [vmem:[%s2081_s12 + $0x228] sm:$0xff]  ;;  %v558_v34 = vld [vmem:[%s2081_s12 + $0x238] sm:$0xff] }
  0x79   : > { %656 = vmatpush1.msra.mxu0 %v495_v61  ;;  %733 = vmatpush1.msra.mxu1 %v497_v62  ;;  %v555_v35 = vld [vmem:[%s2081_s12 + $0x220] sm:$0xff]  ;;  %v557_v36 = vld [vmem:[%s2081_s12 + $0x230] sm:$0xff]  ;;  %v548_v37 = vld [vmem:[%s2081_s12 + $0x1e8] sm:$0xff] }
  0x7a   : > { %657 = vmatprep.subr.mxu0 %v488_v63  ;;  %734 = vmatprep.subr.mxu1 %v490_v0  ;;  %v550_v38 = vld [vmem:[%s2081_s12 + $0x1f8] sm:$0xff]  ;;  %v547_v39 = vld [vmem:[%s2081_s12 + $0x1e0] sm:$0xff]  ;;  %v549_v40 = vld [vmem:[%s2081_s12 + $0x1f0] sm:$0xff] }
  0x7b   : > { %658 = vmatpush1.msra.mxu0 %v487_v2  ;;  %735 = vmatpush1.msra.mxu1 %v489_v3  ;;  %v540_v41 = vld [vmem:[%s2081_s12 + $0x1a8] sm:$0xff]  ;;  %v542_v42 = vld [vmem:[%s2081_s12 + $0x1b8] sm:$0xff]  ;;  %v539_v43 = vld [vmem:[%s2081_s12 + $0x1a0] sm:$0xff] }
  0x7c   : > { %692 = vmatmul.mubr.f32.vlgmr.msra.gmra.mxu0 %v2150_v4  ;;  %769 = vmatmul.mubr.f32.vlgmr.msra.gmra.mxu1 %v2150_v4  ;;  %v541_v44 = vld [vmem:[%s2081_s12 + $0x1b0] sm:$0xff]  ;;  %v532_v45 = vld [vmem:[%s2081_s12 + $0x168] sm:$0xff]  ;;  %v534_v46 = vld [vmem:[%s2081_s12 + $0x178] sm:$0xff] }
  0x7d   : > { %781 = vmatprep.subr.mxu0 %v612_v5  ;;  %858 = vmatprep.subr.mxu1 %v614_v6  ;;  %v531_v47 = vld [vmem:[%s2081_s12 + $0x160] sm:$0xff]  ;;  %v533_v48 = vld [vmem:[%s2081_s12 + $0x170] sm:$0xff]  ;;  %v524_v49 = vld [vmem:[%s2081_s12 + $0x128] sm:$0xff] }
  0x7e   : > { %782 = vmatpush1.msra.mxu0 %v611_v7  ;;  %859 = vmatpush1.msra.mxu1 %v613_v8  ;;  %v526_v50 = vld [vmem:[%s2081_s12 + $0x138] sm:$0xff]  ;;  %v523_v51 = vld [vmem:[%s2081_s12 + $0x120] sm:$0xff]  ;;  %v525_v52 = vld [vmem:[%s2081_s12 + $0x130] sm:$0xff] }
  0x7f   : > { %783 = vmatprep.subr.mxu0 %v604_v9  ;;  %860 = vmatprep.subr.mxu1 %v606_v10  ;;  %v516_v53 = vld [vmem:[%s2081_s12 + $0xe8] sm:$0xff]  ;;  %v518_v54 = vld [vmem:[%s2081_s12 + $0xf8] sm:$0xff]  ;;  %v515_v55 = vld [vmem:[%s2081_s12 + $0xe0] sm:$0xff] }
  0x80   : > { %784 = vmatpush1.msra.mxu0 %v603_v11  ;;  %861 = vmatpush1.msra.mxu1 %v605_v12  ;;  %v517_v56 = vld [vmem:[%s2081_s12 + $0xf0] sm:$0xff]  ;;  %v486_v57 = vld [vmem:[%s3531_s0 + $0x8] sm:$0xff]  ;;  %v510_v59 = vld [vmem:[%s2081_s12 + $0xb8] sm:$0xff] }
  0x81   : > { %785 = vmatprep.subr.mxu0 %v596_v13  ;;  %862 = vmatprep.subr.mxu1 %v598_v14  ;;  %v508_v58 = vld [vmem:[%s2081_s12 + $0xa8] sm:$0xff]  ;;  %v507_v60 = vld [vmem:[%s2081_s12 + $0xa0] sm:$0xff]  ;;  %v509_v61 = vld [vmem:[%s2081_s12 + $0xb0] sm:$0xff] }
  0x82   : > { %786 = vmatpush1.msra.mxu0 %v595_v15  ;;  %863 = vmatpush1.msra.mxu1 %v597_v16  ;;  %v500_v62 = vld [vmem:[%s2081_s12 + $0x68] sm:$0xff]  ;;  %v502_v63 = vld [vmem:[%s2081_s12 + $0x78] sm:$0xff]  ;;  %v499_v0 = vld [vmem:[%s2081_s12 + $0x60] sm:$0xff] }
  0x83   : > { %787 = vmatprep.subr.mxu0 %v588_v17  ;;  %864 = vmatprep.subr.mxu1 %v590_v18  ;;  %v501_v2 = vld [vmem:[%s2081_s12 + $0x70] sm:$0xff]  ;;  %v492_v3 = vld [vmem:[%s2081_s12 + $0x28] sm:$0xff]  ;;  %v494_v5 = vld [vmem:[%s2081_s12 + $0x38] sm:$0xff] }
  0x84   : > { %788 = vmatpush1.msra.mxu0 %v587_v19  ;;  %865 = vmatpush1.msra.mxu1 %v589_v20  ;;  %v491_v6 = vld [vmem:[%s2081_s12 + $0x20] sm:$0xff]  ;;  %v493_v7 = vld [vmem:[%s2081_s12 + $0x30] sm:$0xff]  ;;  %v616_v8 = vld [vmem:[%s3532_s1 + $0x8] sm:$0xff] }
  0x85   : > { %789 = vmatprep.subr.mxu0 %v580_v21  ;;  %866 = vmatprep.subr.mxu1 %v582_v22 }
  0x86   : > { %790 = vmatpush1.msra.mxu0 %v579_v23  ;;  %867 = vmatpush1.msra.mxu1 %v581_v24 }
  0x87   : > { %791 = vmatprep.subr.mxu0 %v572_v25  ;;  %868 = vmatprep.subr.mxu1 %v574_v26 }
  0x88   : > { %792 = vmatpush1.msra.mxu0 %v571_v27  ;;  %869 = vmatpush1.msra.mxu1 %v573_v28 }
  0x89   : > { %793 = vmatprep.subr.mxu0 %v564_v29  ;;  %870 = vmatprep.subr.mxu1 %v566_v30 }
  0x8a   : > { %794 = vmatpush1.msra.mxu0 %v563_v31  ;;  %871 = vmatpush1.msra.mxu1 %v565_v32 }
  0x8b   : > { %795 = vmatprep.subr.mxu0 %v556_v33  ;;  %872 = vmatprep.subr.mxu1 %v558_v34 }
  0x8c   : > { %796 = vmatpush1.msra.mxu0 %v555_v35  ;;  %873 = vmatpush1.msra.mxu1 %v557_v36 }
  0x8d   : > { %797 = vmatprep.subr.mxu0 %v548_v37  ;;  %874 = vmatprep.subr.mxu1 %v550_v38 }
  0x8e   : > { %798 = vmatpush1.msra.mxu0 %v547_v39  ;;  %875 = vmatpush1.msra.mxu1 %v549_v40 }
  0x8f   : > { %799 = vmatprep.subr.mxu0 %v540_v41  ;;  %876 = vmatprep.subr.mxu1 %v542_v42 }
  0x90   : > { %800 = vmatpush1.msra.mxu0 %v539_v43  ;;  %877 = vmatpush1.msra.mxu1 %v541_v44 }
  0x91   : > { %801 = vmatprep.subr.mxu0 %v532_v45  ;;  %878 = vmatprep.subr.mxu1 %v534_v46 }
  0x92   : > { %802 = vmatpush1.msra.mxu0 %v531_v47  ;;  %879 = vmatpush1.msra.mxu1 %v533_v48 }
  0x93   : > { %803 = vmatprep.subr.mxu0 %v524_v49  ;;  %880 = vmatprep.subr.mxu1 %v526_v50 }
  0x94   : > { %804 = vmatpush1.msra.mxu0 %v523_v51  ;;  %881 = vmatpush1.msra.mxu1 %v525_v52 }
  0x95   : > { %805 = vmatprep.subr.mxu0 %v516_v53  ;;  %882 = vmatprep.subr.mxu1 %v518_v54 }
  0x96   : > { %697 = vmatprep.mubr.f32.mxu0 %v1746_v1  ;;  %774 = vmatprep.mubr.f32.mxu1 %v1746_v1 }
  0x97   : > { %806 = vmatpush1.msra.mxu0 %v515_v55  ;;  %883 = vmatpush1.msra.mxu1 %v517_v56 }
  0x98   : > { %698 = vmatmul.mubr.f32.gmra.mxu0 %v486_v57  ;;  %775 = vmatmul.mubr.f32.gmra.mxu1 %v486_v57 }
  0x99   : > { %807 = vmatprep.subr.mxu0 %v508_v58  ;;  %884 = vmatprep.subr.mxu1 %v510_v59 }
  0x9a   : > { %808 = vmatpush1.msra.mxu0 %v507_v60  ;;  %885 = vmatpush1.msra.mxu1 %v509_v61 }
  0x9b   : > { %809 = vmatprep.subr.mxu0 %v500_v62  ;;  %886 = vmatprep.subr.mxu1 %v502_v63 }
  0x9c   : > { %810 = vmatpush1.msra.mxu0 %v499_v0  ;;  %887 = vmatpush1.msra.mxu1 %v501_v2 }
  0x9d   : > { %811 = vmatprep.subr.mxu0 %v492_v3  ;;  %888 = vmatprep.subr.mxu1 %v494_v5 }
  0x9e   : > { %812 = vmatpush1.msra.mxu0 %v491_v6  ;;  %845 = vmatprep.mubr.f32.mxu0 %v1746_v1 }
  0x9f   : > { %889 = vmatpush1.msra.mxu1 %v493_v7  ;;  %922 = vmatprep.mubr.f32.mxu1 %v1746_v1 }
  0xa0   : > { %846 = vmatmul.mubr.f32.vlgmr.msra.gmra.mxu0 %v2150_v4  ;;  %923 = vmatmul.mubr.f32.vlgmr.msra.gmra.mxu1 %v2150_v4 }
  0xa1   : > { %851 = vmatprep.mubr.f32.mxu0 %v1746_v1  ;;  %928 = vmatprep.mubr.f32.mxu1 %v1746_v1 }
  0xa2   : > { %624 = vperm.xlu0 %1715, %v616_v8  }
  0xa4   : > { %852 = vmatmul.mubr.f32.gmra.mxu0 %v486_v57  ;;  %929 = vmatmul.mubr.f32.gmra.mxu1 %v486_v57 }
  0xd7   : > { %v620_v9 = vpop.permute.xlu0 %619 }
 0x11d   : > { %v625_v16 = vpop.permute.xlu0 %624 }
 0x13c   : > { %v693_v10 = vpop.f32.mrf.mxu0  ;;  %v770_v11 = vpop.f32.mrf.mxu1 }
 0x13d   : > { %v694_v1 = vadd.f32 %v693_v10, %v620_v9  ;;  %v771_v4 = vadd.f32 %v770_v11, %v620_v9 }
 0x13e   : > { %v695_v12 = vpop.f32.mrf.mxu0  ;;  %v772_v13 = vpop.f32.mrf.mxu1 }
 0x13f   : > { %940 = vst [vmem:[%s2237_s29] sm:$0xff] %v694_v1  ;;  %942 = vst [vmem:[%s2237_s29 + $0x10] sm:$0xff] %v771_v4  ;;  %v696_v14 = vadd.f32 %v695_v12, %v620_v9  ;;  %v773_v15 = vadd.f32 %v772_v13, %v620_v9 }
 0x141   : > { %941 = vst [vmem:[%s2237_s29 + $0x8] sm:$0xff] %v696_v14  ;;  %943 = vst [vmem:[%s2237_s29 + $0x18] sm:$0xff] %v773_v15 }
 0x158   : > { %v699_v17 = vpop.f32.mrf.mxu0  ;;  %v776_v18 = vpop.f32.mrf.mxu1 }
 0x159   : > { %v700_v19 = vadd.f32 %v699_v17, %v625_v16  ;;  %v777_v20 = vadd.f32 %v776_v18, %v625_v16 }
 0x15a   : > { %v701_v21 = vpop.f32.mrf.mxu0  ;;  %v778_v22 = vpop.f32.mrf.mxu1 }
 0x15b   : > { %948 = vst [vmem:[%s2237_s29 + $0x100] sm:$0xff] %v700_v19  ;;  %950 = vst [vmem:[%s2237_s29 + $0x110] sm:$0xff] %v777_v20  ;;  %v702_v23 = vadd.f32 %v701_v21, %v625_v16  ;;  %v779_v24 = vadd.f32 %v778_v22, %v625_v16 }
 0x15d   : > { %949 = vst [vmem:[%s2237_s29 + $0x108] sm:$0xff] %v702_v23  ;;  %951 = vst [vmem:[%s2237_s29 + $0x118] sm:$0xff] %v779_v24 }
 0x160   : > { %v847_v25 = vpop.f32.mrf.mxu0  ;;  %v924_v26 = vpop.f32.mrf.mxu1 }
 0x161   : > { %v848_v27 = vadd.f32 %v847_v25, %v620_v9  ;;  %v925_v28 = vadd.f32 %v924_v26, %v620_v9 }
 0x162   : > { %v849_v29 = vpop.f32.mrf.mxu0  ;;  %v926_v30 = vpop.f32.mrf.mxu1 }
 0x163   : > { %944 = vst [vmem:[%s2237_s29 + $0x20] sm:$0xff] %v848_v27  ;;  %946 = vst [vmem:[%s2237_s29 + $0x30] sm:$0xff] %v925_v28  ;;  %v850_v31 = vadd.f32 %v849_v29, %v620_v9  ;;  %v927_v32 = vadd.f32 %v926_v30, %v620_v9 }
 0x164   : > { %v853_v33 = vpop.f32.mrf.mxu0  ;;  %v930_v34 = vpop.f32.mrf.mxu1 }
 0x165   : > { %945 = vst [vmem:[%s2237_s29 + $0x28] sm:$0xff] %v850_v31  ;;  %947 = vst [vmem:[%s2237_s29 + $0x38] sm:$0xff] %v927_v32  ;;  %v854_v35 = vadd.f32 %v853_v33, %v625_v16  ;;  %v931_v36 = vadd.f32 %v930_v34, %v625_v16  ;;  %959 = sbr.rel (%p1684_p8) target bundleno = 995 (0x3e3), region = 67 }
 0x166   : > { %v855_v37 = vpop.f32.mrf.mxu0  ;;  %v932_v38 = vpop.f32.mrf.mxu1 }
 0x167   : > { %952 = vst [vmem:[%s2237_s29 + $0x120] sm:$0xff] %v854_v35  ;;  %954 = vst [vmem:[%s2237_s29 + $0x130] sm:$0xff] %v931_v36  ;;  %v856_v39 = vadd.f32 %v855_v37, %v625_v16  ;;  %v933_v40 = vadd.f32 %v932_v38, %v625_v16 }
 0x169   : > { %953 = vst [vmem:[%s2237_s29 + $0x128] sm:$0xff] %v856_v39  ;;  %955 = vst [vmem:[%s2237_s29 + $0x138] sm:$0xff] %v933_v40 }
 0x170   : > { %v2260_v41 = vld [vmem:[%s3536_s5] sm:$0xff]  ;;  %v2265_v42 = vld [vmem:[%s3536_s5 + $0x8] sm:$0xff]  ;;  %v2270_v43 = vld [vmem:[%s3536_s5 + $0x10] sm:$0xff] }
 0x171   : > { %v1024_v44 = vadd.f32 %v2265_v42, %v2260_v41  ;;  %v2277_v45 = vld [vmem:[%s3536_s5 + $0x18] sm:$0xff]  ;;  %v2283_v47 = vld [vmem:[%s3536_s5 + $0x20] sm:$0xff]  ;;  %v2289_v49 = vld [vmem:[%s3536_s5 + $0x28] sm:$0xff] }
 0x172   : > { %v2295_v51 = vld [vmem:[%s3536_s5 + $0x30] sm:$0xff]  ;;  %v2301_v53 = vld [vmem:[%s3536_s5 + $0x38] sm:$0xff]  ;;  %v2306_v54 = vld [vmem:[%s3536_s5 + $0x100] sm:$0xff] }
 0x173   : > { %v1025_v46 = vadd.f32 %v1024_v44, %v2270_v43  ;;  %v2312_v56 = vld [vmem:[%s3536_s5 + $0x108] sm:$0xff]  ;;  %v2317_v57 = vld [vmem:[%s3536_s5 + $0x110] sm:$0xff]  ;;  %v2322_v58 = vld [vmem:[%s3536_s5 + $0x40] sm:$0xff] }
 0x174   : > { %v1057_v59 = vadd.f32 %v2312_v56, %v2306_v54  ;;  %v2330_v61 = vld [vmem:[%s3536_s5 + $0x118] sm:$0xff]  ;;  %v2335_v62 = vld [vmem:[%s3536_s5 + $0x48] sm:$0xff]  ;;  %v2342_v2 = vld [vmem:[%s3536_s5 + $0x120] sm:$0xff] }
 0x175   : > { %v1026_v48 = vadd.f32 %v1025_v46, %v2277_v45  ;;  %v2347_v3 = vld [vmem:[%s3536_s5 + $0x50] sm:$0xff]  ;;  %v2354_v7 = vld [vmem:[%s3536_s5 + $0x128] sm:$0xff]  ;;  %v2359_v8 = vld [vmem:[%s3536_s5 + $0x58] sm:$0xff] }
 0x176   : > { %v1058_v63 = vadd.f32 %v1057_v59, %v2317_v57  ;;  %v2366_v11 = vld [vmem:[%s3536_s5 + $0x130] sm:$0xff]  ;;  %v2371_v1 = vld [vmem:[%s3536_s5 + $0x60] sm:$0xff]  ;;  %v2378_v13 = vld [vmem:[%s3536_s5 + $0x138] sm:$0xff] }
 0x177   : > { %v1027_v50 = vadd.f32 %v1026_v48, %v2283_v47  ;;  %v2383_v14 = vld [vmem:[%s3536_s5 + $0x68] sm:$0xff]  ;;  %v2390_v17 = vld [vmem:[%s3536_s5 + $0x140] sm:$0xff]  ;;  %v2395_v18 = vld [vmem:[%s3536_s5 + $0x70] sm:$0xff] }
 0x178   : > { %v1059_v5 = vadd.f32 %v1058_v63, %v2330_v61  ;;  %v2402_v21 = vld [vmem:[%s3536_s5 + $0x148] sm:$0xff]  ;;  %v2407_v22 = vld [vmem:[%s3536_s5 + $0x78] sm:$0xff]  ;;  %v2414_v25 = vld [vmem:[%s3536_s5 + $0x150] sm:$0xff] }
 0x179   : > { %v1028_v52 = vadd.f32 %v1027_v50, %v2289_v49  ;;  %v2419_v26 = vld [vmem:[%s3536_s5 + $0x80] sm:$0xff]  ;;  %v2426_v29 = vld [vmem:[%s3536_s5 + $0x158] sm:$0xff]  ;;  %v2431_v30 = vld [vmem:[%s3536_s5 + $0x88] sm:$0xff] }
 0x17a   : > { %v1060_v9 = vadd.f32 %v1059_v5, %v2342_v2  ;;  %v2438_v33 = vld [vmem:[%s3536_s5 + $0x160] sm:$0xff]  ;;  %v2443_v34 = vld [vmem:[%s3536_s5 + $0x90] sm:$0xff]  ;;  %v2450_v37 = vld [vmem:[%s3536_s5 + $0x168] sm:$0xff] }
 0x17b   : > { %v1029_v55 = vadd.f32 %v1028_v52, %v2295_v51  ;;  %v2455_v38 = vld [vmem:[%s3536_s5 + $0x98] sm:$0xff]  ;;  %v2462_v44 = vld [vmem:[%s3536_s5 + $0x170] sm:$0xff]  ;;  %v2467_v46 = vld [vmem:[%s3536_s5 + $0xa0] sm:$0xff] }
 0x17c   : > { %v1061_v4 = vadd.f32 %v1060_v9, %v2354_v7  ;;  %v2474_v52 = vld [vmem:[%s3536_s5 + $0x178] sm:$0xff]  ;;  %v2486_v63 = vld [vmem:[%s3536_s5 + $0x180] sm:$0xff]  ;;  %v2498_v9 = vld [vmem:[%s3536_s5 + $0x188] sm:$0xff] }
 0x17d   : > { %v1030_v60 = vadd.f32 %v1029_v55, %v2301_v53  ;;  %v2479_v55 = vld [vmem:[%s3536_s5 + $0xa8] sm:$0xff] }
 0x17e   : > { %v1062_v15 = vadd.f32 %v1061_v4, %v2366_v11 }
 0x17f   : > { %v1031_v0 = vadd.f32 %v1030_v60, %v2322_v58 }
 0x180   : > { %v1063_v19 = vadd.f32 %v1062_v15, %v2378_v13  ;;  %v2510_v15 = vld [vmem:[%s3536_s5 + $0x190] sm:$0xff] }
 0x181   : > { %v1032_v6 = vadd.f32 %v1031_v0, %v2335_v62  ;;  %v2491_v0 = vld [vmem:[%s3536_s5 + $0xb0] sm:$0xff] }
 0x182   : > { %v1064_v23 = vadd.f32 %v1063_v19, %v2390_v17 }
 0x183   : > { %v1033_v10 = vadd.f32 %v1032_v6, %v2347_v3 }
 0x184   : > { %v1065_v27 = vadd.f32 %v1064_v23, %v2402_v21  ;;  %v2522_v23 = vld [vmem:[%s3536_s5 + $0x198] sm:$0xff] }
 0x185   : > { %v1034_v12 = vadd.f32 %v1033_v10, %v2359_v8  ;;  %v2503_v10 = vld [vmem:[%s3536_s5 + $0xb8] sm:$0xff] }
 0x186   : > { %v1066_v31 = vadd.f32 %v1065_v27, %v2414_v25 }
 0x187   : > { %v1035_v16 = vadd.f32 %v1034_v12, %v2371_v1 }
 0x188   : > { %v1067_v35 = vadd.f32 %v1066_v31, %v2426_v29  ;;  %v2534_v31 = vld [vmem:[%s3536_s5 + $0x1a0] sm:$0xff] }
 0x189   : > { %v1036_v20 = vadd.f32 %v1035_v16, %v2383_v14  ;;  %v2515_v16 = vld [vmem:[%s3536_s5 + $0xc0] sm:$0xff] }
 0x18a   : > { %v1068_v39 = vadd.f32 %v1067_v35, %v2438_v33 }
 0x18b   : > { %v1037_v24 = vadd.f32 %v1036_v20, %v2395_v18 }
 0x18c   : > { %v1069_v48 = vadd.f32 %v1068_v39, %v2450_v37  ;;  %v2546_v39 = vld [vmem:[%s3536_s5 + $0x1a8] sm:$0xff] }
 0x18d   : > { %v1038_v28 = vadd.f32 %v1037_v24, %v2407_v22  ;;  %v2527_v24 = vld [vmem:[%s3536_s5 + $0xc8] sm:$0xff]  ;;  %3574 = vst [vmem:[#allocation3_spill] sm:$0xff] %v2546_v39 }
 0x18e   : > { %v1070_v59 = vadd.f32 %v1069_v48, %v2462_v44 }
 0x18f   : > { %v1039_v32 = vadd.f32 %v1038_v28, %v2419_v26 }
 0x190   : > { %v1071_v5 = vadd.f32 %v1070_v59, %v2474_v52  ;;  %v2558_v59 = vld [vmem:[%s3536_s5 + $0x1b0] sm:$0xff] }
 0x191   : > { %v1040_v36 = vadd.f32 %v1039_v32, %v2431_v30  ;;  %v2539_v32 = vld [vmem:[%s3536_s5 + $0xd0] sm:$0xff]  ;;  %3575 = vst [vmem:[#allocation4_spill] sm:$0xff] %v2558_v59 }
 0x192   : > { %v1072_v4 = vadd.f32 %v1071_v5, %v2486_v63 }
 0x193   : > { %v1041_v40 = vadd.f32 %v1040_v36, %v2443_v34 }
 0x194   : > { %v1073_v19 = vadd.f32 %v1072_v4, %v2498_v9  ;;  %v2570_v4 = vld [vmem:[%s3536_s5 + $0x1b8] sm:$0xff] }
 0x195   : > { %v1042_v50 = vadd.f32 %v1041_v40, %v2455_v38  ;;  %v2551_v40 = vld [vmem:[%s3536_s5 + $0xd8] sm:$0xff]  ;;  %3576 = vst [vmem:[#allocation5_spill] sm:$0xff] %v2570_v4 }
 0x196   : > { %v1074_v27 = vadd.f32 %v1073_v19, %v2510_v15 }
 0x197   : > { %v1043_v60 = vadd.f32 %v1042_v50, %v2467_v46 }
 0x198   : > { %v1075_v35 = vadd.f32 %v1074_v27, %v2522_v23  ;;  %v2582_v27 = vld [vmem:[%s3536_s5 + $0x1c0] sm:$0xff] }
 0x199   : > { %v1044_v6 = vadd.f32 %v1043_v60, %v2479_v55  ;;  %v2563_v60 = vld [vmem:[%s3536_s5 + $0xe0] sm:$0xff]  ;;  %3577 = vst [vmem:[#allocation6_spill] sm:$0xff] %v2582_v27 }
 0x19a   : > { %v1076_v48 = vadd.f32 %v1075_v35, %v2534_v31 }
 0x19b   : > { %v1045_v12 = vadd.f32 %v1044_v6, %v2491_v0 }
 0x19c   : > { %v1077_v5 = vadd.f32 %v1076_v48, %v2546_v39  ;;  %v2594_v48 = vld [vmem:[%s3536_s5 + $0x1c8] sm:$0xff] }
 0x19d   : > { %v1046_v20 = vadd.f32 %v1045_v12, %v2503_v10  ;;  %v2575_v12 = vld [vmem:[%s3536_s5 + $0xe8] sm:$0xff]  ;;  %3578 = vst [vmem:[#allocation7_spill] sm:$0xff] %v2594_v48 }
 0x19e   : > { %v1078_v19 = vadd.f32 %v1077_v5, %v2558_v59  ;;  %v2613_v59 = vld [vmem:[%s3536_s5 + $0x1d8] sm:$0xff] }
 0x19f   : > { %v1047_v28 = vadd.f32 %v1046_v20, %v2515_v16  ;;  %3580 = vst [vmem:[#allocation9_spill] sm:$0xff] %v2613_v59 }
 0x1a0   : > { %v1079_v35 = vadd.f32 %v1078_v19, %v2570_v4  ;;  %v2606_v19 = vld [vmem:[%s3536_s5 + $0x1d0] sm:$0xff] }
 0x1a1   : > { %v1048_v36 = vadd.f32 %v1047_v28, %v2527_v24  ;;  %v2587_v28 = vld [vmem:[%s3536_s5 + $0xf0] sm:$0xff]  ;;  %3579 = vst [vmem:[#allocation8_spill] sm:$0xff] %v2606_v19 }
 0x1a2   : > { %v1080_v5 = vadd.f32 %v1079_v35, %v2582_v27  ;;  %v2619_v35 = vld [vmem:[%s3536_s5 + $0x1e0] sm:$0xff] }
 0x1a3   : > { %v1049_v50 = vadd.f32 %v1048_v36, %v2539_v32  ;;  %3581 = vst [vmem:[#allocation10_spill] sm:$0xff] %v2619_v35 }
 0x1a5   : > { %v1050_v6 = vadd.f32 %v1049_v50, %v2551_v40  ;;  %v2599_v50 = vld [vmem:[%s3536_s5 + $0xf8] sm:$0xff] }
 0x1a7   : > { %v1051_v20 = vadd.f32 %v1050_v6, %v2563_v60 }
 0x1a9   : > { %v1052_v36 = vadd.f32 %v1051_v20, %v2575_v12  ;;  %v1081_v20 = vadd.f32 %v1080_v5, %v2594_v48  ;;  %v2625_v5 = vld [vmem:[%s3536_s5 + $0x1e8] sm:$0xff]  ;;  %v2631_v48 = vld [vmem:[%s3536_s5 + $0x1f0] sm:$0xff] }
 0x1aa   : > { %3582 = vst [vmem:[#allocation11_spill] sm:$0xff] %v2625_v5  ;;  %3583 = vst [vmem:[#allocation12_spill] sm:$0xff] %v2631_v48 }
 0x1ab   : > { %v1053_v6 = vadd.f32 %v1052_v36, %v2587_v28  ;;  %v1082_v39 = vadd.f32 %v1081_v20, %v2606_v19  ;;  %v2637_v20 = vld [vmem:[%s3536_s5 + $0x1f8] sm:$0xff] }
 0x1ac   : > { %3584 = vst [vmem:[#allocation13_spill] sm:$0xff] %v2637_v20 }
 0x1ad   : > { %v1054_v4 = vadd.f32 %v1053_v6, %v2599_v50  ;;  %v1083_v36 = vadd.f32 %v1082_v39, %v2613_v59 }
 0x1af   : > { %1055 = vadd.xlane.f32.xlu0 %v1054_v4  ;;  %v1084_v6 = vadd.f32 %v1083_v36, %v2619_v35 }
 0x1b1   : > { %v1085_v4 = vadd.f32 %v1084_v6, %v2625_v5 }
 0x1b3   : > { %v1086_v39 = vadd.f32 %v1085_v4, %v2631_v48 }
 0x1b5   : > { %v1087_v59 = vadd.f32 %v1086_v39, %v2637_v20 }
 0x1b7   : > { %1088 = vadd.xlane.f32.xlu0 %v1087_v59 }
 0x238   : > { %v1056_v19 = vpop.xlane.xlu0 %1055 }
 0x239   : > { %v2641_v27 = vmul.f32 0.00024414063, %v1056_v19 }
 0x23b   : > { %v2645_v36 = vsub.f32 %v2260_v41, %v2641_v27  ;;  %v2649_v6 = vsub.f32 %v2265_v42, %v2641_v27  ;;  %v2653_v5 = vsub.f32 %v2270_v43, %v2641_v27  ;;  %v2661_v19 = vsub.f32 %v2277_v45, %v2641_v27 }
 0x23c   : > { %v2665_v41 = vsub.f32 %v2283_v47, %v2641_v27  ;;  %v2671_v43 = vsub.f32 %v2289_v49, %v2641_v27  ;;  %v2677_v45 = vsub.f32 %v2295_v51, %v2641_v27 }
 0x23d   : > { %3585 = vst [vmem:[#allocation14_spill] sm:$0xff] %v2645_v36  ;;  %3586 = vst [vmem:[#allocation15_spill] sm:$0xff] %v2649_v6  ;;  %v1156_v4 = vmul.f32 %v2645_v36, %v2645_v36  ;;  %v1157_v59 = vmul.f32 %v2649_v6, %v2649_v6  ;;  %v1158_v42 = vmul.f32 %v2653_v5, %v2653_v5 }
 0x23e   : > { %v1159_v36 = vmul.f32 %v2661_v19, %v2661_v19  ;;  %v1160_v47 = vmul.f32 %v2665_v41, %v2665_v41  ;;  %v1161_v49 = vmul.f32 %v2671_v43, %v2671_v43  ;;  %v1162_v51 = vmul.f32 %v2677_v45, %v2677_v45 }
 0x23f   : > { %v1220_v39 = vadd.f32 %v1157_v59, %v1156_v4  ;;  %v2685_v4 = vsub.f32 %v2301_v53, %v2641_v27 }
 0x240   : > { %v1089_v20 = vpop.xlane.xlu0 %1088 }
 0x241   : > { %v1221_v6 = vadd.f32 %v1220_v39, %v1158_v42  ;;  %v2681_v35 = vmul.f32 0.00024414063, %v1089_v20  ;;  %v2691_v42 = vsub.f32 %v2322_v58, %v2641_v27  ;;  %v2697_v20 = vsub.f32 %v2335_v62, %v2641_v27 }
 0x242   : > { %v1163_v53 = vmul.f32 %v2685_v4, %v2685_v4 }
 0x243   : > { %v1222_v48 = vadd.f32 %v1221_v6, %v1159_v36  ;;  %v2703_v6 = vsub.f32 %v2306_v54, %v2681_v35  ;;  %v2707_v58 = vsub.f32 %v2312_v56, %v2681_v35  ;;  %v1164_v62 = vmul.f32 %v2691_v42, %v2691_v42 }
 0x244   : > { %v1165_v54 = vmul.f32 %v2697_v20, %v2697_v20  ;;  %v2723_v56 = vsub.f32 %v2317_v57, %v2681_v35  ;;  %v2741_v57 = vsub.f32 %v2383_v14, %v2641_v27 }
 0x245   : > { %v1223_v59 = vadd.f32 %v1222_v48, %v1160_v47  ;;  %3587 = vst [vmem:[#allocation16_spill] sm:$0xff] %v2703_v6  ;;  %3588 = vst [vmem:[#allocation17_spill] sm:$0xff] %v2707_v58  ;;  %v2711_v48 = vsub.f32 %v2347_v3, %v2641_v27  ;;  %v1188_v3 = vmul.f32 %v2703_v6, %v2703_v6 }
 0x246   : > { %v2759_v6 = vsub.f32 %v2354_v7, %v2681_v35 }
 0x247   : > { %v1224_v39 = vadd.f32 %v1223_v59, %v1161_v49  ;;  %v2717_v49 = vsub.f32 %v2359_v8, %v2641_v27  ;;  %v1166_v8 = vmul.f32 %v2711_v48, %v2711_v48 }
 0x249   : > { %v1225_v36 = vadd.f32 %v1224_v39, %v1162_v51  ;;  %v1189_v51 = vmul.f32 %v2707_v58, %v2707_v58  ;;  %v2731_v39 = vsub.f32 %v2371_v1, %v2641_v27  ;;  %v2747_v1 = vsub.f32 %v2342_v2, %v2681_v35 }
 0x24a   : > { %v1190_v58 = vmul.f32 %v2723_v56, %v2723_v56 }
 0x24b   : > { %v1226_v47 = vadd.f32 %v1225_v36, %v1163_v53  ;;  %v2737_v36 = vsub.f32 %v2330_v61, %v2681_v35  ;;  %v2753_v61 = vsub.f32 %v2395_v18, %v2641_v27  ;;  %v1168_v14 = vmul.f32 %v2731_v39, %v2731_v39 }
 0x24c   : > { %v1169_v18 = vmul.f32 %v2741_v57, %v2741_v57  ;;  %v1192_v7 = vmul.f32 %v2747_v1, %v2747_v1 }
 0x24d   : > { %v1227_v59 = vadd.f32 %v1226_v47, %v1164_v62  ;;  %v1167_v62 = vmul.f32 %v2717_v49, %v2717_v49  ;;  %v1191_v2 = vmul.f32 %v2737_v36, %v2737_v36 }
 0x24f   : > { %v1228_v53 = vadd.f32 %v1227_v59, %v1165_v54  ;;  %v1253_v54 = vadd.f32 %v1189_v51, %v1188_v3  ;;  %v2771_v51 = vsub.f32 %v2366_v11, %v2681_v35  ;;  %v1193_v11 = vmul.f32 %v2759_v6, %v2759_v6 }
 0x251   : > { %v1229_v47 = vadd.f32 %v1228_v53, %v1166_v8  ;;  %v1254_v8 = vadd.f32 %v1253_v54, %v1190_v58  ;;  %v2765_v53 = vsub.f32 %v2407_v22, %v2641_v27  ;;  %v1170_v22 = vmul.f32 %v2753_v61, %v2753_v61 }
 0x252   : > { %v2783_v54 = vsub.f32 %v2378_v13, %v2681_v35  ;;  %v1194_v13 = vmul.f32 %v2771_v51, %v2771_v51 }
 0x253   : > { %v1230_v59 = vadd.f32 %v1229_v47, %v1167_v62  ;;  %v1255_v62 = vadd.f32 %v1254_v8, %v1191_v2  ;;  %v2777_v47 = vsub.f32 %v2419_v26, %v2641_v27  ;;  %v1171_v26 = vmul.f32 %v2765_v53, %v2765_v53 }
 0x254   : > { %v2795_v8 = vsub.f32 %v2390_v17, %v2681_v35  ;;  %v1195_v17 = vmul.f32 %v2783_v54, %v2783_v54 }
 0x255   : > { %v1231_v3 = vadd.f32 %v1230_v59, %v1168_v14  ;;  %v1256_v14 = vadd.f32 %v1255_v62, %v1192_v7  ;;  %v2789_v59 = vsub.f32 %v2431_v30, %v2641_v27  ;;  %v1172_v30 = vmul.f32 %v2777_v47, %v2777_v47 }
 0x256   : > { %v2807_v62 = vsub.f32 %v2402_v21, %v2681_v35  ;;  %v1196_v21 = vmul.f32 %v2795_v8, %v2795_v8 }
 0x257   : > { %v1232_v58 = vadd.f32 %v1231_v3, %v1169_v18  ;;  %v1257_v18 = vadd.f32 %v1256_v14, %v1193_v11  ;;  %v2801_v3 = vsub.f32 %v2443_v34, %v2641_v27  ;;  %v1173_v34 = vmul.f32 %v2789_v59, %v2789_v59 }
 0x258   : > { %v2819_v14 = vsub.f32 %v2414_v25, %v2681_v35  ;;  %v1197_v25 = vmul.f32 %v2807_v62, %v2807_v62 }
 0x259   : > { %v1233_v2 = vadd.f32 %v1232_v58, %v1170_v22  ;;  %v1258_v22 = vadd.f32 %v1257_v18, %v1194_v13  ;;  %v2813_v58 = vsub.f32 %v2455_v38, %v2641_v27  ;;  %v1174_v38 = vmul.f32 %v2801_v3, %v2801_v3 }
 0x25a   : > { %3589 = vst [vmem:[#allocation18_spill] sm:$0xff] %v2819_v14  ;;  %v2831_v18 = vsub.f32 %v2426_v29, %v2681_v35  ;;  %v1198_v29 = vmul.f32 %v2819_v14, %v2819_v14 }
 0x25b   : > { %v1234_v7 = vadd.f32 %v1233_v2, %v1171_v26  ;;  %v1259_v26 = vadd.f32 %v1258_v22, %v1195_v17  ;;  %v2825_v2 = vsub.f32 %v2467_v46, %v2641_v27  ;;  %v1175_v46 = vmul.f32 %v2813_v58, %v2813_v58 }
 0x25c   : > { %3590 = vst [vmem:[#allocation19_spill] sm:$0xff] %v2831_v18  ;;  %v2843_v22 = vsub.f32 %v2438_v33, %v2681_v35  ;;  %v1199_v33 = vmul.f32 %v2831_v18, %v2831_v18 }
 0x25d   : > { %v1235_v11 = vadd.f32 %v1234_v7, %v1172_v30  ;;  %v1260_v30 = vadd.f32 %v1259_v26, %v1196_v21  ;;  %v2837_v7 = vsub.f32 %v2479_v55, %v2641_v27  ;;  %v1176_v55 = vmul.f32 %v2825_v2, %v2825_v2 }
 0x25e   : > { %3591 = vst [vmem:[#allocation20_spill] sm:$0xff] %v2843_v22  ;;  %v2855_v26 = vsub.f32 %v2450_v37, %v2681_v35  ;;  %v1200_v37 = vmul.f32 %v2843_v22, %v2843_v22 }
 0x25f   : > { %v1236_v13 = vadd.f32 %v1235_v11, %v1173_v34  ;;  %v1261_v34 = vadd.f32 %v1260_v30, %v1197_v25  ;;  %v2849_v11 = vsub.f32 %v2491_v0, %v2641_v27  ;;  %v1177_v0 = vmul.f32 %v2837_v7, %v2837_v7 }
 0x260   : > { %3592 = vst [vmem:[#allocation21_spill] sm:$0xff] %v2855_v26  ;;  %v2867_v30 = vsub.f32 %v2462_v44, %v2681_v35  ;;  %v1201_v44 = vmul.f32 %v2855_v26, %v2855_v26 }
 0x261   : > { %v1237_v17 = vadd.f32 %v1236_v13, %v1174_v38  ;;  %v1262_v38 = vadd.f32 %v1261_v34, %v1198_v29  ;;  %v2861_v13 = vsub.f32 %v2503_v10, %v2641_v27  ;;  %v1178_v10 = vmul.f32 %v2849_v11, %v2849_v11 }
 0x262   : > { %3593 = vst [vmem:[#allocation22_spill] sm:$0xff] %v2867_v30  ;;  %v2879_v34 = vsub.f32 %v2474_v52, %v2681_v35  ;;  %v1202_v52 = vmul.f32 %v2867_v30, %v2867_v30 }
 0x263   : > { %v1238_v21 = vadd.f32 %v1237_v17, %v1175_v46  ;;  %v1263_v46 = vadd.f32 %v1262_v38, %v1199_v33  ;;  %v2873_v17 = vsub.f32 %v2515_v16, %v2641_v27  ;;  %v1179_v16 = vmul.f32 %v2861_v13, %v2861_v13 }
 0x264   : > { %3594 = vst [vmem:[#allocation23_spill] sm:$0xff] %v2879_v34  ;;  %v2891_v38 = vsub.f32 %v2486_v63, %v2681_v35  ;;  %v1203_v63 = vmul.f32 %v2879_v34, %v2879_v34 }
 0x265   : > { %v1239_v25 = vadd.f32 %v1238_v21, %v1176_v55  ;;  %v1264_v55 = vadd.f32 %v1263_v46, %v1200_v37  ;;  %v2885_v21 = vsub.f32 %v2527_v24, %v2641_v27  ;;  %v1180_v24 = vmul.f32 %v2873_v17, %v2873_v17 }
 0x266   : > { %3595 = vst [vmem:[#allocation24_spill] sm:$0xff] %v2891_v38  ;;  %v2903_v46 = vsub.f32 %v2498_v9, %v2681_v35  ;;  %v1204_v9 = vmul.f32 %v2891_v38, %v2891_v38 }
 0x267   : > { %v1240_v29 = vadd.f32 %v1239_v25, %v1177_v0  ;;  %v1265_v0 = vadd.f32 %v1264_v55, %v1201_v44  ;;  %v2897_v25 = vsub.f32 %v2539_v32, %v2641_v27  ;;  %v1181_v32 = vmul.f32 %v2885_v21, %v2885_v21 }
 0x268   : > { %3596 = vst [vmem:[#allocation25_spill] sm:$0xff] %v2903_v46  ;;  %v2915_v55 = vsub.f32 %v2510_v15, %v2681_v35  ;;  %v1205_v15 = vmul.f32 %v2903_v46, %v2903_v46 }
 0x269   : > { %v1241_v33 = vadd.f32 %v1240_v29, %v1178_v10  ;;  %v1266_v10 = vadd.f32 %v1265_v0, %v1202_v52  ;;  %v2909_v29 = vsub.f32 %v2551_v40, %v2641_v27  ;;  %v1182_v40 = vmul.f32 %v2897_v25, %v2897_v25 }
 0x26a   : > { %3597 = vst [vmem:[#allocation26_spill] sm:$0xff] %v2915_v55  ;;  %v2927_v0 = vsub.f32 %v2522_v23, %v2681_v35  ;;  %v1206_v23 = vmul.f32 %v2915_v55, %v2915_v55 }
 0x26b   : > { %v1242_v37 = vadd.f32 %v1241_v33, %v1179_v16  ;;  %v1267_v16 = vadd.f32 %v1266_v10, %v1203_v63  ;;  %v2921_v33 = vsub.f32 %v2563_v60, %v2641_v27  ;;  %v1183_v60 = vmul.f32 %v2909_v29, %v2909_v29 }
 0x26c   : > { %3598 = vst [vmem:[#allocation27_spill] sm:$0xff] %v2927_v0  ;;  %v2939_v10 = vsub.f32 %v2534_v31, %v2681_v35  ;;  %v1207_v31 = vmul.f32 %v2927_v0, %v2927_v0  ;;  %v3606_v0 = vld [vmem:[#allocation6_spill] sm:$0xff] }
 0x26d   : > { %v1243_v44 = vadd.f32 %v1242_v37, %v1180_v24  ;;  %v1268_v24 = vadd.f32 %v1267_v16, %v1204_v9  ;;  %v2933_v37 = vsub.f32 %v2575_v12, %v2641_v27  ;;  %v1184_v12 = vmul.f32 %v2921_v33, %v2921_v33  ;;  %v3600_v16 = vld [vmem:[#allocation3_spill] sm:$0xff] }
 0x26e   : > { %3599 = vst [vmem:[#allocation28_spill] sm:$0xff] %v2939_v10  ;;  %v2951_v46 = vsub.f32 %v3600_v16, %v2681_v35 }
 0x26f   : > { %v1244_v52 = vadd.f32 %v1243_v44, %v1181_v32  ;;  %v1269_v32 = vadd.f32 %v1268_v24, %v1205_v15  ;;  %v2945_v44 = vsub.f32 %v2587_v28, %v2641_v27  ;;  %v1185_v28 = vmul.f32 %v2933_v37, %v2933_v37  ;;  %v3602_v24 = vld [vmem:[#allocation4_spill] sm:$0xff] }
 0x270   : > { %3601 = vst [vmem:[#allocation3_spill] sm:$0xff] %v2951_v46  ;;  %v2963_v55 = vsub.f32 %v3602_v24, %v2681_v35 }
 0x271   : > { %v1245_v63 = vadd.f32 %v1244_v52, %v1182_v40  ;;  %v1270_v40 = vadd.f32 %v1269_v32, %v1206_v23  ;;  %v2957_v52 = vsub.f32 %v2599_v50, %v2641_v27  ;;  %v1186_v16 = vmul.f32 %v2945_v44, %v2945_v44  ;;  %v3604_v32 = vld [vmem:[#allocation5_spill] sm:$0xff] }
 0x272   : > { %3603 = vst [vmem:[#allocation4_spill] sm:$0xff] %v2963_v55  ;;  %v2971_v27 = vsub.f32 %v3604_v32, %v2681_v35  ;;  %v1209_v50 = vmul.f32 %v2951_v46, %v2951_v46 }
 0x273   : > { %v1246_v9 = vadd.f32 %v1245_v63, %v1183_v60  ;;  %v1208_v60 = vmul.f32 %v2939_v10, %v2939_v10  ;;  %v1271_v63 = vadd.f32 %v1270_v40, %v1207_v31  ;;  %v2979_v10 = vsub.f32 %v3606_v0, %v2681_v35 }
 0x274   : > { %3605 = vst [vmem:[#allocation5_spill] sm:$0xff] %v2971_v27  ;;  %v1210_v31 = vmul.f32 %v2963_v55, %v2963_v55 }
 0x275   : > { %v1247_v15 = vadd.f32 %v1246_v9, %v1184_v12  ;;  %v1272_v12 = vadd.f32 %v1271_v63, %v1208_v60  ;;  %v1187_v9 = vmul.f32 %v2957_v52, %v2957_v52  ;;  %3607 = vst [vmem:[#allocation6_spill] sm:$0xff] %v2979_v10  ;;  %v1211_v60 = vmul.f32 %v2971_v27, %v2971_v27 }
 0x276   : > { %v1212_v0 = vmul.f32 %v2979_v10, %v2979_v10 }
 0x277   : > { %v1248_v23 = vadd.f32 %v1247_v15, %v1185_v28  ;;  %v1273_v40 = vadd.f32 %v1272_v12, %v1209_v50  ;;  %v3608_v15 = vld [vmem:[#allocation7_spill] sm:$0xff]  ;;  %v3612_v50 = vld [vmem:[#allocation9_spill] sm:$0xff] }
 0x278   : > { %v2985_v32 = vsub.f32 %v3608_v15, %v2681_v35  ;;  %v2997_v12 = vsub.f32 %v3612_v50, %v2681_v35  ;;  %v3614_v15 = vld [vmem:[#allocation10_spill] sm:$0xff]  ;;  %v3618_v50 = vld [vmem:[#allocation12_spill] sm:$0xff] }
 0x279   : > { %v1249_v24 = vadd.f32 %v1248_v23, %v1186_v16  ;;  %v1274_v63 = vadd.f32 %v1273_v40, %v1210_v31  ;;  %v3610_v16 = vld [vmem:[#allocation8_spill] sm:$0xff]  ;;  %v3003_v31 = vsub.f32 %v3614_v15, %v2681_v35  ;;  %v3620_v15 = vld [vmem:[#allocation13_spill] sm:$0xff] }
 0x27a   : > { %3609 = vst [vmem:[#allocation7_spill] sm:$0xff] %v2985_v32  ;;  %v2991_v23 = vsub.f32 %v3610_v16, %v2681_v35  ;;  %3613 = vst [vmem:[#allocation9_spill] sm:$0xff] %v2997_v12  ;;  %v3616_v16 = vld [vmem:[#allocation11_spill] sm:$0xff] }
 0x27b   : > { %v1250_v28 = vadd.f32 %v1249_v24, %v1187_v9  ;;  %v1275_v46 = vadd.f32 %v1274_v63, %v1211_v60  ;;  %v1213_v9 = vmul.f32 %v2985_v32, %v2985_v32  ;;  %3615 = vst [vmem:[#allocation10_spill] sm:$0xff] %v3003_v31  ;;  %v3009_v10 = vsub.f32 %v3616_v16, %v2681_v35 }
 0x27c   : > { %3611 = vst [vmem:[#allocation8_spill] sm:$0xff] %v2991_v23  ;;  %v1214_v40 = vmul.f32 %v2991_v23, %v2991_v23  ;;  %v1215_v60 = vmul.f32 %v2997_v12, %v2997_v12  ;;  %v3015_v32 = vsub.f32 %v3618_v50, %v2681_v35  ;;  %v3021_v23 = vsub.f32 %v3620_v15, %v2681_v35  ;;  %v1288_v15 = vld [vmem:[%s3533_s2] sm:$0xff] }
 0x27d   : > { %1251 = vadd.xlane.f32.xlu1 %v1250_v28  ;;  %v1276_v24 = vadd.f32 %v1275_v46, %v1212_v0  ;;  %3617 = vst [vmem:[#allocation11_spill] sm:$0xff] %v3009_v10  ;;  %v1216_v46 = vmul.f32 %v3003_v31, %v3003_v31  ;;  %v1748_v35 = vmov 0  }
 0x27e   : > { %3619 = vst [vmem:[#allocation12_spill] sm:$0xff] %v3015_v32  ;;  %3621 = vst [vmem:[#allocation13_spill] sm:$0xff] %v3021_v23  ;;  %v1218_v16 = vmul.f32 %v3015_v32, %v3015_v32  ;;  %1717 = vset.pattern.permute.xlu1 %v1748_v35  ;;  %1716 = vset.pattern.permute.xlu0 %v1748_v35  ;;  %v1371_v35 = vld [vmem:[%s3534_s3 + $0x8] sm:$0xff] }
 0x27f   : > { %v1277_v28 = vadd.f32 %v1276_v24, %v1213_v9  ;;  %v1217_v9 = vmul.f32 %v3009_v10, %v3009_v10 }
 0x281   : > { %v1278_v63 = vadd.f32 %v1277_v28, %v1214_v40  ;;  %v1219_v28 = vmul.f32 %v3021_v23, %v3021_v23 }
 0x283   : > { %v1279_v0 = vadd.f32 %v1278_v63, %v1215_v60  ;;  %v1370_v60 = vld [vmem:[%s3534_s3] sm:$0xff] }
 0x285   : > { %v1280_v24 = vadd.f32 %v1279_v0, %v1216_v46 }
 0x287   : > { %v1281_v40 = vadd.f32 %v1280_v24, %v1217_v9 }
 0x289   : > { %v1282_v50 = vadd.f32 %v1281_v40, %v1218_v16 }
 0x28b   : > { %v1283_v12 = vadd.f32 %v1282_v50, %v1219_v28  ;;  %v1289_v28 = vld [vmem:[%s3533_s2 + $0x8] sm:$0xff] }
 0x28d   : > { %1284 = vadd.xlane.f32.xlu1 %v1283_v12 }
 0x29e   : > { %1374 = vperm.xlu1 %1717, %v1370_v60  }
 0x306   : > { %v1252_v63 = vpop.xlane.xlu1 %1251 }
 0x307   : > { %v1286_v46 = vmul.f32 0.00024414063, %v1252_v63 }
 0x309   : > { %v1290_v0 = vadd.f32 1e-05, %v1286_v46  ;;  %v3622_v46 = vld [vmem:[#allocation14_spill] sm:$0xff] }
 0x30b   : > { %1718 = vrsqrt.f32 %v1290_v0 }
 0x316   : > { %v1285_v24 = vpop.xlane.xlu1 %1284 }
 0x317   : > { %v1287_v16 = vmul.f32 0.00024414063, %v1285_v24  ;;  %v3623_v24 = vld [vmem:[#allocation15_spill] sm:$0xff] }
 0x318   : > { %v1719_v9 = vpop.eup %1718 }
 0x319   : > { %v1294_v12 = vmul.f32 %v1719_v9, %v1288_v15  ;;  %v1291_v40 = vadd.f32 1e-05, %v1287_v16 }
 0x31a   : > { %v1375_v23 = vpop.permute.xlu1 %1374 }
 0x31b   : > { %1298 = vperm.xlu0 %1716, %v1294_v12   ;;  %1720 = vrsqrt.f32 %v1291_v40 }
 0x328   : > { %v1721_v50 = vpop.eup %1720 }
 0x329   : > { %v1295_v60 = vmul.f32 %v1721_v50, %v1289_v28 }
 0x32b   : > { %1303 = vperm.xlu1 %1717, %v1295_v60  }
 0x32f   : > { %1379 = vperm.xlu1 %1717, %v1371_v35  }
 0x396   : > { %v1299_v63 = vpop.permute.xlu0 %1298 }
 0x397   : > { %v1306_v0 = vmul.f32 %v1299_v63, %v3622_v46  ;;  %v1307_v15 = vmul.f32 %v1299_v63, %v3623_v24  ;;  %v1308_v9 = vmul.f32 %v1299_v63, %v2653_v5  ;;  %v1309_v16 = vmul.f32 %v1299_v63, %v2661_v19 }
 0x398   : > { %v1310_v12 = vmul.f32 %v1299_v63, %v2665_v41  ;;  %v1311_v40 = vmul.f32 %v1299_v63, %v2671_v43  ;;  %v1312_v28 = vmul.f32 %v1299_v63, %v2677_v45  ;;  %v1313_v50 = vmul.f32 %v1299_v63, %v2685_v4 }
 0x399   : > { %v1314_v60 = vmul.f32 %v1299_v63, %v2691_v42  ;;  %v1315_v35 = vmul.f32 %v1299_v63, %v2697_v20  ;;  %v1316_v46 = vmul.f32 %v1299_v63, %v2711_v48  ;;  %v1317_v24 = vmul.f32 %v1299_v63, %v2717_v49 }
 0x39a   : > { %v1318_v5 = vmul.f32 %v1299_v63, %v2731_v39  ;;  %v1319_v19 = vmul.f32 %v1299_v63, %v2741_v57  ;;  %v1320_v41 = vmul.f32 %v1299_v63, %v2753_v61  ;;  %v1321_v43 = vmul.f32 %v1299_v63, %v2765_v53 }
 0x39b   : > { %v1322_v45 = vmul.f32 %v1299_v63, %v2777_v47  ;;  %v1323_v4 = vmul.f32 %v1299_v63, %v2789_v59  ;;  %v1324_v42 = vmul.f32 %v1299_v63, %v2801_v3  ;;  %v1325_v20 = vmul.f32 %v1299_v63, %v2813_v58 }
 0x39c   : > { %v1326_v48 = vmul.f32 %v1299_v63, %v2825_v2  ;;  %v1327_v49 = vmul.f32 %v1299_v63, %v2837_v7  ;;  %v1328_v39 = vmul.f32 %v1299_v63, %v2849_v11  ;;  %v1329_v57 = vmul.f32 %v1299_v63, %v2861_v13 }
 0x39d   : > { %v1330_v61 = vmul.f32 %v1299_v63, %v2873_v17  ;;  %v1331_v53 = vmul.f32 %v1299_v63, %v2885_v21  ;;  %v1332_v47 = vmul.f32 %v1299_v63, %v2897_v25  ;;  %v1333_v59 = vmul.f32 %v1299_v63, %v2909_v29 }
 0x39e   : > { %v1334_v3 = vmul.f32 %v1299_v63, %v2921_v33  ;;  %v1335_v58 = vmul.f32 %v1299_v63, %v2933_v37  ;;  %v1336_v2 = vmul.f32 %v1299_v63, %v2945_v44  ;;  %v1337_v7 = vmul.f32 %v1299_v63, %v2957_v52 }
 0x39f   : > { %v1382_v11 = vadd.f32 %v1375_v23, %v1306_v0  ;;  %v1383_v32 = vadd.f32 %v1375_v23, %v1307_v15  ;;  %v1384_v13 = vadd.f32 %v1375_v23, %v1308_v9  ;;  %v1385_v10 = vadd.f32 %v1375_v23, %v1309_v16 }
 0x3a0   : > { %v3073_v17 = vadd.f32 %v1375_v23, %v1310_v12  ;;  %v3075_v21 = vadd.f32 %v1375_v23, %v1311_v40  ;;  %v3077_v31 = vadd.f32 %v1375_v23, %v1312_v28  ;;  %v3079_v25 = vadd.f32 %v1375_v23, %v1313_v50 }
 0x3a1   : > { %v3081_v29 = vadd.f32 %v1375_v23, %v1314_v60  ;;  %v3083_v33 = vadd.f32 %v1375_v23, %v1315_v35  ;;  %v3085_v37 = vadd.f32 %v1375_v23, %v1316_v46  ;;  %v3087_v44 = vadd.f32 %v1375_v23, %v1317_v24 }
 0x3a2   : > { %v3089_v52 = vadd.f32 %v1375_v23, %v1318_v5  ;;  %v3091_v63 = vadd.f32 %v1375_v23, %v1319_v19  ;;  %v3093_v0 = vadd.f32 %v1375_v23, %v1320_v41  ;;  %v3095_v15 = vadd.f32 %v1375_v23, %v1321_v43 }
 0x3a3   : > { %v3097_v9 = vadd.f32 %v1375_v23, %v1322_v45  ;;  %v3099_v16 = vadd.f32 %v1375_v23, %v1323_v4  ;;  %v3101_v12 = vadd.f32 %v1375_v23, %v1324_v42  ;;  %v3103_v40 = vadd.f32 %v1375_v23, %v1325_v20 }
 0x3a4   : > { %v3105_v28 = vadd.f32 %v1375_v23, %v1326_v48  ;;  %v3107_v50 = vadd.f32 %v1375_v23, %v1327_v49  ;;  %v3109_v60 = vadd.f32 %v1375_v23, %v1328_v39  ;;  %v3111_v35 = vadd.f32 %v1375_v23, %v1329_v57 }
 0x3a5   : > { %v3113_v46 = vadd.f32 %v1375_v23, %v1330_v61  ;;  %v3115_v24 = vadd.f32 %v1375_v23, %v1331_v53  ;;  %v3117_v5 = vadd.f32 %v1375_v23, %v1332_v47  ;;  %v3119_v19 = vadd.f32 %v1375_v23, %v1333_v59 }
 0x3a6   : > { %v3121_v41 = vadd.f32 %v1375_v23, %v1334_v3  ;;  %v3123_v43 = vadd.f32 %v1375_v23, %v1335_v58  ;;  %v3125_v45 = vadd.f32 %v1375_v23, %v1336_v2  ;;  %v1446_v4 = vmul.f32 0.2, %v1382_v11 }
 0x3a7   : > { %v1447_v42 = vmul.f32 0.2, %v1383_v32  ;;  %v1448_v20 = vmul.f32 0.2, %v1384_v13  ;;  %v3127_v48 = vadd.f32 %v1375_v23, %v1337_v7  ;;  %v1449_v49 = vmul.f32 0.2, %v1385_v10 }
 0x3a8   : > { %v1450_v39 = vmul.f32 0.2, %v3073_v17  ;;  %v1451_v57 = vmul.f32 0.2, %v3075_v21  ;;  %v1452_v61 = vmul.f32 0.2, %v3077_v31  ;;  %v1510_v59 = vmax.f32 %v1382_v11, %v1446_v4 }
 0x3a9   : > { %v1453_v53 = vmul.f32 0.2, %v3079_v25  ;;  %v1454_v47 = vmul.f32 0.2, %v3081_v29  ;;  %v1455_v3 = vmul.f32 0.2, %v3083_v33  ;;  %v1511_v23 = vmax.f32 %v1383_v32, %v1447_v42 }
 0x3aa   : > { %v1456_v58 = vmul.f32 0.2, %v3085_v37  ;;  %v1457_v2 = vmul.f32 0.2, %v3087_v44  ;;  %v1458_v7 = vmul.f32 0.2, %v3089_v52  ;;  %v1512_v38 = vmax.f32 %v1384_v13, %v1448_v20  ;;  %1574 = vst [vmem:[%s3536_s5] sm:$0xff] %v1510_v59 }
 0x3ab   : > { %v1459_v27 = vmul.f32 0.2, %v3091_v63  ;;  %v1460_v55 = vmul.f32 0.2, %v3093_v0  ;;  %v1461_v11 = vmul.f32 0.2, %v3095_v15  ;;  %v1513_v30 = vmax.f32 %v1385_v10, %v1449_v49 }
 0x3ac   : > { %v1462_v4 = vmul.f32 0.2, %v3097_v9  ;;  %v1463_v34 = vmul.f32 0.2, %v3099_v16  ;;  %1575 = vst [vmem:[%s3536_s5 + $0x8] sm:$0xff] %v1511_v23  ;;  %v1514_v20 = vmax.f32 %v3073_v17, %v1450_v39  ;;  %1576 = vst [vmem:[%s3536_s5 + $0x10] sm:$0xff] %v1512_v38  ;;  %v1515_v23 = vmax.f32 %v3075_v21, %v1451_v57 }
 0x3ad   : > { %v1464_v32 = vmul.f32 0.2, %v3101_v12  ;;  %v1465_v42 = vmul.f32 0.2, %v3103_v40  ;;  %v1466_v13 = vmul.f32 0.2, %v3105_v28  ;;  %v1516_v38 = vmax.f32 %v3077_v31, %v1452_v61 }
 0x3ae   : > { %v1467_v59 = vmul.f32 0.2, %v3107_v50  ;;  %v1468_v10 = vmul.f32 0.2, %v3109_v60  ;;  %v1469_v49 = vmul.f32 0.2, %v3111_v35  ;;  %v1518_v61 = vmax.f32 %v3081_v29, %v1454_v47 }
 0x3af   : > { %1577 = vst [vmem:[%s3536_s5 + $0x18] sm:$0xff] %v1513_v30  ;;  %v1470_v26 = vmul.f32 0.2, %v3113_v46  ;;  %v1471_v17 = vmul.f32 0.2, %v3115_v24  ;;  %1578 = vst [vmem:[%s3536_s5 + $0x20] sm:$0xff] %v1514_v20  ;;  %v1517_v30 = vmax.f32 %v3079_v25, %v1453_v53  ;;  %v1519_v20 = vmax.f32 %v3083_v33, %v1455_v3 }
 0x3b0   : > { %v1472_v39 = vmul.f32 0.2, %v3117_v5  ;;  %v1473_v22 = vmul.f32 0.2, %v3119_v19  ;;  %v1474_v21 = vmul.f32 0.2, %v3121_v41  ;;  %v1520_v14 = vmax.f32 %v3085_v37, %v1456_v58 }
 0x3b1   : > { %v1475_v57 = vmul.f32 0.2, %v3123_v43  ;;  %1579 = vst [vmem:[%s3536_s5 + $0x28] sm:$0xff] %v1515_v23  ;;  %v1476_v18 = vmul.f32 0.2, %v3125_v45  ;;  %1580 = vst [vmem:[%s3536_s5 + $0x30] sm:$0xff] %v1516_v38  ;;  %v1521_v25 = vmax.f32 %v3087_v44, %v1457_v2  ;;  %v1522_v53 = vmax.f32 %v3089_v52, %v1458_v7 }
 0x3b2   : > { %v1477_v31 = vmul.f32 0.2, %v3127_v48  ;;  %v1523_v23 = vmax.f32 %v3091_v63, %v1459_v27  ;;  %1581 = vst [vmem:[%s3536_s5 + $0x38] sm:$0xff] %v1517_v30  ;;  %v1524_v29 = vmax.f32 %v3093_v0, %v1460_v55  ;;  %v1525_v33 = vmax.f32 %v3095_v15, %v1461_v11  ;;  %1582 = vst [vmem:[%s3536_s5 + $0x40] sm:$0xff] %v1518_v61  ;;  %v3629_v2 = vld [vmem:[#allocation21_spill] sm:$0xff]  ;;  %v3630_v11 = vld [vmem:[#allocation22_spill] sm:$0xff] }
 0x3b3   : > { %v1526_v47 = vmax.f32 %v3097_v9, %v1462_v4  ;;  %v1527_v3 = vmax.f32 %v3099_v16, %v1463_v34  ;;  %1583 = vst [vmem:[%s3536_s5 + $0x48] sm:$0xff] %v1519_v20  ;;  %v1528_v27 = vmax.f32 %v3101_v12, %v1464_v32  ;;  %v1529_v37 = vmax.f32 %v3103_v40, %v1465_v42  ;;  %v1304_v34 = vpop.permute.xlu1 %1303  ;;  %v3624_v40 = vld [vmem:[#allocation16_spill] sm:$0xff]  ;;  %v3631_v32 = vld [vmem:[#allocation23_spill] sm:$0xff]  ;;  %v3640_v20 = vld [vmem:[#allocation6_spill] sm:$0xff] }
 0x3b4   : > { %v1530_v55 = vmax.f32 %v3105_v28, %v1466_v13  ;;  %v1531_v44 = vmax.f32 %v3107_v50, %v1467_v59  ;;  %1584 = vst [vmem:[%s3536_s5 + $0x50] sm:$0xff] %v1520_v14  ;;  %1585 = vst [vmem:[%s3536_s5 + $0x58] sm:$0xff] %v1521_v25  ;;  %v1532_v52 = vmax.f32 %v3109_v60, %v1468_v10  ;;  %v3625_v28 = vld [vmem:[#allocation17_spill] sm:$0xff]  ;;  %v3632_v42 = vld [vmem:[#allocation24_spill] sm:$0xff] }
 0x3b5   : > { %1586 = vst [vmem:[%s3536_s5 + $0x60] sm:$0xff] %v1522_v53  ;;  %1587 = vst [vmem:[%s3536_s5 + $0x68] sm:$0xff] %v1523_v23  ;;  %v1533_v63 = vmax.f32 %v3111_v35, %v1469_v49  ;;  %v1534_v0 = vmax.f32 %v3113_v46, %v1470_v26  ;;  %v1535_v14 = vmax.f32 %v3115_v24, %v1471_v17  ;;  %v3633_v13 = vld [vmem:[#allocation25_spill] sm:$0xff]  ;;  %v3634_v59 = vld [vmem:[#allocation26_spill] sm:$0xff] }
 0x3b6   : > { %1588 = vst [vmem:[%s3536_s5 + $0x70] sm:$0xff] %v1524_v29  ;;  %1589 = vst [vmem:[%s3536_s5 + $0x78] sm:$0xff] %v1525_v33  ;;  %v1536_v26 = vmax.f32 %v3117_v5, %v1472_v39  ;;  %v1537_v15 = vmax.f32 %v3119_v19, %v1473_v22  ;;  %v1538_v9 = vmax.f32 %v3121_v41, %v1474_v21  ;;  %v3626_v41 = vld [vmem:[#allocation18_spill] sm:$0xff]  ;;  %v3635_v10 = vld [vmem:[#allocation27_spill] sm:$0xff] }
 0x3b7   : > { %1590 = vst [vmem:[%s3536_s5 + $0x80] sm:$0xff] %v1526_v47  ;;  %1591 = vst [vmem:[%s3536_s5 + $0x88] sm:$0xff] %v1527_v3  ;;  %v1539_v16 = vmax.f32 %v3123_v43, %v1475_v57  ;;  %v1540_v22 = vmax.f32 %v3125_v45, %v1476_v18  ;;  %v1541_v12 = vmax.f32 %v3127_v48, %v1477_v31  ;;  %v3627_v43 = vld [vmem:[#allocation19_spill] sm:$0xff]  ;;  %v3628_v48 = vld [vmem:[#allocation20_spill] sm:$0xff]  ;;  %v1380_v39 = vpop.permute.xlu1 %1379 }
 0x3b8   : > { %1592 = vst [vmem:[%s3536_s5 + $0x90] sm:$0xff] %v1528_v27  ;;  %1593 = vst [vmem:[%s3536_s5 + $0x98] sm:$0xff] %v1529_v37  ;;  %v1338_v18 = vmul.f32 %v1304_v34, %v3624_v40  ;;  %v1339_v50 = vmul.f32 %v1304_v34, %v3625_v28  ;;  %v1340_v60 = vmul.f32 %v1304_v34, %v2723_v56  ;;  %v3636_v49 = vld [vmem:[#allocation28_spill] sm:$0xff]  ;;  %v3637_v38 = vld [vmem:[#allocation3_spill] sm:$0xff] }
 0x3b9   : > { %1594 = vst [vmem:[%s3536_s5 + $0xa0] sm:$0xff] %v1530_v55  ;;  %1595 = vst [vmem:[%s3536_s5 + $0xa8] sm:$0xff] %v1531_v44  ;;  %v1341_v35 = vmul.f32 %v1304_v34, %v2737_v36  ;;  %v1342_v46 = vmul.f32 %v1304_v34, %v2747_v1  ;;  %v1343_v24 = vmul.f32 %v1304_v34, %v2759_v6  ;;  %v3638_v57 = vld [vmem:[#allocation4_spill] sm:$0xff]  ;;  %v3639_v31 = vld [vmem:[#allocation5_spill] sm:$0xff] }
 0x3ba   : > { %1596 = vst [vmem:[%s3536_s5 + $0xb0] sm:$0xff] %v1532_v52  ;;  %1597 = vst [vmem:[%s3536_s5 + $0xb8] sm:$0xff] %v1533_v63  ;;  %v1344_v5 = vmul.f32 %v1304_v34, %v2771_v51  ;;  %v1345_v19 = vmul.f32 %v1304_v34, %v2783_v54  ;;  %v1346_v56 = vmul.f32 %v1304_v34, %v2795_v8  ;;  %v3641_v53 = vld [vmem:[#allocation7_spill] sm:$0xff]  ;;  %v3642_v29 = vld [vmem:[#allocation8_spill] sm:$0xff] }
 0x3bb   : > { %1598 = vst [vmem:[%s3536_s5 + $0xc0] sm:$0xff] %v1534_v0  ;;  %1599 = vst [vmem:[%s3536_s5 + $0xc8] sm:$0xff] %v1535_v14  ;;  %v1347_v36 = vmul.f32 %v1304_v34, %v2807_v62  ;;  %v1348_v1 = vmul.f32 %v1304_v34, %v3626_v41  ;;  %v1349_v45 = vmul.f32 %v1304_v34, %v3627_v43  ;;  %v3643_v47 = vld [vmem:[#allocation9_spill] sm:$0xff]  ;;  %v3644_v27 = vld [vmem:[#allocation10_spill] sm:$0xff] }
 0x3bc   : > { %1600 = vst [vmem:[%s3536_s5 + $0xd0] sm:$0xff] %v1536_v26  ;;  %1601 = vst [vmem:[%s3536_s5 + $0xd8] sm:$0xff] %v1537_v15  ;;  %v1350_v58 = vmul.f32 %v1304_v34, %v3628_v48  ;;  %v1351_v7 = vmul.f32 %v1304_v34, %v3629_v2  ;;  %v1352_v4 = vmul.f32 %v1304_v34, %v3630_v11  ;;  %v3645_v55 = vld [vmem:[#allocation11_spill] sm:$0xff]  ;;  %v3646_v52 = vld [vmem:[#allocation12_spill] sm:$0xff] }
 0x3bd   : > { %1602 = vst [vmem:[%s3536_s5 + $0xe0] sm:$0xff] %v1538_v9  ;;  %1603 = vst [vmem:[%s3536_s5 + $0xe8] sm:$0xff] %v1539_v16  ;;  %v1353_v6 = vmul.f32 %v1304_v34, %v3631_v32  ;;  %v1354_v51 = vmul.f32 %v1304_v34, %v3632_v42  ;;  %v1355_v54 = vmul.f32 %v1304_v34, %v3633_v13  ;;  %v3647_v0 = vld [vmem:[#allocation13_spill] sm:$0xff] }
 0x3be   : > { %1604 = vst [vmem:[%s3536_s5 + $0xf0] sm:$0xff] %v1540_v22  ;;  %1605 = vst [vmem:[%s3536_s5 + $0xf8] sm:$0xff] %v1541_v12  ;;  %v1356_v8 = vmul.f32 %v1304_v34, %v3634_v59  ;;  %v1357_v62 = vmul.f32 %v1304_v34, %v3635_v10  ;;  %v1358_v17 = vmul.f32 %v1304_v34, %v3636_v49 }
 0x3bf   : > { %v1359_v21 = vmul.f32 %v1304_v34, %v3637_v38  ;;  %v1360_v30 = vmul.f32 %v1304_v34, %v3638_v57  ;;  %v1361_v61 = vmul.f32 %v1304_v34, %v3639_v31  ;;  %v1362_v25 = vmul.f32 %v1304_v34, %v3640_v20 }
 0x3c0   : > { %v1363_v23 = vmul.f32 %v1304_v34, %v3641_v53  ;;  %v1364_v33 = vmul.f32 %v1304_v34, %v3642_v29  ;;  %v1365_v3 = vmul.f32 %v1304_v34, %v3643_v47  ;;  %v1366_v37 = vmul.f32 %v1304_v34, %v3644_v27 }
 0x3c1   : > { %v1367_v44 = vmul.f32 %v1304_v34, %v3645_v55  ;;  %v1368_v63 = vmul.f32 %v1304_v34, %v3646_v52  ;;  %v1369_v14 = vmul.f32 %v1304_v34, %v3647_v0  ;;  %v1414_v26 = vadd.f32 %v1380_v39, %v1338_v18 }
 0x3c2   : > { %v1415_v15 = vadd.f32 %v1380_v39, %v1339_v50  ;;  %v1416_v9 = vadd.f32 %v1380_v39, %v1340_v60  ;;  %v1417_v16 = vadd.f32 %v1380_v39, %v1341_v35  ;;  %v3313_v22 = vadd.f32 %v1380_v39, %v1342_v46 }
 0x3c3   : > { %v3315_v12 = vadd.f32 %v1380_v39, %v1343_v24  ;;  %v3317_v40 = vadd.f32 %v1380_v39, %v1344_v5  ;;  %v3319_v28 = vadd.f32 %v1380_v39, %v1345_v19  ;;  %v3321_v41 = vadd.f32 %v1380_v39, %v1346_v56 }
 0x3c4   : > { %v3323_v43 = vadd.f32 %v1380_v39, %v1347_v36  ;;  %v3325_v48 = vadd.f32 %v1380_v39, %v1348_v1  ;;  %v3327_v2 = vadd.f32 %v1380_v39, %v1349_v45  ;;  %v3329_v34 = vadd.f32 %v1380_v39, %v1350_v58 }
 0x3c5   : > { %v3331_v18 = vadd.f32 %v1380_v39, %v1351_v7  ;;  %v3333_v50 = vadd.f32 %v1380_v39, %v1352_v4  ;;  %v3335_v60 = vadd.f32 %v1380_v39, %v1353_v6  ;;  %v3337_v35 = vadd.f32 %v1380_v39, %v1354_v51 }
 0x3c6   : > { %v3339_v46 = vadd.f32 %v1380_v39, %v1355_v54  ;;  %v3341_v24 = vadd.f32 %v1380_v39, %v1356_v8  ;;  %v3343_v5 = vadd.f32 %v1380_v39, %v1357_v62  ;;  %v3345_v19 = vadd.f32 %v1380_v39, %v1358_v17 }
 0x3c7   : > { %v3347_v56 = vadd.f32 %v1380_v39, %v1359_v21  ;;  %v3349_v36 = vadd.f32 %v1380_v39, %v1360_v30  ;;  %v3351_v1 = vadd.f32 %v1380_v39, %v1361_v61  ;;  %v3353_v45 = vadd.f32 %v1380_v39, %v1362_v25 }
 0x3c8   : > { %v3355_v58 = vadd.f32 %v1380_v39, %v1363_v23  ;;  %v3357_v7 = vadd.f32 %v1380_v39, %v1364_v33  ;;  %v3359_v11 = vadd.f32 %v1380_v39, %v1365_v3  ;;  %v3361_v4 = vadd.f32 %v1380_v39, %v1366_v37 }
 0x3c9   : > { %v3363_v32 = vadd.f32 %v1380_v39, %v1367_v44  ;;  %v3365_v6 = vadd.f32 %v1380_v39, %v1368_v63  ;;  %v1478_v42 = vmul.f32 0.2, %v1414_v26  ;;  %v1479_v51 = vmul.f32 0.2, %v1415_v15 }
 0x3ca   : > { %v3367_v13 = vadd.f32 %v1380_v39, %v1369_v14  ;;  %v1480_v54 = vmul.f32 0.2, %v1416_v9  ;;  %v1481_v59 = vmul.f32 0.2, %v1417_v16  ;;  %v1482_v8 = vmul.f32 0.2, %v3313_v22 }
 0x3cb   : > { %v1483_v10 = vmul.f32 0.2, %v3315_v12  ;;  %v1484_v62 = vmul.f32 0.2, %v3317_v40  ;;  %v1485_v49 = vmul.f32 0.2, %v3319_v28  ;;  %v1542_v17 = vmax.f32 %v1414_v26, %v1478_v42 }
 0x3cc   : > { %v1486_v38 = vmul.f32 0.2, %v3321_v41  ;;  %v1487_v21 = vmul.f32 0.2, %v3323_v43  ;;  %v1488_v57 = vmul.f32 0.2, %v3325_v48  ;;  %v1543_v30 = vmax.f32 %v1415_v15, %v1479_v51 }
 0x3cd   : > { %v1489_v39 = vmul.f32 0.2, %v3327_v2  ;;  %v1490_v31 = vmul.f32 0.2, %v3329_v34  ;;  %v1491_v61 = vmul.f32 0.2, %v3331_v18  ;;  %v1544_v20 = vmax.f32 %v1416_v9, %v1480_v54 }
 0x3ce   : > { %1606 = vst [vmem:[%s3536_s5 + $0x100] sm:$0xff] %v1542_v17  ;;  %v1492_v25 = vmul.f32 0.2, %v3333_v50  ;;  %v1493_v53 = vmul.f32 0.2, %v3335_v60  ;;  %v1545_v29 = vmax.f32 %v1417_v16, %v1481_v59  ;;  %1607 = vst [vmem:[%s3536_s5 + $0x108] sm:$0xff] %v1543_v30  ;;  %v1546_v27 = vmax.f32 %v3313_v22, %v1482_v8 }
 0x3cf   : > { %v1494_v23 = vmul.f32 0.2, %v3337_v35  ;;  %v1495_v33 = vmul.f32 0.2, %v3339_v46  ;;  %v1496_v47 = vmul.f32 0.2, %v3341_v24  ;;  %v1547_v52 = vmax.f32 %v3315_v12, %v1483_v10 }
 0x3d0   : > { %v1497_v3 = vmul.f32 0.2, %v3343_v5  ;;  %1608 = vst [vmem:[%s3536_s5 + $0x110] sm:$0xff] %v1544_v20  ;;  %v1498_v37 = vmul.f32 0.2, %v3345_v19  ;;  %1609 = vst [vmem:[%s3536_s5 + $0x118] sm:$0xff] %v1545_v29  ;;  %v1548_v26 = vmax.f32 %v3317_v40, %v1484_v62  ;;  %v1549_v22 = vmax.f32 %v3319_v28, %v1485_v49 }
 0x3d1   : > { %v1499_v55 = vmul.f32 0.2, %v3347_v56  ;;  %v1500_v44 = vmul.f32 0.2, %v3349_v36  ;;  %v1501_v63 = vmul.f32 0.2, %v3351_v1  ;;  %v1550_v51 = vmax.f32 %v3321_v41, %v1486_v38 }
 0x3d2   : > { %v1502_v0 = vmul.f32 0.2, %v3353_v45  ;;  %v1503_v14 = vmul.f32 0.2, %v3355_v58  ;;  %1610 = vst [vmem:[%s3536_s5 + $0x120] sm:$0xff] %v1546_v27  ;;  %1611 = vst [vmem:[%s3536_s5 + $0x128] sm:$0xff] %v1547_v52  ;;  %v1551_v54 = vmax.f32 %v3323_v43, %v1487_v21  ;;  %v1552_v28 = vmax.f32 %v3325_v48, %v1488_v57 }
 0x3d3   : > { %v1504_v15 = vmul.f32 0.2, %v3357_v7  ;;  %v1505_v9 = vmul.f32 0.2, %v3359_v11  ;;  %v1506_v16 = vmul.f32 0.2, %v3361_v4  ;;  %v1553_v59 = vmax.f32 %v3327_v2, %v1489_v39 }
 0x3d4   : > { %v1507_v12 = vmul.f32 0.2, %v3363_v32  ;;  %v1508_v40 = vmul.f32 0.2, %v3365_v6  ;;  %v1509_v42 = vmul.f32 0.2, %v3367_v13  ;;  %v1554_v8 = vmax.f32 %v3329_v34, %v1490_v31 }
 0x3d5   : > { %1612 = vst [vmem:[%s3536_s5 + $0x130] sm:$0xff] %v1548_v26  ;;  %1613 = vst [vmem:[%s3536_s5 + $0x138] sm:$0xff] %v1549_v22  ;;  %v1555_v10 = vmax.f32 %v3331_v18, %v1491_v61  ;;  %v1556_v41 = vmax.f32 %v3333_v50, %v1492_v25  ;;  %v1557_v62 = vmax.f32 %v3335_v60, %v1493_v53 }
 0x3d6   : > { %v1558_v49 = vmax.f32 %v3337_v35, %v1494_v23  ;;  %1614 = vst [vmem:[%s3536_s5 + $0x140] sm:$0xff] %v1550_v51  ;;  %v1559_v43 = vmax.f32 %v3339_v46, %v1495_v33  ;;  %v1560_v48 = vmax.f32 %v3341_v24, %v1496_v47  ;;  %v1561_v2 = vmax.f32 %v3343_v5, %v1497_v3 }
 0x3d7   : > { %v1562_v34 = vmax.f32 %v3345_v19, %v1498_v37  ;;  %1615 = vst [vmem:[%s3536_s5 + $0x148] sm:$0xff] %v1551_v54  ;;  %1616 = vst [vmem:[%s3536_s5 + $0x150] sm:$0xff] %v1552_v28  ;;  %v1563_v18 = vmax.f32 %v3347_v56, %v1499_v55  ;;  %v1564_v50 = vmax.f32 %v3349_v36, %v1500_v44 }
 0x3d8   : > { %1617 = vst [vmem:[%s3536_s5 + $0x158] sm:$0xff] %v1553_v59  ;;  %1618 = vst [vmem:[%s3536_s5 + $0x160] sm:$0xff] %v1554_v8  ;;  %v1565_v60 = vmax.f32 %v3351_v1, %v1501_v63  ;;  %v1566_v35 = vmax.f32 %v3353_v45, %v1502_v0  ;;  %v1567_v46 = vmax.f32 %v3355_v58, %v1503_v14 }
 0x3d9   : > { %1619 = vst [vmem:[%s3536_s5 + $0x168] sm:$0xff] %v1555_v10  ;;  %1620 = vst [vmem:[%s3536_s5 + $0x170] sm:$0xff] %v1556_v41  ;;  %v1568_v24 = vmax.f32 %v3357_v7, %v1504_v15  ;;  %v1569_v5 = vmax.f32 %v3359_v11, %v1505_v9  ;;  %v1570_v19 = vmax.f32 %v3361_v4, %v1506_v16 }
 0x3da   : > { %1621 = vst [vmem:[%s3536_s5 + $0x178] sm:$0xff] %v1557_v62  ;;  %1622 = vst [vmem:[%s3536_s5 + $0x180] sm:$0xff] %v1558_v49  ;;  %v1571_v56 = vmax.f32 %v3363_v32, %v1507_v12  ;;  %v1572_v36 = vmax.f32 %v3365_v6, %v1508_v40  ;;  %v1573_v1 = vmax.f32 %v3367_v13, %v1509_v42 }
 0x3db   : > { %1623 = vst [vmem:[%s3536_s5 + $0x188] sm:$0xff] %v1559_v43  ;;  %1624 = vst [vmem:[%s3536_s5 + $0x190] sm:$0xff] %v1560_v48 }
 0x3dc   : > { %1625 = vst [vmem:[%s3536_s5 + $0x198] sm:$0xff] %v1561_v2  ;;  %1626 = vst [vmem:[%s3536_s5 + $0x1a0] sm:$0xff] %v1562_v34 }
 0x3dd   : > { %1627 = vst [vmem:[%s3536_s5 + $0x1a8] sm:$0xff] %v1563_v18  ;;  %1628 = vst [vmem:[%s3536_s5 + $0x1b0] sm:$0xff] %v1564_v50 }
 0x3de   : > { %1629 = vst [vmem:[%s3536_s5 + $0x1b8] sm:$0xff] %v1565_v60  ;;  %1630 = vst [vmem:[%s3536_s5 + $0x1c0] sm:$0xff] %v1566_v35 }
 0x3df   : > { %1631 = vst [vmem:[%s3536_s5 + $0x1c8] sm:$0xff] %v1567_v46  ;;  %1632 = vst [vmem:[%s3536_s5 + $0x1d0] sm:$0xff] %v1568_v24 }
 0x3e0   : > { %1633 = vst [vmem:[%s3536_s5 + $0x1d8] sm:$0xff] %v1569_v5  ;;  %1634 = vst [vmem:[%s3536_s5 + $0x1e0] sm:$0xff] %v1570_v19 }
 0x3e1   : > { %1635 = vst [vmem:[%s3536_s5 + $0x1e8] sm:$0xff] %v1571_v56  ;;  %1636 = vst [vmem:[%s3536_s5 + $0x1f0] sm:$0xff] %v1572_v36 }
 0x3e2   : > { %1637 = vst [vmem:[%s3536_s5 + $0x1f8] sm:$0xff] %v1573_v1 }
 0x3e3 PF: > { %p12_p9 = scmp.ge.s32.totalorder %s1796_s22, 6   ;;  %s3648_s18 = smov %s1740_s19 }
 0x3e4   : > { %s3649_s19 = smov %s1805_s25  ;;  %s3650_s20 = smov %s1796_s22 }
 0x3e5   :  { %14 = sbr.rel (!%p12_p9) target bundleno = 2 (0x2), region = 99 }

// kernel: discriminator_r_forward.8
= control target key start
LH: loop header
LB: loop body
LE: loop exit
PB: predicated region body
PF: predicated region fallthrough
CT: control target
= control target key end

     0   :  { %s1388_s18 = smov 0   ;;  %s1390_s19 = smov 0   ;;  %s2380_s0 = inlined_call_operand.vmem [shape: f32[32,256], index: 0, kind: input, shape index: {}]   ;;  %s2381_s1 = inlined_call_operand.vmem [shape: f32[32,1], index: 1, kind: input, shape index: {}]   ;;  %s2382_s2 = inlined_call_operand.vmem [shape: f32[32,1], index: 2, kind: input, shape index: {}]   ;;  %s2383_s3 = inlined_call_operand.vmem [shape: f32[32,1], index: 3, kind: input, shape index: {}]   ;;  %s2384_s4 = inlined_call_operand.vmem [shape: f32[256,1024], index: 4, kind: input, shape index: {}]   ;;  %s2385_s5 = inlined_call_operand.vmem [shape: f32[32,1024], index: 5, kind: output, shape index: {}]  }
   0x1   :  { %s1392_s20 = smov 0  }
   0x2 LB: > { %s1280_s21 = sadd.s32 4294967295, %s1354_s20   ;;  %s1405_s22 = sadd.s32 1, %s1354_s20   ;;  %s1354_s20 = sphi %s1392_s20, %s2388_s20   ;;  %s1350_s19 = sphi %s1390_s19, %s2387_s19   ;;  %s1346_s18 = sphi %s1388_s18, %s2386_s18  }
   0x3   : > { %s103_s23 = ssub.s32 %s1354_s20, %s1405_s22  ;;  %s106_s24 = sadd.s32 1, %s1350_s19 }
   0x4   : > { %p104_p0 = scmp.eq.s32.totalorder %s103_s23, 0  ;;  %p113_p1 = scmp.ne.s32.totalorder %s1350_s19, %s1346_s18 }
   0x5   : > { %p114_p2 = scmp.eq.s32.totalorder %s1354_s20, 0  ;;  %p1282_p4 = scmp.ge.s32.totalorder %s1354_s20, 2 }
   0x6   : > { %s1414_s25 = scalar_select %p104_p0, %s1350_s19, %s106_s24  }
   0x7   : > { %p115_p3 = por %p114_p2, %p113_p1  ;;  %172 = sbr.rel (%p1282_p4) target bundleno = 80 (0x50), region = 32 }
   0xc   : > { %175 = sbr.rel (!%p115_p3) target bundleno = 80 (0x50), region = 36  ;;  %s177_s26 = sand.u32 (%p115_p3), 1, %s1350_s19  }
   0xd   : > { %s1293_s27 = sshll.u32 (%p115_p3), %s1354_s20, 5  ;;  %s1283_s28 = sshll.u32 (%p115_p3), %s177_s26, 10 }
   0xe   : > { %s1422_s6 = scalar_lea.vmem (%p115_p3), %s2384_s4, %s1293_s27  ;;  %s1427_s7 = scalar_lea.vmem (%p115_p3), [#allocation2], %s1283_s28 }
   0xf   : > { %v195_v0 = vld [vmem:[%s1422_s6] sm:$0xff] (%p115_p3)  ;;  %v197_v1 = vld [vmem:[%s1422_s6 + $0x8] sm:$0xff] (%p115_p3)  ;;  %v199_v2 = vld [vmem:[%s1422_s6 + $0x10] sm:$0xff] (%p115_p3) }
  0x10   : > { %196 = vst [vmem:[%s1427_s7] sm:$0xff] (%p115_p3), %v195_v0  ;;  %198 = vst [vmem:[%s1427_s7 + $0x8] sm:$0xff] (%p115_p3), %v197_v1  ;;  %v201_v3 = vld [vmem:[%s1422_s6 + $0x18] sm:$0xff] (%p115_p3)  ;;  %v203_v4 = vld [vmem:[%s1422_s6 + $0x40] sm:$0xff] (%p115_p3) }
  0x11   : > { %200 = vst [vmem:[%s1427_s7 + $0x10] sm:$0xff] %v199_v2  ;;  %v205_v5 = vld [vmem:[%s1422_s6 + $0x48] sm:$0xff]  ;;  %202 = vst [vmem:[%s1427_s7 + $0x18] sm:$0xff] %v201_v3  ;;  %v207_v6 = vld [vmem:[%s1422_s6 + $0x50] sm:$0xff] }
  0x12   : > { %204 = vst [vmem:[%s1427_s7 + $0x20] sm:$0xff] %v203_v4  ;;  %206 = vst [vmem:[%s1427_s7 + $0x28] sm:$0xff] %v205_v5  ;;  %v209_v7 = vld [vmem:[%s1422_s6 + $0x58] sm:$0xff]  ;;  %v211_v8 = vld [vmem:[%s1422_s6 + $0x80] sm:$0xff] }
  0x13   : > { %208 = vst [vmem:[%s1427_s7 + $0x30] sm:$0xff] %v207_v6  ;;  %210 = vst [vmem:[%s1427_s7 + $0x38] sm:$0xff] %v209_v7  ;;  %v213_v9 = vld [vmem:[%s1422_s6 + $0x88] sm:$0xff]  ;;  %v215_v10 = vld [vmem:[%s1422_s6 + $0x90] sm:$0xff] }
  0x14   : > { %212 = vst [vmem:[%s1427_s7 + $0x40] sm:$0xff] %v211_v8  ;;  %v217_v11 = vld [vmem:[%s1422_s6 + $0x98] sm:$0xff]  ;;  %214 = vst [vmem:[%s1427_s7 + $0x48] sm:$0xff] %v213_v9  ;;  %v219_v12 = vld [vmem:[%s1422_s6 + $0xc0] sm:$0xff] }
  0x15   : > { %216 = vst [vmem:[%s1427_s7 + $0x50] sm:$0xff] %v215_v10  ;;  %218 = vst [vmem:[%s1427_s7 + $0x58] sm:$0xff] %v217_v11  ;;  %v221_v13 = vld [vmem:[%s1422_s6 + $0xc8] sm:$0xff]  ;;  %v223_v14 = vld [vmem:[%s1422_s6 + $0xd0] sm:$0xff] }
  0x16   : > { %220 = vst [vmem:[%s1427_s7 + $0x60] sm:$0xff] %v219_v12  ;;  %222 = vst [vmem:[%s1427_s7 + $0x68] sm:$0xff] %v221_v13  ;;  %v225_v15 = vld [vmem:[%s1422_s6 + $0xd8] sm:$0xff]  ;;  %v227_v16 = vld [vmem:[%s1422_s6 + $0x100] sm:$0xff] }
  0x17   : > { %224 = vst [vmem:[%s1427_s7 + $0x70] sm:$0xff] %v223_v14  ;;  %v229_v17 = vld [vmem:[%s1422_s6 + $0x108] sm:$0xff]  ;;  %226 = vst [vmem:[%s1427_s7 + $0x78] sm:$0xff] %v225_v15  ;;  %v231_v18 = vld [vmem:[%s1422_s6 + $0x110] sm:$0xff] }
  0x18   : > { %228 = vst [vmem:[%s1427_s7 + $0x80] sm:$0xff] %v227_v16  ;;  %230 = vst [vmem:[%s1427_s7 + $0x88] sm:$0xff] %v229_v17  ;;  %v233_v19 = vld [vmem:[%s1422_s6 + $0x118] sm:$0xff]  ;;  %v235_v20 = vld [vmem:[%s1422_s6 + $0x140] sm:$0xff] }
  0x19   : > { %232 = vst [vmem:[%s1427_s7 + $0x90] sm:$0xff] %v231_v18  ;;  %234 = vst [vmem:[%s1427_s7 + $0x98] sm:$0xff] %v233_v19  ;;  %v237_v21 = vld [vmem:[%s1422_s6 + $0x148] sm:$0xff]  ;;  %v239_v22 = vld [vmem:[%s1422_s6 + $0x150] sm:$0xff] }
  0x1a   : > { %236 = vst [vmem:[%s1427_s7 + $0xa0] sm:$0xff] %v235_v20  ;;  %v241_v23 = vld [vmem:[%s1422_s6 + $0x158] sm:$0xff]  ;;  %238 = vst [vmem:[%s1427_s7 + $0xa8] sm:$0xff] %v237_v21  ;;  %v243_v24 = vld [vmem:[%s1422_s6 + $0x180] sm:$0xff] }
  0x1b   : > { %240 = vst [vmem:[%s1427_s7 + $0xb0] sm:$0xff] %v239_v22  ;;  %242 = vst [vmem:[%s1427_s7 + $0xb8] sm:$0xff] %v241_v23  ;;  %v245_v25 = vld [vmem:[%s1422_s6 + $0x188] sm:$0xff]  ;;  %v247_v26 = vld [vmem:[%s1422_s6 + $0x190] sm:$0xff] }
  0x1c   : > { %244 = vst [vmem:[%s1427_s7 + $0xc0] sm:$0xff] %v243_v24  ;;  %246 = vst [vmem:[%s1427_s7 + $0xc8] sm:$0xff] %v245_v25  ;;  %v249_v27 = vld [vmem:[%s1422_s6 + $0x198] sm:$0xff]  ;;  %v251_v28 = vld [vmem:[%s1422_s6 + $0x1c0] sm:$0xff] }
  0x1d   : > { %248 = vst [vmem:[%s1427_s7 + $0xd0] sm:$0xff] %v247_v26  ;;  %v253_v29 = vld [vmem:[%s1422_s6 + $0x1c8] sm:$0xff]  ;;  %250 = vst [vmem:[%s1427_s7 + $0xd8] sm:$0xff] %v249_v27  ;;  %v255_v30 = vld [vmem:[%s1422_s6 + $0x1d0] sm:$0xff] }
  0x1e   : > { %252 = vst [vmem:[%s1427_s7 + $0xe0] sm:$0xff] %v251_v28  ;;  %254 = vst [vmem:[%s1427_s7 + $0xe8] sm:$0xff] %v253_v29  ;;  %v257_v31 = vld [vmem:[%s1422_s6 + $0x1d8] sm:$0xff]  ;;  %v259_v32 = vld [vmem:[%s1422_s6 + $0x200] sm:$0xff] }
  0x1f   : > { %256 = vst [vmem:[%s1427_s7 + $0xf0] sm:$0xff] %v255_v30  ;;  %258 = vst [vmem:[%s1427_s7 + $0xf8] sm:$0xff] %v257_v31  ;;  %v261_v33 = vld [vmem:[%s1422_s6 + $0x208] sm:$0xff]  ;;  %v263_v34 = vld [vmem:[%s1422_s6 + $0x210] sm:$0xff] }
  0x20   : > { %260 = vst [vmem:[%s1427_s7 + $0x100] sm:$0xff] %v259_v32  ;;  %v265_v35 = vld [vmem:[%s1422_s6 + $0x218] sm:$0xff]  ;;  %262 = vst [vmem:[%s1427_s7 + $0x108] sm:$0xff] %v261_v33  ;;  %v267_v36 = vld [vmem:[%s1422_s6 + $0x240] sm:$0xff] }
  0x21   : > { %264 = vst [vmem:[%s1427_s7 + $0x110] sm:$0xff] %v263_v34  ;;  %266 = vst [vmem:[%s1427_s7 + $0x118] sm:$0xff] %v265_v35  ;;  %v269_v37 = vld [vmem:[%s1422_s6 + $0x248] sm:$0xff]  ;;  %v271_v38 = vld [vmem:[%s1422_s6 + $0x250] sm:$0xff] }
  0x22   : > { %268 = vst [vmem:[%s1427_s7 + $0x120] sm:$0xff] %v267_v36  ;;  %270 = vst [vmem:[%s1427_s7 + $0x128] sm:$0xff] %v269_v37  ;;  %v273_v39 = vld [vmem:[%s1422_s6 + $0x258] sm:$0xff]  ;;  %v275_v40 = vld [vmem:[%s1422_s6 + $0x280] sm:$0xff] }
  0x23   : > { %272 = vst [vmem:[%s1427_s7 + $0x130] sm:$0xff] %v271_v38  ;;  %v277_v41 = vld [vmem:[%s1422_s6 + $0x288] sm:$0xff]  ;;  %274 = vst [vmem:[%s1427_s7 + $0x138] sm:$0xff] %v273_v39  ;;  %v279_v42 = vld [vmem:[%s1422_s6 + $0x290] sm:$0xff] }
  0x24   : > { %276 = vst [vmem:[%s1427_s7 + $0x140] sm:$0xff] %v275_v40  ;;  %278 = vst [vmem:[%s1427_s7 + $0x148] sm:$0xff] %v277_v41  ;;  %v281_v43 = vld [vmem:[%s1422_s6 + $0x298] sm:$0xff]  ;;  %v283_v44 = vld [vmem:[%s1422_s6 + $0x2c0] sm:$0xff] }
  0x25   : > { %280 = vst [vmem:[%s1427_s7 + $0x150] sm:$0xff] %v279_v42  ;;  %282 = vst [vmem:[%s1427_s7 + $0x158] sm:$0xff] %v281_v43  ;;  %v285_v45 = vld [vmem:[%s1422_s6 + $0x2c8] sm:$0xff]  ;;  %v287_v46 = vld [vmem:[%s1422_s6 + $0x2d0] sm:$0xff] }
  0x26   : > { %284 = vst [vmem:[%s1427_s7 + $0x160] sm:$0xff] %v283_v44  ;;  %v289_v47 = vld [vmem:[%s1422_s6 + $0x2d8] sm:$0xff]  ;;  %286 = vst [vmem:[%s1427_s7 + $0x168] sm:$0xff] %v285_v45  ;;  %v291_v48 = vld [vmem:[%s1422_s6 + $0x300] sm:$0xff] }
  0x27   : > { %288 = vst [vmem:[%s1427_s7 + $0x170] sm:$0xff] %v287_v46  ;;  %290 = vst [vmem:[%s1427_s7 + $0x178] sm:$0xff] %v289_v47  ;;  %v293_v49 = vld [vmem:[%s1422_s6 + $0x308] sm:$0xff]  ;;  %v295_v50 = vld [vmem:[%s1422_s6 + $0x310] sm:$0xff] }
  0x28   : > { %292 = vst [vmem:[%s1427_s7 + $0x180] sm:$0xff] %v291_v48  ;;  %294 = vst [vmem:[%s1427_s7 + $0x188] sm:$0xff] %v293_v49  ;;  %v297_v51 = vld [vmem:[%s1422_s6 + $0x318] sm:$0xff]  ;;  %v299_v52 = vld [vmem:[%s1422_s6 + $0x340] sm:$0xff] }
  0x29   : > { %296 = vst [vmem:[%s1427_s7 + $0x190] sm:$0xff] %v295_v50  ;;  %v301_v53 = vld [vmem:[%s1422_s6 + $0x348] sm:$0xff]  ;;  %298 = vst [vmem:[%s1427_s7 + $0x198] sm:$0xff] %v297_v51  ;;  %v303_v54 = vld [vmem:[%s1422_s6 + $0x350] sm:$0xff] }
  0x2a   : > { %300 = vst [vmem:[%s1427_s7 + $0x1a0] sm:$0xff] %v299_v52  ;;  %302 = vst [vmem:[%s1427_s7 + $0x1a8] sm:$0xff] %v301_v53  ;;  %v305_v55 = vld [vmem:[%s1422_s6 + $0x358] sm:$0xff]  ;;  %v307_v56 = vld [vmem:[%s1422_s6 + $0x380] sm:$0xff] }
  0x2b   : > { %304 = vst [vmem:[%s1427_s7 + $0x1b0] sm:$0xff] %v303_v54  ;;  %306 = vst [vmem:[%s1427_s7 + $0x1b8] sm:$0xff] %v305_v55  ;;  %v309_v57 = vld [vmem:[%s1422_s6 + $0x388] sm:$0xff]  ;;  %v311_v58 = vld [vmem:[%s1422_s6 + $0x390] sm:$0xff] }
  0x2c   : > { %308 = vst [vmem:[%s1427_s7 + $0x1c0] sm:$0xff] %v307_v56  ;;  %v313_v59 = vld [vmem:[%s1422_s6 + $0x398] sm:$0xff]  ;;  %310 = vst [vmem:[%s1427_s7 + $0x1c8] sm:$0xff] %v309_v57  ;;  %v315_v60 = vld [vmem:[%s1422_s6 + $0x3c0] sm:$0xff] }
  0x2d   : > { %312 = vst [vmem:[%s1427_s7 + $0x1d0] sm:$0xff] %v311_v58  ;;  %314 = vst [vmem:[%s1427_s7 + $0x1d8] sm:$0xff] %v313_v59  ;;  %v317_v61 = vld [vmem:[%s1422_s6 + $0x3c8] sm:$0xff]  ;;  %v319_v62 = vld [vmem:[%s1422_s6 + $0x3d0] sm:$0xff] }
  0x2e   : > { %316 = vst [vmem:[%s1427_s7 + $0x1e0] sm:$0xff] %v315_v60  ;;  %318 = vst [vmem:[%s1427_s7 + $0x1e8] sm:$0xff] %v317_v61  ;;  %v321_v63 = vld [vmem:[%s1422_s6 + $0x3d8] sm:$0xff]  ;;  %v323_v0 = vld [vmem:[%s1422_s6 + $0x400] sm:$0xff] }
  0x2f   : > { %320 = vst [vmem:[%s1427_s7 + $0x1f0] sm:$0xff] %v319_v62  ;;  %v325_v1 = vld [vmem:[%s1422_s6 + $0x408] sm:$0xff]  ;;  %322 = vst [vmem:[%s1427_s7 + $0x1f8] sm:$0xff] %v321_v63  ;;  %v327_v2 = vld [vmem:[%s1422_s6 + $0x410] sm:$0xff] }
  0x30   : > { %324 = vst [vmem:[%s1427_s7 + $0x200] sm:$0xff] %v323_v0  ;;  %326 = vst [vmem:[%s1427_s7 + $0x208] sm:$0xff] %v325_v1  ;;  %v329_v3 = vld [vmem:[%s1422_s6 + $0x418] sm:$0xff]  ;;  %v331_v4 = vld [vmem:[%s1422_s6 + $0x440] sm:$0xff] }
  0x31   : > { %328 = vst [vmem:[%s1427_s7 + $0x210] sm:$0xff] %v327_v2  ;;  %330 = vst [vmem:[%s1427_s7 + $0x218] sm:$0xff] %v329_v3  ;;  %v333_v5 = vld [vmem:[%s1422_s6 + $0x448] sm:$0xff]  ;;  %v335_v6 = vld [vmem:[%s1422_s6 + $0x450] sm:$0xff] }
  0x32   : > { %332 = vst [vmem:[%s1427_s7 + $0x220] sm:$0xff] %v331_v4  ;;  %v337_v7 = vld [vmem:[%s1422_s6 + $0x458] sm:$0xff]  ;;  %334 = vst [vmem:[%s1427_s7 + $0x228] sm:$0xff] %v333_v5  ;;  %v339_v8 = vld [vmem:[%s1422_s6 + $0x480] sm:$0xff] }
  0x33   : > { %336 = vst [vmem:[%s1427_s7 + $0x230] sm:$0xff] %v335_v6  ;;  %338 = vst [vmem:[%s1427_s7 + $0x238] sm:$0xff] %v337_v7  ;;  %v341_v9 = vld [vmem:[%s1422_s6 + $0x488] sm:$0xff]  ;;  %v343_v10 = vld [vmem:[%s1422_s6 + $0x490] sm:$0xff] }
  0x34   : > { %340 = vst [vmem:[%s1427_s7 + $0x240] sm:$0xff] %v339_v8  ;;  %342 = vst [vmem:[%s1427_s7 + $0x248] sm:$0xff] %v341_v9  ;;  %v345_v11 = vld [vmem:[%s1422_s6 + $0x498] sm:$0xff]  ;;  %v347_v12 = vld [vmem:[%s1422_s6 + $0x4c0] sm:$0xff] }
  0x35   : > { %344 = vst [vmem:[%s1427_s7 + $0x250] sm:$0xff] %v343_v10  ;;  %v349_v13 = vld [vmem:[%s1422_s6 + $0x4c8] sm:$0xff]  ;;  %346 = vst [vmem:[%s1427_s7 + $0x258] sm:$0xff] %v345_v11  ;;  %v351_v14 = vld [vmem:[%s1422_s6 + $0x4d0] sm:$0xff] }
  0x36   : > { %348 = vst [vmem:[%s1427_s7 + $0x260] sm:$0xff] %v347_v12  ;;  %350 = vst [vmem:[%s1427_s7 + $0x268] sm:$0xff] %v349_v13  ;;  %v353_v15 = vld [vmem:[%s1422_s6 + $0x4d8] sm:$0xff]  ;;  %v355_v16 = vld [vmem:[%s1422_s6 + $0x500] sm:$0xff] }
  0x37   : > { %352 = vst [vmem:[%s1427_s7 + $0x270] sm:$0xff] %v351_v14  ;;  %354 = vst [vmem:[%s1427_s7 + $0x278] sm:$0xff] %v353_v15  ;;  %v357_v17 = vld [vmem:[%s1422_s6 + $0x508] sm:$0xff]  ;;  %v359_v18 = vld [vmem:[%s1422_s6 + $0x510] sm:$0xff] }
  0x38   : > { %356 = vst [vmem:[%s1427_s7 + $0x280] sm:$0xff] %v355_v16  ;;  %v361_v19 = vld [vmem:[%s1422_s6 + $0x518] sm:$0xff]  ;;  %358 = vst [vmem:[%s1427_s7 + $0x288] sm:$0xff] %v357_v17  ;;  %v363_v20 = vld [vmem:[%s1422_s6 + $0x540] sm:$0xff] }
  0x39   : > { %360 = vst [vmem:[%s1427_s7 + $0x290] sm:$0xff] %v359_v18  ;;  %362 = vst [vmem:[%s1427_s7 + $0x298] sm:$0xff] %v361_v19  ;;  %v365_v21 = vld [vmem:[%s1422_s6 + $0x548] sm:$0xff]  ;;  %v367_v22 = vld [vmem:[%s1422_s6 + $0x550] sm:$0xff] }
  0x3a   : > { %364 = vst [vmem:[%s1427_s7 + $0x2a0] sm:$0xff] %v363_v20  ;;  %366 = vst [vmem:[%s1427_s7 + $0x2a8] sm:$0xff] %v365_v21  ;;  %v369_v23 = vld [vmem:[%s1422_s6 + $0x558] sm:$0xff]  ;;  %v371_v24 = vld [vmem:[%s1422_s6 + $0x580] sm:$0xff] }
  0x3b   : > { %368 = vst [vmem:[%s1427_s7 + $0x2b0] sm:$0xff] %v367_v22  ;;  %v373_v25 = vld [vmem:[%s1422_s6 + $0x588] sm:$0xff]  ;;  %370 = vst [vmem:[%s1427_s7 + $0x2b8] sm:$0xff] %v369_v23  ;;  %v375_v26 = vld [vmem:[%s1422_s6 + $0x590] sm:$0xff] }
  0x3c   : > { %372 = vst [vmem:[%s1427_s7 + $0x2c0] sm:$0xff] %v371_v24  ;;  %374 = vst [vmem:[%s1427_s7 + $0x2c8] sm:$0xff] %v373_v25  ;;  %v377_v27 = vld [vmem:[%s1422_s6 + $0x598] sm:$0xff]  ;;  %v379_v28 = vld [vmem:[%s1422_s6 + $0x5c0] sm:$0xff] }
  0x3d   : > { %376 = vst [vmem:[%s1427_s7 + $0x2d0] sm:$0xff] %v375_v26  ;;  %378 = vst [vmem:[%s1427_s7 + $0x2d8] sm:$0xff] %v377_v27  ;;  %v381_v29 = vld [vmem:[%s1422_s6 + $0x5c8] sm:$0xff]  ;;  %v383_v30 = vld [vmem:[%s1422_s6 + $0x5d0] sm:$0xff] }
  0x3e   : > { %380 = vst [vmem:[%s1427_s7 + $0x2e0] sm:$0xff] %v379_v28  ;;  %v385_v31 = vld [vmem:[%s1422_s6 + $0x5d8] sm:$0xff]  ;;  %382 = vst [vmem:[%s1427_s7 + $0x2e8] sm:$0xff] %v381_v29  ;;  %v387_v32 = vld [vmem:[%s1422_s6 + $0x600] sm:$0xff] }
  0x3f   : > { %384 = vst [vmem:[%s1427_s7 + $0x2f0] sm:$0xff] %v383_v30  ;;  %386 = vst [vmem:[%s1427_s7 + $0x2f8] sm:$0xff] %v385_v31  ;;  %v389_v33 = vld [vmem:[%s1422_s6 + $0x608] sm:$0xff]  ;;  %v391_v34 = vld [vmem:[%s1422_s6 + $0x610] sm:$0xff] }
  0x40   : > { %388 = vst [vmem:[%s1427_s7 + $0x300] sm:$0xff] %v387_v32  ;;  %390 = vst [vmem:[%s1427_s7 + $0x308] sm:$0xff] %v389_v33  ;;  %v393_v35 = vld [vmem:[%s1422_s6 + $0x618] sm:$0xff]  ;;  %v395_v36 = vld [vmem:[%s1422_s6 + $0x640] sm:$0xff] }
  0x41   : > { %392 = vst [vmem:[%s1427_s7 + $0x310] sm:$0xff] %v391_v34  ;;  %v397_v37 = vld [vmem:[%s1422_s6 + $0x648] sm:$0xff]  ;;  %394 = vst [vmem:[%s1427_s7 + $0x318] sm:$0xff] %v393_v35  ;;  %v399_v38 = vld [vmem:[%s1422_s6 + $0x650] sm:$0xff] }
  0x42   : > { %396 = vst [vmem:[%s1427_s7 + $0x320] sm:$0xff] %v395_v36  ;;  %398 = vst [vmem:[%s1427_s7 + $0x328] sm:$0xff] %v397_v37  ;;  %v401_v39 = vld [vmem:[%s1422_s6 + $0x658] sm:$0xff]  ;;  %v403_v40 = vld [vmem:[%s1422_s6 + $0x680] sm:$0xff] }
  0x43   : > { %400 = vst [vmem:[%s1427_s7 + $0x330] sm:$0xff] %v399_v38  ;;  %402 = vst [vmem:[%s1427_s7 + $0x338] sm:$0xff] %v401_v39  ;;  %v405_v41 = vld [vmem:[%s1422_s6 + $0x688] sm:$0xff]  ;;  %v407_v42 = vld [vmem:[%s1422_s6 + $0x690] sm:$0xff] }
  0x44   : > { %404 = vst [vmem:[%s1427_s7 + $0x340] sm:$0xff] %v403_v40  ;;  %v409_v43 = vld [vmem:[%s1422_s6 + $0x698] sm:$0xff]  ;;  %406 = vst [vmem:[%s1427_s7 + $0x348] sm:$0xff] %v405_v41  ;;  %v411_v44 = vld [vmem:[%s1422_s6 + $0x6c0] sm:$0xff] }
  0x45   : > { %408 = vst [vmem:[%s1427_s7 + $0x350] sm:$0xff] %v407_v42  ;;  %410 = vst [vmem:[%s1427_s7 + $0x358] sm:$0xff] %v409_v43  ;;  %v413_v45 = vld [vmem:[%s1422_s6 + $0x6c8] sm:$0xff]  ;;  %v415_v46 = vld [vmem:[%s1422_s6 + $0x6d0] sm:$0xff] }
  0x46   : > { %412 = vst [vmem:[%s1427_s7 + $0x360] sm:$0xff] %v411_v44  ;;  %414 = vst [vmem:[%s1427_s7 + $0x368] sm:$0xff] %v413_v45  ;;  %v417_v47 = vld [vmem:[%s1422_s6 + $0x6d8] sm:$0xff]  ;;  %v419_v48 = vld [vmem:[%s1422_s6 + $0x700] sm:$0xff] }
  0x47   : > { %416 = vst [vmem:[%s1427_s7 + $0x370] sm:$0xff] %v415_v46  ;;  %v421_v49 = vld [vmem:[%s1422_s6 + $0x708] sm:$0xff]  ;;  %418 = vst [vmem:[%s1427_s7 + $0x378] sm:$0xff] %v417_v47  ;;  %v423_v50 = vld [vmem:[%s1422_s6 + $0x710] sm:$0xff] }
  0x48   : > { %420 = vst [vmem:[%s1427_s7 + $0x380] sm:$0xff] %v419_v48  ;;  %422 = vst [vmem:[%s1427_s7 + $0x388] sm:$0xff] %v421_v49  ;;  %v425_v51 = vld [vmem:[%s1422_s6 + $0x718] sm:$0xff]  ;;  %v427_v52 = vld [vmem:[%s1422_s6 + $0x740] sm:$0xff] }
  0x49   : > { %424 = vst [vmem:[%s1427_s7 + $0x390] sm:$0xff] %v423_v50  ;;  %426 = vst [vmem:[%s1427_s7 + $0x398] sm:$0xff] %v425_v51  ;;  %v429_v53 = vld [vmem:[%s1422_s6 + $0x748] sm:$0xff]  ;;  %v431_v54 = vld [vmem:[%s1422_s6 + $0x750] sm:$0xff] }
  0x4a   : > { %428 = vst [vmem:[%s1427_s7 + $0x3a0] sm:$0xff] %v427_v52  ;;  %v433_v55 = vld [vmem:[%s1422_s6 + $0x758] sm:$0xff]  ;;  %430 = vst [vmem:[%s1427_s7 + $0x3a8] sm:$0xff] %v429_v53  ;;  %v435_v56 = vld [vmem:[%s1422_s6 + $0x780] sm:$0xff] }
  0x4b   : > { %432 = vst [vmem:[%s1427_s7 + $0x3b0] sm:$0xff] %v431_v54  ;;  %434 = vst [vmem:[%s1427_s7 + $0x3b8] sm:$0xff] %v433_v55  ;;  %v437_v57 = vld [vmem:[%s1422_s6 + $0x788] sm:$0xff]  ;;  %v439_v58 = vld [vmem:[%s1422_s6 + $0x790] sm:$0xff] }
  0x4c   : > { %436 = vst [vmem:[%s1427_s7 + $0x3c0] sm:$0xff] %v435_v56  ;;  %438 = vst [vmem:[%s1427_s7 + $0x3c8] sm:$0xff] %v437_v57  ;;  %v441_v59 = vld [vmem:[%s1422_s6 + $0x798] sm:$0xff]  ;;  %v443_v60 = vld [vmem:[%s1422_s6 + $0x7c0] sm:$0xff] }
  0x4d   : > { %440 = vst [vmem:[%s1427_s7 + $0x3d0] sm:$0xff] %v439_v58  ;;  %v445_v61 = vld [vmem:[%s1422_s6 + $0x7c8] sm:$0xff]  ;;  %442 = vst [vmem:[%s1427_s7 + $0x3d8] sm:$0xff] %v441_v59  ;;  %v447_v62 = vld [vmem:[%s1422_s6 + $0x7d0] sm:$0xff] }
  0x4e   : > { %444 = vst [vmem:[%s1427_s7 + $0x3e0] sm:$0xff] %v443_v60  ;;  %446 = vst [vmem:[%s1427_s7 + $0x3e8] sm:$0xff] %v445_v61  ;;  %v449_v63 = vld [vmem:[%s1422_s6 + $0x7d8] sm:$0xff] }
  0x4f   : > { %448 = vst [vmem:[%s1427_s7 + $0x3f0] sm:$0xff] %v447_v62  ;;  %450 = vst [vmem:[%s1427_s7 + $0x3f8] sm:$0xff] %v449_v63 }
  0x50 PF: > { %p1286_p5 = scmp.ge.s32.totalorder %s1354_s20, 1  ;;  %p455_p6 = scmp.lt.s32.totalorder %s1354_s20, 3 }
  0x52   : > { %p456_p7 = pnand %p1286_p5, %p455_p6 }
  0x53   : > { %s462_s8 = sand.u32 (!%p456_p7), 1, %s1346_s18   ;;  %s1288_s15 = sshll.u32 (!%p456_p7), %s1280_s21, 9 }
  0x54   : > { %459 = sbr.rel (%p456_p7) target bundleno = 868 (0x364), region = 59  ;;  %s1287_s11 = sshll.u32 (!%p456_p7), %s462_s8, 10 }
  0x55   : > { %s1691_s14 = scalar_lea.vmem (!%p456_p7), [#allocation2], %s1287_s11  ;;  %s824_s16 = sshra.s32 (!%p456_p7), %s1288_s15, 7 }
  0x56   : > { %s1289_s17 = sshll.u32 (!%p456_p7), %s824_s16, 3  ;;  %p1290_p8 = scmp.ne.s32.totalorder (!%p456_p7), %s1280_s21, 1 }
  0x57   : > { %s1856_s24 = scalar_lea.vmem (!%p456_p7), %s2385_s5, %s1289_s17 }
  0x59   : > { %v486_v0 = vld [vmem:[%s2380_s0 + $0x8] sm:$0xff]  ;;  %v1356_v1 = vmov 0   ;;  %v621_v2 = vld [vmem:[%s2381_s1] sm:$0xff]  ;;  %v556_v4 = vld [vmem:[%s1691_s14 + $0x1f8] sm:$0xff] }
  0x5a   : > { %709 = vmatprep.mubr.f32.mxu0 %v486_v0  ;;  %798 = vmatprep.mubr.f32.mxu1 %v486_v0  ;;  %v554_v3 = vld [vmem:[%s1691_s14 + $0x1e8] sm:$0xff]  ;;  %v553_v5 = vld [vmem:[%s1691_s14 + $0x1e0] sm:$0xff]  ;;  %v555_v6 = vld [vmem:[%s1691_s14 + $0x1f0] sm:$0xff] }
  0x5b   : > { %1320 = vset.pattern.permute.xlu0 %v1356_v1  ;;  %1321 = vset.pattern.permute.xlu1 %v1356_v1  ;;  %v550_v7 = vld [vmem:[%s1691_s14 + $0x1c8] sm:$0xff]  ;;  %v552_v8 = vld [vmem:[%s1691_s14 + $0x1d8] sm:$0xff]  ;;  %v549_v9 = vld [vmem:[%s1691_s14 + $0x1c0] sm:$0xff] }
  0x5c   : > { %627 = vperm.xlu0 %1320, %v621_v2   ;;  %645 = vmatprep.subr.mxu0 %v554_v3  ;;  %v551_v10 = vld [vmem:[%s1691_s14 + $0x1d0] sm:$0xff]  ;;  %v546_v11 = vld [vmem:[%s1691_s14 + $0x1a8] sm:$0xff]  ;;  %v548_v12 = vld [vmem:[%s1691_s14 + $0x1b8] sm:$0xff] }
  0x5d   : > { %734 = vmatprep.subr.mxu1 %v556_v4  ;;  %646 = vmatpush1.msra.mxu0 %v553_v5  ;;  %v545_v13 = vld [vmem:[%s1691_s14 + $0x1a0] sm:$0xff]  ;;  %v547_v14 = vld [vmem:[%s1691_s14 + $0x1b0] sm:$0xff]  ;;  %v542_v15 = vld [vmem:[%s1691_s14 + $0x188] sm:$0xff] }
  0x5e   : > { %735 = vmatpush1.msra.mxu1 %v555_v6  ;;  %647 = vmatprep.subr.mxu0 %v550_v7  ;;  %v544_v16 = vld [vmem:[%s1691_s14 + $0x198] sm:$0xff]  ;;  %v541_v17 = vld [vmem:[%s1691_s14 + $0x180] sm:$0xff]  ;;  %v543_v18 = vld [vmem:[%s1691_s14 + $0x190] sm:$0xff] }
  0x5f   : > { %736 = vmatprep.subr.mxu1 %v552_v8  ;;  %648 = vmatpush1.msra.mxu0 %v549_v9  ;;  %v538_v19 = vld [vmem:[%s1691_s14 + $0x168] sm:$0xff]  ;;  %v540_v20 = vld [vmem:[%s1691_s14 + $0x178] sm:$0xff]  ;;  %v537_v21 = vld [vmem:[%s1691_s14 + $0x160] sm:$0xff] }
  0x60   : > { %737 = vmatpush1.msra.mxu1 %v551_v10  ;;  %649 = vmatprep.subr.mxu0 %v546_v11  ;;  %v539_v22 = vld [vmem:[%s1691_s14 + $0x170] sm:$0xff]  ;;  %v534_v23 = vld [vmem:[%s1691_s14 + $0x148] sm:$0xff]  ;;  %v536_v24 = vld [vmem:[%s1691_s14 + $0x158] sm:$0xff] }
  0x61   : > { %738 = vmatprep.subr.mxu1 %v548_v12  ;;  %650 = vmatpush1.msra.mxu0 %v545_v13  ;;  %v533_v25 = vld [vmem:[%s1691_s14 + $0x140] sm:$0xff]  ;;  %v535_v26 = vld [vmem:[%s1691_s14 + $0x150] sm:$0xff]  ;;  %v530_v27 = vld [vmem:[%s1691_s14 + $0x128] sm:$0xff] }
  0x62   : > { %739 = vmatpush1.msra.mxu1 %v547_v14  ;;  %651 = vmatprep.subr.mxu0 %v542_v15  ;;  %v532_v28 = vld [vmem:[%s1691_s14 + $0x138] sm:$0xff]  ;;  %v529_v29 = vld [vmem:[%s1691_s14 + $0x120] sm:$0xff]  ;;  %v531_v30 = vld [vmem:[%s1691_s14 + $0x130] sm:$0xff] }
  0x63   : > { %740 = vmatprep.subr.mxu1 %v544_v16  ;;  %652 = vmatpush1.msra.mxu0 %v541_v17  ;;  %v526_v31 = vld [vmem:[%s1691_s14 + $0x108] sm:$0xff]  ;;  %v528_v32 = vld [vmem:[%s1691_s14 + $0x118] sm:$0xff]  ;;  %v525_v33 = vld [vmem:[%s1691_s14 + $0x100] sm:$0xff] }
  0x64   : > { %741 = vmatpush1.msra.mxu1 %v543_v18  ;;  %653 = vmatprep.subr.mxu0 %v538_v19  ;;  %v527_v34 = vld [vmem:[%s1691_s14 + $0x110] sm:$0xff]  ;;  %v522_v35 = vld [vmem:[%s1691_s14 + $0xe8] sm:$0xff]  ;;  %v524_v36 = vld [vmem:[%s1691_s14 + $0xf8] sm:$0xff] }
  0x65   : > { %742 = vmatprep.subr.mxu1 %v540_v20  ;;  %654 = vmatpush1.msra.mxu0 %v537_v21  ;;  %v521_v37 = vld [vmem:[%s1691_s14 + $0xe0] sm:$0xff]  ;;  %v523_v38 = vld [vmem:[%s1691_s14 + $0xf0] sm:$0xff]  ;;  %v518_v39 = vld [vmem:[%s1691_s14 + $0xc8] sm:$0xff] }
  0x66   : > { %743 = vmatpush1.msra.mxu1 %v539_v22  ;;  %655 = vmatprep.subr.mxu0 %v534_v23  ;;  %v520_v40 = vld [vmem:[%s1691_s14 + $0xd8] sm:$0xff]  ;;  %v517_v41 = vld [vmem:[%s1691_s14 + $0xc0] sm:$0xff]  ;;  %v519_v42 = vld [vmem:[%s1691_s14 + $0xd0] sm:$0xff] }
  0x67   : > { %744 = vmatprep.subr.mxu1 %v536_v24  ;;  %656 = vmatpush1.msra.mxu0 %v533_v25  ;;  %v514_v43 = vld [vmem:[%s1691_s14 + $0xa8] sm:$0xff]  ;;  %v516_v44 = vld [vmem:[%s1691_s14 + $0xb8] sm:$0xff]  ;;  %v513_v45 = vld [vmem:[%s1691_s14 + $0xa0] sm:$0xff] }
  0x68   : > { %745 = vmatpush1.msra.mxu1 %v535_v26  ;;  %657 = vmatprep.subr.mxu0 %v530_v27  ;;  %v515_v46 = vld [vmem:[%s1691_s14 + $0xb0] sm:$0xff]  ;;  %v510_v47 = vld [vmem:[%s1691_s14 + $0x88] sm:$0xff]  ;;  %v512_v48 = vld [vmem:[%s1691_s14 + $0x98] sm:$0xff] }
  0x69   : > { %746 = vmatprep.subr.mxu1 %v532_v28  ;;  %658 = vmatpush1.msra.mxu0 %v529_v29  ;;  %v509_v49 = vld [vmem:[%s1691_s14 + $0x80] sm:$0xff]  ;;  %v511_v50 = vld [vmem:[%s1691_s14 + $0x90] sm:$0xff]  ;;  %v506_v51 = vld [vmem:[%s1691_s14 + $0x68] sm:$0xff] }
  0x6a   : > { %747 = vmatpush1.msra.mxu1 %v531_v30  ;;  %659 = vmatprep.subr.mxu0 %v526_v31  ;;  %v508_v52 = vld [vmem:[%s1691_s14 + $0x78] sm:$0xff]  ;;  %v505_v53 = vld [vmem:[%s1691_s14 + $0x60] sm:$0xff]  ;;  %v507_v54 = vld [vmem:[%s1691_s14 + $0x70] sm:$0xff] }
  0x6b   : > { %748 = vmatprep.subr.mxu1 %v528_v32  ;;  %660 = vmatpush1.msra.mxu0 %v525_v33  ;;  %v502_v55 = vld [vmem:[%s1691_s14 + $0x48] sm:$0xff]  ;;  %v504_v56 = vld [vmem:[%s1691_s14 + $0x58] sm:$0xff]  ;;  %v501_v57 = vld [vmem:[%s1691_s14 + $0x40] sm:$0xff] }
  0x6c   : > { %749 = vmatpush1.msra.mxu1 %v527_v34  ;;  %661 = vmatprep.subr.mxu0 %v522_v35  ;;  %v503_v58 = vld [vmem:[%s1691_s14 + $0x50] sm:$0xff]  ;;  %v498_v59 = vld [vmem:[%s1691_s14 + $0x28] sm:$0xff]  ;;  %v500_v60 = vld [vmem:[%s1691_s14 + $0x38] sm:$0xff] }
  0x6d   : > { %750 = vmatprep.subr.mxu1 %v524_v36  ;;  %662 = vmatpush1.msra.mxu0 %v521_v37  ;;  %v497_v61 = vld [vmem:[%s1691_s14 + $0x20] sm:$0xff]  ;;  %v499_v62 = vld [vmem:[%s1691_s14 + $0x30] sm:$0xff]  ;;  %v494_v63 = vld [vmem:[%s1691_s14 + $0x8] sm:$0xff] }
  0x6e   : > { %751 = vmatpush1.msra.mxu1 %v523_v38  ;;  %663 = vmatprep.subr.mxu0 %v518_v39  ;;  %v496_v0 = vld [vmem:[%s1691_s14 + $0x18] sm:$0xff]  ;;  %v493_v1 = vld [vmem:[%s1691_s14] sm:$0xff]  ;;  %v495_v2 = vld [vmem:[%s1691_s14 + $0x10] sm:$0xff] }
  0x6f   : > { %752 = vmatprep.subr.mxu1 %v520_v40  ;;  %664 = vmatpush1.msra.mxu0 %v517_v41  ;;  %v618_v3 = vld [vmem:[%s1691_s14 + $0x3e8] sm:$0xff]  ;;  %v620_v4 = vld [vmem:[%s1691_s14 + $0x3f8] sm:$0xff]  ;;  %v617_v5 = vld [vmem:[%s1691_s14 + $0x3e0] sm:$0xff] }
  0x70   : > { %753 = vmatpush1.msra.mxu1 %v519_v42  ;;  %665 = vmatprep.subr.mxu0 %v514_v43  ;;  %v619_v6 = vld [vmem:[%s1691_s14 + $0x3f0] sm:$0xff]  ;;  %v614_v7 = vld [vmem:[%s1691_s14 + $0x3c8] sm:$0xff]  ;;  %v616_v8 = vld [vmem:[%s1691_s14 + $0x3d8] sm:$0xff] }
  0x71   : > { %754 = vmatprep.subr.mxu1 %v516_v44  ;;  %666 = vmatpush1.msra.mxu0 %v513_v45  ;;  %v613_v9 = vld [vmem:[%s1691_s14 + $0x3c0] sm:$0xff]  ;;  %v615_v10 = vld [vmem:[%s1691_s14 + $0x3d0] sm:$0xff]  ;;  %v610_v11 = vld [vmem:[%s1691_s14 + $0x3a8] sm:$0xff] }
  0x72   : > { %755 = vmatpush1.msra.mxu1 %v515_v46  ;;  %667 = vmatprep.subr.mxu0 %v510_v47  ;;  %v612_v12 = vld [vmem:[%s1691_s14 + $0x3b8] sm:$0xff]  ;;  %v609_v13 = vld [vmem:[%s1691_s14 + $0x3a0] sm:$0xff]  ;;  %v611_v14 = vld [vmem:[%s1691_s14 + $0x3b0] sm:$0xff] }
  0x73   : > { %756 = vmatprep.subr.mxu1 %v512_v48  ;;  %668 = vmatpush1.msra.mxu0 %v509_v49  ;;  %v606_v15 = vld [vmem:[%s1691_s14 + $0x388] sm:$0xff]  ;;  %v608_v16 = vld [vmem:[%s1691_s14 + $0x398] sm:$0xff]  ;;  %v605_v17 = vld [vmem:[%s1691_s14 + $0x380] sm:$0xff] }
  0x74   : > { %757 = vmatpush1.msra.mxu1 %v511_v50  ;;  %669 = vmatprep.subr.mxu0 %v506_v51  ;;  %v607_v18 = vld [vmem:[%s1691_s14 + $0x390] sm:$0xff]  ;;  %v602_v19 = vld [vmem:[%s1691_s14 + $0x368] sm:$0xff]  ;;  %v604_v20 = vld [vmem:[%s1691_s14 + $0x378] sm:$0xff] }
  0x75   : > { %758 = vmatprep.subr.mxu1 %v508_v52  ;;  %670 = vmatpush1.msra.mxu0 %v505_v53  ;;  %v601_v21 = vld [vmem:[%s1691_s14 + $0x360] sm:$0xff]  ;;  %v603_v22 = vld [vmem:[%s1691_s14 + $0x370] sm:$0xff]  ;;  %v598_v23 = vld [vmem:[%s1691_s14 + $0x348] sm:$0xff] }
  0x76   : > { %759 = vmatpush1.msra.mxu1 %v507_v54  ;;  %671 = vmatprep.subr.mxu0 %v502_v55  ;;  %v600_v24 = vld [vmem:[%s1691_s14 + $0x358] sm:$0xff]  ;;  %v597_v25 = vld [vmem:[%s1691_s14 + $0x340] sm:$0xff]  ;;  %v599_v26 = vld [vmem:[%s1691_s14 + $0x350] sm:$0xff] }
  0x77   : > { %760 = vmatprep.subr.mxu1 %v504_v56  ;;  %672 = vmatpush1.msra.mxu0 %v501_v57  ;;  %v594_v27 = vld [vmem:[%s1691_s14 + $0x328] sm:$0xff]  ;;  %v596_v28 = vld [vmem:[%s1691_s14 + $0x338] sm:$0xff]  ;;  %v593_v29 = vld [vmem:[%s1691_s14 + $0x320] sm:$0xff] }
  0x78   : > { %761 = vmatpush1.msra.mxu1 %v503_v58  ;;  %673 = vmatprep.subr.mxu0 %v498_v59  ;;  %v595_v30 = vld [vmem:[%s1691_s14 + $0x330] sm:$0xff]  ;;  %v590_v31 = vld [vmem:[%s1691_s14 + $0x308] sm:$0xff]  ;;  %v592_v32 = vld [vmem:[%s1691_s14 + $0x318] sm:$0xff] }
  0x79   : > { %762 = vmatprep.subr.mxu1 %v500_v60  ;;  %674 = vmatpush1.msra.mxu0 %v497_v61  ;;  %v589_v33 = vld [vmem:[%s1691_s14 + $0x300] sm:$0xff]  ;;  %v591_v34 = vld [vmem:[%s1691_s14 + $0x310] sm:$0xff]  ;;  %v586_v35 = vld [vmem:[%s1691_s14 + $0x2e8] sm:$0xff] }
  0x7a   : > { %763 = vmatpush1.msra.mxu1 %v499_v62  ;;  %675 = vmatprep.subr.mxu0 %v494_v63  ;;  %v588_v36 = vld [vmem:[%s1691_s14 + $0x2f8] sm:$0xff]  ;;  %v585_v37 = vld [vmem:[%s1691_s14 + $0x2e0] sm:$0xff]  ;;  %v587_v38 = vld [vmem:[%s1691_s14 + $0x2f0] sm:$0xff] }
  0x7b   : > { %764 = vmatprep.subr.mxu1 %v496_v0  ;;  %676 = vmatpush1.msra.mxu0 %v493_v1  ;;  %v582_v39 = vld [vmem:[%s1691_s14 + $0x2c8] sm:$0xff]  ;;  %v584_v40 = vld [vmem:[%s1691_s14 + $0x2d8] sm:$0xff]  ;;  %v581_v41 = vld [vmem:[%s1691_s14 + $0x2c0] sm:$0xff] }
  0x7c   : > { %765 = vmatpush1.msra.mxu1 %v495_v2  ;;  %677 = vmatprep.subr.mxu0 %v618_v3  ;;  %v583_v42 = vld [vmem:[%s1691_s14 + $0x2d0] sm:$0xff]  ;;  %v578_v43 = vld [vmem:[%s1691_s14 + $0x2a8] sm:$0xff]  ;;  %v580_v44 = vld [vmem:[%s1691_s14 + $0x2b8] sm:$0xff] }
  0x7d   : > { %766 = vmatprep.subr.mxu1 %v620_v4  ;;  %678 = vmatpush2.msra.mxu0 %v617_v5  ;;  %v577_v45 = vld [vmem:[%s1691_s14 + $0x2a0] sm:$0xff]  ;;  %v579_v46 = vld [vmem:[%s1691_s14 + $0x2b0] sm:$0xff]  ;;  %v574_v47 = vld [vmem:[%s1691_s14 + $0x288] sm:$0xff] }
  0x7e   : > { %767 = vmatpush2.msra.mxu1 %v619_v6  ;;  %679 = vmatprep.subr.mxu0 %v614_v7  ;;  %v576_v48 = vld [vmem:[%s1691_s14 + $0x298] sm:$0xff]  ;;  %v573_v49 = vld [vmem:[%s1691_s14 + $0x280] sm:$0xff]  ;;  %v575_v50 = vld [vmem:[%s1691_s14 + $0x290] sm:$0xff] }
  0x7f   : > { %768 = vmatprep.subr.mxu1 %v616_v8  ;;  %680 = vmatpush2.msra.mxu0 %v613_v9  ;;  %v570_v51 = vld [vmem:[%s1691_s14 + $0x268] sm:$0xff]  ;;  %v572_v52 = vld [vmem:[%s1691_s14 + $0x278] sm:$0xff]  ;;  %v569_v53 = vld [vmem:[%s1691_s14 + $0x260] sm:$0xff] }
  0x80   : > { %769 = vmatpush2.msra.mxu1 %v615_v10  ;;  %681 = vmatprep.subr.mxu0 %v610_v11  ;;  %v571_v54 = vld [vmem:[%s1691_s14 + $0x270] sm:$0xff]  ;;  %v566_v55 = vld [vmem:[%s1691_s14 + $0x248] sm:$0xff]  ;;  %v568_v56 = vld [vmem:[%s1691_s14 + $0x258] sm:$0xff] }
  0x81   : > { %770 = vmatprep.subr.mxu1 %v612_v12  ;;  %682 = vmatpush2.msra.mxu0 %v609_v13  ;;  %v565_v57 = vld [vmem:[%s1691_s14 + $0x240] sm:$0xff]  ;;  %v567_v58 = vld [vmem:[%s1691_s14 + $0x250] sm:$0xff]  ;;  %v562_v59 = vld [vmem:[%s1691_s14 + $0x228] sm:$0xff] }
  0x82   : > { %771 = vmatpush2.msra.mxu1 %v611_v14  ;;  %683 = vmatprep.subr.mxu0 %v606_v15  ;;  %v564_v60 = vld [vmem:[%s1691_s14 + $0x238] sm:$0xff]  ;;  %v561_v61 = vld [vmem:[%s1691_s14 + $0x220] sm:$0xff]  ;;  %v563_v62 = vld [vmem:[%s1691_s14 + $0x230] sm:$0xff] }
  0x83   : > { %772 = vmatprep.subr.mxu1 %v608_v16  ;;  %684 = vmatpush2.msra.mxu0 %v605_v17  ;;  %v558_v63 = vld [vmem:[%s1691_s14 + $0x208] sm:$0xff]  ;;  %v560_v0 = vld [vmem:[%s1691_s14 + $0x218] sm:$0xff]  ;;  %v557_v1 = vld [vmem:[%s1691_s14 + $0x200] sm:$0xff] }
  0x84   : > { %773 = vmatpush2.msra.mxu1 %v607_v18  ;;  %685 = vmatprep.subr.mxu0 %v602_v19  ;;  %v559_v2 = vld [vmem:[%s1691_s14 + $0x210] sm:$0xff]  ;;  %v485_v3 = vld [vmem:[%s2380_s0] sm:$0xff]  ;;  %v488_v4 = vld [vmem:[%s2380_s0 + $0x18] sm:$0xff] }
  0x85   : > { %774 = vmatprep.subr.mxu1 %v604_v20  ;;  %686 = vmatpush2.msra.mxu0 %v601_v21  ;;  %v622_v5 = vld [vmem:[%s2381_s1 + $0x8] sm:$0xff]  ;;  %v623_v6 = vld [vmem:[%s2381_s1 + $0x10] sm:$0xff]  ;;  %v624_v9 = vld [vmem:[%s2381_s1 + $0x18] sm:$0xff] }
  0x86   : > { %775 = vmatpush2.msra.mxu1 %v603_v22  ;;  %687 = vmatprep.subr.mxu0 %v598_v23  ;;  %v487_v7 = vld [vmem:[%s2380_s0 + $0x10] sm:$0xff]  ;;  %v490_v8 = vld [vmem:[%s2380_s0 + $0x28] sm:$0xff]  ;;  %v489_v10 = vld [vmem:[%s2380_s0 + $0x20] sm:$0xff] }
  0x87   : > { %776 = vmatprep.subr.mxu1 %v600_v24  ;;  %688 = vmatpush2.msra.mxu0 %v597_v25  ;;  %v492_v11 = vld [vmem:[%s2380_s0 + $0x38] sm:$0xff]  ;;  %v491_v12 = vld [vmem:[%s2380_s0 + $0x30] sm:$0xff] }
  0x88   : > { %777 = vmatpush2.msra.mxu1 %v599_v26  ;;  %689 = vmatprep.subr.mxu0 %v594_v27 }
  0x89   : > { %778 = vmatprep.subr.mxu1 %v596_v28  ;;  %690 = vmatpush2.msra.mxu0 %v593_v29 }
  0x8a   : > { %779 = vmatpush2.msra.mxu1 %v595_v30  ;;  %691 = vmatprep.subr.mxu0 %v590_v31 }
  0x8b   : > { %780 = vmatprep.subr.mxu1 %v592_v32  ;;  %692 = vmatpush2.msra.mxu0 %v589_v33 }
  0x8c   : > { %781 = vmatpush2.msra.mxu1 %v591_v34  ;;  %693 = vmatprep.subr.mxu0 %v586_v35 }
  0x8d   : > { %782 = vmatprep.subr.mxu1 %v588_v36  ;;  %694 = vmatpush2.msra.mxu0 %v585_v37 }
  0x8e   : > { %783 = vmatpush2.msra.mxu1 %v587_v38  ;;  %695 = vmatprep.subr.mxu0 %v582_v39 }
  0x8f   : > { %784 = vmatprep.subr.mxu1 %v584_v40  ;;  %696 = vmatpush2.msra.mxu0 %v581_v41 }
  0x90   : > { %785 = vmatpush2.msra.mxu1 %v583_v42  ;;  %697 = vmatprep.subr.mxu0 %v578_v43 }
  0x91   : > { %786 = vmatprep.subr.mxu1 %v580_v44  ;;  %698 = vmatpush2.msra.mxu0 %v577_v45 }
  0x92   : > { %787 = vmatpush2.msra.mxu1 %v579_v46  ;;  %699 = vmatprep.subr.mxu0 %v574_v47 }
  0x93   : > { %788 = vmatprep.subr.mxu1 %v576_v48  ;;  %700 = vmatpush2.msra.mxu0 %v573_v49 }
  0x94   : > { %789 = vmatpush2.msra.mxu1 %v575_v50  ;;  %701 = vmatprep.subr.mxu0 %v570_v51 }
  0x95   : > { %790 = vmatprep.subr.mxu1 %v572_v52  ;;  %702 = vmatpush2.msra.mxu0 %v569_v53 }
  0x96   : > { %791 = vmatpush2.msra.mxu1 %v571_v54  ;;  %703 = vmatprep.subr.mxu0 %v566_v55 }
  0x97   : > { %792 = vmatprep.subr.mxu1 %v568_v56  ;;  %704 = vmatpush2.msra.mxu0 %v565_v57 }
  0x98   : > { %793 = vmatpush2.msra.mxu1 %v567_v58  ;;  %705 = vmatprep.subr.mxu0 %v562_v59 }
  0x99   : > { %794 = vmatprep.subr.mxu1 %v564_v60  ;;  %706 = vmatpush2.msra.mxu0 %v561_v61 }
  0x9a   : > { %795 = vmatpush2.msra.mxu1 %v563_v62  ;;  %707 = vmatprep.subr.mxu0 %v558_v63 }
  0x9b   : > { %796 = vmatprep.subr.mxu1 %v560_v0  ;;  %708 = vmatpush2.msra.mxu0 %v557_v1 }
  0x9c   : > { %797 = vmatpush2.msra.mxu1 %v559_v2  ;;  %710 = vmatmul.mubr.f32.vlgmr.msra.gmra.mxu0 %v485_v3 }
  0x9d   : > { %799 = vmatmul.mubr.f32.vlgmr.msra.gmra.mxu1 %v485_v3  ;;  %715 = vmatprep.mubr.f32.mxu0 %v488_v4 }
  0x9e   : > { %804 = vmatprep.mubr.f32.mxu1 %v488_v4  ;;  %632 = vperm.xlu0 %1320, %v622_v5  }
  0x9f   : > { %637 = vperm.xlu1 %1321, %v623_v6  }
  0xa0   : > { %716 = vmatmul.mubr.f32.gmra.mxu0 %v487_v7 }
  0xa1   : > { %805 = vmatmul.mubr.f32.gmra.mxu1 %v487_v7  ;;  %721 = vmatprep.mubr.f32.mxu0 %v490_v8 }
  0xa2   : > { %810 = vmatprep.mubr.f32.mxu1 %v490_v8 }
  0xa3   : > { %642 = vperm.xlu1 %1321, %v624_v9  }
  0xa4   : > { %722 = vmatmul.mubr.f32.gmra.mxu0 %v489_v10 }
  0xa5   : > { %811 = vmatmul.mubr.f32.gmra.mxu1 %v489_v10  ;;  %727 = vmatprep.mubr.f32.mxu0 %v492_v11 }
  0xa6   : > { %816 = vmatprep.mubr.f32.mxu1 %v492_v11 }
  0xa8   : > { %728 = vmatmul.mubr.f32.gmra.mxu0 %v491_v12 }
  0xa9   : > { %817 = vmatmul.mubr.f32.gmra.mxu1 %v491_v12 }
  0xd7   : > { %v628_v13 = vpop.permute.xlu0 %627 }
 0x119   : > { %v633_v18 = vpop.permute.xlu0 %632 }
 0x11a   : > { %v638_v27 = vpop.permute.xlu1 %637 }
 0x11e   : > { %v643_v38 = vpop.permute.xlu1 %642 }
 0x15c   : > { %v711_v14 = vpop.f32.mrf.mxu0 }
 0x15d   : > { %v800_v15 = vpop.f32.mrf.mxu1  ;;  %v712_v16 = vadd.f32 %v711_v14, %v628_v13 }
 0x15e   : > { %v801_v17 = vadd.f32 %v800_v15, %v628_v13  ;;  %v713_v19 = vpop.f32.mrf.mxu0 }
 0x15f   : > { %v802_v20 = vpop.f32.mrf.mxu1  ;;  %828 = vst [vmem:[%s1856_s24] sm:$0xff] %v712_v16  ;;  %v714_v21 = vadd.f32 %v713_v19, %v628_v13 }
 0x160   : > { %830 = vst [vmem:[%s1856_s24 + $0x10] sm:$0xff] %v801_v17  ;;  %v803_v22 = vadd.f32 %v802_v20, %v628_v13  ;;  %v717_v23 = vpop.f32.mrf.mxu0 }
 0x161   : > { %v806_v24 = vpop.f32.mrf.mxu1  ;;  %829 = vst [vmem:[%s1856_s24 + $0x8] sm:$0xff] %v714_v21  ;;  %v718_v25 = vadd.f32 %v717_v23, %v633_v18 }
 0x162   : > { %831 = vst [vmem:[%s1856_s24 + $0x18] sm:$0xff] %v803_v22  ;;  %v807_v26 = vadd.f32 %v806_v24, %v633_v18  ;;  %v719_v28 = vpop.f32.mrf.mxu0 }
 0x163   : > { %v808_v29 = vpop.f32.mrf.mxu1  ;;  %832 = vst [vmem:[%s1856_s24 + $0x40] sm:$0xff] %v718_v25  ;;  %v720_v30 = vadd.f32 %v719_v28, %v633_v18 }
 0x164   : > { %834 = vst [vmem:[%s1856_s24 + $0x50] sm:$0xff] %v807_v26  ;;  %v809_v31 = vadd.f32 %v808_v29, %v633_v18  ;;  %v723_v32 = vpop.f32.mrf.mxu0 }
 0x165   : > { %v812_v33 = vpop.f32.mrf.mxu1  ;;  %833 = vst [vmem:[%s1856_s24 + $0x48] sm:$0xff] %v720_v30  ;;  %v724_v34 = vadd.f32 %v723_v32, %v638_v27 }
 0x166   : > { %835 = vst [vmem:[%s1856_s24 + $0x58] sm:$0xff] %v809_v31  ;;  %v813_v35 = vadd.f32 %v812_v33, %v638_v27  ;;  %v725_v36 = vpop.f32.mrf.mxu0 }
 0x167   : > { %v814_v37 = vpop.f32.mrf.mxu1  ;;  %836 = vst [vmem:[%s1856_s24 + $0x80] sm:$0xff] %v724_v34  ;;  %v726_v39 = vadd.f32 %v725_v36, %v638_v27 }
 0x168   : > { %838 = vst [vmem:[%s1856_s24 + $0x90] sm:$0xff] %v813_v35  ;;  %v815_v40 = vadd.f32 %v814_v37, %v638_v27  ;;  %v729_v41 = vpop.f32.mrf.mxu0 }
 0x169   : > { %v818_v42 = vpop.f32.mrf.mxu1  ;;  %837 = vst [vmem:[%s1856_s24 + $0x88] sm:$0xff] %v726_v39  ;;  %v730_v43 = vadd.f32 %v729_v41, %v643_v38 }
 0x16a   : > { %839 = vst [vmem:[%s1856_s24 + $0x98] sm:$0xff] %v815_v40  ;;  %v819_v44 = vadd.f32 %v818_v42, %v643_v38  ;;  %v731_v45 = vpop.f32.mrf.mxu0  ;;  %847 = sbr.rel (%p1290_p8) target bundleno = 868 (0x364), region = 67 }
 0x16b   : > { %v820_v46 = vpop.f32.mrf.mxu1  ;;  %840 = vst [vmem:[%s1856_s24 + $0xc0] sm:$0xff] %v730_v43  ;;  %v732_v47 = vadd.f32 %v731_v45, %v643_v38 }
 0x16c   : > { %842 = vst [vmem:[%s1856_s24 + $0xd0] sm:$0xff] %v819_v44  ;;  %v821_v48 = vadd.f32 %v820_v46, %v643_v38 }
 0x16d   : > { %841 = vst [vmem:[%s1856_s24 + $0xc8] sm:$0xff] %v732_v47 }
 0x16e   : > { %843 = vst [vmem:[%s1856_s24 + $0xd8] sm:$0xff] %v821_v48 }
 0x175   : > { %v1879_v49 = vld [vmem:[%s2385_s5 + $0x80] sm:$0xff]  ;;  %v1884_v50 = vld [vmem:[%s2385_s5 + $0x88] sm:$0xff]  ;;  %v1889_v51 = vld [vmem:[%s2385_s5 + $0x90] sm:$0xff] }
 0x176   : > { %v898_v52 = vadd.f32 %v1884_v50, %v1879_v49  ;;  %v1896_v53 = vld [vmem:[%s2385_s5 + $0x98] sm:$0xff]  ;;  %v1901_v54 = vld [vmem:[%s2385_s5] sm:$0xff]  ;;  %v1907_v56 = vld [vmem:[%s2385_s5 + $0x8] sm:$0xff] }
 0x177   : > { %v1912_v57 = vld [vmem:[%s2385_s5 + $0x10] sm:$0xff]  ;;  %v1917_v58 = vld [vmem:[%s2385_s5 + $0xa0] sm:$0xff]  ;;  %v880_v59 = vadd.f32 %v1907_v56, %v1901_v54  ;;  %v851_v61 = vld [vmem:[%s2385_s5 + $0x18] sm:$0xff] }
 0x178   : > { %v899_v55 = vadd.f32 %v898_v52, %v1889_v51  ;;  %v1928_v62 = vld [vmem:[%s2385_s5 + $0xc0] sm:$0xff]  ;;  %v1933_v63 = vld [vmem:[%s2385_s5 + $0xc8] sm:$0xff]  ;;  %v1944_v2 = vld [vmem:[%s2385_s5 + $0xd0] sm:$0xff] }
 0x179   : > { %v1938_v0 = vld [vmem:[%s2385_s5 + $0xa8] sm:$0xff]  ;;  %v881_v1 = vadd.f32 %v880_v59, %v1912_v57  ;;  %v907_v3 = vadd.f32 %v1933_v63, %v1928_v62  ;;  %v1951_v4 = vld [vmem:[%s2385_s5 + $0xb0] sm:$0xff]  ;;  %v852_v6 = vld [vmem:[%s2385_s5 + $0x20] sm:$0xff] }
 0x17a   : > { %v900_v60 = vadd.f32 %v899_v55, %v1896_v53  ;;  %v1960_v7 = vld [vmem:[%s2385_s5 + $0xd8] sm:$0xff]  ;;  %v1966_v10 = vld [vmem:[%s2385_s5 + $0x40] sm:$0xff]  ;;  %v1971_v11 = vld [vmem:[%s2385_s5 + $0x48] sm:$0xff] }
 0x17b   : > { %v882_v8 = vadd.f32 %v881_v1, %v851_v61  ;;  %v908_v9 = vadd.f32 %v907_v3, %v1944_v2  ;;  %v1976_v12 = vld [vmem:[%s2385_s5 + $0x50] sm:$0xff]  ;;  %v853_v14 = vld [vmem:[%s2385_s5 + $0x28] sm:$0xff]  ;;  %v1985_v15 = vld [vmem:[%s2385_s5 + $0xe0] sm:$0xff]  ;;  %v889_v16 = vadd.f32 %v1971_v11, %v1966_v10 }
 0x17c   : > { %v901_v5 = vadd.f32 %v900_v60, %v1917_v58  ;;  %v1992_v17 = vld [vmem:[%s2385_s5 + $0xb8] sm:$0xff]  ;;  %v854_v22 = vld [vmem:[%s2385_s5 + $0x30] sm:$0xff]  ;;  %v2007_v23 = vld [vmem:[%s2385_s5 + $0xe8] sm:$0xff] }
 0x17d   : > { %v883_v18 = vadd.f32 %v882_v8, %v852_v6  ;;  %v909_v19 = vadd.f32 %v908_v9, %v1960_v7  ;;  %v1998_v20 = vld [vmem:[%s2385_s5 + $0x58] sm:$0xff]  ;;  %v890_v24 = vadd.f32 %v889_v16, %v1976_v12  ;;  %v2014_v27 = vld [vmem:[%s2385_s5 + $0x60] sm:$0xff]  ;;  %v2023_v30 = vld [vmem:[%s2385_s5 + $0xf0] sm:$0xff] }
 0x17e   : > { %v902_v13 = vadd.f32 %v901_v5, %v1938_v0  ;;  %v855_v29 = vld [vmem:[%s2385_s5 + $0x38] sm:$0xff]  ;;  %v2030_v34 = vld [vmem:[%s2385_s5 + $0x68] sm:$0xff]  ;;  %v2042_v39 = vld [vmem:[%s2385_s5 + $0x70] sm:$0xff] }
 0x17f   : > { %v884_v25 = vadd.f32 %v883_v18, %v853_v14  ;;  %v910_v26 = vadd.f32 %v909_v19, %v1985_v15  ;;  %v891_v31 = vadd.f32 %v890_v24, %v1998_v20  ;;  %v2035_v35 = vld [vmem:[%s2385_s5 + $0xf8] sm:$0xff] }
 0x180   : > { %v903_v21 = vadd.f32 %v902_v13, %v1951_v4  ;;  %v2049_v42 = vld [vmem:[%s2385_s5 + $0x78] sm:$0xff] }
 0x181   : > { %v885_v32 = vadd.f32 %v884_v25, %v854_v22  ;;  %v911_v33 = vadd.f32 %v910_v26, %v2007_v23  ;;  %v892_v36 = vadd.f32 %v891_v31, %v2014_v27 }
 0x182   : > { %v904_v28 = vadd.f32 %v903_v21, %v1992_v17 }
 0x183   : > { %v886_v37 = vadd.f32 %v885_v32, %v855_v29  ;;  %v912_v38 = vadd.f32 %v911_v33, %v2023_v30  ;;  %v893_v40 = vadd.f32 %v892_v36, %v2030_v34 }
 0x184   : > { %905 = vadd.xlane.f32.xlu1 %v904_v28 }
 0x185   : > { %887 = vadd.xlane.f32.xlu0 %v886_v37  ;;  %v913_v41 = vadd.f32 %v912_v38, %v2035_v35  ;;  %v894_v43 = vadd.f32 %v893_v40, %v2042_v39 }
 0x187   : > { %v895_v44 = vadd.f32 %v894_v43, %v2049_v42 }
 0x188   : > { %914 = vadd.xlane.f32.xlu1 %v913_v41 }
 0x189   : > { %896 = vadd.xlane.f32.xlu0 %v895_v44 }
 0x20d   : > { %v906_v45 = vpop.xlane.xlu1 %905 }
 0x20e   : > { %v918_v46 = vmul.f32 0.0009765625, %v906_v45  ;;  %v888_v47 = vpop.xlane.xlu0 %887 }
 0x20f   : > { %v916_v48 = vmul.f32 0.0009765625, %v888_v47 }
 0x210   : > { %v2054_v52 = vsub.f32 %v1879_v49, %v918_v46  ;;  %v2057_v55 = vsub.f32 %v1884_v50, %v918_v46  ;;  %v2069_v3 = vsub.f32 %v1889_v51, %v918_v46  ;;  %v2074_v49 = vsub.f32 %v1896_v53, %v918_v46 }
 0x211   : > { %v2060_v59 = vsub.f32 %v1901_v54, %v916_v48  ;;  %v2063_v60 = vsub.f32 %v1907_v56, %v916_v48  ;;  %v2066_v1 = vsub.f32 %v1912_v57, %v916_v48  ;;  %v2071_v5 = vsub.f32 %v851_v61, %v916_v48  ;;  %v915_v13 = vpop.xlane.xlu1 %914 }
 0x212   : > { %v2077_v50 = vsub.f32 %v1917_v58, %v918_v46  ;;  %v897_v8 = vpop.xlane.xlu0 %896  ;;  %v968_v57 = vmul.f32 %v2054_v52, %v2054_v52  ;;  %v969_v51 = vmul.f32 %v2057_v55, %v2057_v55  ;;  %v2087_v9 = vsub.f32 %v852_v6, %v916_v48 }
 0x213   : > { %v952_v54 = vmul.f32 %v2060_v59, %v2060_v59  ;;  %v953_v56 = vmul.f32 %v2063_v60, %v2063_v60  ;;  %v917_v61 = vmul.f32 0.0009765625, %v897_v8  ;;  %v2090_v53 = vsub.f32 %v1938_v0, %v918_v46 }
 0x214   : > { %v2093_v58 = vsub.f32 %v1951_v4, %v918_v46  ;;  %v2095_v16 = vsub.f32 %v853_v14, %v916_v48  ;;  %v954_v18 = vmul.f32 %v2066_v1, %v2066_v1  ;;  %v970_v21 = vmul.f32 %v2069_v3, %v2069_v3 }
 0x215   : > { %v984_v19 = vadd.f32 %v953_v56, %v952_v54  ;;  %v2101_v24 = vsub.f32 %v854_v22, %v916_v48  ;;  %v2103_v6 = vsub.f32 %v855_v29, %v916_v48  ;;  %v955_v0 = vmul.f32 %v2071_v5, %v2071_v5 }
 0x216   : > { %v971_v4 = vmul.f32 %v2074_v49, %v2074_v49  ;;  %v1002_v14 = vadd.f32 %v969_v51, %v968_v57  ;;  %v2110_v26 = vsub.f32 %v1966_v10, %v917_v61  ;;  %v2113_v28 = vsub.f32 %v1971_v11, %v917_v61 }
 0x217   : > { %v985_v25 = vadd.f32 %v984_v19, %v954_v18  ;;  %v919_v31 = vmul.f32 0.0009765625, %v915_v13  ;;  %v956_v22 = vmul.f32 %v2087_v9, %v2087_v9  ;;  %v2118_v29 = vsub.f32 %v1992_v17, %v918_v46 }
 0x218   : > { %v2121_v32 = vsub.f32 %v1976_v12, %v917_v61  ;;  %v957_v33 = vmul.f32 %v2095_v16, %v2095_v16  ;;  %v972_v10 = vmul.f32 %v2077_v50, %v2077_v50  ;;  %v1003_v37 = vadd.f32 %v1002_v14, %v970_v21 }
 0x219   : > { %v986_v36 = vadd.f32 %v985_v25, %v955_v0  ;;  %v958_v11 = vmul.f32 %v2101_v24, %v2101_v24  ;;  %v2130_v38 = vsub.f32 %v1998_v20, %v917_v61  ;;  %v960_v17 = vmul.f32 %v2110_v26, %v2110_v26 }
 0x21a   : > { %v961_v12 = vmul.f32 %v2113_v28, %v2113_v28  ;;  %v959_v40 = vmul.f32 %v2103_v6, %v2103_v6  ;;  %v973_v43 = vmul.f32 %v2090_v53, %v2090_v53  ;;  %v1004_v44 = vadd.f32 %v1003_v37, %v971_v4 }
 0x21b   : > { %v987_v41 = vadd.f32 %v986_v36, %v956_v22  ;;  %v2141_v45 = vsub.f32 %v2014_v27, %v917_v61  ;;  %v962_v20 = vmul.f32 %v2121_v32, %v2121_v32  ;;  %v2146_v47 = vsub.f32 %v1928_v62, %v919_v31 }
 0x21c   : > { %v993_v46 = vadd.f32 %v961_v12, %v960_v17  ;;  %v1005_v8 = vadd.f32 %v1004_v44, %v972_v10  ;;  %v2149_v54 = vsub.f32 %v1933_v63, %v919_v31  ;;  %v2152_v56 = vsub.f32 %v1944_v2, %v919_v31 }
 0x21d   : > { %v988_v48 = vadd.f32 %v987_v41, %v957_v33  ;;  %v974_v57 = vmul.f32 %v2093_v58, %v2093_v58  ;;  %v2157_v27 = vsub.f32 %v2030_v34, %v917_v61  ;;  %v963_v51 = vmul.f32 %v2130_v38, %v2130_v38 }
 0x21e   : > { %v994_v13 = vadd.f32 %v993_v46, %v962_v20  ;;  %v1006_v18 = vadd.f32 %v1005_v8, %v973_v43  ;;  %v2162_v19 = vsub.f32 %v2042_v39, %v917_v61  ;;  %v2165_v63 = vsub.f32 %v1960_v7, %v919_v31 }
 0x21f   : > { %v989_v62 = vadd.f32 %v988_v48, %v958_v11  ;;  %v964_v2 = vmul.f32 %v2141_v45, %v2141_v45  ;;  %v976_v34 = vmul.f32 %v2146_v47, %v2146_v47  ;;  %v977_v0 = vmul.f32 %v2149_v54, %v2149_v54 }
 0x220   : > { %v995_v21 = vadd.f32 %v994_v13, %v963_v51  ;;  %v1007_v25 = vadd.f32 %v1006_v18, %v974_v57  ;;  %v2174_v14 = vsub.f32 %v1985_v15, %v919_v31  ;;  %v978_v39 = vmul.f32 %v2152_v56, %v2152_v56  ;;  %v1094_v18 = vld [vmem:[%s2383_s3 + $0x10] sm:$0xff] }
 0x221   : > { %v990_v4 = vadd.f32 %v989_v62, %v959_v40  ;;  %v2179_v7 = vsub.f32 %v2049_v42, %v917_v61  ;;  %v965_v22 = vmul.f32 %v2157_v27, %v2157_v27  ;;  %v975_v36 = vmul.f32 %v2118_v29, %v2118_v29 }
 0x222   : > { %v996_v33 = vadd.f32 %v995_v21, %v964_v2  ;;  %v2186_v10 = vsub.f32 %v2007_v23, %v919_v31  ;;  %v979_v15 = vmul.f32 %v2165_v63, %v2165_v63  ;;  %v1011_v37 = vadd.f32 %v977_v0, %v976_v34 }
 0x223   : > { %991 = vadd.xlane.f32.xlu0 %v990_v4  ;;  %v966_v11 = vmul.f32 %v2162_v19, %v2162_v19  ;;  %v1008_v61 = vadd.f32 %v1007_v25, %v975_v36  ;;  %v980_v17 = vmul.f32 %v2174_v14, %v2174_v14  ;;  %v967_v40 = vmul.f32 %v2179_v7, %v2179_v7 }
 0x224   : > { %v997_v42 = vadd.f32 %v996_v33, %v965_v22  ;;  %v1012_v12 = vadd.f32 %v1011_v37, %v978_v39  ;;  %v2197_v23 = vsub.f32 %v2023_v30, %v919_v31  ;;  %v981_v43 = vmul.f32 %v2186_v10, %v2186_v10  ;;  %v1024_v37 = vld [vmem:[%s2382_s2] sm:$0xff] }
 0x225   : > { %v2202_v46 = vsub.f32 %v2035_v35, %v919_v31  ;;  %v1357_v62 = vmov 0   ;;  %v1092_v35 = vld [vmem:[%s2383_s3] sm:$0xff]  ;;  %v1093_v31 = vld [vmem:[%s2383_s3 + $0x8] sm:$0xff] }
 0x226   : > { %v998_v41 = vadd.f32 %v997_v42, %v966_v11  ;;  %v1013_v44 = vadd.f32 %v1012_v12, %v979_v15  ;;  %v982_v8 = vmul.f32 %v2197_v23, %v2197_v23  ;;  %1323 = vset.pattern.permute.xlu1 %v1357_v62  ;;  %1322 = vset.pattern.permute.xlu0 %v1357_v62 }
 0x227   : > { %1009 = vadd.xlane.f32.xlu0 %v1008_v61  ;;  %v983_v51 = vmul.f32 %v2202_v46, %v2202_v46 }
 0x228   : > { %v999_v20 = vadd.f32 %v998_v41, %v967_v40  ;;  %v1014_v48 = vadd.f32 %v1013_v44, %v980_v17  ;;  %v1025_v17 = vld [vmem:[%s2382_s2 + $0x8] sm:$0xff] }
 0x22a   : > { %1000 = vadd.xlane.f32.xlu1 %v999_v20  ;;  %v1015_v57 = vadd.f32 %v1014_v48, %v981_v43  ;;  %v1026_v43 = vld [vmem:[%s2382_s2 + $0x10] sm:$0xff]  ;;  %v1027_v20 = vld [vmem:[%s2382_s2 + $0x18] sm:$0xff] }
 0x22c   : > { %v1016_v13 = vadd.f32 %v1015_v57, %v982_v8  ;;  %v1095_v57 = vld [vmem:[%s2383_s3 + $0x18] sm:$0xff] }
 0x22e   : > { %v1017_v30 = vadd.f32 %v1016_v13, %v983_v51 }
 0x230   : > { %1018 = vadd.xlane.f32.xlu1 %v1017_v30 }
 0x241   : > { %1098 = vperm.xlu1 %1323, %v1092_v35  }
 0x245   : > { %1103 = vperm.xlu1 %1323, %v1093_v31  }
 0x249   : > { %1108 = vperm.xlu1 %1323, %v1094_v18  }
 0x2ac   : > { %v992_v2 = vpop.xlane.xlu0 %991 }
 0x2ad   : > { %v1020_v21 = vmul.f32 0.0009765625, %v992_v2 }
 0x2af   : > { %v1028_v34 = vadd.f32 1e-05, %v1020_v21 }
 0x2b0   : > { %v1010_v0 = vpop.xlane.xlu0 %1009 }
 0x2b1   : > { %1324 = vrsqrt.f32 %v1028_v34  ;;  %v1022_v4 = vmul.f32 0.0009765625, %v1010_v0 }
 0x2b3   : > { %v1001_v25 = vpop.xlane.xlu1 %1000  ;;  %v1030_v33 = vadd.f32 1e-05, %v1022_v4 }
 0x2b4   : > { %v1021_v39 = vmul.f32 0.0009765625, %v1001_v25 }
 0x2b6   : > { %v1029_v22 = vadd.f32 1e-05, %v1021_v39 }
 0x2b8   : > { %1326 = vrsqrt.f32 %v1029_v22 }
 0x2b9   : > { %1328 = vrsqrt.f32 %v1030_v33  ;;  %v1019_v36 = vpop.xlane.xlu1 %1018 }
 0x2ba   : > { %v1023_v15 = vmul.f32 0.0009765625, %v1019_v36 }
 0x2bc   : > { %v1031_v11 = vadd.f32 1e-05, %v1023_v15 }
 0x2bd   : > { %v1099_v51 = vpop.permute.xlu1 %1098 }
 0x2be   : > { %v1325_v42 = vpop.eup %1324  ;;  %1330 = vrsqrt.f32 %v1031_v11 }
 0x2bf   : > { %v1036_v61 = vmul.f32 %v1325_v42, %v1024_v37 }
 0x2c1   : > { %1042 = vperm.xlu0 %1322, %v1036_v61   ;;  %v1104_v13 = vpop.permute.xlu1 %1103 }
 0x2c5   : > { %v1327_v12 = vpop.eup %1326  ;;  %v2240_v4 = vpop.permute.xlu1 %1108 }
 0x2c6   : > { %v1037_v40 = vmul.f32 %v1327_v12, %v1025_v17  ;;  %v1329_v41 = vpop.eup %1328 }
 0x2c7   : > { %v1038_v44 = vmul.f32 %v1329_v41, %v1026_v43 }
 0x2c8   : > { %1047 = vperm.xlu1 %1323, %v1037_v40  }
 0x2cb   : > { %v1331_v48 = vpop.eup %1330 }
 0x2cc   : > { %1052 = vperm.xlu1 %1323, %v1038_v44   ;;  %v1039_v8 = vmul.f32 %v1331_v48, %v1027_v20 }
 0x2d0   : > { %1057 = vperm.xlu1 %1323, %v1039_v8  }
 0x2d4   : > { %1113 = vperm.xlu1 %1323, %v1095_v57  }
 0x33c   : > { %v1043_v30 = vpop.permute.xlu0 %1042 }
 0x33d   : > { %v1060_v62 = vmul.f32 %v1043_v30, %v2060_v59  ;;  %v1061_v35 = vmul.f32 %v1043_v30, %v2063_v60  ;;  %v1062_v31 = vmul.f32 %v1043_v30, %v2066_v1  ;;  %v1063_v18 = vmul.f32 %v1043_v30, %v2071_v5 }
 0x33e   : > { %v1064_v2 = vmul.f32 %v1043_v30, %v2087_v9  ;;  %v1065_v21 = vmul.f32 %v1043_v30, %v2095_v16  ;;  %v1066_v34 = vmul.f32 %v1043_v30, %v2101_v24  ;;  %v1067_v0 = vmul.f32 %v1043_v30, %v2103_v6 }
 0x33f   : > { %v1116_v25 = vadd.f32 %v1099_v51, %v1060_v62  ;;  %v1117_v39 = vadd.f32 %v1099_v51, %v1061_v35  ;;  %v1118_v22 = vadd.f32 %v1099_v51, %v1062_v31  ;;  %v1119_v59 = vadd.f32 %v1099_v51, %v1063_v18 }
 0x340   : > { %v1120_v33 = vadd.f32 %v1099_v51, %v1064_v2  ;;  %v1121_v60 = vadd.f32 %v1099_v51, %v1065_v21  ;;  %v1122_v36 = vadd.f32 %v1099_v51, %v1066_v34  ;;  %v1123_v1 = vadd.f32 %v1099_v51, %v1067_v0 }
 0x341   : > { %v1148_v15 = vmul.f32 0.2, %v1116_v25  ;;  %v1149_v5 = vmul.f32 0.2, %v1117_v39  ;;  %v1150_v37 = vmul.f32 0.2, %v1118_v22 }
 0x342   : > { %v1151_v9 = vmul.f32 0.2, %v1119_v59  ;;  %v1152_v11 = vmul.f32 0.2, %v1120_v33  ;;  %v1153_v16 = vmul.f32 0.2, %v1121_v60 }
 0x343   : > { %v1154_v42 = vmul.f32 0.2, %v1122_v36  ;;  %v1155_v24 = vmul.f32 0.2, %v1123_v1  ;;  %v1180_v61 = vmax.f32 %v1116_v25, %v1148_v15  ;;  %v1181_v6 = vmax.f32 %v1117_v39, %v1149_v5  ;;  %v1048_v17 = vpop.permute.xlu1 %1047 }
 0x344   : > { %v1182_v12 = vmax.f32 %v1118_v22, %v1150_v37  ;;  %v1183_v40 = vmax.f32 %v1119_v59, %v1151_v9  ;;  %v1184_v41 = vmax.f32 %v1120_v33, %v1152_v11  ;;  %v1185_v43 = vmax.f32 %v1121_v60, %v1153_v16 }
 0x345   : > { %v1186_v44 = vmax.f32 %v1122_v36, %v1154_v42  ;;  %v1187_v20 = vmax.f32 %v1123_v1, %v1155_v24  ;;  %1212 = vst [vmem:[%s2385_s5] sm:$0xff] %v1180_v61  ;;  %1213 = vst [vmem:[%s2385_s5 + $0x8] sm:$0xff] %v1181_v6  ;;  %v1068_v48 = vmul.f32 %v1048_v17, %v2110_v26 }
 0x346   : > { %v1069_v8 = vmul.f32 %v1048_v17, %v2113_v28  ;;  %1214 = vst [vmem:[%s2385_s5 + $0x10] sm:$0xff] %v1182_v12  ;;  %1215 = vst [vmem:[%s2385_s5 + $0x18] sm:$0xff] %v1183_v40  ;;  %v1070_v26 = vmul.f32 %v1048_v17, %v2121_v32  ;;  %v1071_v28 = vmul.f32 %v1048_v17, %v2130_v38 }
 0x347   : > { %1216 = vst [vmem:[%s2385_s5 + $0x20] sm:$0xff] %v1184_v41  ;;  %1217 = vst [vmem:[%s2385_s5 + $0x28] sm:$0xff] %v1185_v43  ;;  %v1072_v57 = vmul.f32 %v1048_v17, %v2141_v45  ;;  %v1073_v51 = vmul.f32 %v1048_v17, %v2157_v27  ;;  %v1074_v30 = vmul.f32 %v1048_v17, %v2162_v19  ;;  %v1053_v31 = vpop.permute.xlu1 %1052 }
 0x348   : > { %1218 = vst [vmem:[%s2385_s5 + $0x30] sm:$0xff] %v1186_v44  ;;  %1219 = vst [vmem:[%s2385_s5 + $0x38] sm:$0xff] %v1187_v20  ;;  %v1075_v62 = vmul.f32 %v1048_v17, %v2179_v7  ;;  %v1124_v35 = vadd.f32 %v1104_v13, %v1068_v48  ;;  %v1125_v32 = vadd.f32 %v1104_v13, %v1069_v8 }
 0x349   : > { %v1126_v38 = vadd.f32 %v1104_v13, %v1070_v26  ;;  %v1127_v18 = vadd.f32 %v1104_v13, %v1071_v28  ;;  %v1128_v45 = vadd.f32 %v1104_v13, %v1072_v57  ;;  %v1129_v2 = vadd.f32 %v1104_v13, %v1073_v51 }
 0x34a   : > { %v1130_v27 = vadd.f32 %v1104_v13, %v1074_v30  ;;  %v1131_v21 = vadd.f32 %v1104_v13, %v1075_v62  ;;  %v1156_v34 = vmul.f32 0.2, %v1124_v35  ;;  %v1157_v0 = vmul.f32 0.2, %v1125_v32 }
 0x34b   : > { %v1158_v25 = vmul.f32 0.2, %v1126_v38  ;;  %v1159_v39 = vmul.f32 0.2, %v1127_v18  ;;  %v1160_v22 = vmul.f32 0.2, %v1128_v45  ;;  %v1076_v59 = vmul.f32 %v1053_v31, %v2054_v52  ;;  %v1058_v24 = vpop.permute.xlu1 %1057 }
 0x34c   : > { %v1161_v33 = vmul.f32 0.2, %v1129_v2  ;;  %v1162_v19 = vmul.f32 0.2, %v1130_v27  ;;  %v1163_v60 = vmul.f32 0.2, %v1131_v21  ;;  %v1188_v7 = vmax.f32 %v1124_v35, %v1156_v34 }
 0x34d   : > { %v1189_v36 = vmax.f32 %v1125_v32, %v1157_v0  ;;  %v1190_v1 = vmax.f32 %v1126_v38, %v1158_v25  ;;  %v1191_v15 = vmax.f32 %v1127_v18, %v1159_v39  ;;  %v1192_v5 = vmax.f32 %v1128_v45, %v1160_v22 }
 0x34e   : > { %v1193_v37 = vmax.f32 %v1129_v2, %v1161_v33  ;;  %v1194_v9 = vmax.f32 %v1130_v27, %v1162_v19  ;;  %v1195_v11 = vmax.f32 %v1131_v21, %v1163_v60  ;;  %1220 = vst [vmem:[%s2385_s5 + $0x40] sm:$0xff] %v1188_v7  ;;  %v1077_v13 = vmul.f32 %v1053_v31, %v2057_v55 }
 0x34f   : > { %1221 = vst [vmem:[%s2385_s5 + $0x48] sm:$0xff] %v1189_v36  ;;  %1222 = vst [vmem:[%s2385_s5 + $0x50] sm:$0xff] %v1190_v1  ;;  %v1078_v52 = vmul.f32 %v1053_v31, %v2069_v3  ;;  %v1079_v55 = vmul.f32 %v1053_v31, %v2074_v49  ;;  %v1080_v16 = vmul.f32 %v1053_v31, %v2077_v50  ;;  %v1114_v32 = vpop.permute.xlu1 %1113 }
 0x350   : > { %1223 = vst [vmem:[%s2385_s5 + $0x58] sm:$0xff] %v1191_v15  ;;  %1224 = vst [vmem:[%s2385_s5 + $0x60] sm:$0xff] %v1192_v5  ;;  %v1081_v42 = vmul.f32 %v1053_v31, %v2090_v53  ;;  %v1082_v3 = vmul.f32 %v1053_v31, %v2093_v58  ;;  %v1083_v49 = vmul.f32 %v1053_v31, %v2118_v29 }
 0x351   : > { %1225 = vst [vmem:[%s2385_s5 + $0x68] sm:$0xff] %v1193_v37  ;;  %1226 = vst [vmem:[%s2385_s5 + $0x70] sm:$0xff] %v1194_v9  ;;  %v1132_v50 = vadd.f32 %v2240_v4, %v1076_v59  ;;  %v1133_v53 = vadd.f32 %v2240_v4, %v1077_v13  ;;  %v1134_v61 = vadd.f32 %v2240_v4, %v1078_v52 }
 0x352   : > { %1227 = vst [vmem:[%s2385_s5 + $0x78] sm:$0xff] %v1195_v11  ;;  %v1135_v6 = vadd.f32 %v2240_v4, %v1079_v55  ;;  %v1136_v17 = vadd.f32 %v2240_v4, %v1080_v16  ;;  %v1137_v12 = vadd.f32 %v2240_v4, %v1081_v42  ;;  %v1138_v40 = vadd.f32 %v2240_v4, %v1082_v3 }
 0x353   : > { %v1139_v41 = vadd.f32 %v2240_v4, %v1083_v49  ;;  %v1164_v43 = vmul.f32 0.2, %v1132_v50  ;;  %v1165_v58 = vmul.f32 0.2, %v1133_v53  ;;  %v1166_v44 = vmul.f32 0.2, %v1134_v61 }
 0x354   : > { %v1167_v29 = vmul.f32 0.2, %v1135_v6  ;;  %v1168_v20 = vmul.f32 0.2, %v1136_v17  ;;  %v1084_v48 = vmul.f32 %v1058_v24, %v2146_v47  ;;  %v1169_v8 = vmul.f32 0.2, %v1137_v12 }
 0x355   : > { %v1170_v26 = vmul.f32 0.2, %v1138_v40  ;;  %v1171_v28 = vmul.f32 0.2, %v1139_v41  ;;  %v1196_v57 = vmax.f32 %v1132_v50, %v1164_v43  ;;  %v1197_v51 = vmax.f32 %v1133_v53, %v1165_v58 }
 0x356   : > { %v1198_v30 = vmax.f32 %v1134_v61, %v1166_v44  ;;  %v1199_v62 = vmax.f32 %v1135_v6, %v1167_v29  ;;  %v1200_v35 = vmax.f32 %v1136_v17, %v1168_v20  ;;  %v1201_v31 = vmax.f32 %v1137_v12, %v1169_v8 }
 0x357   : > { %v1202_v38 = vmax.f32 %v1138_v40, %v1170_v26  ;;  %v1203_v18 = vmax.f32 %v1139_v41, %v1171_v28  ;;  %1228 = vst [vmem:[%s2385_s5 + $0x80] sm:$0xff] %v1196_v57  ;;  %v1085_v4 = vmul.f32 %v1058_v24, %v2149_v54  ;;  %1229 = vst [vmem:[%s2385_s5 + $0x88] sm:$0xff] %v1197_v51 }
 0x358   : > { %1230 = vst [vmem:[%s2385_s5 + $0x90] sm:$0xff] %v1198_v30  ;;  %1231 = vst [vmem:[%s2385_s5 + $0x98] sm:$0xff] %v1199_v62  ;;  %v1086_v47 = vmul.f32 %v1058_v24, %v2152_v56  ;;  %v1087_v54 = vmul.f32 %v1058_v24, %v2165_v63  ;;  %v1088_v45 = vmul.f32 %v1058_v24, %v2174_v14 }
 0x359   : > { %1232 = vst [vmem:[%s2385_s5 + $0xa0] sm:$0xff] %v1200_v35  ;;  %v1089_v2 = vmul.f32 %v1058_v24, %v2186_v10  ;;  %1233 = vst [vmem:[%s2385_s5 + $0xa8] sm:$0xff] %v1201_v31  ;;  %v1090_v56 = vmul.f32 %v1058_v24, %v2197_v23  ;;  %v1091_v63 = vmul.f32 %v1058_v24, %v2202_v46 }
 0x35a   : > { %1234 = vst [vmem:[%s2385_s5 + $0xb0] sm:$0xff] %v1202_v38  ;;  %1235 = vst [vmem:[%s2385_s5 + $0xb8] sm:$0xff] %v1203_v18  ;;  %v1140_v27 = vadd.f32 %v1114_v32, %v1084_v48  ;;  %v1141_v14 = vadd.f32 %v1114_v32, %v1085_v4  ;;  %v1142_v21 = vadd.f32 %v1114_v32, %v1086_v47 }
 0x35b   : > { %v1143_v10 = vadd.f32 %v1114_v32, %v1087_v54  ;;  %v1144_v34 = vadd.f32 %v1114_v32, %v1088_v45  ;;  %v1145_v0 = vadd.f32 %v1114_v32, %v1089_v2  ;;  %v1146_v25 = vadd.f32 %v1114_v32, %v1090_v56 }
 0x35c   : > { %v1147_v39 = vadd.f32 %v1114_v32, %v1091_v63  ;;  %v1172_v22 = vmul.f32 0.2, %v1140_v27  ;;  %v1173_v59 = vmul.f32 0.2, %v1141_v14  ;;  %v1174_v33 = vmul.f32 0.2, %v1142_v21 }
 0x35d   : > { %v1175_v19 = vmul.f32 0.2, %v1143_v10  ;;  %v1176_v60 = vmul.f32 0.2, %v1144_v34  ;;  %v1177_v7 = vmul.f32 0.2, %v1145_v0 }
 0x35e   : > { %v1178_v36 = vmul.f32 0.2, %v1146_v25  ;;  %v1179_v1 = vmul.f32 0.2, %v1147_v39  ;;  %v1204_v15 = vmax.f32 %v1140_v27, %v1172_v22  ;;  %v1205_v23 = vmax.f32 %v1141_v14, %v1173_v59 }
 0x35f   : > { %v1206_v5 = vmax.f32 %v1142_v21, %v1174_v33  ;;  %v1207_v46 = vmax.f32 %v1143_v10, %v1175_v19  ;;  %v1208_v37 = vmax.f32 %v1144_v34, %v1176_v60  ;;  %v1209_v9 = vmax.f32 %v1145_v0, %v1177_v7 }
 0x360   : > { %v1210_v11 = vmax.f32 %v1146_v25, %v1178_v36  ;;  %v1211_v13 = vmax.f32 %v1147_v39, %v1179_v1  ;;  %1236 = vst [vmem:[%s2385_s5 + $0xc0] sm:$0xff] %v1204_v15  ;;  %1237 = vst [vmem:[%s2385_s5 + $0xc8] sm:$0xff] %v1205_v23 }
 0x361   : > { %1238 = vst [vmem:[%s2385_s5 + $0xd0] sm:$0xff] %v1206_v5  ;;  %1239 = vst [vmem:[%s2385_s5 + $0xd8] sm:$0xff] %v1207_v46 }
 0x362   : > { %1240 = vst [vmem:[%s2385_s5 + $0xe0] sm:$0xff] %v1208_v37  ;;  %1241 = vst [vmem:[%s2385_s5 + $0xe8] sm:$0xff] %v1209_v9 }
 0x363   : > { %1242 = vst [vmem:[%s2385_s5 + $0xf0] sm:$0xff] %v1210_v11  ;;  %1243 = vst [vmem:[%s2385_s5 + $0xf8] sm:$0xff] %v1211_v13 }
 0x364 PF: > { %p12_p9 = scmp.ge.s32.totalorder %s1405_s22, 4   ;;  %s2386_s18 = smov %s1350_s19 }
 0x365   : > { %s2387_s19 = smov %s1414_s25  ;;  %s2388_s20 = smov %s1405_s22 }
 0x366   :  { %14 = sbr.rel (!%p12_p9) target bundleno = 2 (0x2), region = 99 }

// kernel: discriminator_r_forward.9
= control target key start
LH: loop header
LB: loop body
LE: loop exit
PB: predicated region body
PF: predicated region fallthrough
CT: control target
= control target key end

     0   :  { %s1442_s18 = smov 0   ;;  %s1444_s19 = smov 0   ;;  %s2048_s0 = inlined_call_operand.vmem [shape: f32[64,512], index: 0, kind: input, shape index: {}]   ;;  %s2049_s1 = inlined_call_operand.vmem [shape: f32[64,1], index: 1, kind: input, shape index: {}]   ;;  %s2050_s2 = inlined_call_operand.vmem [shape: f32[64,1], index: 2, kind: input, shape index: {}]   ;;  %s2051_s3 = inlined_call_operand.vmem [shape: f32[64,1], index: 3, kind: input, shape index: {}]   ;;  %s2052_s4 = inlined_call_operand.vmem [shape: f32[512,256], index: 4, kind: input, shape index: {}]   ;;  %s2053_s5 = inlined_call_operand.vmem [shape: f32[64,256], index: 5, kind: output, shape index: {}]  }
   0x1   :  { %s1446_s20 = smov 0  }
   0x2 LB: > { %s1216_s21 = sadd.s32 4294967295, %s1408_s20   ;;  %s1459_s22 = sadd.s32 1, %s1408_s20   ;;  %s1408_s20 = sphi %s1446_s20, %s2056_s20   ;;  %s1404_s19 = sphi %s1444_s19, %s2055_s19   ;;  %s1400_s18 = sphi %s1442_s18, %s2054_s18  }
   0x3   : > { %s103_s23 = ssub.s32 %s1408_s20, %s1459_s22  ;;  %s106_s24 = sadd.s32 1, %s1404_s19 }
   0x4   : > { %p104_p0 = scmp.eq.s32.totalorder %s103_s23, 0  ;;  %p113_p1 = scmp.ne.s32.totalorder %s1404_s19, %s1400_s18 }
   0x5   : > { %p114_p2 = scmp.eq.s32.totalorder %s1408_s20, 0  ;;  %p1218_p4 = scmp.ge.s32.totalorder %s1408_s20, 2 }
   0x6   : > { %s1468_s25 = scalar_select %p104_p0, %s1404_s19, %s106_s24  }
   0x7   : > { %p115_p3 = por %p114_p2, %p113_p1  ;;  %172 = sbr.rel (%p1218_p4) target bundleno = 48 (0x30), region = 32 }
   0xc   : > { %175 = sbr.rel (!%p115_p3) target bundleno = 48 (0x30), region = 36  ;;  %s177_s26 = sand.u32 (%p115_p3), 1, %s1404_s19  }
   0xd   : > { %s1220_s27 = sshll.u32 (%p115_p3), %s1408_s20, 3  ;;  %s1219_s28 = sshll.u32 (%p115_p3), %s177_s26, 9 }
   0xe   : > { %s1476_s6 = scalar_lea.vmem (%p115_p3), %s2052_s4, %s1220_s27  ;;  %s1481_s7 = scalar_lea.vmem (%p115_p3), [#allocation2], %s1219_s28 }
   0xf   : > { %v336_v0 = vld [vmem:[%s1476_s6] sm:$0xff] (%p115_p3)  ;;  %v338_v1 = vld [vmem:[%s1476_s6 + $0x10] sm:$0xff] (%p115_p3) }
  0x10   : > { %v340_v2 = vld [vmem:[%s1476_s6 + $0x20] sm:$0xff] (%p115_p3)  ;;  %337 = vst [vmem:[%s1481_s7] sm:$0xff] (%p115_p3), %v336_v0  ;;  %339 = vst [vmem:[%s1481_s7 + $0x8] sm:$0xff] (%p115_p3), %v338_v1  ;;  %v342_v3 = vld [vmem:[%s1476_s6 + $0x30] sm:$0xff] (%p115_p3) }
  0x11   : > { %341 = vst [vmem:[%s1481_s7 + $0x10] sm:$0xff] %v340_v2  ;;  %v344_v4 = vld [vmem:[%s1476_s6 + $0x40] sm:$0xff]  ;;  %v346_v5 = vld [vmem:[%s1476_s6 + $0x50] sm:$0xff]  ;;  %343 = vst [vmem:[%s1481_s7 + $0x18] sm:$0xff] %v342_v3 }
  0x12   : > { %345 = vst [vmem:[%s1481_s7 + $0x20] sm:$0xff] %v344_v4  ;;  %347 = vst [vmem:[%s1481_s7 + $0x28] sm:$0xff] %v346_v5  ;;  %v348_v6 = vld [vmem:[%s1476_s6 + $0x60] sm:$0xff]  ;;  %v350_v7 = vld [vmem:[%s1476_s6 + $0x70] sm:$0xff] }
  0x13   : > { %v352_v8 = vld [vmem:[%s1476_s6 + $0x80] sm:$0xff]  ;;  %349 = vst [vmem:[%s1481_s7 + $0x30] sm:$0xff] %v348_v6  ;;  %351 = vst [vmem:[%s1481_s7 + $0x38] sm:$0xff] %v350_v7  ;;  %v354_v9 = vld [vmem:[%s1476_s6 + $0x90] sm:$0xff] }
  0x14   : > { %353 = vst [vmem:[%s1481_s7 + $0x40] sm:$0xff] %v352_v8  ;;  %v356_v10 = vld [vmem:[%s1476_s6 + $0xa0] sm:$0xff]  ;;  %v358_v11 = vld [vmem:[%s1476_s6 + $0xb0] sm:$0xff]  ;;  %355 = vst [vmem:[%s1481_s7 + $0x48] sm:$0xff] %v354_v9 }
  0x15   : > { %357 = vst [vmem:[%s1481_s7 + $0x50] sm:$0xff] %v356_v10  ;;  %359 = vst [vmem:[%s1481_s7 + $0x58] sm:$0xff] %v358_v11  ;;  %v360_v12 = vld [vmem:[%s1476_s6 + $0xc0] sm:$0xff]  ;;  %v362_v13 = vld [vmem:[%s1476_s6 + $0xd0] sm:$0xff] }
  0x16   : > { %v364_v14 = vld [vmem:[%s1476_s6 + $0xe0] sm:$0xff]  ;;  %361 = vst [vmem:[%s1481_s7 + $0x60] sm:$0xff] %v360_v12  ;;  %363 = vst [vmem:[%s1481_s7 + $0x68] sm:$0xff] %v362_v13  ;;  %v366_v15 = vld [vmem:[%s1476_s6 + $0xf0] sm:$0xff] }
  0x17   : > { %365 = vst [vmem:[%s1481_s7 + $0x70] sm:$0xff] %v364_v14  ;;  %v368_v16 = vld [vmem:[%s1476_s6 + $0x100] sm:$0xff]  ;;  %v370_v17 = vld [vmem:[%s1476_s6 + $0x110] sm:$0xff]  ;;  %367 = vst [vmem:[%s1481_s7 + $0x78] sm:$0xff] %v366_v15 }
  0x18   : > { %369 = vst [vmem:[%s1481_s7 + $0x80] sm:$0xff] %v368_v16  ;;  %371 = vst [vmem:[%s1481_s7 + $0x88] sm:$0xff] %v370_v17  ;;  %v372_v18 = vld [vmem:[%s1476_s6 + $0x120] sm:$0xff]  ;;  %v374_v19 = vld [vmem:[%s1476_s6 + $0x130] sm:$0xff] }
  0x19   : > { %v376_v20 = vld [vmem:[%s1476_s6 + $0x140] sm:$0xff]  ;;  %373 = vst [vmem:[%s1481_s7 + $0x90] sm:$0xff] %v372_v18  ;;  %375 = vst [vmem:[%s1481_s7 + $0x98] sm:$0xff] %v374_v19  ;;  %v378_v21 = vld [vmem:[%s1476_s6 + $0x150] sm:$0xff] }
  0x1a   : > { %377 = vst [vmem:[%s1481_s7 + $0xa0] sm:$0xff] %v376_v20  ;;  %v380_v22 = vld [vmem:[%s1476_s6 + $0x160] sm:$0xff]  ;;  %v382_v23 = vld [vmem:[%s1476_s6 + $0x170] sm:$0xff]  ;;  %379 = vst [vmem:[%s1481_s7 + $0xa8] sm:$0xff] %v378_v21 }
  0x1b   : > { %381 = vst [vmem:[%s1481_s7 + $0xb0] sm:$0xff] %v380_v22  ;;  %383 = vst [vmem:[%s1481_s7 + $0xb8] sm:$0xff] %v382_v23  ;;  %v384_v24 = vld [vmem:[%s1476_s6 + $0x180] sm:$0xff]  ;;  %v386_v25 = vld [vmem:[%s1476_s6 + $0x190] sm:$0xff] }
  0x1c   : > { %v388_v26 = vld [vmem:[%s1476_s6 + $0x1a0] sm:$0xff]  ;;  %385 = vst [vmem:[%s1481_s7 + $0xc0] sm:$0xff] %v384_v24  ;;  %387 = vst [vmem:[%s1481_s7 + $0xc8] sm:$0xff] %v386_v25  ;;  %v390_v27 = vld [vmem:[%s1476_s6 + $0x1b0] sm:$0xff] }
  0x1d   : > { %389 = vst [vmem:[%s1481_s7 + $0xd0] sm:$0xff] %v388_v26  ;;  %v392_v28 = vld [vmem:[%s1476_s6 + $0x1c0] sm:$0xff]  ;;  %v394_v29 = vld [vmem:[%s1476_s6 + $0x1d0] sm:$0xff]  ;;  %391 = vst [vmem:[%s1481_s7 + $0xd8] sm:$0xff] %v390_v27 }
  0x1e   : > { %393 = vst [vmem:[%s1481_s7 + $0xe0] sm:$0xff] %v392_v28  ;;  %395 = vst [vmem:[%s1481_s7 + $0xe8] sm:$0xff] %v394_v29  ;;  %v396_v30 = vld [vmem:[%s1476_s6 + $0x1e0] sm:$0xff]  ;;  %v398_v31 = vld [vmem:[%s1476_s6 + $0x1f0] sm:$0xff] }
  0x1f   : > { %v400_v32 = vld [vmem:[%s1476_s6 + $0x200] sm:$0xff]  ;;  %397 = vst [vmem:[%s1481_s7 + $0xf0] sm:$0xff] %v396_v30  ;;  %399 = vst [vmem:[%s1481_s7 + $0xf8] sm:$0xff] %v398_v31  ;;  %v402_v33 = vld [vmem:[%s1476_s6 + $0x210] sm:$0xff] }
  0x20   : > { %401 = vst [vmem:[%s1481_s7 + $0x100] sm:$0xff] %v400_v32  ;;  %v404_v34 = vld [vmem:[%s1476_s6 + $0x220] sm:$0xff]  ;;  %v406_v35 = vld [vmem:[%s1476_s6 + $0x230] sm:$0xff]  ;;  %403 = vst [vmem:[%s1481_s7 + $0x108] sm:$0xff] %v402_v33 }
  0x21   : > { %405 = vst [vmem:[%s1481_s7 + $0x110] sm:$0xff] %v404_v34  ;;  %407 = vst [vmem:[%s1481_s7 + $0x118] sm:$0xff] %v406_v35  ;;  %v408_v36 = vld [vmem:[%s1476_s6 + $0x240] sm:$0xff]  ;;  %v410_v37 = vld [vmem:[%s1476_s6 + $0x250] sm:$0xff] }
  0x22   : > { %v412_v38 = vld [vmem:[%s1476_s6 + $0x260] sm:$0xff]  ;;  %409 = vst [vmem:[%s1481_s7 + $0x120] sm:$0xff] %v408_v36  ;;  %411 = vst [vmem:[%s1481_s7 + $0x128] sm:$0xff] %v410_v37  ;;  %v414_v39 = vld [vmem:[%s1476_s6 + $0x270] sm:$0xff] }
  0x23   : > { %413 = vst [vmem:[%s1481_s7 + $0x130] sm:$0xff] %v412_v38  ;;  %v416_v40 = vld [vmem:[%s1476_s6 + $0x280] sm:$0xff]  ;;  %v418_v41 = vld [vmem:[%s1476_s6 + $0x290] sm:$0xff]  ;;  %415 = vst [vmem:[%s1481_s7 + $0x138] sm:$0xff] %v414_v39 }
  0x24   : > { %417 = vst [vmem:[%s1481_s7 + $0x140] sm:$0xff] %v416_v40  ;;  %419 = vst [vmem:[%s1481_s7 + $0x148] sm:$0xff] %v418_v41  ;;  %v420_v42 = vld [vmem:[%s1476_s6 + $0x2a0] sm:$0xff]  ;;  %v422_v43 = vld [vmem:[%s1476_s6 + $0x2b0] sm:$0xff] }
  0x25   : > { %v424_v44 = vld [vmem:[%s1476_s6 + $0x2c0] sm:$0xff]  ;;  %421 = vst [vmem:[%s1481_s7 + $0x150] sm:$0xff] %v420_v42  ;;  %423 = vst [vmem:[%s1481_s7 + $0x158] sm:$0xff] %v422_v43  ;;  %v426_v45 = vld [vmem:[%s1476_s6 + $0x2d0] sm:$0xff] }
  0x26   : > { %425 = vst [vmem:[%s1481_s7 + $0x160] sm:$0xff] %v424_v44  ;;  %v428_v46 = vld [vmem:[%s1476_s6 + $0x2e0] sm:$0xff]  ;;  %v430_v47 = vld [vmem:[%s1476_s6 + $0x2f0] sm:$0xff]  ;;  %427 = vst [vmem:[%s1481_s7 + $0x168] sm:$0xff] %v426_v45 }
  0x27   : > { %429 = vst [vmem:[%s1481_s7 + $0x170] sm:$0xff] %v428_v46  ;;  %431 = vst [vmem:[%s1481_s7 + $0x178] sm:$0xff] %v430_v47  ;;  %v432_v48 = vld [vmem:[%s1476_s6 + $0x300] sm:$0xff]  ;;  %v434_v49 = vld [vmem:[%s1476_s6 + $0x310] sm:$0xff] }
  0x28   : > { %v436_v50 = vld [vmem:[%s1476_s6 + $0x320] sm:$0xff]  ;;  %433 = vst [vmem:[%s1481_s7 + $0x180] sm:$0xff] %v432_v48  ;;  %435 = vst [vmem:[%s1481_s7 + $0x188] sm:$0xff] %v434_v49  ;;  %v438_v51 = vld [vmem:[%s1476_s6 + $0x330] sm:$0xff] }
  0x29   : > { %437 = vst [vmem:[%s1481_s7 + $0x190] sm:$0xff] %v436_v50  ;;  %v440_v52 = vld [vmem:[%s1476_s6 + $0x340] sm:$0xff]  ;;  %v442_v53 = vld [vmem:[%s1476_s6 + $0x350] sm:$0xff]  ;;  %439 = vst [vmem:[%s1481_s7 + $0x198] sm:$0xff] %v438_v51 }
  0x2a   : > { %441 = vst [vmem:[%s1481_s7 + $0x1a0] sm:$0xff] %v440_v52  ;;  %443 = vst [vmem:[%s1481_s7 + $0x1a8] sm:$0xff] %v442_v53  ;;  %v444_v54 = vld [vmem:[%s1476_s6 + $0x360] sm:$0xff]  ;;  %v446_v55 = vld [vmem:[%s1476_s6 + $0x370] sm:$0xff] }
  0x2b   : > { %v448_v56 = vld [vmem:[%s1476_s6 + $0x380] sm:$0xff]  ;;  %445 = vst [vmem:[%s1481_s7 + $0x1b0] sm:$0xff] %v444_v54  ;;  %447 = vst [vmem:[%s1481_s7 + $0x1b8] sm:$0xff] %v446_v55  ;;  %v450_v57 = vld [vmem:[%s1476_s6 + $0x390] sm:$0xff] }
  0x2c   : > { %449 = vst [vmem:[%s1481_s7 + $0x1c0] sm:$0xff] %v448_v56  ;;  %v452_v58 = vld [vmem:[%s1476_s6 + $0x3a0] sm:$0xff]  ;;  %v454_v59 = vld [vmem:[%s1476_s6 + $0x3b0] sm:$0xff]  ;;  %451 = vst [vmem:[%s1481_s7 + $0x1c8] sm:$0xff] %v450_v57 }
  0x2d   : > { %453 = vst [vmem:[%s1481_s7 + $0x1d0] sm:$0xff] %v452_v58  ;;  %455 = vst [vmem:[%s1481_s7 + $0x1d8] sm:$0xff] %v454_v59  ;;  %v456_v60 = vld [vmem:[%s1476_s6 + $0x3c0] sm:$0xff]  ;;  %v458_v61 = vld [vmem:[%s1476_s6 + $0x3d0] sm:$0xff] }
  0x2e   : > { %v460_v62 = vld [vmem:[%s1476_s6 + $0x3e0] sm:$0xff]  ;;  %457 = vst [vmem:[%s1481_s7 + $0x1e0] sm:$0xff] %v456_v60  ;;  %459 = vst [vmem:[%s1481_s7 + $0x1e8] sm:$0xff] %v458_v61  ;;  %v462_v63 = vld [vmem:[%s1476_s6 + $0x3f0] sm:$0xff] }
  0x2f   : > { %461 = vst [vmem:[%s1481_s7 + $0x1f0] sm:$0xff] %v460_v62  ;;  %463 = vst [vmem:[%s1481_s7 + $0x1f8] sm:$0xff] %v462_v63 }
  0x30 PF: > { %p1221_p5 = scmp.ge.s32.totalorder %s1408_s20, 1  ;;  %p468_p6 = scmp.lt.s32.totalorder %s1408_s20, 3 }
  0x32   : > { %p469_p7 = pnand %p1221_p5, %p468_p6 }
  0x33   : > { %s475_s8 = sand.u32 (!%p469_p7), 1, %s1400_s18   ;;  %s1223_s11 = sshll.u32 (!%p469_p7), %s1216_s21, 7 }
  0x34   : > { %472 = sbr.rel (%p469_p7) target bundleno = 798 (0x31e), region = 74  ;;  %s1222_s13 = sshll.u32 (!%p469_p7), %s475_s8, 9 }
  0x35   : > { %s1617_s14 = scalar_lea.vmem (!%p469_p7), [#allocation2], %s1222_s13  ;;  %s852_s12 = sshra.s32 (!%p469_p7), %s1223_s11, 7 }
  0x36   : > { %s1224_s13 = sshll.u32 (!%p469_p7), %s852_s12, 3  ;;  %p1225_p8 = scmp.ne.s32.totalorder (!%p469_p7), %s1216_s21, 1 }
  0x37   : > { %s1802_s16 = scalar_lea.vmem (!%p469_p7), %s2053_s5, %s1224_s13 }
  0x39   : > { %v498_v0 = vld [vmem:[%s2048_s0 + $0x8] sm:$0xff]  ;;  %v500_v1 = vld [vmem:[%s2048_s0 + $0x18] sm:$0xff]  ;;  %v1410_v2 = vmov 0   ;;  %v559_v7 = vld [vmem:[%s1617_s14 + $0xf0] sm:$0xff] }
  0x3a   : > { %705 = vmatprep.mubr.f32.mxu0 %v498_v0  ;;  %810 = vmatprep.mubr.f32.mxu1 %v500_v1  ;;  %v560_v3 = vld [vmem:[%s1617_s14 + $0xf8] sm:$0xff]  ;;  %v591_v8 = vld [vmem:[%s1617_s14 + $0x1f0] sm:$0xff]  ;;  %v558_v11 = vld [vmem:[%s1617_s14 + $0xe8] sm:$0xff] }
  0x3b   : > { %1366 = vset.pattern.permute.xlu0 %v1410_v2  ;;  %1367 = vset.pattern.permute.xlu1 %v1410_v2  ;;  %v592_v4 = vld [vmem:[%s1617_s14 + $0x1f8] sm:$0xff]  ;;  %v543_v9 = vld [vmem:[%s1617_s14 + $0x70] sm:$0xff]  ;;  %v590_v12 = vld [vmem:[%s1617_s14 + $0x1e8] sm:$0xff] }
  0x3c   : > { %v544_v5 = vld [vmem:[%s1617_s14 + $0x78] sm:$0xff]  ;;  %1228 = vmatprep.subr.mxu0 %v560_v3  ;;  %1284 = vmatprep.subr.mxu1 %v592_v4  ;;  %v575_v10 = vld [vmem:[%s1617_s14 + $0x170] sm:$0xff]  ;;  %v542_v13 = vld [vmem:[%s1617_s14 + $0x68] sm:$0xff] }
  0x3d   : > { %v576_v6 = vld [vmem:[%s1617_s14 + $0x178] sm:$0xff]  ;;  %1229 = vmatpush3.msra.mxu0 %v544_v5  ;;  %v574_v14 = vld [vmem:[%s1617_s14 + $0x168] sm:$0xff]  ;;  %v557_v15 = vld [vmem:[%s1617_s14 + $0xe0] sm:$0xff] }
  0x3e   : > { %1285 = vmatpush3.msra.mxu1 %v576_v6  ;;  %1230 = vmatprep.subr.mxu0 %v559_v7  ;;  %v589_v16 = vld [vmem:[%s1617_s14 + $0x1e0] sm:$0xff]  ;;  %v556_v19 = vld [vmem:[%s1617_s14 + $0xd8] sm:$0xff]  ;;  %v555_v23 = vld [vmem:[%s1617_s14 + $0xd0] sm:$0xff] }
  0x3f   : > { %1286 = vmatprep.subr.mxu1 %v591_v8  ;;  %1231 = vmatpush3.msra.mxu0 %v543_v9  ;;  %v541_v17 = vld [vmem:[%s1617_s14 + $0x60] sm:$0xff]  ;;  %v588_v20 = vld [vmem:[%s1617_s14 + $0x1d8] sm:$0xff]  ;;  %v587_v24 = vld [vmem:[%s1617_s14 + $0x1d0] sm:$0xff] }
  0x40   : > { %1287 = vmatpush3.msra.mxu1 %v575_v10  ;;  %1232 = vmatprep.subr.mxu0 %v558_v11  ;;  %v573_v18 = vld [vmem:[%s1617_s14 + $0x160] sm:$0xff]  ;;  %v540_v21 = vld [vmem:[%s1617_s14 + $0x58] sm:$0xff]  ;;  %v539_v25 = vld [vmem:[%s1617_s14 + $0x50] sm:$0xff] }
  0x41   : > { %1288 = vmatprep.subr.mxu1 %v590_v12  ;;  %1233 = vmatpush3.msra.mxu0 %v542_v13  ;;  %v572_v22 = vld [vmem:[%s1617_s14 + $0x158] sm:$0xff]  ;;  %v571_v26 = vld [vmem:[%s1617_s14 + $0x150] sm:$0xff]  ;;  %v554_v27 = vld [vmem:[%s1617_s14 + $0xc8] sm:$0xff] }
  0x42   : > { %1289 = vmatpush3.msra.mxu1 %v574_v14  ;;  %1234 = vmatprep.subr.mxu0 %v557_v15  ;;  %v586_v28 = vld [vmem:[%s1617_s14 + $0x1c8] sm:$0xff]  ;;  %v553_v31 = vld [vmem:[%s1617_s14 + $0xc0] sm:$0xff]  ;;  %v552_v35 = vld [vmem:[%s1617_s14 + $0xb8] sm:$0xff] }
  0x43   : > { %1290 = vmatprep.subr.mxu1 %v589_v16  ;;  %1235 = vmatpush3.msra.mxu0 %v541_v17  ;;  %v538_v29 = vld [vmem:[%s1617_s14 + $0x48] sm:$0xff]  ;;  %v585_v32 = vld [vmem:[%s1617_s14 + $0x1c0] sm:$0xff]  ;;  %v584_v36 = vld [vmem:[%s1617_s14 + $0x1b8] sm:$0xff] }
  0x44   : > { %1291 = vmatpush3.msra.mxu1 %v573_v18  ;;  %1236 = vmatprep.subr.mxu0 %v556_v19  ;;  %v570_v30 = vld [vmem:[%s1617_s14 + $0x148] sm:$0xff]  ;;  %v537_v33 = vld [vmem:[%s1617_s14 + $0x40] sm:$0xff]  ;;  %v536_v37 = vld [vmem:[%s1617_s14 + $0x38] sm:$0xff] }
  0x45   : > { %1292 = vmatprep.subr.mxu1 %v588_v20  ;;  %1237 = vmatpush3.msra.mxu0 %v540_v21  ;;  %v569_v34 = vld [vmem:[%s1617_s14 + $0x140] sm:$0xff]  ;;  %v568_v38 = vld [vmem:[%s1617_s14 + $0x138] sm:$0xff]  ;;  %v551_v39 = vld [vmem:[%s1617_s14 + $0xb0] sm:$0xff] }
  0x46   : > { %1293 = vmatpush3.msra.mxu1 %v572_v22  ;;  %1238 = vmatprep.subr.mxu0 %v555_v23  ;;  %v583_v40 = vld [vmem:[%s1617_s14 + $0x1b0] sm:$0xff]  ;;  %v550_v43 = vld [vmem:[%s1617_s14 + $0xa8] sm:$0xff]  ;;  %v549_v47 = vld [vmem:[%s1617_s14 + $0xa0] sm:$0xff] }
  0x47   : > { %1294 = vmatprep.subr.mxu1 %v587_v24  ;;  %1239 = vmatpush3.msra.mxu0 %v539_v25  ;;  %v535_v41 = vld [vmem:[%s1617_s14 + $0x30] sm:$0xff]  ;;  %v582_v44 = vld [vmem:[%s1617_s14 + $0x1a8] sm:$0xff]  ;;  %v581_v48 = vld [vmem:[%s1617_s14 + $0x1a0] sm:$0xff] }
  0x48   : > { %1295 = vmatpush3.msra.mxu1 %v571_v26  ;;  %1240 = vmatprep.subr.mxu0 %v554_v27  ;;  %v567_v42 = vld [vmem:[%s1617_s14 + $0x130] sm:$0xff]  ;;  %v534_v45 = vld [vmem:[%s1617_s14 + $0x28] sm:$0xff]  ;;  %v533_v49 = vld [vmem:[%s1617_s14 + $0x20] sm:$0xff] }
  0x49   : > { %1296 = vmatprep.subr.mxu1 %v586_v28  ;;  %1241 = vmatpush3.msra.mxu0 %v538_v29  ;;  %v566_v46 = vld [vmem:[%s1617_s14 + $0x128] sm:$0xff]  ;;  %v565_v50 = vld [vmem:[%s1617_s14 + $0x120] sm:$0xff]  ;;  %v548_v51 = vld [vmem:[%s1617_s14 + $0x98] sm:$0xff] }
  0x4a   : > { %1297 = vmatpush3.msra.mxu1 %v570_v30  ;;  %1242 = vmatprep.subr.mxu0 %v553_v31  ;;  %v580_v52 = vld [vmem:[%s1617_s14 + $0x198] sm:$0xff]  ;;  %v547_v55 = vld [vmem:[%s1617_s14 + $0x90] sm:$0xff]  ;;  %v546_v59 = vld [vmem:[%s1617_s14 + $0x88] sm:$0xff] }
  0x4b   : > { %1298 = vmatprep.subr.mxu1 %v585_v32  ;;  %1243 = vmatpush3.msra.mxu0 %v537_v33  ;;  %v532_v53 = vld [vmem:[%s1617_s14 + $0x18] sm:$0xff]  ;;  %v579_v56 = vld [vmem:[%s1617_s14 + $0x190] sm:$0xff]  ;;  %v578_v60 = vld [vmem:[%s1617_s14 + $0x188] sm:$0xff] }
  0x4c   : > { %1299 = vmatpush3.msra.mxu1 %v569_v34  ;;  %1244 = vmatprep.subr.mxu0 %v552_v35  ;;  %v564_v54 = vld [vmem:[%s1617_s14 + $0x118] sm:$0xff]  ;;  %v531_v57 = vld [vmem:[%s1617_s14 + $0x10] sm:$0xff]  ;;  %v530_v61 = vld [vmem:[%s1617_s14 + $0x8] sm:$0xff] }
  0x4d   : > { %1300 = vmatprep.subr.mxu1 %v584_v36  ;;  %1245 = vmatpush3.msra.mxu0 %v536_v37  ;;  %v563_v58 = vld [vmem:[%s1617_s14 + $0x110] sm:$0xff]  ;;  %v562_v62 = vld [vmem:[%s1617_s14 + $0x108] sm:$0xff]  ;;  %v545_v63 = vld [vmem:[%s1617_s14 + $0x80] sm:$0xff] }
  0x4e   : > { %1301 = vmatpush3.msra.mxu1 %v568_v38  ;;  %1246 = vmatprep.subr.mxu0 %v551_v39  ;;  %v577_v0 = vld [vmem:[%s1617_s14 + $0x180] sm:$0xff]  ;;  %v499_v4 = vld [vmem:[%s2048_s0 + $0x10] sm:$0xff]  ;;  %v502_v5 = vld [vmem:[%s2048_s0 + $0x28] sm:$0xff] }
  0x4f   : > { %1302 = vmatprep.subr.mxu1 %v583_v40  ;;  %1247 = vmatpush3.msra.mxu0 %v535_v41  ;;  %v529_v1 = vld [vmem:[%s1617_s14] sm:$0xff]  ;;  %v504_v6 = vld [vmem:[%s2048_s0 + $0x38] sm:$0xff]  ;;  %v595_v8 = vld [vmem:[%s2049_s1 + $0x10] sm:$0xff] }
  0x50   : > { %1303 = vmatpush3.msra.mxu1 %v567_v42  ;;  %1248 = vmatprep.subr.mxu0 %v550_v43  ;;  %v561_v2 = vld [vmem:[%s1617_s14 + $0x100] sm:$0xff]  ;;  %v503_v10 = vld [vmem:[%s2048_s0 + $0x30] sm:$0xff]  ;;  %v506_v11 = vld [vmem:[%s2048_s0 + $0x48] sm:$0xff] }
  0x51   : > { %1304 = vmatprep.subr.mxu1 %v582_v44  ;;  %1249 = vmatpush3.msra.mxu0 %v534_v45  ;;  %v497_v3 = vld [vmem:[%s2048_s0] sm:$0xff]  ;;  %v508_v12 = vld [vmem:[%s2048_s0 + $0x58] sm:$0xff]  ;;  %v594_v13 = vld [vmem:[%s2049_s1 + $0x8] sm:$0xff] }
  0x52   : > { %1305 = vmatpush3.msra.mxu1 %v566_v46  ;;  %1250 = vmatprep.subr.mxu0 %v549_v47  ;;  %v593_v7 = vld [vmem:[%s2049_s1] sm:$0xff]  ;;  %v596_v14 = vld [vmem:[%s2049_s1 + $0x18] sm:$0xff]  ;;  %v507_v16 = vld [vmem:[%s2048_s0 + $0x50] sm:$0xff] }
  0x53   : > { %1306 = vmatprep.subr.mxu1 %v581_v48  ;;  %1251 = vmatpush3.msra.mxu0 %v533_v49  ;;  %v501_v9 = vld [vmem:[%s2048_s0 + $0x20] sm:$0xff]  ;;  %v510_v17 = vld [vmem:[%s2048_s0 + $0x68] sm:$0xff]  ;;  %v512_v18 = vld [vmem:[%s2048_s0 + $0x78] sm:$0xff] }
  0x54   : > { %1307 = vmatpush3.msra.mxu1 %v565_v50  ;;  %1252 = vmatprep.subr.mxu0 %v548_v51  ;;  %v505_v15 = vld [vmem:[%s2048_s0 + $0x40] sm:$0xff]  ;;  %v598_v19 = vld [vmem:[%s2049_s1 + $0x28] sm:$0xff]  ;;  %v511_v22 = vld [vmem:[%s2048_s0 + $0x70] sm:$0xff] }
  0x55   : > { %1308 = vmatprep.subr.mxu1 %v580_v52  ;;  %1253 = vmatpush3.msra.mxu0 %v532_v53  ;;  %v597_v20 = vld [vmem:[%s2049_s1 + $0x20] sm:$0xff]  ;;  %v514_v23 = vld [vmem:[%s2048_s0 + $0x88] sm:$0xff]  ;;  %v516_v24 = vld [vmem:[%s2048_s0 + $0x98] sm:$0xff] }
  0x56   : > { %1309 = vmatpush3.msra.mxu1 %v564_v54  ;;  %1254 = vmatprep.subr.mxu0 %v547_v55  ;;  %v509_v21 = vld [vmem:[%s2048_s0 + $0x60] sm:$0xff]  ;;  %v600_v25 = vld [vmem:[%s2049_s1 + $0x38] sm:$0xff]  ;;  %v599_v26 = vld [vmem:[%s2049_s1 + $0x30] sm:$0xff] }
  0x57   : > { %1310 = vmatprep.subr.mxu1 %v579_v56  ;;  %1255 = vmatpush3.msra.mxu0 %v531_v57  ;;  %v513_v27 = vld [vmem:[%s2048_s0 + $0x80] sm:$0xff]  ;;  %v515_v28 = vld [vmem:[%s2048_s0 + $0x90] sm:$0xff]  ;;  %v518_v29 = vld [vmem:[%s2048_s0 + $0xa8] sm:$0xff] }
  0x58   : > { %1311 = vmatpush3.msra.mxu1 %v563_v58  ;;  %1256 = vmatprep.subr.mxu0 %v546_v59  ;;  %v520_v30 = vld [vmem:[%s2048_s0 + $0xb8] sm:$0xff]  ;;  %v517_v31 = vld [vmem:[%s2048_s0 + $0xa0] sm:$0xff]  ;;  %v519_v32 = vld [vmem:[%s2048_s0 + $0xb0] sm:$0xff] }
  0x59   : > { %1312 = vmatprep.subr.mxu1 %v578_v60  ;;  %1257 = vmatpush3.msra.mxu0 %v530_v61  ;;  %v522_v33 = vld [vmem:[%s2048_s0 + $0xc8] sm:$0xff]  ;;  %v524_v34 = vld [vmem:[%s2048_s0 + $0xd8] sm:$0xff]  ;;  %v521_v35 = vld [vmem:[%s2048_s0 + $0xc0] sm:$0xff] }
  0x5a   : > { %1313 = vmatpush3.msra.mxu1 %v562_v62  ;;  %1258 = vmatprep.subr.mxu0 %v545_v63  ;;  %v523_v36 = vld [vmem:[%s2048_s0 + $0xd0] sm:$0xff]  ;;  %v526_v37 = vld [vmem:[%s2048_s0 + $0xe8] sm:$0xff]  ;;  %v528_v38 = vld [vmem:[%s2048_s0 + $0xf8] sm:$0xff] }
  0x5b   : > { %1314 = vmatprep.subr.mxu1 %v577_v0  ;;  %1259 = vmatpush3.msra.mxu0 %v529_v1  ;;  %v525_v39 = vld [vmem:[%s2048_s0 + $0xe0] sm:$0xff]  ;;  %v527_v40 = vld [vmem:[%s2048_s0 + $0xf0] sm:$0xff] }
  0x5c   : > { %1315 = vmatpush3.msra.mxu1 %v561_v2  ;;  %706 = vmatmul.mubr.f32.vlgmr.msra.gmra.mxu0 %v497_v3 }
  0x5d   : > { %811 = vmatmul.mubr.f32.vlgmr.msra.gmra.mxu1 %v499_v4  ;;  %710 = vmatprep.mubr.f32.mxu0 %v502_v5 }
  0x5e   : > { %815 = vmatprep.mubr.f32.mxu1 %v504_v6  ;;  %603 = vperm.xlu0 %1366, %v593_v7  }
  0x5f   : > { %613 = vperm.xlu1 %1367, %v595_v8  }
  0x60   : > { %711 = vmatmul.mubr.f32.gmra.mxu0 %v501_v9 }
  0x61   : > { %816 = vmatmul.mubr.f32.gmra.mxu1 %v503_v10  ;;  %715 = vmatprep.mubr.f32.mxu0 %v506_v11 }
  0x62   : > { %820 = vmatprep.mubr.f32.mxu1 %v508_v12  ;;  %608 = vperm.xlu0 %1366, %v594_v13  }
  0x63   : > { %618 = vperm.xlu1 %1367, %v596_v14  }
  0x64   : > { %716 = vmatmul.mubr.f32.gmra.mxu0 %v505_v15 }
  0x65   : > { %821 = vmatmul.mubr.f32.gmra.mxu1 %v507_v16  ;;  %720 = vmatprep.mubr.f32.mxu0 %v510_v17 }
  0x66   : > { %825 = vmatprep.mubr.f32.mxu1 %v512_v18  ;;  %623 = vperm.xlu0 %1366, %v597_v20  }
  0x67   : > { %628 = vperm.xlu1 %1367, %v598_v19  }
  0x68   : > { %721 = vmatmul.mubr.f32.gmra.mxu0 %v509_v21 }
  0x69   : > { %826 = vmatmul.mubr.f32.gmra.mxu1 %v511_v22  ;;  %725 = vmatprep.mubr.f32.mxu0 %v514_v23 }
  0x6a   : > { %830 = vmatprep.mubr.f32.mxu1 %v516_v24  ;;  %633 = vperm.xlu0 %1366, %v599_v26  }
  0x6b   : > { %638 = vperm.xlu1 %1367, %v600_v25  }
  0x6c   : > { %726 = vmatmul.mubr.f32.gmra.mxu0 %v513_v27 }
  0x6d   : > { %831 = vmatmul.mubr.f32.gmra.mxu1 %v515_v28  ;;  %730 = vmatprep.mubr.f32.mxu0 %v518_v29 }
  0x6e   : > { %835 = vmatprep.mubr.f32.mxu1 %v520_v30 }
  0x70   : > { %731 = vmatmul.mubr.f32.gmra.mxu0 %v517_v31 }
  0x71   : > { %836 = vmatmul.mubr.f32.gmra.mxu1 %v519_v32  ;;  %735 = vmatprep.mubr.f32.mxu0 %v522_v33 }
  0x72   : > { %840 = vmatprep.mubr.f32.mxu1 %v524_v34 }
  0x74   : > { %736 = vmatmul.mubr.f32.gmra.mxu0 %v521_v35 }
  0x75   : > { %841 = vmatmul.mubr.f32.gmra.mxu1 %v523_v36  ;;  %740 = vmatprep.mubr.f32.mxu0 %v526_v37 }
  0x76   : > { %845 = vmatprep.mubr.f32.mxu1 %v528_v38 }
  0x78   : > { %741 = vmatmul.mubr.f32.gmra.mxu0 %v525_v39 }
  0x79   : > { %846 = vmatmul.mubr.f32.gmra.mxu1 %v527_v40 }
  0xd9   : > { %v604_v41 = vpop.permute.xlu0 %603 }
  0xda   : > { %v614_v59 = vpop.permute.xlu1 %613 }
  0xdd   : > { %v609_v51 = vpop.permute.xlu0 %608 }
  0xde   : > { %v619_v8 = vpop.permute.xlu1 %618 }
  0xe1   : > { %v624_v17 = vpop.permute.xlu0 %623 }
  0xe2   : > { %v629_v25 = vpop.permute.xlu1 %628 }
  0xe5   : > { %v634_v34 = vpop.permute.xlu0 %633 }
 0x11c   : > { %v1260_v42 = vpop.f32.mrf.mxu0 }
 0x11d   : > { %v1316_v43 = vpop.f32.mrf.mxu1 }
 0x11e   : > { %v1261_v44 = vpop.f32.mrf.mxu0 }
 0x11f   : > { %v1317_v45 = vpop.f32.mrf.mxu1  ;;  %v1262_v46 = vadd.f32 %v1261_v44, %v1260_v42 }
 0x120   : > { %v1263_v47 = vpop.f32.mrf.mxu0  ;;  %v1318_v49 = vadd.f32 %v1317_v45, %v1316_v43  ;;  %v639_v45 = vpop.permute.xlu1 %638 }
 0x121   : > { %v1319_v48 = vpop.f32.mrf.mxu1  ;;  %v708_v50 = vadd.f32 %v1262_v46, %v604_v41 }
 0x122   : > { %v1264_v52 = vpop.f32.mrf.mxu0 }
 0x123   : > { %v1320_v53 = vpop.f32.mrf.mxu1  ;;  %v813_v54 = vadd.f32 %v1318_v49, %v708_v50  ;;  %v1265_v55 = vadd.f32 %v1264_v52, %v1263_v47 }
 0x124   : > { %v1266_v56 = vpop.f32.mrf.mxu0  ;;  %v1321_v58 = vadd.f32 %v1320_v53, %v1319_v48 }
 0x125   : > { %v1322_v57 = vpop.f32.mrf.mxu1  ;;  %856 = vst [vmem:[%s1802_s16] sm:$0xff] %v813_v54  ;;  %v713_v60 = vadd.f32 %v1265_v55, %v609_v51 }
 0x126   : > { %v1267_v61 = vpop.f32.mrf.mxu0 }
 0x127   : > { %v1323_v62 = vpop.f32.mrf.mxu1  ;;  %v818_v63 = vadd.f32 %v1321_v58, %v713_v60  ;;  %v1268_v0 = vadd.f32 %v1267_v61, %v1266_v56 }
 0x128   : > { %v1269_v1 = vpop.f32.mrf.mxu0  ;;  %v1324_v4 = vadd.f32 %v1323_v62, %v1322_v57 }
 0x129   : > { %v1325_v2 = vpop.f32.mrf.mxu1  ;;  %857 = vst [vmem:[%s1802_s16 + $0x10] sm:$0xff] %v818_v63  ;;  %v718_v3 = vadd.f32 %v1268_v0, %v614_v59 }
 0x12a   : > { %v1270_v5 = vpop.f32.mrf.mxu0 }
 0x12b   : > { %v1326_v6 = vpop.f32.mrf.mxu1  ;;  %v823_v7 = vadd.f32 %v1324_v4, %v718_v3  ;;  %v1271_v9 = vadd.f32 %v1270_v5, %v1269_v1 }
 0x12c   : > { %v1272_v10 = vpop.f32.mrf.mxu0  ;;  %v1327_v13 = vadd.f32 %v1326_v6, %v1325_v2 }
 0x12d   : > { %v1328_v11 = vpop.f32.mrf.mxu1  ;;  %858 = vst [vmem:[%s1802_s16 + $0x20] sm:$0xff] %v823_v7  ;;  %v723_v12 = vadd.f32 %v1271_v9, %v619_v8 }
 0x12e   : > { %v1273_v14 = vpop.f32.mrf.mxu0 }
 0x12f   : > { %v1329_v15 = vpop.f32.mrf.mxu1  ;;  %v828_v16 = vadd.f32 %v1327_v13, %v723_v12  ;;  %v1274_v18 = vadd.f32 %v1273_v14, %v1272_v10 }
 0x130   : > { %v1275_v19 = vpop.f32.mrf.mxu0  ;;  %v1330_v22 = vadd.f32 %v1329_v15, %v1328_v11 }
 0x131   : > { %v1331_v20 = vpop.f32.mrf.mxu1  ;;  %859 = vst [vmem:[%s1802_s16 + $0x30] sm:$0xff] %v828_v16  ;;  %v728_v21 = vadd.f32 %v1274_v18, %v624_v17 }
 0x132   : > { %v1276_v23 = vpop.f32.mrf.mxu0 }
 0x133   : > { %v1332_v24 = vpop.f32.mrf.mxu1  ;;  %v833_v26 = vadd.f32 %v1330_v22, %v728_v21  ;;  %v1277_v27 = vadd.f32 %v1276_v23, %v1275_v19 }
 0x134   : > { %v1278_v28 = vpop.f32.mrf.mxu0  ;;  %v1333_v31 = vadd.f32 %v1332_v24, %v1331_v20 }
 0x135   : > { %v1334_v29 = vpop.f32.mrf.mxu1  ;;  %860 = vst [vmem:[%s1802_s16 + $0x40] sm:$0xff] %v833_v26  ;;  %v733_v30 = vadd.f32 %v1277_v27, %v629_v25 }
 0x136   : > { %v1279_v32 = vpop.f32.mrf.mxu0 }
 0x137   : > { %v1335_v33 = vpop.f32.mrf.mxu1  ;;  %v838_v35 = vadd.f32 %v1333_v31, %v733_v30  ;;  %v1280_v36 = vadd.f32 %v1279_v32, %v1278_v28 }
 0x138   : > { %v1281_v37 = vpop.f32.mrf.mxu0  ;;  %v1336_v40 = vadd.f32 %v1335_v33, %v1334_v29 }
 0x139   : > { %v1337_v38 = vpop.f32.mrf.mxu1  ;;  %861 = vst [vmem:[%s1802_s16 + $0x50] sm:$0xff] %v838_v35  ;;  %v738_v39 = vadd.f32 %v1280_v36, %v634_v34 }
 0x13a   : > { %v1282_v41 = vpop.f32.mrf.mxu0 }
 0x13b   : > { %v1338_v42 = vpop.f32.mrf.mxu1  ;;  %v843_v43 = vadd.f32 %v1336_v40, %v738_v39  ;;  %v1283_v44 = vadd.f32 %v1282_v41, %v1281_v37 }
 0x13c   : > { %v1339_v47 = vadd.f32 %v1338_v42, %v1337_v38 }
 0x13d   : > { %862 = vst [vmem:[%s1802_s16 + $0x60] sm:$0xff] %v843_v43  ;;  %v743_v46 = vadd.f32 %v1283_v44, %v639_v45  ;;  %867 = sbr.rel (%p1225_p8) target bundleno = 798 (0x31e), region = 82 }
 0x13f   : > { %v848_v48 = vadd.f32 %v1339_v47, %v743_v46 }
 0x141   : > { %863 = vst [vmem:[%s1802_s16 + $0x70] sm:$0xff] %v848_v48 }
 0x148   : > { %v868_v49 = vld [vmem:[%s2053_s5] sm:$0xff]  ;;  %v869_v50 = vld [vmem:[%s2053_s5 + $0x8] sm:$0xff]  ;;  %v870_v51 = vld [vmem:[%s2053_s5 + $0x10] sm:$0xff] }
 0x149   : > { %v884_v52 = vadd.f32 %v869_v50, %v868_v49  ;;  %v871_v53 = vld [vmem:[%s2053_s5 + $0x18] sm:$0xff]  ;;  %v872_v54 = vld [vmem:[%s2053_s5 + $0x20] sm:$0xff]  ;;  %v873_v55 = vld [vmem:[%s2053_s5 + $0x28] sm:$0xff] }
 0x14a   : > { %v890_v56 = vadd.f32 %v873_v55, %v872_v54  ;;  %v874_v57 = vld [vmem:[%s2053_s5 + $0x30] sm:$0xff]  ;;  %v875_v58 = vld [vmem:[%s2053_s5 + $0x38] sm:$0xff]  ;;  %v887_v59 = vadd.f32 %v871_v53, %v870_v51  ;;  %v876_v61 = vld [vmem:[%s2053_s5 + $0x40] sm:$0xff] }
 0x14b   : > { %885 = vadd.xlane.f32.xlu0 %v884_v52  ;;  %v893_v60 = vadd.f32 %v875_v58, %v874_v57  ;;  %v877_v62 = vld [vmem:[%s2053_s5 + $0x48] sm:$0xff]  ;;  %v878_v63 = vld [vmem:[%s2053_s5 + $0x50] sm:$0xff]  ;;  %v879_v0 = vld [vmem:[%s2053_s5 + $0x58] sm:$0xff] }
 0x14c   : > { %891 = vadd.xlane.f32.xlu1 %v890_v56  ;;  %v896_v1 = vadd.f32 %v877_v62, %v876_v61  ;;  %v899_v2 = vadd.f32 %v879_v0, %v878_v63  ;;  %v880_v3 = vld [vmem:[%s2053_s5 + $0x60] sm:$0xff]  ;;  %v881_v4 = vld [vmem:[%s2053_s5 + $0x68] sm:$0xff]  ;;  %v882_v5 = vld [vmem:[%s2053_s5 + $0x70] sm:$0xff] }
 0x14d   : > { %v883_v6 = vld [vmem:[%s2053_s5 + $0x78] sm:$0xff]  ;;  %v902_v7 = vadd.f32 %v881_v4, %v880_v3 }
 0x14e   : > { %v905_v8 = vadd.f32 %v883_v6, %v882_v5 }
 0x14f   : > { %888 = vadd.xlane.f32.xlu0 %v887_v59 }
 0x150   : > { %894 = vadd.xlane.f32.xlu1 %v893_v60 }
 0x153   : > { %897 = vadd.xlane.f32.xlu0 %v896_v1  ;;  %v1411_v1 = vmov 0  }
 0x154   : > { %900 = vadd.xlane.f32.xlu1 %v899_v2  ;;  %1369 = vset.pattern.permute.xlu0 %v1411_v1  ;;  %v1068_v2 = vld [vmem:[%s2051_s3] sm:$0xff] }
 0x155   : > { %1368 = vset.pattern.permute.xlu1 %v1411_v1  ;;  %v985_v1 = vld [vmem:[%s2050_s2 + $0x28] sm:$0xff] }
 0x157   : > { %903 = vadd.xlane.f32.xlu0 %v902_v7  ;;  %v1073_v7 = vld [vmem:[%s2051_s3 + $0x28] sm:$0xff] }
 0x158   : > { %906 = vadd.xlane.f32.xlu1 %v905_v8 }
 0x1d4   : > { %v886_v9 = vpop.xlane.xlu0 %885 }
 0x1d5   : > { %v908_v10 = vmul.f32 0.00390625, %v886_v9  ;;  %v892_v11 = vpop.xlane.xlu1 %891 }
 0x1d6   : > { %v910_v12 = vmul.f32 0.00390625, %v892_v11 }
 0x1d7   : > { %v1862_v13 = vsub.f32 %v868_v49, %v908_v10  ;;  %v1864_v14 = vsub.f32 %v869_v50, %v908_v10 }
 0x1d8   : > { %v889_v15 = vpop.xlane.xlu0 %888  ;;  %v1866_v16 = vsub.f32 %v872_v54, %v910_v12  ;;  %v1868_v17 = vsub.f32 %v873_v55, %v910_v12 }
 0x1d9   : > { %v909_v18 = vmul.f32 0.00390625, %v889_v15  ;;  %v932_v19 = vmul.f32 %v1862_v13, %v1862_v13  ;;  %v933_v20 = vmul.f32 %v1864_v14, %v1864_v14  ;;  %v895_v21 = vpop.xlane.xlu1 %894 }
 0x1da   : > { %v911_v22 = vmul.f32 0.00390625, %v895_v21  ;;  %v936_v23 = vmul.f32 %v1866_v16, %v1866_v16  ;;  %v937_v24 = vmul.f32 %v1868_v17, %v1868_v17 }
 0x1db   : > { %v1878_v25 = vsub.f32 %v870_v51, %v909_v18  ;;  %v1880_v26 = vsub.f32 %v871_v53, %v909_v18  ;;  %v948_v27 = vadd.f32 %v933_v20, %v932_v19 }
 0x1dc   : > { %v1882_v28 = vsub.f32 %v874_v57, %v911_v22  ;;  %v1884_v29 = vsub.f32 %v875_v58, %v911_v22  ;;  %v898_v30 = vpop.xlane.xlu0 %897  ;;  %v954_v34 = vadd.f32 %v937_v24, %v936_v23 }
 0x1dd   : > { %949 = vadd.xlane.f32.xlu0 %v948_v27  ;;  %v934_v31 = vmul.f32 %v1878_v25, %v1878_v25  ;;  %v935_v32 = vmul.f32 %v1880_v26, %v1880_v26  ;;  %v912_v33 = vmul.f32 0.00390625, %v898_v30  ;;  %v901_v35 = vpop.xlane.xlu1 %900 }
 0x1de   : > { %v913_v36 = vmul.f32 0.00390625, %v901_v35  ;;  %v938_v37 = vmul.f32 %v1882_v28, %v1882_v28  ;;  %v939_v38 = vmul.f32 %v1884_v29, %v1884_v29 }
 0x1df   : > { %v951_v39 = vadd.f32 %v935_v32, %v934_v31  ;;  %v1894_v40 = vsub.f32 %v876_v61, %v912_v33  ;;  %v1896_v41 = vsub.f32 %v877_v62, %v912_v33 }
 0x1e0   : > { %v1898_v42 = vsub.f32 %v878_v63, %v913_v36  ;;  %v1900_v43 = vsub.f32 %v879_v0, %v913_v36  ;;  %v904_v44 = vpop.xlane.xlu0 %903  ;;  %v957_v45 = vadd.f32 %v939_v38, %v938_v37 }
 0x1e1   : > { %952 = vadd.xlane.f32.xlu1 %v951_v39  ;;  %955 = vadd.xlane.f32.xlu0 %v954_v34  ;;  %v914_v46 = vmul.f32 0.00390625, %v904_v44  ;;  %v940_v47 = vmul.f32 %v1894_v40, %v1894_v40  ;;  %v941_v48 = vmul.f32 %v1896_v41, %v1896_v41  ;;  %v907_v49 = vpop.xlane.xlu1 %906  ;;  %v980_v34 = vld [vmem:[%s2050_s2] sm:$0xff]  ;;  %v981_v44 = vld [vmem:[%s2050_s2 + $0x8] sm:$0xff] }
 0x1e2   : > { %v915_v50 = vmul.f32 0.00390625, %v907_v49  ;;  %v942_v51 = vmul.f32 %v1898_v42, %v1898_v42  ;;  %v943_v52 = vmul.f32 %v1900_v43, %v1900_v43  ;;  %v1075_v49 = vld [vmem:[%s2051_s3 + $0x38] sm:$0xff] }
 0x1e3   : > { %v1910_v53 = vsub.f32 %v880_v3, %v914_v46  ;;  %v1912_v54 = vsub.f32 %v881_v4, %v914_v46  ;;  %v960_v55 = vadd.f32 %v941_v48, %v940_v47  ;;  %v1069_v3 = vld [vmem:[%s2051_s3 + $0x8] sm:$0xff]  ;;  %v1070_v4 = vld [vmem:[%s2051_s3 + $0x10] sm:$0xff] }
 0x1e4   : > { %v1914_v56 = vsub.f32 %v882_v5, %v915_v50  ;;  %v1916_v57 = vsub.f32 %v883_v6, %v915_v50  ;;  %v963_v58 = vadd.f32 %v943_v52, %v942_v51  ;;  %v1071_v5 = vld [vmem:[%s2051_s3 + $0x18] sm:$0xff]  ;;  %v1072_v6 = vld [vmem:[%s2051_s3 + $0x20] sm:$0xff]  ;;  %v982_v48 = vld [vmem:[%s2050_s2 + $0x10] sm:$0xff] }
 0x1e5   : > { %958 = vadd.xlane.f32.xlu1 %v957_v45  ;;  %961 = vadd.xlane.f32.xlu0 %v960_v55  ;;  %v944_v59 = vmul.f32 %v1910_v53, %v1910_v53  ;;  %v945_v60 = vmul.f32 %v1912_v54, %v1912_v54 }
 0x1e6   : > { %v946_v61 = vmul.f32 %v1914_v56, %v1914_v56  ;;  %v947_v62 = vmul.f32 %v1916_v57, %v1916_v57 }
 0x1e7   : > { %v966_v63 = vadd.f32 %v945_v60, %v944_v59  ;;  %v983_v59 = vld [vmem:[%s2050_s2 + $0x18] sm:$0xff] }
 0x1e8   : > { %v969_v0 = vadd.f32 %v947_v62, %v946_v61  ;;  %v984_v62 = vld [vmem:[%s2050_s2 + $0x20] sm:$0xff] }
 0x1e9   : > { %964 = vadd.xlane.f32.xlu1 %v963_v58  ;;  %967 = vadd.xlane.f32.xlu0 %v966_v63 }
 0x1ed   : > { %970 = vadd.xlane.f32.xlu1 %v969_v0 }
 0x1fe   : > { %1078 = vperm.xlu1 %1368, %v1068_v2  }
 0x1ff   : > { %1083 = vperm.xlu0 %1369, %v1069_v3  }
 0x202   : > { %1088 = vperm.xlu1 %1368, %v1070_v4   ;;  %v986_v4 = vld [vmem:[%s2050_s2 + $0x30] sm:$0xff] }
 0x203   : > { %1093 = vperm.xlu0 %1369, %v1071_v5  }
 0x206   : > { %1098 = vperm.xlu1 %1368, %v1072_v6  }
 0x207   : > { %1103 = vperm.xlu0 %1369, %v1073_v7   ;;  %v987_v7 = vld [vmem:[%s2050_s2 + $0x38] sm:$0xff] }
 0x266   : > { %v950_v8 = vpop.xlane.xlu0 %949 }
 0x267   : > { %v972_v9 = vmul.f32 0.00390625, %v950_v8 }
 0x269   : > { %v988_v10 = vadd.f32 1e-05, %v972_v9  ;;  %v1074_v9 = vld [vmem:[%s2051_s3 + $0x30] sm:$0xff] }
 0x26a   : > { %v953_v11 = vpop.xlane.xlu1 %952  ;;  %v956_v12 = vpop.xlane.xlu0 %955 }
 0x26b   : > { %1370 = vrsqrt.f32 %v988_v10  ;;  %v973_v15 = vmul.f32 0.00390625, %v953_v11  ;;  %v974_v18 = vmul.f32 0.00390625, %v956_v12 }
 0x26d   : > { %v989_v19 = vadd.f32 1e-05, %v973_v15  ;;  %v990_v20 = vadd.f32 1e-05, %v974_v18 }
 0x26e   : > { %v959_v21 = vpop.xlane.xlu1 %958  ;;  %v962_v22 = vpop.xlane.xlu0 %961 }
 0x26f   : > { %1372 = vrsqrt.f32 %v989_v19  ;;  %v975_v23 = vmul.f32 0.00390625, %v959_v21  ;;  %v976_v24 = vmul.f32 0.00390625, %v962_v22 }
 0x270   : > { %1374 = vrsqrt.f32 %v990_v20 }
 0x271   : > { %v991_v27 = vadd.f32 1e-05, %v975_v23  ;;  %v992_v31 = vadd.f32 1e-05, %v976_v24 }
 0x272   : > { %v965_v30 = vpop.xlane.xlu1 %964  ;;  %v968_v33 = vpop.xlane.xlu0 %967 }
 0x273   : > { %1376 = vrsqrt.f32 %v991_v27  ;;  %v977_v32 = vmul.f32 0.00390625, %v965_v30  ;;  %v978_v36 = vmul.f32 0.00390625, %v968_v33 }
 0x274   : > { %1378 = vrsqrt.f32 %v992_v31 }
 0x275   : > { %v993_v35 = vadd.f32 1e-05, %v977_v32  ;;  %v994_v45 = vadd.f32 1e-05, %v978_v36 }
 0x276   : > { %v971_v38 = vpop.xlane.xlu1 %970 }
 0x277   : > { %1380 = vrsqrt.f32 %v993_v35  ;;  %v979_v46 = vmul.f32 0.00390625, %v971_v38 }
 0x278   : > { %v1371_v37 = vpop.eup %1370  ;;  %1382 = vrsqrt.f32 %v994_v45 }
 0x279   : > { %v1004_v39 = vmul.f32 %v1371_v37, %v980_v34  ;;  %v995_v52 = vadd.f32 1e-05, %v979_v46 }
 0x27a   : > { %v1084_v10 = vpop.permute.xlu0 %1083  ;;  %v1079_v11 = vpop.permute.xlu1 %1078 }
 0x27b   : > { %1014 = vperm.xlu0 %1369, %v1004_v39   ;;  %1384 = vrsqrt.f32 %v995_v52 }
 0x27c   : > { %v1373_v47 = vpop.eup %1372 }
 0x27d   : > { %v1375_v50 = vpop.eup %1374  ;;  %v1005_v51 = vmul.f32 %v1373_v47, %v981_v44 }
 0x27e   : > { %v1006_v55 = vmul.f32 %v1375_v50, %v982_v48  ;;  %v1094_v12 = vpop.permute.xlu0 %1093  ;;  %v1089_v15 = vpop.permute.xlu1 %1088 }
 0x27f   : > { %1019 = vperm.xlu1 %1368, %v1005_v51   ;;  %1113 = vperm.xlu0 %1369, %v1075_v49  }
 0x280   : > { %v1377_v58 = vpop.eup %1376 }
 0x281   : > { %v1007_v60 = vmul.f32 %v1377_v58, %v983_v59  ;;  %v1379_v61 = vpop.eup %1378 }
 0x282   : > { %v1008_v63 = vmul.f32 %v1379_v61, %v984_v62  ;;  %v1104_v18 = vpop.permute.xlu0 %1103  ;;  %v1099_v19 = vpop.permute.xlu1 %1098 }
 0x283   : > { %1024 = vperm.xlu1 %1368, %v1006_v55  }
 0x284   : > { %v1381_v0 = vpop.eup %1380 }
 0x285   : > { %v1009_v2 = vmul.f32 %v1381_v0, %v985_v1  ;;  %v1383_v3 = vpop.eup %1382 }
 0x286   : > { %v1010_v5 = vmul.f32 %v1383_v3, %v986_v4 }
 0x287   : > { %1029 = vperm.xlu1 %1368, %v1007_v60  }
 0x288   : > { %v1385_v6 = vpop.eup %1384 }
 0x289   : > { %v1011_v8 = vmul.f32 %v1385_v6, %v987_v7 }
 0x28b   : > { %1034 = vperm.xlu1 %1368, %v1008_v63  }
 0x28f   : > { %1039 = vperm.xlu1 %1368, %v1009_v2  }
 0x293   : > { %1044 = vperm.xlu1 %1368, %v1010_v5  }
 0x297   : > { %1049 = vperm.xlu1 %1368, %v1011_v8  }
 0x29b   : > { %1108 = vperm.xlu1 %1368, %v1074_v9  }
 0x2f6   : > { %v1015_v20 = vpop.permute.xlu0 %1014 }
 0x2f7   : > { %v1052_v21 = vmul.f32 %v1015_v20, %v1862_v13  ;;  %v1053_v22 = vmul.f32 %v1015_v20, %v1864_v14 }
 0x2f9   : > { %v1116_v23 = vadd.f32 %v1079_v11, %v1052_v21  ;;  %v1117_v24 = vadd.f32 %v1079_v11, %v1053_v22 }
 0x2fa   : > { %v1020_v27 = vpop.permute.xlu1 %1019 }
 0x2fb   : > { %v1132_v30 = vmul.f32 0.2, %v1116_v23  ;;  %v1133_v31 = vmul.f32 0.2, %v1117_v24  ;;  %v1054_v32 = vmul.f32 %v1020_v27, %v1878_v25  ;;  %v1055_v33 = vmul.f32 %v1020_v27, %v1880_v26 }
 0x2fd   : > { %v1148_v34 = vmax.f32 %v1116_v23, %v1132_v30  ;;  %v1149_v35 = vmax.f32 %v1117_v24, %v1133_v31  ;;  %v1118_v36 = vadd.f32 %v1084_v10, %v1054_v32  ;;  %v1119_v37 = vadd.f32 %v1084_v10, %v1055_v33 }
 0x2fe   : > { %v1025_v38 = vpop.permute.xlu1 %1024 }
 0x2ff   : > { %1164 = vst [vmem:[%s2053_s5] sm:$0xff] %v1148_v34  ;;  %1165 = vst [vmem:[%s2053_s5 + $0x8] sm:$0xff] %v1149_v35  ;;  %v1134_v13 = vmul.f32 0.2, %v1118_v36  ;;  %v1135_v14 = vmul.f32 0.2, %v1119_v37  ;;  %v1056_v39 = vmul.f32 %v1025_v38, %v1866_v16  ;;  %v1057_v25 = vmul.f32 %v1025_v38, %v1868_v17 }
 0x301   : > { %v1150_v26 = vmax.f32 %v1118_v36, %v1134_v13  ;;  %v1151_v44 = vmax.f32 %v1119_v37, %v1135_v14  ;;  %v1120_v45 = vadd.f32 %v1089_v15, %v1056_v39  ;;  %v1121_v46 = vadd.f32 %v1089_v15, %v1057_v25 }
 0x302   : > { %v1030_v47 = vpop.permute.xlu1 %1029 }
 0x303   : > { %1166 = vst [vmem:[%s2053_s5 + $0x10] sm:$0xff] %v1150_v26  ;;  %1167 = vst [vmem:[%s2053_s5 + $0x18] sm:$0xff] %v1151_v44  ;;  %v1136_v48 = vmul.f32 0.2, %v1120_v45  ;;  %v1137_v49 = vmul.f32 0.2, %v1121_v46  ;;  %v1058_v50 = vmul.f32 %v1030_v47, %v1882_v28  ;;  %v1059_v16 = vmul.f32 %v1030_v47, %v1884_v29 }
 0x305   : > { %v1152_v17 = vmax.f32 %v1120_v45, %v1136_v48  ;;  %v1153_v51 = vmax.f32 %v1121_v46, %v1137_v49  ;;  %v1122_v52 = vadd.f32 %v1094_v12, %v1058_v50  ;;  %v1123_v55 = vadd.f32 %v1094_v12, %v1059_v16 }
 0x306   : > { %v1035_v58 = vpop.permute.xlu1 %1034 }
 0x307   : > { %1168 = vst [vmem:[%s2053_s5 + $0x20] sm:$0xff] %v1152_v17  ;;  %1169 = vst [vmem:[%s2053_s5 + $0x28] sm:$0xff] %v1153_v51  ;;  %v1138_v59 = vmul.f32 0.2, %v1122_v52  ;;  %v1139_v60 = vmul.f32 0.2, %v1123_v55  ;;  %v1060_v61 = vmul.f32 %v1035_v58, %v1894_v40  ;;  %v1061_v28 = vmul.f32 %v1035_v58, %v1896_v41 }
 0x309   : > { %v1154_v29 = vmax.f32 %v1122_v52, %v1138_v59  ;;  %v1155_v62 = vmax.f32 %v1123_v55, %v1139_v60  ;;  %v1124_v63 = vadd.f32 %v1099_v19, %v1060_v61  ;;  %v1125_v0 = vadd.f32 %v1099_v19, %v1061_v28 }
 0x30a   : > { %v1040_v1 = vpop.permute.xlu1 %1039 }
 0x30b   : > { %1170 = vst [vmem:[%s2053_s5 + $0x30] sm:$0xff] %v1154_v29  ;;  %1171 = vst [vmem:[%s2053_s5 + $0x38] sm:$0xff] %v1155_v62  ;;  %v1140_v2 = vmul.f32 0.2, %v1124_v63  ;;  %v1141_v3 = vmul.f32 0.2, %v1125_v0  ;;  %v1062_v4 = vmul.f32 %v1040_v1, %v1898_v42  ;;  %v1063_v40 = vmul.f32 %v1040_v1, %v1900_v43 }
 0x30d   : > { %v1156_v41 = vmax.f32 %v1124_v63, %v1140_v2  ;;  %v1157_v5 = vmax.f32 %v1125_v0, %v1141_v3  ;;  %v1126_v6 = vadd.f32 %v1104_v18, %v1062_v4  ;;  %v1127_v7 = vadd.f32 %v1104_v18, %v1063_v40  ;;  %v1114_v18 = vpop.permute.xlu0 %1113 }
 0x30e   : > { %v1045_v8 = vpop.permute.xlu1 %1044 }
 0x30f   : > { %1172 = vst [vmem:[%s2053_s5 + $0x40] sm:$0xff] %v1156_v41  ;;  %1173 = vst [vmem:[%s2053_s5 + $0x48] sm:$0xff] %v1157_v5  ;;  %v1142_v9 = vmul.f32 0.2, %v1126_v6  ;;  %v1143_v10 = vmul.f32 0.2, %v1127_v7  ;;  %v1064_v19 = vmul.f32 %v1045_v8, %v1910_v53  ;;  %v1065_v20 = vmul.f32 %v1045_v8, %v1912_v54 }
 0x311   : > { %v1158_v11 = vmax.f32 %v1126_v6, %v1142_v9  ;;  %v1159_v12 = vmax.f32 %v1127_v7, %v1143_v10 }
 0x312   : > { %v1050_v42 = vpop.permute.xlu1 %1049 }
 0x313   : > { %1174 = vst [vmem:[%s2053_s5 + $0x50] sm:$0xff] %v1158_v11  ;;  %1175 = vst [vmem:[%s2053_s5 + $0x58] sm:$0xff] %v1159_v12  ;;  %v1066_v43 = vmul.f32 %v1050_v42, %v1914_v56  ;;  %v1067_v15 = vmul.f32 %v1050_v42, %v1916_v57 }
 0x315   : > { %v1130_v21 = vadd.f32 %v1114_v18, %v1066_v43  ;;  %v1131_v22 = vadd.f32 %v1114_v18, %v1067_v15 }
 0x316   : > { %v1109_v23 = vpop.permute.xlu1 %1108 }
 0x317   : > { %v1146_v24 = vmul.f32 0.2, %v1130_v21  ;;  %v1147_v27 = vmul.f32 0.2, %v1131_v22  ;;  %v1128_v30 = vadd.f32 %v1109_v23, %v1064_v19  ;;  %v1129_v31 = vadd.f32 %v1109_v23, %v1065_v20 }
 0x319   : > { %v1162_v32 = vmax.f32 %v1130_v21, %v1146_v24  ;;  %v1163_v33 = vmax.f32 %v1131_v22, %v1147_v27  ;;  %v1144_v34 = vmul.f32 0.2, %v1128_v30  ;;  %v1145_v35 = vmul.f32 0.2, %v1129_v31 }
 0x31b   : > { %1178 = vst [vmem:[%s2053_s5 + $0x70] sm:$0xff] %v1162_v32  ;;  %1179 = vst [vmem:[%s2053_s5 + $0x78] sm:$0xff] %v1163_v33  ;;  %v1160_v53 = vmax.f32 %v1128_v30, %v1144_v34  ;;  %v1161_v54 = vmax.f32 %v1129_v31, %v1145_v35 }
 0x31d   : > { %1176 = vst [vmem:[%s2053_s5 + $0x60] sm:$0xff] %v1160_v53  ;;  %1177 = vst [vmem:[%s2053_s5 + $0x68] sm:$0xff] %v1161_v54 }
 0x31e PF: > { %p12_p9 = scmp.ge.s32.totalorder %s1459_s22, 4   ;;  %s2054_s18 = smov %s1404_s19 }
 0x31f   : > { %s2055_s19 = smov %s1468_s25  ;;  %s2056_s20 = smov %s1459_s22 }
 0x320   :  { %14 = sbr.rel (!%p12_p9) target bundleno = 2 (0x2), region = 114 }

// kernel: discriminator_r_forward.10
= control target key start
LH: loop header
LB: loop body
LE: loop exit
PB: predicated region body
PF: predicated region fallthrough
CT: control target
= control target key end

     0   :  { %v1188_v3 = vmov 0   ;;  %vm680_vm0 = vcmask 523264   ;;  %s2058_s4 = inlined_call_operand.vmem [shape: f32[1024,64], index: 4, kind: input, shape index: {}]   ;;  %s2059_s0 = inlined_call_operand.vmem [shape: f32[64,1024], index: 0, kind: input, shape index: {}]   ;;  %s2060_s1 = inlined_call_operand.vmem [shape: f32[64,1], index: 1, kind: input, shape index: {}]   ;;  %s2061_s5 = inlined_call_operand.vmem [shape: f32[64,64], index: 5, kind: output, shape index: {}]   ;;  %s2062_s3 = inlined_call_operand.vmem [shape: f32[64,1], index: 3, kind: input, shape index: {}]   ;;  %s2063_s2 = inlined_call_operand.vmem [shape: f32[64,1], index: 2, kind: input, shape index: {}]  }
   0x1   :  { %v115_v0 = vld [vmem:[%s2058_s4 + $0xf8] sm:$0xff]  ;;  %1170 = vset.pattern.permute.xlu0 %v1188_v3  ;;  %1171 = vset.pattern.permute.xlu1 %v1188_v3  ;;  %v114_v4 = vld [vmem:[%s2058_s4 + $0xf0] sm:$0xff]  ;;  %v113_v8 = vld [vmem:[%s2058_s4 + $0xe8] sm:$0xff] }
   0x2   :  { %v99_v1 = vld [vmem:[%s2058_s4 + $0x78] sm:$0xff]  ;;  %945 = vmatprep.subr.mxu0 %v115_v0  ;;  %v98_v6 = vld [vmem:[%s2058_s4 + $0x70] sm:$0xff]  ;;  %v97_v10 = vld [vmem:[%s2058_s4 + $0x68] sm:$0xff] }
   0x3   :  { %v147_v2 = vld [vmem:[%s2058_s4 + $0x1f8] sm:$0xff]  ;;  %946 = vmatpush3.msra.mxu0 %v99_v1  ;;  %v146_v7 = vld [vmem:[%s2058_s4 + $0x1f0] sm:$0xff]  ;;  %v145_v11 = vld [vmem:[%s2058_s4 + $0x1e8] sm:$0xff] }
   0x4   :  { %1001 = vmatprep.subr.mxu1 %v147_v2  ;;  %v131_v5 = vld [vmem:[%s2058_s4 + $0x178] sm:$0xff]  ;;  %v130_v9 = vld [vmem:[%s2058_s4 + $0x170] sm:$0xff]  ;;  %947 = vmatprep.subr.mxu0 %v114_v4  ;;  %v112_v12 = vld [vmem:[%s2058_s4 + $0xe0] sm:$0xff] }
   0x5   :  { %1002 = vmatpush3.msra.mxu1 %v131_v5  ;;  %948 = vmatpush3.msra.mxu0 %v98_v6  ;;  %v129_v13 = vld [vmem:[%s2058_s4 + $0x168] sm:$0xff]  ;;  %v144_v14 = vld [vmem:[%s2058_s4 + $0x1e0] sm:$0xff]  ;;  %v111_v17 = vld [vmem:[%s2058_s4 + $0xd8] sm:$0xff] }
   0x6   :  { %1003 = vmatprep.subr.mxu1 %v146_v7  ;;  %949 = vmatprep.subr.mxu0 %v113_v8  ;;  %v96_v15 = vld [vmem:[%s2058_s4 + $0x60] sm:$0xff]  ;;  %v143_v18 = vld [vmem:[%s2058_s4 + $0x1d8] sm:$0xff]  ;;  %v110_v21 = vld [vmem:[%s2058_s4 + $0xd0] sm:$0xff] }
   0x7   :  { %1004 = vmatpush3.msra.mxu1 %v130_v9  ;;  %v128_v16 = vld [vmem:[%s2058_s4 + $0x160] sm:$0xff]  ;;  %950 = vmatpush3.msra.mxu0 %v97_v10  ;;  %v95_v19 = vld [vmem:[%s2058_s4 + $0x58] sm:$0xff]  ;;  %v142_v22 = vld [vmem:[%s2058_s4 + $0x1d0] sm:$0xff] }
   0x8   :  { %1005 = vmatprep.subr.mxu1 %v145_v11  ;;  %951 = vmatprep.subr.mxu0 %v112_v12  ;;  %v127_v20 = vld [vmem:[%s2058_s4 + $0x158] sm:$0xff]  ;;  %v94_v23 = vld [vmem:[%s2058_s4 + $0x50] sm:$0xff]  ;;  %v109_v25 = vld [vmem:[%s2058_s4 + $0xc8] sm:$0xff] }
   0x9   :  { %1006 = vmatpush3.msra.mxu1 %v129_v13  ;;  %952 = vmatpush3.msra.mxu0 %v96_v15  ;;  %v126_v24 = vld [vmem:[%s2058_s4 + $0x150] sm:$0xff]  ;;  %v141_v26 = vld [vmem:[%s2058_s4 + $0x1c8] sm:$0xff]  ;;  %v108_v29 = vld [vmem:[%s2058_s4 + $0xc0] sm:$0xff] }
   0xa   :  { %1007 = vmatprep.subr.mxu1 %v144_v14  ;;  %953 = vmatprep.subr.mxu0 %v111_v17  ;;  %v93_v27 = vld [vmem:[%s2058_s4 + $0x48] sm:$0xff]  ;;  %v140_v30 = vld [vmem:[%s2058_s4 + $0x1c0] sm:$0xff]  ;;  %v107_v33 = vld [vmem:[%s2058_s4 + $0xb8] sm:$0xff] }
   0xb   :  { %1008 = vmatpush3.msra.mxu1 %v128_v16  ;;  %954 = vmatpush3.msra.mxu0 %v95_v19  ;;  %v125_v28 = vld [vmem:[%s2058_s4 + $0x148] sm:$0xff]  ;;  %v92_v31 = vld [vmem:[%s2058_s4 + $0x40] sm:$0xff]  ;;  %v139_v34 = vld [vmem:[%s2058_s4 + $0x1b8] sm:$0xff] }
   0xc   :  { %1009 = vmatprep.subr.mxu1 %v143_v18  ;;  %955 = vmatprep.subr.mxu0 %v110_v21  ;;  %v124_v32 = vld [vmem:[%s2058_s4 + $0x140] sm:$0xff]  ;;  %v91_v35 = vld [vmem:[%s2058_s4 + $0x38] sm:$0xff]  ;;  %v106_v37 = vld [vmem:[%s2058_s4 + $0xb0] sm:$0xff] }
   0xd   :  { %1010 = vmatpush3.msra.mxu1 %v127_v20  ;;  %956 = vmatpush3.msra.mxu0 %v94_v23  ;;  %v123_v36 = vld [vmem:[%s2058_s4 + $0x138] sm:$0xff]  ;;  %v138_v38 = vld [vmem:[%s2058_s4 + $0x1b0] sm:$0xff]  ;;  %v105_v41 = vld [vmem:[%s2058_s4 + $0xa8] sm:$0xff] }
   0xe   :  { %1011 = vmatprep.subr.mxu1 %v142_v22  ;;  %957 = vmatprep.subr.mxu0 %v109_v25  ;;  %v90_v39 = vld [vmem:[%s2058_s4 + $0x30] sm:$0xff]  ;;  %v137_v42 = vld [vmem:[%s2058_s4 + $0x1a8] sm:$0xff]  ;;  %v104_v45 = vld [vmem:[%s2058_s4 + $0xa0] sm:$0xff] }
   0xf   :  { %1012 = vmatpush3.msra.mxu1 %v126_v24  ;;  %958 = vmatpush3.msra.mxu0 %v93_v27  ;;  %v122_v40 = vld [vmem:[%s2058_s4 + $0x130] sm:$0xff]  ;;  %v89_v43 = vld [vmem:[%s2058_s4 + $0x28] sm:$0xff]  ;;  %v136_v46 = vld [vmem:[%s2058_s4 + $0x1a0] sm:$0xff] }
  0x10   :  { %1013 = vmatprep.subr.mxu1 %v141_v26  ;;  %959 = vmatprep.subr.mxu0 %v108_v29  ;;  %v121_v44 = vld [vmem:[%s2058_s4 + $0x128] sm:$0xff]  ;;  %v88_v47 = vld [vmem:[%s2058_s4 + $0x20] sm:$0xff]  ;;  %v103_v49 = vld [vmem:[%s2058_s4 + $0x98] sm:$0xff] }
  0x11   :  { %1014 = vmatpush3.msra.mxu1 %v125_v28  ;;  %960 = vmatpush3.msra.mxu0 %v92_v31  ;;  %v120_v48 = vld [vmem:[%s2058_s4 + $0x120] sm:$0xff]  ;;  %v135_v50 = vld [vmem:[%s2058_s4 + $0x198] sm:$0xff]  ;;  %v102_v53 = vld [vmem:[%s2058_s4 + $0x90] sm:$0xff] }
  0x12   :  { %1015 = vmatprep.subr.mxu1 %v140_v30  ;;  %961 = vmatprep.subr.mxu0 %v107_v33  ;;  %v87_v51 = vld [vmem:[%s2058_s4 + $0x18] sm:$0xff]  ;;  %v134_v54 = vld [vmem:[%s2058_s4 + $0x190] sm:$0xff]  ;;  %v101_v57 = vld [vmem:[%s2058_s4 + $0x88] sm:$0xff] }
  0x13   :  { %1016 = vmatpush3.msra.mxu1 %v124_v32  ;;  %962 = vmatpush3.msra.mxu0 %v91_v35  ;;  %v119_v52 = vld [vmem:[%s2058_s4 + $0x118] sm:$0xff]  ;;  %v86_v55 = vld [vmem:[%s2058_s4 + $0x10] sm:$0xff]  ;;  %v133_v58 = vld [vmem:[%s2058_s4 + $0x188] sm:$0xff] }
  0x14   :  { %1017 = vmatprep.subr.mxu1 %v139_v34  ;;  %963 = vmatprep.subr.mxu0 %v106_v37  ;;  %v118_v56 = vld [vmem:[%s2058_s4 + $0x110] sm:$0xff]  ;;  %v85_v59 = vld [vmem:[%s2058_s4 + $0x8] sm:$0xff]  ;;  %v100_v61 = vld [vmem:[%s2058_s4 + $0x80] sm:$0xff] }
  0x15   :  { %1018 = vmatpush3.msra.mxu1 %v123_v36  ;;  %964 = vmatpush3.msra.mxu0 %v90_v39  ;;  %v117_v60 = vld [vmem:[%s2058_s4 + $0x108] sm:$0xff]  ;;  %v84_v63 = vld [vmem:[%s2058_s4] sm:$0xff]  ;;  %v23_v3 = vld [vmem:[%s2059_s0 + $0x18] sm:$0xff] }
  0x16   :  { %1019 = vmatprep.subr.mxu1 %v138_v38  ;;  %965 = vmatprep.subr.mxu0 %v105_v41  ;;  %v21_v62 = vld [vmem:[%s2059_s0 + $0x8] sm:$0xff]  ;;  %v132_v0 = vld [vmem:[%s2058_s4 + $0x180] sm:$0xff]  ;;  %v179_v4 = vld [vmem:[%s2058_s4 + $0x2f8] sm:$0xff] }
  0x17   :  { %1020 = vmatpush3.msra.mxu1 %v122_v40  ;;  %966 = vmatpush3.msra.mxu0 %v89_v43  ;;  %v20_v1 = vld [vmem:[%s2059_s0] sm:$0xff]  ;;  %v22_v5 = vld [vmem:[%s2059_s0 + $0x10] sm:$0xff]  ;;  %v163_v6 = vld [vmem:[%s2058_s4 + $0x278] sm:$0xff] }
  0x18   :  { %1021 = vmatprep.subr.mxu1 %v137_v42  ;;  %967 = vmatprep.subr.mxu0 %v104_v45  ;;  %v116_v2 = vld [vmem:[%s2058_s4 + $0x100] sm:$0xff]  ;;  %v211_v7 = vld [vmem:[%s2058_s4 + $0x3f8] sm:$0xff]  ;;  %v178_v8 = vld [vmem:[%s2058_s4 + $0x2f0] sm:$0xff] }
  0x19   :  { %1022 = vmatpush3.msra.mxu1 %v121_v44  ;;  %968 = vmatpush3.msra.mxu0 %v88_v47  ;;  %v195_v9 = vld [vmem:[%s2058_s4 + $0x378] sm:$0xff]  ;;  %v29_v10 = vld [vmem:[%s2059_s0 + $0x48] sm:$0xff]  ;;  %v162_v11 = vld [vmem:[%s2058_s4 + $0x270] sm:$0xff] }
  0x1a   :  { %1023 = vmatprep.subr.mxu1 %v136_v46  ;;  %969 = vmatprep.subr.mxu0 %v103_v49  ;;  %v210_v12 = vld [vmem:[%s2058_s4 + $0x3f0] sm:$0xff]  ;;  %v28_v13 = vld [vmem:[%s2059_s0 + $0x40] sm:$0xff]  ;;  %v31_v14 = vld [vmem:[%s2059_s0 + $0x58] sm:$0xff] }
  0x1b   :  { %1024 = vmatpush3.msra.mxu1 %v120_v48  ;;  %970 = vmatpush3.msra.mxu0 %v87_v51  ;;  %v177_v15 = vld [vmem:[%s2058_s4 + $0x2e8] sm:$0xff]  ;;  %v194_v16 = vld [vmem:[%s2058_s4 + $0x370] sm:$0xff]  ;;  %v176_v20 = vld [vmem:[%s2058_s4 + $0x2e0] sm:$0xff] }
  0x1c   :  { %1025 = vmatprep.subr.mxu1 %v135_v50  ;;  %971 = vmatprep.subr.mxu0 %v102_v53  ;;  %v30_v17 = vld [vmem:[%s2059_s0 + $0x50] sm:$0xff]  ;;  %v161_v18 = vld [vmem:[%s2058_s4 + $0x268] sm:$0xff]  ;;  %v160_v23 = vld [vmem:[%s2058_s4 + $0x260] sm:$0xff] }
  0x1d   :  { %1026 = vmatpush3.msra.mxu1 %v119_v52  ;;  %972 = vmatpush3.msra.mxu0 %v86_v55  ;;  %v209_v19 = vld [vmem:[%s2058_s4 + $0x3e8] sm:$0xff]  ;;  %v208_v24 = vld [vmem:[%s2058_s4 + $0x3e0] sm:$0xff]  ;;  %v39_v26 = vld [vmem:[%s2059_s0 + $0x98] sm:$0xff] }
  0x1e   :  { %1027 = vmatprep.subr.mxu1 %v134_v54  ;;  %973 = vmatprep.subr.mxu0 %v101_v57  ;;  %v193_v21 = vld [vmem:[%s2058_s4 + $0x368] sm:$0xff]  ;;  %v36_v25 = vld [vmem:[%s2059_s0 + $0x80] sm:$0xff]  ;;  %v175_v27 = vld [vmem:[%s2058_s4 + $0x2d8] sm:$0xff] }
  0x1f   :  { %1028 = vmatpush3.msra.mxu1 %v118_v56  ;;  %974 = vmatpush3.msra.mxu0 %v85_v59  ;;  %v37_v22 = vld [vmem:[%s2059_s0 + $0x88] sm:$0xff]  ;;  %v192_v28 = vld [vmem:[%s2058_s4 + $0x360] sm:$0xff]  ;;  %v38_v29 = vld [vmem:[%s2059_s0 + $0x90] sm:$0xff] }
  0x20   :  { %1029 = vmatprep.subr.mxu1 %v133_v58  ;;  %975 = vmatprep.subr.mxu0 %v100_v61  ;;  %v159_v30 = vld [vmem:[%s2058_s4 + $0x258] sm:$0xff]  ;;  %v174_v32 = vld [vmem:[%s2058_s4 + $0x2d0] sm:$0xff]  ;;  %v45_v34 = vld [vmem:[%s2059_s0 + $0xc8] sm:$0xff] }
  0x21   :  { %1030 = vmatpush3.msra.mxu1 %v117_v60  ;;  %324 = vmatprep.mubr.f32.mxu0 %v21_v62  ;;  %v207_v31 = vld [vmem:[%s2058_s4 + $0x3d8] sm:$0xff]  ;;  %v158_v35 = vld [vmem:[%s2058_s4 + $0x250] sm:$0xff]  ;;  %v44_v37 = vld [vmem:[%s2059_s0 + $0xc0] sm:$0xff] }
  0x22   :  { %976 = vmatpush3.msra.mxu0 %v84_v63  ;;  %1031 = vmatprep.subr.mxu1 %v132_v0  ;;  %v191_v33 = vld [vmem:[%s2058_s4 + $0x358] sm:$0xff]  ;;  %v206_v36 = vld [vmem:[%s2058_s4 + $0x3d0] sm:$0xff]  ;;  %v173_v39 = vld [vmem:[%s2058_s4 + $0x2c8] sm:$0xff] }
  0x23   :  { %325 = vmatmul.mubr.f32.vlgmr.msra.gmra.mxu0 %v20_v1  ;;  %1032 = vmatpush3.msra.mxu1 %v116_v2  ;;  %v47_v38 = vld [vmem:[%s2059_s0 + $0xd8] sm:$0xff]  ;;  %v190_v40 = vld [vmem:[%s2058_s4 + $0x350] sm:$0xff]  ;;  %v157_v42 = vld [vmem:[%s2058_s4 + $0x248] sm:$0xff] }
  0x24   :  { %429 = vmatprep.mubr.f32.mxu1 %v23_v3  ;;  %1057 = vmatprep.subr.mxu0 %v179_v4  ;;  %v46_v41 = vld [vmem:[%s2059_s0 + $0xd0] sm:$0xff]  ;;  %v205_v43 = vld [vmem:[%s2058_s4 + $0x3c8] sm:$0xff]  ;;  %v172_v44 = vld [vmem:[%s2058_s4 + $0x2c0] sm:$0xff] }
  0x25   :  { %430 = vmatmul.mubr.f32.vlgmr.msra.gmra.mxu1 %v22_v5  ;;  %1058 = vmatpush3.msra.mxu0 %v163_v6  ;;  %v189_v45 = vld [vmem:[%s2058_s4 + $0x348] sm:$0xff]  ;;  %v156_v47 = vld [vmem:[%s2058_s4 + $0x240] sm:$0xff]  ;;  %v55_v50 = vld [vmem:[%s2059_s0 + $0x118] sm:$0xff] }
  0x26   :  { %1113 = vmatprep.subr.mxu1 %v211_v7  ;;  %1059 = vmatprep.subr.mxu0 %v178_v8  ;;  %v53_v46 = vld [vmem:[%s2059_s0 + $0x108] sm:$0xff]  ;;  %v204_v48 = vld [vmem:[%s2058_s4 + $0x3c0] sm:$0xff]  ;;  %v171_v51 = vld [vmem:[%s2058_s4 + $0x2b8] sm:$0xff] }
  0x27   :  { %1114 = vmatpush3.msra.mxu1 %v195_v9  ;;  %329 = vmatprep.mubr.f32.mxu0 %v29_v10  ;;  %v52_v49 = vld [vmem:[%s2059_s0 + $0x100] sm:$0xff]  ;;  %v54_v53 = vld [vmem:[%s2059_s0 + $0x110] sm:$0xff]  ;;  %v155_v54 = vld [vmem:[%s2058_s4 + $0x238] sm:$0xff] }
  0x28   :  { %1060 = vmatpush3.msra.mxu0 %v162_v11  ;;  %1115 = vmatprep.subr.mxu1 %v210_v12  ;;  %v188_v52 = vld [vmem:[%s2058_s4 + $0x340] sm:$0xff]  ;;  %v203_v55 = vld [vmem:[%s2058_s4 + $0x3b8] sm:$0xff]  ;;  %v170_v56 = vld [vmem:[%s2058_s4 + $0x2b0] sm:$0xff] }
  0x29   :  { %330 = vmatmul.mubr.f32.gmra.mxu0 %v28_v13  ;;  %434 = vmatprep.mubr.f32.mxu1 %v31_v14  ;;  %v187_v57 = vld [vmem:[%s2058_s4 + $0x338] sm:$0xff]  ;;  %v61_v58 = vld [vmem:[%s2059_s0 + $0x148] sm:$0xff]  ;;  %v154_v59 = vld [vmem:[%s2058_s4 + $0x230] sm:$0xff] }
  0x2a   :  { %1061 = vmatprep.subr.mxu0 %v177_v15  ;;  %1116 = vmatpush3.msra.mxu1 %v194_v16  ;;  %v202_v60 = vld [vmem:[%s2058_s4 + $0x3b0] sm:$0xff]  ;;  %v60_v61 = vld [vmem:[%s2059_s0 + $0x140] sm:$0xff]  ;;  %v63_v62 = vld [vmem:[%s2059_s0 + $0x158] sm:$0xff] }
  0x2b   :  { %435 = vmatmul.mubr.f32.gmra.mxu1 %v30_v17  ;;  %1062 = vmatpush3.msra.mxu0 %v161_v18  ;;  %v169_v63 = vld [vmem:[%s2058_s4 + $0x2a8] sm:$0xff]  ;;  %v186_v0 = vld [vmem:[%s2058_s4 + $0x330] sm:$0xff]  ;;  %v168_v4 = vld [vmem:[%s2058_s4 + $0x2a0] sm:$0xff] }
  0x2c   :  { %1117 = vmatprep.subr.mxu1 %v209_v19  ;;  %1063 = vmatprep.subr.mxu0 %v176_v20  ;;  %v62_v1 = vld [vmem:[%s2059_s0 + $0x150] sm:$0xff]  ;;  %v153_v2 = vld [vmem:[%s2058_s4 + $0x228] sm:$0xff]  ;;  %v152_v7 = vld [vmem:[%s2058_s4 + $0x220] sm:$0xff] }
  0x2d   :  { %1118 = vmatpush3.msra.mxu1 %v193_v21  ;;  %334 = vmatprep.mubr.f32.mxu0 %v37_v22  ;;  %v201_v3 = vld [vmem:[%s2058_s4 + $0x3a8] sm:$0xff]  ;;  %v200_v8 = vld [vmem:[%s2058_s4 + $0x3a0] sm:$0xff]  ;;  %v71_v10 = vld [vmem:[%s2059_s0 + $0x198] sm:$0xff] }
  0x2e   :  { %1064 = vmatpush3.msra.mxu0 %v160_v23  ;;  %1119 = vmatprep.subr.mxu1 %v208_v24  ;;  %v185_v5 = vld [vmem:[%s2058_s4 + $0x328] sm:$0xff]  ;;  %v68_v9 = vld [vmem:[%s2059_s0 + $0x180] sm:$0xff]  ;;  %v167_v11 = vld [vmem:[%s2058_s4 + $0x298] sm:$0xff] }
  0x2f   :  { %335 = vmatmul.mubr.f32.gmra.mxu0 %v36_v25  ;;  %439 = vmatprep.mubr.f32.mxu1 %v39_v26  ;;  %v69_v6 = vld [vmem:[%s2059_s0 + $0x188] sm:$0xff]  ;;  %v184_v12 = vld [vmem:[%s2058_s4 + $0x320] sm:$0xff]  ;;  %v70_v13 = vld [vmem:[%s2059_s0 + $0x190] sm:$0xff] }
  0x30   :  { %1065 = vmatprep.subr.mxu0 %v175_v27  ;;  %1120 = vmatpush3.msra.mxu1 %v192_v28  ;;  %v151_v14 = vld [vmem:[%s2058_s4 + $0x218] sm:$0xff]  ;;  %v166_v16 = vld [vmem:[%s2058_s4 + $0x290] sm:$0xff]  ;;  %v77_v18 = vld [vmem:[%s2059_s0 + $0x1c8] sm:$0xff] }
  0x31   :  { %440 = vmatmul.mubr.f32.gmra.mxu1 %v38_v29  ;;  %1066 = vmatpush3.msra.mxu0 %v159_v30  ;;  %v199_v15 = vld [vmem:[%s2058_s4 + $0x398] sm:$0xff]  ;;  %v150_v19 = vld [vmem:[%s2058_s4 + $0x210] sm:$0xff]  ;;  %v76_v21 = vld [vmem:[%s2059_s0 + $0x1c0] sm:$0xff] }
  0x32   :  { %1121 = vmatprep.subr.mxu1 %v207_v31  ;;  %1067 = vmatprep.subr.mxu0 %v174_v32  ;;  %v183_v17 = vld [vmem:[%s2058_s4 + $0x318] sm:$0xff]  ;;  %v198_v20 = vld [vmem:[%s2058_s4 + $0x390] sm:$0xff]  ;;  %v165_v23 = vld [vmem:[%s2058_s4 + $0x288] sm:$0xff] }
  0x33   :  { %1122 = vmatpush3.msra.mxu1 %v191_v33  ;;  %339 = vmatprep.mubr.f32.mxu0 %v45_v34  ;;  %v79_v22 = vld [vmem:[%s2059_s0 + $0x1d8] sm:$0xff]  ;;  %v182_v24 = vld [vmem:[%s2058_s4 + $0x310] sm:$0xff]  ;;  %v149_v26 = vld [vmem:[%s2058_s4 + $0x208] sm:$0xff] }
  0x34   :  { %1068 = vmatpush3.msra.mxu0 %v158_v35  ;;  %1123 = vmatprep.subr.mxu1 %v206_v36  ;;  %v78_v25 = vld [vmem:[%s2059_s0 + $0x1d0] sm:$0xff]  ;;  %v197_v27 = vld [vmem:[%s2058_s4 + $0x388] sm:$0xff]  ;;  %v164_v28 = vld [vmem:[%s2058_s4 + $0x280] sm:$0xff] }
  0x35   :  { %340 = vmatmul.mubr.f32.gmra.mxu0 %v44_v37  ;;  %444 = vmatprep.mubr.f32.mxu1 %v47_v38  ;;  %v181_v29 = vld [vmem:[%s2058_s4 + $0x308] sm:$0xff]  ;;  %v148_v30 = vld [vmem:[%s2058_s4 + $0x200] sm:$0xff]  ;;  %v27_v35 = vld [vmem:[%s2059_s0 + $0x38] sm:$0xff] }
  0x36   :  { %1069 = vmatprep.subr.mxu0 %v173_v39  ;;  %1124 = vmatpush3.msra.mxu1 %v190_v40  ;;  %v25_v31 = vld [vmem:[%s2059_s0 + $0x28] sm:$0xff]  ;;  %v196_v32 = vld [vmem:[%s2058_s4 + $0x380] sm:$0xff]  ;;  %v26_v37 = vld [vmem:[%s2059_s0 + $0x30] sm:$0xff] }
  0x37   :  { %445 = vmatmul.mubr.f32.gmra.mxu1 %v46_v41  ;;  %1070 = vmatpush3.msra.mxu0 %v157_v42  ;;  %v24_v33 = vld [vmem:[%s2059_s0 + $0x20] sm:$0xff]  ;;  %v33_v36 = vld [vmem:[%s2059_s0 + $0x68] sm:$0xff]  ;;  %v35_v39 = vld [vmem:[%s2059_s0 + $0x78] sm:$0xff] }
  0x38   :  { %1125 = vmatprep.subr.mxu1 %v205_v43  ;;  %1071 = vmatprep.subr.mxu0 %v172_v44  ;;  %v180_v34 = vld [vmem:[%s2058_s4 + $0x300] sm:$0xff]  ;;  %v214_v40 = vld [vmem:[%s2060_s1 + $0x10] sm:$0xff]  ;;  %v41_v42 = vld [vmem:[%s2059_s0 + $0xa8] sm:$0xff] }
  0x39   :  { %1126 = vmatpush3.msra.mxu1 %v189_v45  ;;  %344 = vmatprep.mubr.f32.mxu0 %v53_v46  ;;  %v212_v38 = vld [vmem:[%s2060_s1] sm:$0xff]  ;;  %v34_v43 = vld [vmem:[%s2059_s0 + $0x70] sm:$0xff]  ;;  %v213_v44 = vld [vmem:[%s2060_s1 + $0x8] sm:$0xff] }
  0x3a   :  { %1072 = vmatpush3.msra.mxu0 %v156_v47  ;;  %1127 = vmatprep.subr.mxu1 %v204_v48  ;;  %v32_v41 = vld [vmem:[%s2059_s0 + $0x60] sm:$0xff]  ;;  %v43_v45 = vld [vmem:[%s2059_s0 + $0xb8] sm:$0xff]  ;;  %v49_v48 = vld [vmem:[%s2059_s0 + $0xe8] sm:$0xff] }
  0x3b   :  { %345 = vmatmul.mubr.f32.gmra.mxu0 %v52_v49  ;;  %449 = vmatprep.mubr.f32.mxu1 %v55_v50  ;;  %v215_v46 = vld [vmem:[%s2060_s1 + $0x18] sm:$0xff]  ;;  %v40_v47 = vld [vmem:[%s2059_s0 + $0xa0] sm:$0xff]  ;;  %v42_v49 = vld [vmem:[%s2059_s0 + $0xb0] sm:$0xff] }
  0x3c   :  { %1073 = vmatprep.subr.mxu0 %v171_v51  ;;  %1128 = vmatpush3.msra.mxu1 %v188_v52  ;;  %v216_v50 = vld [vmem:[%s2060_s1 + $0x20] sm:$0xff]  ;;  %v51_v51 = vld [vmem:[%s2059_s0 + $0xf8] sm:$0xff]  ;;  %v217_v52 = vld [vmem:[%s2060_s1 + $0x28] sm:$0xff] }
  0x3d   :  { %450 = vmatmul.mubr.f32.gmra.mxu1 %v54_v53  ;;  %1074 = vmatpush3.msra.mxu0 %v155_v54  ;;  %v48_v53 = vld [vmem:[%s2059_s0 + $0xe0] sm:$0xff]  ;;  %v57_v54 = vld [vmem:[%s2059_s0 + $0x128] sm:$0xff] }
  0x3e   :  { %1129 = vmatprep.subr.mxu1 %v203_v55  ;;  %1075 = vmatprep.subr.mxu0 %v170_v56  ;;  %v50_v55 = vld [vmem:[%s2059_s0 + $0xf0] sm:$0xff] }
  0x3f   :  { %1130 = vmatpush3.msra.mxu1 %v187_v57  ;;  %349 = vmatprep.mubr.f32.mxu0 %v61_v58  ;;  %v218_v56 = vld [vmem:[%s2060_s1 + $0x30] sm:$0xff]  ;;  %v59_v57 = vld [vmem:[%s2059_s0 + $0x138] sm:$0xff] }
  0x40   :  { %1076 = vmatpush3.msra.mxu0 %v154_v59  ;;  %1131 = vmatprep.subr.mxu1 %v202_v60  ;;  %v219_v58 = vld [vmem:[%s2060_s1 + $0x38] sm:$0xff]  ;;  %v56_v59 = vld [vmem:[%s2059_s0 + $0x120] sm:$0xff]  ;;  %v65_v60 = vld [vmem:[%s2059_s0 + $0x168] sm:$0xff] }
  0x41   :  { %350 = vmatmul.mubr.f32.gmra.mxu0 %v60_v61  ;;  %454 = vmatprep.mubr.f32.mxu1 %v63_v62  ;;  %v58_v61 = vld [vmem:[%s2059_s0 + $0x130] sm:$0xff]  ;;  %v67_v62 = vld [vmem:[%s2059_s0 + $0x178] sm:$0xff] }
  0x42   :  { %1077 = vmatprep.subr.mxu0 %v169_v63  ;;  %1132 = vmatpush3.msra.mxu1 %v186_v0  ;;  %v64_v63 = vld [vmem:[%s2059_s0 + $0x160] sm:$0xff]  ;;  %v73_v0 = vld [vmem:[%s2059_s0 + $0x1a8] sm:$0xff] }
  0x43   :  { %455 = vmatmul.mubr.f32.gmra.mxu1 %v62_v1  ;;  %1078 = vmatpush3.msra.mxu0 %v153_v2  ;;  %v66_v1 = vld [vmem:[%s2059_s0 + $0x170] sm:$0xff]  ;;  %v75_v2 = vld [vmem:[%s2059_s0 + $0x1b8] sm:$0xff] }
  0x44   :  { %1133 = vmatprep.subr.mxu1 %v201_v3  ;;  %1079 = vmatprep.subr.mxu0 %v168_v4  ;;  %v72_v3 = vld [vmem:[%s2059_s0 + $0x1a0] sm:$0xff]  ;;  %v81_v4 = vld [vmem:[%s2059_s0 + $0x1e8] sm:$0xff] }
  0x45   :  { %1134 = vmatpush3.msra.mxu1 %v185_v5  ;;  %354 = vmatprep.mubr.f32.mxu0 %v69_v6  ;;  %v74_v5 = vld [vmem:[%s2059_s0 + $0x1b0] sm:$0xff]  ;;  %v83_v6 = vld [vmem:[%s2059_s0 + $0x1f8] sm:$0xff] }
  0x46   :  { %1080 = vmatpush3.msra.mxu0 %v152_v7  ;;  %1135 = vmatprep.subr.mxu1 %v200_v8  ;;  %v80_v7 = vld [vmem:[%s2059_s0 + $0x1e0] sm:$0xff]  ;;  %v82_v8 = vld [vmem:[%s2059_s0 + $0x1f0] sm:$0xff] }
  0x47   :  { %355 = vmatmul.mubr.f32.gmra.mxu0 %v68_v9  ;;  %459 = vmatprep.mubr.f32.mxu1 %v71_v10 }
  0x48   :  { %1081 = vmatprep.subr.mxu0 %v167_v11  ;;  %1136 = vmatpush3.msra.mxu1 %v184_v12 }
  0x49   :  { %460 = vmatmul.mubr.f32.gmra.mxu1 %v70_v13  ;;  %1082 = vmatpush3.msra.mxu0 %v151_v14 }
  0x4a   :  { %1137 = vmatprep.subr.mxu1 %v199_v15  ;;  %1083 = vmatprep.subr.mxu0 %v166_v16 }
  0x4b   :  { %1138 = vmatpush3.msra.mxu1 %v183_v17  ;;  %359 = vmatprep.mubr.f32.mxu0 %v77_v18 }
  0x4c   :  { %1084 = vmatpush3.msra.mxu0 %v150_v19  ;;  %1139 = vmatprep.subr.mxu1 %v198_v20 }
  0x4d   :  { %360 = vmatmul.mubr.f32.gmra.mxu0 %v76_v21  ;;  %464 = vmatprep.mubr.f32.mxu1 %v79_v22 }
  0x4e   :  { %1085 = vmatprep.subr.mxu0 %v165_v23  ;;  %1140 = vmatpush3.msra.mxu1 %v182_v24 }
  0x4f   :  { %465 = vmatmul.mubr.f32.gmra.mxu1 %v78_v25  ;;  %1086 = vmatpush3.msra.mxu0 %v149_v26 }
  0x50   :  { %1141 = vmatprep.subr.mxu1 %v197_v27  ;;  %1087 = vmatprep.subr.mxu0 %v164_v28 }
  0x51   :  { %1142 = vmatpush3.msra.mxu1 %v181_v29  ;;  %1088 = vmatpush3.msra.mxu0 %v148_v30 }
  0x52   :  { %534 = vmatprep.mubr.f32.mxu0 %v25_v31  ;;  %1143 = vmatprep.subr.mxu1 %v196_v32 }
  0x53   :  { %535 = vmatmul.mubr.f32.vlgmr.msra.gmra.mxu0 %v24_v33  ;;  %1144 = vmatpush3.msra.mxu1 %v180_v34 }
  0x54   :  { %639 = vmatprep.mubr.f32.mxu1 %v27_v35  ;;  %539 = vmatprep.mubr.f32.mxu0 %v33_v36 }
  0x55   :  { %640 = vmatmul.mubr.f32.vlgmr.msra.gmra.mxu1 %v26_v37  ;;  %222 = vperm.xlu0 %1170, %v212_v38  }
  0x56   :  { %644 = vmatprep.mubr.f32.mxu1 %v35_v39  ;;  %232 = vperm.xlu1 %1171, %v214_v40  }
  0x57   :  { %540 = vmatmul.mubr.f32.gmra.mxu0 %v32_v41 }
  0x58   :  { %544 = vmatprep.mubr.f32.mxu0 %v41_v42 }
  0x59   :  { %645 = vmatmul.mubr.f32.gmra.mxu1 %v34_v43  ;;  %227 = vperm.xlu0 %1170, %v213_v44  }
  0x5a   :  { %649 = vmatprep.mubr.f32.mxu1 %v43_v45  ;;  %237 = vperm.xlu1 %1171, %v215_v46  }
  0x5b   :  { %545 = vmatmul.mubr.f32.gmra.mxu0 %v40_v47 }
  0x5c   :  { %549 = vmatprep.mubr.f32.mxu0 %v49_v48 }
  0x5d   :  { %650 = vmatmul.mubr.f32.gmra.mxu1 %v42_v49  ;;  %242 = vperm.xlu0 %1170, %v216_v50  }
  0x5e   :  { %654 = vmatprep.mubr.f32.mxu1 %v51_v51  ;;  %247 = vperm.xlu1 %1171, %v217_v52  }
  0x5f   :  { %550 = vmatmul.mubr.f32.gmra.mxu0 %v48_v53 }
  0x60   :  { %554 = vmatprep.mubr.f32.mxu0 %v57_v54 }
  0x61   :  { %655 = vmatmul.mubr.f32.gmra.mxu1 %v50_v55  ;;  %252 = vperm.xlu0 %1170, %v218_v56  }
  0x62   :  { %659 = vmatprep.mubr.f32.mxu1 %v59_v57  ;;  %257 = vperm.xlu1 %1171, %v219_v58  }
  0x63   :  { %555 = vmatmul.mubr.f32.gmra.mxu0 %v56_v59 }
  0x64   :  { %559 = vmatprep.mubr.f32.mxu0 %v65_v60 }
  0x65   :  { %660 = vmatmul.mubr.f32.gmra.mxu1 %v58_v61 }
  0x66   :  { %664 = vmatprep.mubr.f32.mxu1 %v67_v62 }
  0x67   :  { %560 = vmatmul.mubr.f32.gmra.mxu0 %v64_v63 }
  0x68   :  { %564 = vmatprep.mubr.f32.mxu0 %v73_v0 }
  0x69   :  { %665 = vmatmul.mubr.f32.gmra.mxu1 %v66_v1 }
  0x6a   :  { %669 = vmatprep.mubr.f32.mxu1 %v75_v2 }
  0x6b   :  { %565 = vmatmul.mubr.f32.gmra.mxu0 %v72_v3 }
  0x6c   :  { %569 = vmatprep.mubr.f32.mxu0 %v81_v4 }
  0x6d   :  { %670 = vmatmul.mubr.f32.gmra.mxu1 %v74_v5 }
  0x6e   :  { %674 = vmatprep.mubr.f32.mxu1 %v83_v6 }
  0x6f   :  { %570 = vmatmul.mubr.f32.gmra.mxu0 %v80_v7 }
  0x71   :  { %675 = vmatmul.mubr.f32.gmra.mxu1 %v82_v8 }
  0xd0   :  { %v223_v37 = vpop.permute.xlu0 %222 }
  0xd1   :  { %v233_v48 = vpop.permute.xlu1 %232 }
  0xd4   :  { %v228_v45 = vpop.permute.xlu0 %227 }
  0xd5   :  { %v238_v1 = vpop.permute.xlu1 %237 }
  0xe3   :  { %v977_v9 = vpop.f32.mrf.mxu0 }
  0xe5   :  { %v1033_v10 = vpop.f32.mrf.mxu1  ;;  %v978_v11 = vpop.f32.mrf.mxu0 }
  0xe6   :  { %v979_v39 = vadd.f32 %v978_v11, %v977_v9 }
  0xe7   :  { %v1034_v12 = vpop.f32.mrf.mxu1 }
  0xe8   :  { %v327_v43 = vadd.f32 %v979_v39, %v223_v37  ;;  %v1035_v47 = vadd.f32 %v1034_v12, %v1033_v10 }
  0xe9   :  { %v980_v13 = vpop.f32.mrf.mxu0 }
  0xea   :  { %v432_v52 = vadd.f32 %v1035_v47, %v327_v43 }
  0xeb   :  { %v1036_v14 = vpop.f32.mrf.mxu1  ;;  %v981_v15 = vpop.f32.mrf.mxu0 }
  0xec   :  { %v982_v44 = vadd.f32 %v981_v15, %v980_v13 }
  0xed   :  { %v1037_v16 = vpop.f32.mrf.mxu1 }
  0xee   :  { %v332_v53 = vadd.f32 %v982_v44, %v228_v45  ;;  %v1038_v57 = vadd.f32 %v1037_v16, %v1036_v14  ;;  %v243_v14 = vpop.permute.xlu0 %242 }
  0xef   :  { %v983_v17 = vpop.f32.mrf.mxu0 }
  0xf0   :  { %v437_v63 = vadd.f32 %v1038_v57, %v332_v53 }
  0xf1   :  { %v1039_v18 = vpop.f32.mrf.mxu1  ;;  %v984_v19 = vpop.f32.mrf.mxu0 }
  0xf2   :  { %v985_v49 = vadd.f32 %v984_v19, %v983_v17 }
  0xf3   :  { %v1040_v20 = vpop.f32.mrf.mxu1 }
  0xf4   :  { %v337_v60 = vadd.f32 %v985_v49, %v233_v48  ;;  %v1041_v4 = vadd.f32 %v1040_v20, %v1039_v18 }
  0xf5   :  { %v986_v21 = vpop.f32.mrf.mxu0 }
  0xf6   :  { %v442_v9 = vadd.f32 %v1041_v4, %v337_v60 }
  0xf7   :  { %v1819_v22 = vpop.f32.mrf.mxu1  ;;  %v987_v23 = vpop.f32.mrf.mxu0 }
  0xf8   :  { %v988_v0 = vadd.f32 %v987_v23, %v986_v21 }
  0xf9   :  { %v1043_v24 = vpop.f32.mrf.mxu1 }
  0xfa   :  { %v342_v12 = vadd.f32 %v988_v0, %v238_v1  ;;  %v1044_v18 = vadd.f32 %v1043_v24, %v1819_v22 }
  0xfb   :  { %v989_v25 = vpop.f32.mrf.mxu0 }
  0xfc   :  { %v447_v43 = vadd.f32 %v1044_v18, %v342_v12 }
  0xfd   :  { %v1821_v26 = vpop.f32.mrf.mxu1  ;;  %v990_v27 = vpop.f32.mrf.mxu0 }
  0xfe   :  { %v991_v13 = vadd.f32 %v990_v27, %v989_v25  ;;  %v248_v25 = vpop.permute.xlu1 %247 }
  0xff   :  { %v1823_v28 = vpop.f32.mrf.mxu1 }
 0x100   :  { %v347_v44 = vadd.f32 %v991_v13, %v243_v14  ;;  %v1047_v24 = vadd.f32 %v1823_v28, %v1821_v26 }
 0x101   :  { %v992_v29 = vpop.f32.mrf.mxu0 }
 0x103   :  { %v1825_v30 = vpop.f32.mrf.mxu1  ;;  %v993_v31 = vpop.f32.mrf.mxu0 }
 0x104   :  { %v994_v23 = vadd.f32 %v993_v31, %v992_v29 }
 0x105   :  { %v1827_v32 = vpop.f32.mrf.mxu1 }
 0x106   :  { %v352_v49 = vadd.f32 %v994_v23, %v248_v25 }
 0x107   :  { %v1829_v33 = vpop.f32.mrf.mxu0 }
 0x109   :  { %v1831_v34 = vpop.f32.mrf.mxu1  ;;  %v1833_v35 = vpop.f32.mrf.mxu0 }
 0x10a   :  { %v997_v53 = vadd.f32 %v1833_v35, %v1829_v33 }
 0x10b   :  { %v1835_v36 = vpop.f32.mrf.mxu1 }
 0x10d   :  { %v1837_v38 = vpop.f32.mrf.mxu0 }
 0x10f   :  { %v1839_v40 = vpop.f32.mrf.mxu1  ;;  %v1841_v41 = vpop.f32.mrf.mxu0 }
 0x111   :  { %v1843_v42 = vpop.f32.mrf.mxu1 }
 0x113   :  { %v1089_v46 = vpop.f32.mrf.mxu0 }
 0x115   :  { %v1145_v50 = vpop.f32.mrf.mxu1  ;;  %v1090_v51 = vpop.f32.mrf.mxu0 }
 0x116   :  { %v1091_v54 = vadd.f32 %v1090_v51, %v1089_v46 }
 0x117   :  { %v1146_v55 = vpop.f32.mrf.mxu1  ;;  %v1092_v56 = vpop.f32.mrf.mxu0 }
 0x118   :  { %v537_v58 = vadd.f32 %v1091_v54, %v432_v52  ;;  %v1147_v59 = vadd.f32 %v1146_v55, %v1145_v50  ;;  %v452_v52 = vadd.f32 %v1047_v24, %v347_v44  ;;  %v253_v54 = vpop.permute.xlu0 %252  ;;  %v1050_v55 = vadd.f32 %v1827_v32, %v1825_v30 }
 0x119   :  { %v1148_v61 = vpop.f32.mrf.mxu1  ;;  %v1093_v62 = vpop.f32.mrf.mxu0  ;;  %v357_v32 = vadd.f32 %v997_v53, %v253_v54 }
 0x11a   :  { %v642_v2 = vadd.f32 %v1147_v59, %v537_v58  ;;  %v1094_v3 = vadd.f32 %v1093_v62, %v1092_v56  ;;  %v457_v60 = vadd.f32 %v1050_v55, %v352_v49  ;;  %v1000_v62 = vadd.f32 %v1841_v41, %v1837_v38 }
 0x11b   :  { %v1149_v5 = vpop.f32.mrf.mxu1  ;;  %v1095_v6 = vpop.f32.mrf.mxu0 }
 0x11c   :  { %681 = vst.msk [vmem:[%s2061_s5] sm:$0xff] %vm680_vm0, %v642_v2  ;;  %v542_v7 = vadd.f32 %v1094_v3, %v437_v63  ;;  %v1150_v8 = vadd.f32 %v1149_v5, %v1148_v61  ;;  %v258_v63 = vpop.permute.xlu1 %257  ;;  %v1053_v5 = vadd.f32 %v1835_v36, %v1831_v34  ;;  %v1056_v36 = vadd.f32 %v1843_v42, %v1839_v40 }
 0x11d   :  { %v1151_v10 = vpop.f32.mrf.mxu1  ;;  %v1096_v11 = vpop.f32.mrf.mxu0 }
 0x11e   :  { %v647_v15 = vadd.f32 %v1150_v8, %v542_v7  ;;  %v1097_v16 = vadd.f32 %v1096_v11, %v1095_v6 }
 0x11f   :  { %v1152_v17 = vpop.f32.mrf.mxu1  ;;  %v1098_v19 = vpop.f32.mrf.mxu0 }
 0x120   :  { %682 = vst.msk [vmem:[%s2061_s5 + $0x8] sm:$0xff] %vm680_vm0, %v647_v15  ;;  %v547_v20 = vadd.f32 %v1097_v16, %v442_v9  ;;  %v1153_v21 = vadd.f32 %v1152_v17, %v1151_v10  ;;  %v462_v9 = vadd.f32 %v1053_v5, %v357_v32  ;;  %v362_v10 = vadd.f32 %v1000_v62, %v258_v63 }
 0x121   :  { %v1154_v37 = vpop.f32.mrf.mxu1  ;;  %v1099_v39 = vpop.f32.mrf.mxu0 }
 0x122   :  { %v652_v27 = vadd.f32 %v1153_v21, %v547_v20  ;;  %v1100_v45 = vadd.f32 %v1099_v39, %v1098_v19  ;;  %v467_v20 = vadd.f32 %v1056_v36, %v362_v10  ;;  %v861_v36 = vld [vmem:[%s2062_s3] sm:$0xff] }
 0x123   :  { %v1155_v46 = vpop.f32.mrf.mxu1  ;;  %v1101_v47 = vpop.f32.mrf.mxu0  ;;  %v1857_v22 = vld [vmem:[%s2061_s5] sm:$0xff] }
 0x124   :  { %683 = vst.msk [vmem:[%s2061_s5 + $0x10] sm:$0xff] %vm680_vm0, %v652_v27  ;;  %v552_v29 = vadd.f32 %v1100_v45, %v447_v43  ;;  %v1156_v31 = vadd.f32 %v1155_v46, %v1154_v37  ;;  %v701_v48 = vsel %vm680_vm0, %v1857_v22, 0.0 }
 0x125   :  { %v1157_v50 = vpop.f32.mrf.mxu1  ;;  %v1102_v51 = vpop.f32.mrf.mxu0  ;;  %702 = vadd.xlane.f32.xlu0 %v701_v48 }
 0x126   :  { %v657_v26 = vadd.f32 %v1156_v31, %v552_v29  ;;  %v1103_v28 = vadd.f32 %v1102_v51, %v1101_v47 }
 0x127   :  { %v1158_v56 = vpop.f32.mrf.mxu1  ;;  %v1104_v57 = vpop.f32.mrf.mxu0  ;;  %v1874_v58 = vld [vmem:[%s2061_s5 + $0x8] sm:$0xff] }
 0x128   :  { %684 = vst.msk [vmem:[%s2061_s5 + $0x18] sm:$0xff] %vm680_vm0, %v657_v26  ;;  %v557_v59 = vadd.f32 %v1103_v28, %v452_v52  ;;  %v1159_v33 = vadd.f32 %v1158_v56, %v1157_v50  ;;  %v704_v35 = vsel %vm680_vm0, %v1874_v58, 0.0 }
 0x129   :  { %v1160_v61 = vpop.f32.mrf.mxu1  ;;  %v1105_v30 = vpop.f32.mrf.mxu0  ;;  %705 = vadd.xlane.f32.xlu1 %v704_v35 }
 0x12a   :  { %v662_v0 = vadd.f32 %v1159_v33, %v557_v59  ;;  %v1106_v1 = vadd.f32 %v1105_v30, %v1104_v57 }
 0x12b   :  { %v1161_v2 = vpop.f32.mrf.mxu1  ;;  %v1107_v3 = vpop.f32.mrf.mxu0  ;;  %v695_v4 = vld [vmem:[%s2061_s5 + $0x10] sm:$0xff] }
 0x12c   :  { %685 = vst.msk [vmem:[%s2061_s5 + $0x20] sm:$0xff] %vm680_vm0, %v662_v0  ;;  %v562_v6 = vadd.f32 %v1106_v1, %v457_v60  ;;  %v1162_v7 = vadd.f32 %v1161_v2, %v1160_v61  ;;  %v707_v38 = vsel %vm680_vm0, %v695_v4, 0.0 }
 0x12d   :  { %v1163_v41 = vpop.f32.mrf.mxu1  ;;  %v1108_v8 = vpop.f32.mrf.mxu0  ;;  %708 = vadd.xlane.f32.xlu0 %v707_v38 }
 0x12e   :  { %v667_v11 = vadd.f32 %v1162_v7, %v562_v6  ;;  %v1109_v12 = vadd.f32 %v1108_v8, %v1107_v3 }
 0x12f   :  { %v1164_v13 = vpop.f32.mrf.mxu1  ;;  %v1110_v14 = vpop.f32.mrf.mxu0  ;;  %v696_v34 = vld [vmem:[%s2061_s5 + $0x18] sm:$0xff] }
 0x130   :  { %686 = vst.msk [vmem:[%s2061_s5 + $0x28] sm:$0xff] %vm680_vm0, %v667_v11  ;;  %v567_v15 = vadd.f32 %v1109_v12, %v462_v9  ;;  %v1165_v16 = vadd.f32 %v1164_v13, %v1163_v41  ;;  %v710_v17 = vsel %vm680_vm0, %v696_v34, 0.0  ;;  %v862_v13 = vld [vmem:[%s2062_s3 + $0x8] sm:$0xff] }
 0x131   :  { %v1166_v19 = vpop.f32.mrf.mxu1  ;;  %v1111_v18 = vpop.f32.mrf.mxu0  ;;  %711 = vadd.xlane.f32.xlu0 %v710_v17 }
 0x132   :  { %v672_v21 = vadd.f32 %v1165_v16, %v567_v15  ;;  %v1112_v23 = vadd.f32 %v1111_v18, %v1110_v14  ;;  %v864_v14 = vld [vmem:[%s2062_s3 + $0x18] sm:$0xff]  ;;  %v863_v15 = vld [vmem:[%s2062_s3 + $0x10] sm:$0xff]  ;;  %v865_v16 = vld [vmem:[%s2062_s3 + $0x20] sm:$0xff] }
 0x133   :  { %v1167_v37 = vpop.f32.mrf.mxu1  ;;  %v697_v40 = vld [vmem:[%s2061_s5 + $0x20] sm:$0xff] }
 0x134   :  { %687 = vst.msk [vmem:[%s2061_s5 + $0x30] sm:$0xff] %vm680_vm0, %v672_v21  ;;  %v572_v42 = vadd.f32 %v1112_v23, %v467_v20  ;;  %v1168_v39 = vadd.f32 %v1167_v37, %v1166_v19  ;;  %v713_v43 = vsel %vm680_vm0, %v697_v40, 0.0 }
 0x135   :  { %714 = vadd.xlane.f32.xlu1 %v713_v43 }
 0x136   :  { %v677_v44 = vadd.f32 %v1168_v39, %v572_v42 }
 0x137   :  { %v698_v25 = vld [vmem:[%s2061_s5 + $0x28] sm:$0xff] }
 0x138   :  { %688 = vst.msk [vmem:[%s2061_s5 + $0x38] sm:$0xff] %vm680_vm0, %v677_v44  ;;  %v716_v27 = vsel %vm680_vm0, %v698_v25, 0.0 }
 0x139   :  { %717 = vadd.xlane.f32.xlu0 %v716_v27  ;;  %v781_v27 = vld [vmem:[%s2063_s2] sm:$0xff] }
 0x13b   :  { %v699_v45 = vld [vmem:[%s2061_s5 + $0x30] sm:$0xff] }
 0x13c   :  { %v719_v46 = vsel %vm680_vm0, %v699_v45, 0.0 }
 0x13d   :  { %720 = vadd.xlane.f32.xlu1 %v719_v46 }
 0x13f   :  { %v700_v47 = vld [vmem:[%s2061_s5 + $0x38] sm:$0xff] }
 0x140   :  { %v722_v24 = vsel %vm680_vm0, %v700_v47, 0.0 }
 0x141   :  { %723 = vadd.xlane.f32.xlu0 %v722_v24 }
 0x1ae   :  { %v703_v29 = vpop.xlane.xlu0 %702 }
 0x1af   :  { %v725_v31 = vmul.f32 0.015625, %v703_v29 }
 0x1b1   :  { %v1929_v48 = vsub.f32 %v1857_v22, %v725_v31  ;;  %v782_v31 = vld [vmem:[%s2063_s2 + $0x8] sm:$0xff] }
 0x1b2   :  { %v706_v49 = vpop.xlane.xlu1 %705 }
 0x1b3   :  { %v726_v50 = vmul.f32 0.015625, %v706_v49  ;;  %v741_v51 = vmul.f32 %v1929_v48, %v1929_v48 }
 0x1b5   :  { %v1934_v52 = vsub.f32 %v1874_v58, %v726_v50  ;;  %v749_v53 = vsel %vm680_vm0, %v741_v51, 0.0 }
 0x1b6   :  { %750 = vadd.xlane.f32.xlu1 %v749_v53  ;;  %v709_v54 = vpop.xlane.xlu0 %708 }
 0x1b7   :  { %v727_v26 = vmul.f32 0.015625, %v709_v54  ;;  %v742_v28 = vmul.f32 %v1934_v52, %v1934_v52 }
 0x1b9   :  { %v1939_v55 = vsub.f32 %v695_v4, %v727_v26  ;;  %v752_v22 = vsel %vm680_vm0, %v742_v28, 0.0  ;;  %v783_v26 = vld [vmem:[%s2063_s2 + $0x10] sm:$0xff] }
 0x1ba   :  { %753 = vadd.xlane.f32.xlu0 %v752_v22  ;;  %v712_v56 = vpop.xlane.xlu0 %711 }
 0x1bb   :  { %v728_v57 = vmul.f32 0.015625, %v712_v56  ;;  %v743_v59 = vmul.f32 %v1939_v55, %v1939_v55 }
 0x1bd   :  { %v1944_v58 = vsub.f32 %v696_v34, %v728_v57  ;;  %v755_v33 = vsel %vm680_vm0, %v743_v59, 0.0  ;;  %v866_v34 = vld [vmem:[%s2062_s3 + $0x28] sm:$0xff] }
 0x1be   :  { %v715_v35 = vpop.xlane.xlu1 %714  ;;  %756 = vadd.xlane.f32.xlu1 %v755_v33  ;;  %v784_v33 = vld [vmem:[%s2063_s2 + $0x18] sm:$0xff] }
 0x1bf   :  { %v729_v60 = vmul.f32 0.015625, %v715_v35  ;;  %v744_v61 = vmul.f32 %v1944_v58, %v1944_v58 }
 0x1c1   :  { %v1949_v30 = vsub.f32 %v697_v40, %v729_v60  ;;  %v758_v32 = vsel %vm680_vm0, %v744_v61, 0.0 }
 0x1c2   :  { %759 = vadd.xlane.f32.xlu0 %v758_v32  ;;  %v718_v62 = vpop.xlane.xlu0 %717 }
 0x1c3   :  { %v730_v63 = vmul.f32 0.015625, %v718_v62  ;;  %v745_v0 = vmul.f32 %v1949_v30, %v1949_v30  ;;  %v785_v62 = vld [vmem:[%s2063_s2 + $0x20] sm:$0xff] }
 0x1c5   :  { %v1954_v1 = vsub.f32 %v698_v25, %v730_v63  ;;  %v761_v2 = vsel %vm680_vm0, %v745_v0, 0.0 }
 0x1c6   :  { %v721_v3 = vpop.xlane.xlu1 %720  ;;  %762 = vadd.xlane.f32.xlu1 %v761_v2  ;;  %v786_v2 = vld [vmem:[%s2063_s2 + $0x28] sm:$0xff] }
 0x1c7   :  { %v731_v4 = vmul.f32 0.015625, %v721_v3  ;;  %v746_v5 = vmul.f32 %v1954_v1, %v1954_v1 }
 0x1c9   :  { %v1959_v6 = vsub.f32 %v699_v45, %v731_v4  ;;  %v764_v7 = vsel %vm680_vm0, %v746_v5, 0.0  ;;  %v787_v5 = vld [vmem:[%s2063_s2 + $0x30] sm:$0xff] }
 0x1ca   :  { %765 = vadd.xlane.f32.xlu0 %v764_v7  ;;  %v724_v38 = vpop.xlane.xlu0 %723 }
 0x1cb   :  { %v732_v41 = vmul.f32 0.015625, %v724_v38  ;;  %v747_v8 = vmul.f32 %v1959_v6, %v1959_v6 }
 0x1cd   :  { %v1964_v9 = vsub.f32 %v700_v47, %v732_v41  ;;  %v767_v10 = vsel %vm680_vm0, %v747_v8, 0.0  ;;  %v788_v41 = vld [vmem:[%s2063_s2 + $0x38] sm:$0xff] }
 0x1ce   :  { %768 = vadd.xlane.f32.xlu1 %v767_v10  ;;  %v867_v10 = vld [vmem:[%s2062_s3 + $0x30] sm:$0xff] }
 0x1cf   :  { %v748_v11 = vmul.f32 %v1964_v9, %v1964_v9 }
 0x1d1   :  { %v770_v12 = vsel %vm680_vm0, %v748_v11, 0.0 }
 0x1d2   :  { %771 = vadd.xlane.f32.xlu0 %v770_v12  ;;  %v868_v12 = vld [vmem:[%s2062_s3 + $0x38] sm:$0xff] }
 0x1df   :  { %876 = vperm.xlu1 %1171, %v862_v13  }
 0x1e3   :  { %886 = vperm.xlu1 %1171, %v864_v14  }
 0x1e7   :  { %896 = vperm.xlu1 %1171, %v866_v34  }
 0x1e8   :  { %871 = vperm.xlu0 %1170, %v861_v36  }
 0x1ec   :  { %881 = vperm.xlu0 %1170, %v863_v15  }
 0x1f0   :  { %891 = vperm.xlu0 %1170, %v865_v16  }
 0x23f   :  { %v751_v17 = vpop.xlane.xlu1 %750 }
 0x240   :  { %v773_v19 = vmul.f32 0.015625, %v751_v17 }
 0x242   :  { %v789_v18 = vadd.f32 1e-05, %v773_v19 }
 0x243   :  { %v754_v20 = vpop.xlane.xlu0 %753 }
 0x244   :  { %1172 = vrsqrt.f32 %v789_v18  ;;  %v774_v21 = vmul.f32 0.015625, %v754_v20 }
 0x246   :  { %v790_v23 = vadd.f32 1e-05, %v774_v21 }
 0x247   :  { %v757_v37 = vpop.xlane.xlu1 %756 }
 0x248   :  { %1174 = vrsqrt.f32 %v790_v23  ;;  %v775_v40 = vmul.f32 0.015625, %v757_v37 }
 0x24a   :  { %v791_v42 = vadd.f32 1e-05, %v775_v40 }
 0x24b   :  { %v760_v39 = vpop.xlane.xlu0 %759 }
 0x24c   :  { %1176 = vrsqrt.f32 %v791_v42  ;;  %v776_v43 = vmul.f32 0.015625, %v760_v39 }
 0x24e   :  { %v792_v44 = vadd.f32 1e-05, %v776_v43 }
 0x24f   :  { %v763_v25 = vpop.xlane.xlu1 %762 }
 0x250   :  { %1178 = vrsqrt.f32 %v792_v44  ;;  %v777_v45 = vmul.f32 0.015625, %v763_v25 }
 0x251   :  { %v1173_v46 = vpop.eup %1172 }
 0x252   :  { %v793_v47 = vadd.f32 1e-05, %v777_v45  ;;  %v805_v24 = vmul.f32 %v1173_v46, %v781_v27 }
 0x253   :  { %v766_v29 = vpop.xlane.xlu0 %765 }
 0x254   :  { %1180 = vrsqrt.f32 %v793_v47  ;;  %v778_v49 = vmul.f32 0.015625, %v766_v29  ;;  %815 = vperm.xlu1 %1171, %v805_v24  }
 0x255   :  { %v1175_v50 = vpop.eup %1174 }
 0x256   :  { %v794_v51 = vadd.f32 1e-05, %v778_v49  ;;  %v806_v53 = vmul.f32 %v1175_v50, %v782_v31 }
 0x257   :  { %v769_v54 = vpop.xlane.xlu1 %768 }
 0x258   :  { %1182 = vrsqrt.f32 %v794_v51  ;;  %v779_v28 = vmul.f32 0.015625, %v769_v54  ;;  %820 = vperm.xlu0 %1170, %v806_v53  }
 0x259   :  { %v1177_v22 = vpop.eup %1176 }
 0x25a   :  { %v795_v56 = vadd.f32 1e-05, %v779_v28  ;;  %v807_v57 = vmul.f32 %v1177_v22, %v783_v26 }
 0x25b   :  { %v772_v59 = vpop.xlane.xlu0 %771  ;;  %v877_v13 = vpop.permute.xlu1 %876 }
 0x25c   :  { %1184 = vrsqrt.f32 %v795_v56  ;;  %v780_v35 = vmul.f32 0.015625, %v772_v59  ;;  %825 = vperm.xlu1 %1171, %v807_v57  }
 0x25d   :  { %v1179_v60 = vpop.eup %1178 }
 0x25e   :  { %v796_v61 = vadd.f32 1e-05, %v780_v35  ;;  %v808_v32 = vmul.f32 %v1179_v60, %v784_v33 }
 0x25f   :  { %v887_v34 = vpop.permute.xlu1 %886 }
 0x260   :  { %1186 = vrsqrt.f32 %v796_v61  ;;  %830 = vperm.xlu1 %1171, %v808_v32  }
 0x261   :  { %v1181_v63 = vpop.eup %1180 }
 0x262   :  { %v809_v0 = vmul.f32 %v1181_v63, %v785_v62 }
 0x263   :  { %v872_v14 = vpop.permute.xlu0 %871  ;;  %v897_v15 = vpop.permute.xlu1 %896 }
 0x264   :  { %835 = vperm.xlu0 %1170, %v809_v0  }
 0x265   :  { %v1183_v3 = vpop.eup %1182 }
 0x266   :  { %v810_v4 = vmul.f32 %v1183_v3, %v786_v2 }
 0x267   :  { %v882_v36 = vpop.permute.xlu0 %881 }
 0x268   :  { %840 = vperm.xlu1 %1171, %v810_v4  }
 0x269   :  { %v1185_v7 = vpop.eup %1184 }
 0x26a   :  { %v811_v38 = vmul.f32 %v1185_v7, %v787_v5 }
 0x26b   :  { %v892_v16 = vpop.permute.xlu0 %891 }
 0x26c   :  { %845 = vperm.xlu0 %1170, %v811_v38  }
 0x26d   :  { %v1187_v8 = vpop.eup %1186 }
 0x26e   :  { %v812_v11 = vmul.f32 %v1187_v8, %v788_v41 }
 0x270   :  { %901 = vperm.xlu0 %1170, %v867_v10   ;;  %850 = vperm.xlu1 %1171, %v812_v11  }
 0x274   :  { %906 = vperm.xlu1 %1171, %v868_v12  }
 0x2cf   :  { %v816_v17 = vpop.permute.xlu1 %815 }
 0x2d0   :  { %v853_v19 = vmul.f32 %v816_v17, %v1929_v48 }
 0x2d2   :  { %v909_v18 = vadd.f32 %v872_v14, %v853_v19 }
 0x2d3   :  { %v821_v20 = vpop.permute.xlu0 %820 }
 0x2d4   :  { %v917_v21 = vmul.f32 0.2, %v909_v18  ;;  %v854_v23 = vmul.f32 %v821_v20, %v1934_v52 }
 0x2d6   :  { %v925_v37 = vmax.f32 %v909_v18, %v917_v21  ;;  %v910_v40 = vadd.f32 %v877_v13, %v854_v23 }
 0x2d7   :  { %v826_v42 = vpop.permute.xlu1 %825 }
 0x2d8   :  { %933 = vst.msk [vmem:[%s2061_s5] sm:$0xff] %vm680_vm0, %v925_v37  ;;  %v918_v39 = vmul.f32 0.2, %v910_v40  ;;  %v855_v43 = vmul.f32 %v826_v42, %v1939_v55 }
 0x2da   :  { %v926_v44 = vmax.f32 %v910_v40, %v918_v39  ;;  %v911_v25 = vadd.f32 %v882_v36, %v855_v43 }
 0x2db   :  { %v831_v27 = vpop.permute.xlu1 %830 }
 0x2dc   :  { %934 = vst.msk [vmem:[%s2061_s5 + $0x8] sm:$0xff] %vm680_vm0, %v926_v44  ;;  %v919_v48 = vmul.f32 0.2, %v911_v25  ;;  %v856_v52 = vmul.f32 %v831_v27, %v1944_v58 }
 0x2de   :  { %v927_v45 = vmax.f32 %v911_v25, %v919_v48  ;;  %v912_v46 = vadd.f32 %v887_v34, %v856_v52 }
 0x2df   :  { %v836_v47 = vpop.permute.xlu0 %835 }
 0x2e0   :  { %935 = vst.msk [vmem:[%s2061_s5 + $0x10] sm:$0xff] %vm680_vm0, %v927_v45  ;;  %v920_v55 = vmul.f32 0.2, %v912_v46  ;;  %v857_v24 = vmul.f32 %v836_v47, %v1949_v30 }
 0x2e2   :  { %v928_v29 = vmax.f32 %v912_v46, %v920_v55  ;;  %v913_v31 = vadd.f32 %v892_v16, %v857_v24 }
 0x2e3   :  { %v841_v49 = vpop.permute.xlu1 %840 }
 0x2e4   :  { %936 = vst.msk [vmem:[%s2061_s5 + $0x18] sm:$0xff] %vm680_vm0, %v928_v29  ;;  %v921_v58 = vmul.f32 0.2, %v913_v31  ;;  %v858_v50 = vmul.f32 %v841_v49, %v1954_v1 }
 0x2e6   :  { %v929_v51 = vmax.f32 %v913_v31, %v921_v58  ;;  %v914_v53 = vadd.f32 %v897_v15, %v858_v50 }
 0x2e7   :  { %v846_v54 = vpop.permute.xlu0 %845 }
 0x2e8   :  { %937 = vst.msk [vmem:[%s2061_s5 + $0x20] sm:$0xff] %vm680_vm0, %v929_v51  ;;  %v922_v30 = vmul.f32 0.2, %v914_v53  ;;  %v859_v28 = vmul.f32 %v846_v54, %v1959_v6 }
 0x2ea   :  { %v930_v26 = vmax.f32 %v914_v53, %v922_v30 }
 0x2eb   :  { %v851_v22 = vpop.permute.xlu1 %850  ;;  %v902_v56 = vpop.permute.xlu0 %901 }
 0x2ec   :  { %938 = vst.msk [vmem:[%s2061_s5 + $0x28] sm:$0xff] %vm680_vm0, %v930_v26  ;;  %v915_v1 = vadd.f32 %v902_v56, %v859_v28  ;;  %v860_v57 = vmul.f32 %v851_v22, %v1964_v9 }
 0x2ee   :  { %v923_v59 = vmul.f32 0.2, %v915_v1 }
 0x2ef   :  { %v907_v33 = vpop.permute.xlu1 %906 }
 0x2f0   :  { %v931_v35 = vmax.f32 %v915_v1, %v923_v59  ;;  %v916_v60 = vadd.f32 %v907_v33, %v860_v57 }
 0x2f2   :  { %939 = vst.msk [vmem:[%s2061_s5 + $0x30] sm:$0xff] %vm680_vm0, %v931_v35  ;;  %v924_v6 = vmul.f32 0.2, %v916_v60 }
 0x2f4   :  { %v932_v61 = vmax.f32 %v916_v60, %v924_v6 }
 0x2f6   :  { %940 = vst.msk [vmem:[%s2061_s5 + $0x38] sm:$0xff] %vm680_vm0, %v932_v61 }

// kernel: discriminator_r_forward.11
= control target key start
LH: loop header
LB: loop body
LE: loop exit
PB: predicated region body
PF: predicated region fallthrough
CT: control target
= control target key end

     0   :  { %s2104_s0 = inlined_call_operand.vmem [shape: f32[64,1024], index: 0, kind: input, shape index: {}]   ;;  %s2105_s1 = inlined_call_operand.vmem [shape: f32[64,1], index: 1, kind: input, shape index: {}]   ;;  %s2106_s2 = inlined_call_operand.vmem [shape: f32[64,1], index: 2, kind: input, shape index: {}]   ;;  %s2107_s3 = inlined_call_operand.vmem [shape: f32[64,1], index: 3, kind: input, shape index: {}]   ;;  %s2108_s4 = inlined_call_operand.vmem [shape: f32[64,16], index: 4, kind: input, shape index: {}]   ;;  %s2109_s5 = inlined_call_operand.<no memory space> [shape: f32[1,1], index: 5, kind: input, shape index: {}]   ;;  %s2110_s6 = inlined_call_operand.vmem [shape: f32[1024,16], index: 6, kind: input, shape index: {}]   ;;  %s2111_s7 = inlined_call_operand.hbm [shape: f32[1,1], index: 7, kind: output, shape index: {}]  }
   0x1   :  { %v12_v0 = vstv %s2109_s5 }
   0x2   :  { %13 = vst [vmem:[#allocation2] sm:$0x1] %v12_v0 }
   0x3   :  { %v124_v1 = vld [vmem:[%s2110_s6 + $0xf8] sm:$0xff]  ;;  %v123_v4 = vld [vmem:[%s2110_s6 + $0xf0] sm:$0xff]  ;;  %v122_v8 = vld [vmem:[%s2110_s6 + $0xe8] sm:$0xff] }
   0x4   :  { %v108_v2 = vld [vmem:[%s2110_s6 + $0x78] sm:$0xff]  ;;  %997 = vmatprep.subr.mxu0 %v124_v1  ;;  %v107_v6 = vld [vmem:[%s2110_s6 + $0x70] sm:$0xff]  ;;  %v106_v10 = vld [vmem:[%s2110_s6 + $0x68] sm:$0xff] }
   0x5   :  { %v156_v3 = vld [vmem:[%s2110_s6 + $0x1f8] sm:$0xff]  ;;  %998 = vmatpush3.msra.mxu0 %v108_v2  ;;  %v155_v7 = vld [vmem:[%s2110_s6 + $0x1f0] sm:$0xff]  ;;  %v154_v11 = vld [vmem:[%s2110_s6 + $0x1e8] sm:$0xff] }
   0x6   :  { %1053 = vmatprep.subr.mxu1 %v156_v3  ;;  %v140_v5 = vld [vmem:[%s2110_s6 + $0x178] sm:$0xff]  ;;  %v139_v9 = vld [vmem:[%s2110_s6 + $0x170] sm:$0xff]  ;;  %999 = vmatprep.subr.mxu0 %v123_v4  ;;  %v121_v12 = vld [vmem:[%s2110_s6 + $0xe0] sm:$0xff] }
   0x7   :  { %1054 = vmatpush3.msra.mxu1 %v140_v5  ;;  %1000 = vmatpush3.msra.mxu0 %v107_v6  ;;  %v138_v13 = vld [vmem:[%s2110_s6 + $0x168] sm:$0xff]  ;;  %v153_v14 = vld [vmem:[%s2110_s6 + $0x1e0] sm:$0xff]  ;;  %v120_v17 = vld [vmem:[%s2110_s6 + $0xd8] sm:$0xff] }
   0x8   :  { %1055 = vmatprep.subr.mxu1 %v155_v7  ;;  %1001 = vmatprep.subr.mxu0 %v122_v8  ;;  %v105_v15 = vld [vmem:[%s2110_s6 + $0x60] sm:$0xff]  ;;  %v152_v18 = vld [vmem:[%s2110_s6 + $0x1d8] sm:$0xff]  ;;  %v119_v21 = vld [vmem:[%s2110_s6 + $0xd0] sm:$0xff] }
   0x9   :  { %1056 = vmatpush3.msra.mxu1 %v139_v9  ;;  %v137_v16 = vld [vmem:[%s2110_s6 + $0x160] sm:$0xff]  ;;  %1002 = vmatpush3.msra.mxu0 %v106_v10  ;;  %v104_v19 = vld [vmem:[%s2110_s6 + $0x58] sm:$0xff]  ;;  %v151_v22 = vld [vmem:[%s2110_s6 + $0x1d0] sm:$0xff] }
   0xa   :  { %1057 = vmatprep.subr.mxu1 %v154_v11  ;;  %1003 = vmatprep.subr.mxu0 %v121_v12  ;;  %v136_v20 = vld [vmem:[%s2110_s6 + $0x158] sm:$0xff]  ;;  %v103_v23 = vld [vmem:[%s2110_s6 + $0x50] sm:$0xff]  ;;  %v118_v25 = vld [vmem:[%s2110_s6 + $0xc8] sm:$0xff] }
   0xb   :  { %1058 = vmatpush3.msra.mxu1 %v138_v13  ;;  %1004 = vmatpush3.msra.mxu0 %v105_v15  ;;  %v135_v24 = vld [vmem:[%s2110_s6 + $0x150] sm:$0xff]  ;;  %v150_v26 = vld [vmem:[%s2110_s6 + $0x1c8] sm:$0xff]  ;;  %v117_v29 = vld [vmem:[%s2110_s6 + $0xc0] sm:$0xff] }
   0xc   :  { %1059 = vmatprep.subr.mxu1 %v153_v14  ;;  %1005 = vmatprep.subr.mxu0 %v120_v17  ;;  %v102_v27 = vld [vmem:[%s2110_s6 + $0x48] sm:$0xff]  ;;  %v149_v30 = vld [vmem:[%s2110_s6 + $0x1c0] sm:$0xff]  ;;  %v116_v33 = vld [vmem:[%s2110_s6 + $0xb8] sm:$0xff] }
   0xd   :  { %1060 = vmatpush3.msra.mxu1 %v137_v16  ;;  %1006 = vmatpush3.msra.mxu0 %v104_v19  ;;  %v134_v28 = vld [vmem:[%s2110_s6 + $0x148] sm:$0xff]  ;;  %v101_v31 = vld [vmem:[%s2110_s6 + $0x40] sm:$0xff]  ;;  %v148_v34 = vld [vmem:[%s2110_s6 + $0x1b8] sm:$0xff] }
   0xe   :  { %1061 = vmatprep.subr.mxu1 %v152_v18  ;;  %1007 = vmatprep.subr.mxu0 %v119_v21  ;;  %v133_v32 = vld [vmem:[%s2110_s6 + $0x140] sm:$0xff]  ;;  %v100_v35 = vld [vmem:[%s2110_s6 + $0x38] sm:$0xff]  ;;  %v115_v37 = vld [vmem:[%s2110_s6 + $0xb0] sm:$0xff] }
   0xf   :  { %1062 = vmatpush3.msra.mxu1 %v136_v20  ;;  %1008 = vmatpush3.msra.mxu0 %v103_v23  ;;  %v132_v36 = vld [vmem:[%s2110_s6 + $0x138] sm:$0xff]  ;;  %v147_v38 = vld [vmem:[%s2110_s6 + $0x1b0] sm:$0xff]  ;;  %v114_v41 = vld [vmem:[%s2110_s6 + $0xa8] sm:$0xff] }
  0x10   :  { %1063 = vmatprep.subr.mxu1 %v151_v22  ;;  %1009 = vmatprep.subr.mxu0 %v118_v25  ;;  %v99_v39 = vld [vmem:[%s2110_s6 + $0x30] sm:$0xff]  ;;  %v146_v42 = vld [vmem:[%s2110_s6 + $0x1a8] sm:$0xff]  ;;  %v113_v45 = vld [vmem:[%s2110_s6 + $0xa0] sm:$0xff] }
  0x11   :  { %1064 = vmatpush3.msra.mxu1 %v135_v24  ;;  %1010 = vmatpush3.msra.mxu0 %v102_v27  ;;  %v131_v40 = vld [vmem:[%s2110_s6 + $0x130] sm:$0xff]  ;;  %v98_v43 = vld [vmem:[%s2110_s6 + $0x28] sm:$0xff]  ;;  %v145_v46 = vld [vmem:[%s2110_s6 + $0x1a0] sm:$0xff] }
  0x12   :  { %1065 = vmatprep.subr.mxu1 %v150_v26  ;;  %1011 = vmatprep.subr.mxu0 %v117_v29  ;;  %v130_v44 = vld [vmem:[%s2110_s6 + $0x128] sm:$0xff]  ;;  %v97_v47 = vld [vmem:[%s2110_s6 + $0x20] sm:$0xff]  ;;  %v112_v49 = vld [vmem:[%s2110_s6 + $0x98] sm:$0xff] }
  0x13   :  { %1066 = vmatpush3.msra.mxu1 %v134_v28  ;;  %1012 = vmatpush3.msra.mxu0 %v101_v31  ;;  %v129_v48 = vld [vmem:[%s2110_s6 + $0x120] sm:$0xff]  ;;  %v144_v50 = vld [vmem:[%s2110_s6 + $0x198] sm:$0xff]  ;;  %v111_v53 = vld [vmem:[%s2110_s6 + $0x90] sm:$0xff] }
  0x14   :  { %1067 = vmatprep.subr.mxu1 %v149_v30  ;;  %1013 = vmatprep.subr.mxu0 %v116_v33  ;;  %v96_v51 = vld [vmem:[%s2110_s6 + $0x18] sm:$0xff]  ;;  %v143_v54 = vld [vmem:[%s2110_s6 + $0x190] sm:$0xff]  ;;  %v110_v57 = vld [vmem:[%s2110_s6 + $0x88] sm:$0xff] }
  0x15   :  { %1068 = vmatpush3.msra.mxu1 %v133_v32  ;;  %1014 = vmatpush3.msra.mxu0 %v100_v35  ;;  %v128_v52 = vld [vmem:[%s2110_s6 + $0x118] sm:$0xff]  ;;  %v95_v55 = vld [vmem:[%s2110_s6 + $0x10] sm:$0xff]  ;;  %v142_v58 = vld [vmem:[%s2110_s6 + $0x188] sm:$0xff] }
  0x16   :  { %1069 = vmatprep.subr.mxu1 %v148_v34  ;;  %1015 = vmatprep.subr.mxu0 %v115_v37  ;;  %v127_v56 = vld [vmem:[%s2110_s6 + $0x110] sm:$0xff]  ;;  %v94_v59 = vld [vmem:[%s2110_s6 + $0x8] sm:$0xff]  ;;  %v109_v61 = vld [vmem:[%s2110_s6 + $0x80] sm:$0xff] }
  0x17   :  { %1070 = vmatpush3.msra.mxu1 %v132_v36  ;;  %1016 = vmatpush3.msra.mxu0 %v99_v39  ;;  %v126_v60 = vld [vmem:[%s2110_s6 + $0x108] sm:$0xff]  ;;  %v93_v63 = vld [vmem:[%s2110_s6] sm:$0xff]  ;;  %v32_v3 = vld [vmem:[%s2104_s0 + $0x18] sm:$0xff] }
  0x18   :  { %1071 = vmatprep.subr.mxu1 %v147_v38  ;;  %1017 = vmatprep.subr.mxu0 %v114_v41  ;;  %v30_v62 = vld [vmem:[%s2104_s0 + $0x8] sm:$0xff]  ;;  %v141_v0 = vld [vmem:[%s2110_s6 + $0x180] sm:$0xff]  ;;  %v188_v4 = vld [vmem:[%s2110_s6 + $0x2f8] sm:$0xff] }
  0x19   :  { %1072 = vmatpush3.msra.mxu1 %v131_v40  ;;  %1018 = vmatpush3.msra.mxu0 %v98_v43  ;;  %v29_v1 = vld [vmem:[%s2104_s0] sm:$0xff]  ;;  %v31_v5 = vld [vmem:[%s2104_s0 + $0x10] sm:$0xff]  ;;  %v172_v6 = vld [vmem:[%s2110_s6 + $0x278] sm:$0xff] }
  0x1a   :  { %1073 = vmatprep.subr.mxu1 %v146_v42  ;;  %1019 = vmatprep.subr.mxu0 %v113_v45  ;;  %v125_v2 = vld [vmem:[%s2110_s6 + $0x100] sm:$0xff]  ;;  %v220_v7 = vld [vmem:[%s2110_s6 + $0x3f8] sm:$0xff]  ;;  %v187_v8 = vld [vmem:[%s2110_s6 + $0x2f0] sm:$0xff] }
  0x1b   :  { %1074 = vmatpush3.msra.mxu1 %v130_v44  ;;  %1020 = vmatpush3.msra.mxu0 %v97_v47  ;;  %v204_v9 = vld [vmem:[%s2110_s6 + $0x378] sm:$0xff]  ;;  %v38_v10 = vld [vmem:[%s2104_s0 + $0x48] sm:$0xff]  ;;  %v171_v11 = vld [vmem:[%s2110_s6 + $0x270] sm:$0xff] }
  0x1c   :  { %1075 = vmatprep.subr.mxu1 %v145_v46  ;;  %1021 = vmatprep.subr.mxu0 %v112_v49  ;;  %v219_v12 = vld [vmem:[%s2110_s6 + $0x3f0] sm:$0xff]  ;;  %v37_v13 = vld [vmem:[%s2104_s0 + $0x40] sm:$0xff]  ;;  %v40_v14 = vld [vmem:[%s2104_s0 + $0x58] sm:$0xff] }
  0x1d   :  { %1076 = vmatpush3.msra.mxu1 %v129_v48  ;;  %1022 = vmatpush3.msra.mxu0 %v96_v51  ;;  %v186_v15 = vld [vmem:[%s2110_s6 + $0x2e8] sm:$0xff]  ;;  %v203_v16 = vld [vmem:[%s2110_s6 + $0x370] sm:$0xff]  ;;  %v185_v20 = vld [vmem:[%s2110_s6 + $0x2e0] sm:$0xff] }
  0x1e   :  { %1077 = vmatprep.subr.mxu1 %v144_v50  ;;  %1023 = vmatprep.subr.mxu0 %v111_v53  ;;  %v39_v17 = vld [vmem:[%s2104_s0 + $0x50] sm:$0xff]  ;;  %v170_v18 = vld [vmem:[%s2110_s6 + $0x268] sm:$0xff]  ;;  %v169_v23 = vld [vmem:[%s2110_s6 + $0x260] sm:$0xff] }
  0x1f   :  { %1078 = vmatpush3.msra.mxu1 %v128_v52  ;;  %1024 = vmatpush3.msra.mxu0 %v95_v55  ;;  %v218_v19 = vld [vmem:[%s2110_s6 + $0x3e8] sm:$0xff]  ;;  %v217_v24 = vld [vmem:[%s2110_s6 + $0x3e0] sm:$0xff]  ;;  %v48_v26 = vld [vmem:[%s2104_s0 + $0x98] sm:$0xff] }
  0x20   :  { %1079 = vmatprep.subr.mxu1 %v143_v54  ;;  %1025 = vmatprep.subr.mxu0 %v110_v57  ;;  %v202_v21 = vld [vmem:[%s2110_s6 + $0x368] sm:$0xff]  ;;  %v45_v25 = vld [vmem:[%s2104_s0 + $0x80] sm:$0xff]  ;;  %v184_v27 = vld [vmem:[%s2110_s6 + $0x2d8] sm:$0xff] }
  0x21   :  { %1080 = vmatpush3.msra.mxu1 %v127_v56  ;;  %1026 = vmatpush3.msra.mxu0 %v94_v59  ;;  %v46_v22 = vld [vmem:[%s2104_s0 + $0x88] sm:$0xff]  ;;  %v201_v28 = vld [vmem:[%s2110_s6 + $0x360] sm:$0xff]  ;;  %v47_v29 = vld [vmem:[%s2104_s0 + $0x90] sm:$0xff] }
  0x22   :  { %1081 = vmatprep.subr.mxu1 %v142_v58  ;;  %1027 = vmatprep.subr.mxu0 %v109_v61  ;;  %v168_v30 = vld [vmem:[%s2110_s6 + $0x258] sm:$0xff]  ;;  %v183_v32 = vld [vmem:[%s2110_s6 + $0x2d0] sm:$0xff]  ;;  %v54_v34 = vld [vmem:[%s2104_s0 + $0xc8] sm:$0xff] }
  0x23   :  { %1082 = vmatpush3.msra.mxu1 %v126_v60  ;;  %333 = vmatprep.mubr.f32.mxu0 %v30_v62  ;;  %v216_v31 = vld [vmem:[%s2110_s6 + $0x3d8] sm:$0xff]  ;;  %v167_v35 = vld [vmem:[%s2110_s6 + $0x250] sm:$0xff]  ;;  %v53_v37 = vld [vmem:[%s2104_s0 + $0xc0] sm:$0xff] }
  0x24   :  { %1028 = vmatpush3.msra.mxu0 %v93_v63  ;;  %1083 = vmatprep.subr.mxu1 %v141_v0  ;;  %v200_v33 = vld [vmem:[%s2110_s6 + $0x358] sm:$0xff]  ;;  %v215_v36 = vld [vmem:[%s2110_s6 + $0x3d0] sm:$0xff]  ;;  %v182_v39 = vld [vmem:[%s2110_s6 + $0x2c8] sm:$0xff] }
  0x25   :  { %334 = vmatmul.mubr.f32.vlgmr.msra.gmra.mxu0 %v29_v1  ;;  %1084 = vmatpush3.msra.mxu1 %v125_v2  ;;  %v56_v38 = vld [vmem:[%s2104_s0 + $0xd8] sm:$0xff]  ;;  %v199_v40 = vld [vmem:[%s2110_s6 + $0x350] sm:$0xff]  ;;  %v166_v42 = vld [vmem:[%s2110_s6 + $0x248] sm:$0xff] }
  0x26   :  { %438 = vmatprep.mubr.f32.mxu1 %v32_v3  ;;  %1109 = vmatprep.subr.mxu0 %v188_v4  ;;  %v55_v41 = vld [vmem:[%s2104_s0 + $0xd0] sm:$0xff]  ;;  %v214_v43 = vld [vmem:[%s2110_s6 + $0x3c8] sm:$0xff]  ;;  %v181_v44 = vld [vmem:[%s2110_s6 + $0x2c0] sm:$0xff] }
  0x27   :  { %439 = vmatmul.mubr.f32.vlgmr.msra.gmra.mxu1 %v31_v5  ;;  %1110 = vmatpush3.msra.mxu0 %v172_v6  ;;  %v198_v45 = vld [vmem:[%s2110_s6 + $0x348] sm:$0xff]  ;;  %v165_v47 = vld [vmem:[%s2110_s6 + $0x240] sm:$0xff]  ;;  %v64_v50 = vld [vmem:[%s2104_s0 + $0x118] sm:$0xff] }
  0x28   :  { %1165 = vmatprep.subr.mxu1 %v220_v7  ;;  %1111 = vmatprep.subr.mxu0 %v187_v8  ;;  %v62_v46 = vld [vmem:[%s2104_s0 + $0x108] sm:$0xff]  ;;  %v213_v48 = vld [vmem:[%s2110_s6 + $0x3c0] sm:$0xff]  ;;  %v180_v51 = vld [vmem:[%s2110_s6 + $0x2b8] sm:$0xff] }
  0x29   :  { %1166 = vmatpush3.msra.mxu1 %v204_v9  ;;  %338 = vmatprep.mubr.f32.mxu0 %v38_v10  ;;  %v61_v49 = vld [vmem:[%s2104_s0 + $0x100] sm:$0xff]  ;;  %v63_v53 = vld [vmem:[%s2104_s0 + $0x110] sm:$0xff]  ;;  %v164_v54 = vld [vmem:[%s2110_s6 + $0x238] sm:$0xff] }
  0x2a   :  { %1112 = vmatpush3.msra.mxu0 %v171_v11  ;;  %1167 = vmatprep.subr.mxu1 %v219_v12  ;;  %v197_v52 = vld [vmem:[%s2110_s6 + $0x340] sm:$0xff]  ;;  %v212_v55 = vld [vmem:[%s2110_s6 + $0x3b8] sm:$0xff]  ;;  %v179_v56 = vld [vmem:[%s2110_s6 + $0x2b0] sm:$0xff] }
  0x2b   :  { %339 = vmatmul.mubr.f32.gmra.mxu0 %v37_v13  ;;  %443 = vmatprep.mubr.f32.mxu1 %v40_v14  ;;  %v196_v57 = vld [vmem:[%s2110_s6 + $0x338] sm:$0xff]  ;;  %v70_v58 = vld [vmem:[%s2104_s0 + $0x148] sm:$0xff]  ;;  %v163_v59 = vld [vmem:[%s2110_s6 + $0x230] sm:$0xff] }
  0x2c   :  { %1113 = vmatprep.subr.mxu0 %v186_v15  ;;  %1168 = vmatpush3.msra.mxu1 %v203_v16  ;;  %v211_v60 = vld [vmem:[%s2110_s6 + $0x3b0] sm:$0xff]  ;;  %v69_v61 = vld [vmem:[%s2104_s0 + $0x140] sm:$0xff]  ;;  %v72_v62 = vld [vmem:[%s2104_s0 + $0x158] sm:$0xff] }
  0x2d   :  { %444 = vmatmul.mubr.f32.gmra.mxu1 %v39_v17  ;;  %1114 = vmatpush3.msra.mxu0 %v170_v18  ;;  %v178_v63 = vld [vmem:[%s2110_s6 + $0x2a8] sm:$0xff]  ;;  %v195_v0 = vld [vmem:[%s2110_s6 + $0x330] sm:$0xff]  ;;  %v177_v4 = vld [vmem:[%s2110_s6 + $0x2a0] sm:$0xff] }
  0x2e   :  { %1169 = vmatprep.subr.mxu1 %v218_v19  ;;  %1115 = vmatprep.subr.mxu0 %v185_v20  ;;  %v71_v1 = vld [vmem:[%s2104_s0 + $0x150] sm:$0xff]  ;;  %v162_v2 = vld [vmem:[%s2110_s6 + $0x228] sm:$0xff]  ;;  %v161_v7 = vld [vmem:[%s2110_s6 + $0x220] sm:$0xff] }
  0x2f   :  { %1170 = vmatpush3.msra.mxu1 %v202_v21  ;;  %343 = vmatprep.mubr.f32.mxu0 %v46_v22  ;;  %v210_v3 = vld [vmem:[%s2110_s6 + $0x3a8] sm:$0xff]  ;;  %v209_v8 = vld [vmem:[%s2110_s6 + $0x3a0] sm:$0xff]  ;;  %v80_v10 = vld [vmem:[%s2104_s0 + $0x198] sm:$0xff] }
  0x30   :  { %1116 = vmatpush3.msra.mxu0 %v169_v23  ;;  %1171 = vmatprep.subr.mxu1 %v217_v24  ;;  %v194_v5 = vld [vmem:[%s2110_s6 + $0x328] sm:$0xff]  ;;  %v77_v9 = vld [vmem:[%s2104_s0 + $0x180] sm:$0xff] }
  0x31   :  { %344 = vmatmul.mubr.f32.gmra.mxu0 %v45_v25  ;;  %448 = vmatprep.mubr.f32.mxu1 %v48_v26  ;;  %v78_v6 = vld [vmem:[%s2104_s0 + $0x188] sm:$0xff] }
  0x32   :  { %1117 = vmatprep.subr.mxu0 %v184_v27  ;;  %1172 = vmatpush3.msra.mxu1 %v201_v28 }
  0x33   :  { %449 = vmatmul.mubr.f32.gmra.mxu1 %v47_v29  ;;  %1118 = vmatpush3.msra.mxu0 %v168_v30 }
  0x34   :  { %1173 = vmatprep.subr.mxu1 %v216_v31  ;;  %1119 = vmatprep.subr.mxu0 %v183_v32 }
  0x35   :  { %1174 = vmatpush3.msra.mxu1 %v200_v33  ;;  %348 = vmatprep.mubr.f32.mxu0 %v54_v34 }
  0x36   :  { %1120 = vmatpush3.msra.mxu0 %v167_v35  ;;  %1175 = vmatprep.subr.mxu1 %v215_v36 }
  0x37   :  { %349 = vmatmul.mubr.f32.gmra.mxu0 %v53_v37  ;;  %453 = vmatprep.mubr.f32.mxu1 %v56_v38 }
  0x38   :  { %1121 = vmatprep.subr.mxu0 %v182_v39  ;;  %1176 = vmatpush3.msra.mxu1 %v199_v40 }
  0x39   :  { %454 = vmatmul.mubr.f32.gmra.mxu1 %v55_v41  ;;  %1122 = vmatpush3.msra.mxu0 %v166_v42 }
  0x3a   :  { %1177 = vmatprep.subr.mxu1 %v214_v43  ;;  %1123 = vmatprep.subr.mxu0 %v181_v44 }
  0x3b   :  { %1178 = vmatpush3.msra.mxu1 %v198_v45  ;;  %353 = vmatprep.mubr.f32.mxu0 %v62_v46 }
  0x3c   :  { %1124 = vmatpush3.msra.mxu0 %v165_v47  ;;  %1179 = vmatprep.subr.mxu1 %v213_v48 }
  0x3d   :  { %354 = vmatmul.mubr.f32.gmra.mxu0 %v61_v49  ;;  %458 = vmatprep.mubr.f32.mxu1 %v64_v50 }
  0x3e   :  { %1125 = vmatprep.subr.mxu0 %v180_v51  ;;  %1180 = vmatpush3.msra.mxu1 %v197_v52 }
  0x3f   :  { %459 = vmatmul.mubr.f32.gmra.mxu1 %v63_v53  ;;  %1126 = vmatpush3.msra.mxu0 %v164_v54 }
  0x40   :  { %1181 = vmatprep.subr.mxu1 %v212_v55  ;;  %1127 = vmatprep.subr.mxu0 %v179_v56 }
  0x41   :  { %1182 = vmatpush3.msra.mxu1 %v196_v57  ;;  %358 = vmatprep.mubr.f32.mxu0 %v70_v58 }
  0x42   :  { %1128 = vmatpush3.msra.mxu0 %v163_v59  ;;  %1183 = vmatprep.subr.mxu1 %v211_v60 }
  0x43   :  { %359 = vmatmul.mubr.f32.gmra.mxu0 %v69_v61  ;;  %463 = vmatprep.mubr.f32.mxu1 %v72_v62 }
  0x44   :  { %1129 = vmatprep.subr.mxu0 %v178_v63  ;;  %1184 = vmatpush3.msra.mxu1 %v195_v0 }
  0x45   :  { %464 = vmatmul.mubr.f32.gmra.mxu1 %v71_v1  ;;  %1130 = vmatpush3.msra.mxu0 %v162_v2 }
  0x46   :  { %1185 = vmatprep.subr.mxu1 %v210_v3  ;;  %1131 = vmatprep.subr.mxu0 %v177_v4 }
  0x47   :  { %14 = vsyncpa [#allocation4], 0  ;;  %1186 = vmatpush3.msra.mxu1 %v194_v5  ;;  %363 = vmatprep.mubr.f32.mxu0 %v78_v6  ;;  %v176_v11 = vld [vmem:[%s2110_s6 + $0x298] sm:$0xff]  ;;  %v193_v12 = vld [vmem:[%s2110_s6 + $0x320] sm:$0xff]  ;;  %v1265_v42 = vmov 0   ;;  %vm689_vm0 = vcmask 130048  }
  0x48   :  { %1132 = vmatpush3.msra.mxu0 %v161_v7  ;;  %1187 = vmatprep.subr.mxu1 %v209_v8  ;;  %v79_v13 = vld [vmem:[%s2104_s0 + $0x190] sm:$0xff]  ;;  %v160_v14 = vld [vmem:[%s2110_s6 + $0x218] sm:$0xff]  ;;  %v86_v18 = vld [vmem:[%s2104_s0 + $0x1c8] sm:$0xff]  ;;  %vm981_vm1 = vcmask 0  }
  0x49   :  { %364 = vmatmul.mubr.f32.gmra.mxu0 %v77_v9  ;;  %468 = vmatprep.mubr.f32.mxu1 %v80_v10  ;;  %v208_v15 = vld [vmem:[%s2110_s6 + $0x398] sm:$0xff]  ;;  %v175_v16 = vld [vmem:[%s2110_s6 + $0x290] sm:$0xff]  ;;  %v85_v21 = vld [vmem:[%s2104_s0 + $0x1c0] sm:$0xff] }
  0x4a   :  { %1133 = vmatprep.subr.mxu0 %v176_v11  ;;  %1188 = vmatpush3.msra.mxu1 %v193_v12  ;;  %v192_v17 = vld [vmem:[%s2110_s6 + $0x318] sm:$0xff]  ;;  %v159_v19 = vld [vmem:[%s2110_s6 + $0x210] sm:$0xff]  ;;  %v174_v23 = vld [vmem:[%s2110_s6 + $0x288] sm:$0xff] }
  0x4b   :  { %469 = vmatmul.mubr.f32.gmra.mxu1 %v79_v13  ;;  %1134 = vmatpush3.msra.mxu0 %v160_v14  ;;  %v207_v20 = vld [vmem:[%s2110_s6 + $0x390] sm:$0xff]  ;;  %v88_v22 = vld [vmem:[%s2104_s0 + $0x1d8] sm:$0xff]  ;;  %v158_v26 = vld [vmem:[%s2110_s6 + $0x208] sm:$0xff] }
  0x4c   :  { %1189 = vmatprep.subr.mxu1 %v208_v15  ;;  %1135 = vmatprep.subr.mxu0 %v175_v16  ;;  %v191_v24 = vld [vmem:[%s2110_s6 + $0x310] sm:$0xff]  ;;  %v206_v27 = vld [vmem:[%s2110_s6 + $0x388] sm:$0xff]  ;;  %v173_v28 = vld [vmem:[%s2110_s6 + $0x280] sm:$0xff] }
  0x4d   :  { %1190 = vmatpush3.msra.mxu1 %v192_v17  ;;  %368 = vmatprep.mubr.f32.mxu0 %v86_v18  ;;  %v87_v25 = vld [vmem:[%s2104_s0 + $0x1d0] sm:$0xff]  ;;  %v190_v29 = vld [vmem:[%s2110_s6 + $0x308] sm:$0xff]  ;;  %v157_v30 = vld [vmem:[%s2110_s6 + $0x200] sm:$0xff] }
  0x4e   :  { %1136 = vmatpush3.msra.mxu0 %v159_v19  ;;  %1191 = vmatprep.subr.mxu1 %v207_v20  ;;  %v34_v31 = vld [vmem:[%s2104_s0 + $0x28] sm:$0xff]  ;;  %v205_v32 = vld [vmem:[%s2110_s6 + $0x380] sm:$0xff]  ;;  %v36_v35 = vld [vmem:[%s2104_s0 + $0x38] sm:$0xff] }
  0x4f   :  { %369 = vmatmul.mubr.f32.gmra.mxu0 %v85_v21  ;;  %473 = vmatprep.mubr.f32.mxu1 %v88_v22  ;;  %v33_v33 = vld [vmem:[%s2104_s0 + $0x20] sm:$0xff]  ;;  %v42_v36 = vld [vmem:[%s2104_s0 + $0x68] sm:$0xff]  ;;  %v35_v37 = vld [vmem:[%s2104_s0 + $0x30] sm:$0xff] }
  0x50   :  { %1137 = vmatprep.subr.mxu0 %v174_v23  ;;  %1192 = vmatpush3.msra.mxu1 %v191_v24  ;;  %v189_v34 = vld [vmem:[%s2110_s6 + $0x300] sm:$0xff]  ;;  %v44_v38 = vld [vmem:[%s2104_s0 + $0x78] sm:$0xff]  ;;  %v50_v41 = vld [vmem:[%s2104_s0 + $0xa8] sm:$0xff] }
  0x51   :  { %474 = vmatmul.mubr.f32.gmra.mxu1 %v87_v25  ;;  %1138 = vmatpush3.msra.mxu0 %v158_v26  ;;  %v221_v39 = vld [vmem:[%s2105_s1] sm:$0xff]  ;;  %v223_v43 = vld [vmem:[%s2105_s1 + $0x10] sm:$0xff]  ;;  %v52_v45 = vld [vmem:[%s2104_s0 + $0xb8] sm:$0xff] }
  0x52   :  { %1193 = vmatprep.subr.mxu1 %v206_v27  ;;  %1139 = vmatprep.subr.mxu0 %v173_v28  ;;  %v41_v40 = vld [vmem:[%s2104_s0 + $0x60] sm:$0xff]  ;;  %v43_v44 = vld [vmem:[%s2104_s0 + $0x70] sm:$0xff]  ;;  %v222_v46 = vld [vmem:[%s2105_s1 + $0x8] sm:$0xff] }
  0x53   :  { %1194 = vmatpush3.msra.mxu1 %v190_v29  ;;  %1140 = vmatpush3.msra.mxu0 %v157_v30  ;;  %v49_v47 = vld [vmem:[%s2104_s0 + $0xa0] sm:$0xff]  ;;  %v58_v48 = vld [vmem:[%s2104_s0 + $0xe8] sm:$0xff]  ;;  %v224_v49 = vld [vmem:[%s2105_s1 + $0x18] sm:$0xff] }
  0x54   :  { %543 = vmatprep.mubr.f32.mxu0 %v34_v31  ;;  %1195 = vmatprep.subr.mxu1 %v205_v32  ;;  %v51_v50 = vld [vmem:[%s2104_s0 + $0xb0] sm:$0xff]  ;;  %v60_v51 = vld [vmem:[%s2104_s0 + $0xf8] sm:$0xff]  ;;  %v225_v52 = vld [vmem:[%s2105_s1 + $0x20] sm:$0xff] }
  0x55   :  { %544 = vmatmul.mubr.f32.vlgmr.msra.gmra.mxu0 %v33_v33  ;;  %1196 = vmatpush3.msra.mxu1 %v189_v34  ;;  %v57_v53 = vld [vmem:[%s2104_s0 + $0xe0] sm:$0xff]  ;;  %v66_v54 = vld [vmem:[%s2104_s0 + $0x128] sm:$0xff]  ;;  %v59_v56 = vld [vmem:[%s2104_s0 + $0xf0] sm:$0xff] }
  0x56   :  { %648 = vmatprep.mubr.f32.mxu1 %v36_v35  ;;  %548 = vmatprep.mubr.f32.mxu0 %v42_v36  ;;  %v226_v55 = vld [vmem:[%s2105_s1 + $0x28] sm:$0xff]  ;;  %v68_v57 = vld [vmem:[%s2104_s0 + $0x138] sm:$0xff]  ;;  %v227_v58 = vld [vmem:[%s2105_s1 + $0x30] sm:$0xff] }
  0x57   :  { %649 = vmatmul.mubr.f32.vlgmr.msra.gmra.mxu1 %v35_v37  ;;  %1223 = vset.pattern.permute.xlu0 %v1265_v42  ;;  %v65_v59 = vld [vmem:[%s2104_s0 + $0x120] sm:$0xff]  ;;  %v74_v60 = vld [vmem:[%s2104_s0 + $0x168] sm:$0xff]  ;;  %v228_v61 = vld [vmem:[%s2105_s1 + $0x38] sm:$0xff] }
  0x58   :  { %653 = vmatprep.mubr.f32.mxu1 %v44_v38  ;;  %231 = vperm.xlu0 %1223, %v221_v39   ;;  %v67_v62 = vld [vmem:[%s2104_s0 + $0x130] sm:$0xff]  ;;  %v76_v63 = vld [vmem:[%s2104_s0 + $0x178] sm:$0xff]  ;;  %v73_v0 = vld [vmem:[%s2104_s0 + $0x160] sm:$0xff] }
  0x59   :  { %549 = vmatmul.mubr.f32.gmra.mxu0 %v41_v40  ;;  %1224 = vset.pattern.permute.xlu1 %v1265_v42  ;;  %v82_v1 = vld [vmem:[%s2104_s0 + $0x1a8] sm:$0xff]  ;;  %v75_v2 = vld [vmem:[%s2104_s0 + $0x170] sm:$0xff]  ;;  %v84_v3 = vld [vmem:[%s2104_s0 + $0x1b8] sm:$0xff] }
  0x5a   :  { %553 = vmatprep.mubr.f32.mxu0 %v50_v41  ;;  %241 = vperm.xlu1 %1224, %v223_v43   ;;  %v81_v4 = vld [vmem:[%s2104_s0 + $0x1a0] sm:$0xff]  ;;  %v90_v5 = vld [vmem:[%s2104_s0 + $0x1e8] sm:$0xff]  ;;  %v83_v6 = vld [vmem:[%s2104_s0 + $0x1b0] sm:$0xff] }
  0x5b   :  { %654 = vmatmul.mubr.f32.gmra.mxu1 %v43_v44  ;;  %v92_v7 = vld [vmem:[%s2104_s0 + $0x1f8] sm:$0xff]  ;;  %v89_v8 = vld [vmem:[%s2104_s0 + $0x1e0] sm:$0xff]  ;;  %v91_v9 = vld [vmem:[%s2104_s0 + $0x1f0] sm:$0xff] }
  0x5c   :  { %658 = vmatprep.mubr.f32.mxu1 %v52_v45  ;;  %236 = vperm.xlu0 %1223, %v222_v46  }
  0x5d   :  { %554 = vmatmul.mubr.f32.gmra.mxu0 %v49_v47 }
  0x5e   :  { %558 = vmatprep.mubr.f32.mxu0 %v58_v48  ;;  %246 = vperm.xlu1 %1224, %v224_v49  }
  0x5f   :  { %659 = vmatmul.mubr.f32.gmra.mxu1 %v51_v50 }
  0x60   :  { %663 = vmatprep.mubr.f32.mxu1 %v60_v51  ;;  %251 = vperm.xlu0 %1223, %v225_v52  }
  0x61   :  { %559 = vmatmul.mubr.f32.gmra.mxu0 %v57_v53 }
  0x62   :  { %563 = vmatprep.mubr.f32.mxu0 %v66_v54  ;;  %256 = vperm.xlu1 %1224, %v226_v55  }
  0x63   :  { %664 = vmatmul.mubr.f32.gmra.mxu1 %v59_v56 }
  0x64   :  { %668 = vmatprep.mubr.f32.mxu1 %v68_v57  ;;  %261 = vperm.xlu0 %1223, %v227_v58  }
  0x65   :  { %564 = vmatmul.mubr.f32.gmra.mxu0 %v65_v59 }
  0x66   :  { %568 = vmatprep.mubr.f32.mxu0 %v74_v60  ;;  %266 = vperm.xlu1 %1224, %v228_v61  }
  0x67   :  { %669 = vmatmul.mubr.f32.gmra.mxu1 %v67_v62 }
  0x68   :  { %673 = vmatprep.mubr.f32.mxu1 %v76_v63 }
  0x69   :  { %569 = vmatmul.mubr.f32.gmra.mxu0 %v73_v0 }
  0x6a   :  { %573 = vmatprep.mubr.f32.mxu0 %v82_v1 }
  0x6b   :  { %674 = vmatmul.mubr.f32.gmra.mxu1 %v75_v2 }
  0x6c   :  { %678 = vmatprep.mubr.f32.mxu1 %v84_v3 }
  0x6d   :  { %574 = vmatmul.mubr.f32.gmra.mxu0 %v81_v4 }
  0x6e   :  { %578 = vmatprep.mubr.f32.mxu0 %v90_v5 }
  0x6f   :  { %679 = vmatmul.mubr.f32.gmra.mxu1 %v83_v6 }
  0x70   :  { %683 = vmatprep.mubr.f32.mxu1 %v92_v7 }
  0x71   :  { %579 = vmatmul.mubr.f32.gmra.mxu0 %v89_v8 }
  0x73   :  { %684 = vmatmul.mubr.f32.gmra.mxu1 %v91_v9 }
  0xd3   :  { %v232_v38 = vpop.permute.xlu0 %231 }
  0xd5   :  { %v242_v49 = vpop.permute.xlu1 %241 }
  0xd7   :  { %v237_v46 = vpop.permute.xlu0 %236 }
  0xd9   :  { %v247_v2 = vpop.permute.xlu1 %246 }
  0xe5   :  { %v1029_v10 = vpop.f32.mrf.mxu0 }
  0xe7   :  { %v1085_v11 = vpop.f32.mrf.mxu1  ;;  %v1030_v12 = vpop.f32.mrf.mxu0 }
  0xe8   :  { %v1031_v40 = vadd.f32 %v1030_v12, %v1029_v10 }
  0xe9   :  { %v1086_v13 = vpop.f32.mrf.mxu1 }
  0xea   :  { %v336_v44 = vadd.f32 %v1031_v40, %v232_v38  ;;  %v1087_v48 = vadd.f32 %v1086_v13, %v1085_v11 }
  0xeb   :  { %v1032_v14 = vpop.f32.mrf.mxu0 }
  0xec   :  { %v441_v53 = vadd.f32 %v1087_v48, %v336_v44 }
  0xed   :  { %v1088_v15 = vpop.f32.mrf.mxu1  ;;  %v1033_v16 = vpop.f32.mrf.mxu0 }
  0xee   :  { %v1034_v45 = vadd.f32 %v1033_v16, %v1032_v14  ;;  %v252_v16 = vpop.permute.xlu0 %251 }
  0xef   :  { %v1089_v17 = vpop.f32.mrf.mxu1 }
  0xf0   :  { %v341_v54 = vadd.f32 %v1034_v45, %v237_v46  ;;  %v1090_v58 = vadd.f32 %v1089_v17, %v1088_v15 }
  0xf1   :  { %v1035_v18 = vpop.f32.mrf.mxu0 }
  0xf2   :  { %v446_v0 = vadd.f32 %v1090_v58, %v341_v54 }
  0xf3   :  { %v1091_v19 = vpop.f32.mrf.mxu1  ;;  %v1036_v20 = vpop.f32.mrf.mxu0 }
  0xf4   :  { %v1037_v50 = vadd.f32 %v1036_v20, %v1035_v18 }
  0xf5   :  { %v1092_v21 = vpop.f32.mrf.mxu1 }
  0xf6   :  { %v346_v61 = vadd.f32 %v1037_v50, %v242_v49  ;;  %v1093_v5 = vadd.f32 %v1092_v21, %v1091_v19 }
  0xf7   :  { %v1038_v22 = vpop.f32.mrf.mxu0 }
  0xf8   :  { %v451_v11 = vadd.f32 %v1093_v5, %v346_v61 }
  0xf9   :  { %v1910_v23 = vpop.f32.mrf.mxu1  ;;  %v1039_v24 = vpop.f32.mrf.mxu0 }
  0xfa   :  { %v1040_v1 = vadd.f32 %v1039_v24, %v1038_v22 }
  0xfb   :  { %v1095_v25 = vpop.f32.mrf.mxu1 }
  0xfc   :  { %v351_v14 = vadd.f32 %v1040_v1, %v247_v2  ;;  %v1096_v19 = vadd.f32 %v1095_v25, %v1910_v23 }
  0xfd   :  { %v1041_v26 = vpop.f32.mrf.mxu0 }
  0xfe   :  { %v456_v46 = vadd.f32 %v1096_v19, %v351_v14 }
  0xff   :  { %v1912_v27 = vpop.f32.mrf.mxu1  ;;  %v1042_v28 = vpop.f32.mrf.mxu0 }
 0x100   :  { %v1043_v15 = vadd.f32 %v1042_v28, %v1041_v26  ;;  %v257_v26 = vpop.permute.xlu1 %256 }
 0x101   :  { %v1914_v29 = vpop.f32.mrf.mxu1 }
 0x102   :  { %v1099_v23 = vadd.f32 %v1914_v29, %v1912_v27 }
 0x103   :  { %v1044_v30 = vpop.f32.mrf.mxu0 }
 0x105   :  { %v1916_v31 = vpop.f32.mrf.mxu1  ;;  %v1045_v32 = vpop.f32.mrf.mxu0 }
 0x106   :  { %v1046_v40 = vadd.f32 %v1045_v32, %v1044_v30 }
 0x107   :  { %v1918_v33 = vpop.f32.mrf.mxu1 }
 0x108   :  { %v361_v30 = vadd.f32 %v1046_v40, %v257_v26  ;;  %v1102_v27 = vadd.f32 %v1918_v33, %v1916_v31 }
 0x109   :  { %v1920_v34 = vpop.f32.mrf.mxu0 }
 0x10b   :  { %v1922_v35 = vpop.f32.mrf.mxu1  ;;  %v1924_v36 = vpop.f32.mrf.mxu0 }
 0x10d   :  { %v1926_v37 = vpop.f32.mrf.mxu1 }
 0x10e   :  { %v1105_v33 = vadd.f32 %v1926_v37, %v1922_v35 }
 0x10f   :  { %v1928_v39 = vpop.f32.mrf.mxu0 }
 0x111   :  { %v1930_v41 = vpop.f32.mrf.mxu1  ;;  %v1932_v42 = vpop.f32.mrf.mxu0 }
 0x113   :  { %v1934_v43 = vpop.f32.mrf.mxu1 }
 0x115   :  { %v1141_v47 = vpop.f32.mrf.mxu0 }
 0x117   :  { %v1197_v51 = vpop.f32.mrf.mxu1  ;;  %v1142_v52 = vpop.f32.mrf.mxu0 }
 0x118   :  { %v1143_v55 = vadd.f32 %v1142_v52, %v1141_v47  ;;  %v356_v47 = vadd.f32 %v1043_v15, %v252_v16  ;;  %v1108_v16 = vadd.f32 %v1934_v43, %v1930_v41 }
 0x119   :  { %v1198_v56 = vpop.f32.mrf.mxu1  ;;  %v1144_v57 = vpop.f32.mrf.mxu0 }
 0x11a   :  { %v546_v59 = vadd.f32 %v1143_v55, %v441_v53  ;;  %v1199_v60 = vadd.f32 %v1198_v56, %v1197_v51  ;;  %v461_v54 = vadd.f32 %v1099_v23, %v356_v47  ;;  %v1049_v55 = vadd.f32 %v1924_v36, %v1920_v34  ;;  %v262_v56 = vpop.permute.xlu0 %261  ;;  %v267_v36 = vpop.permute.xlu1 %266 }
 0x11b   :  { %v1200_v62 = vpop.f32.mrf.mxu1  ;;  %v1145_v63 = vpop.f32.mrf.mxu0  ;;  %v1052_v34 = vadd.f32 %v1932_v42, %v1928_v39 }
 0x11c   :  { %v1146_v3 = vadd.f32 %v1145_v63, %v1144_v57  ;;  %v1936_v4 = vadd.f32 %v1199_v60, %v546_v59  ;;  %v466_v63 = vadd.f32 %v1102_v27, %v361_v30  ;;  %v366_v2 = vadd.f32 %v1049_v55, %v262_v56 }
 0x11d   :  { %v1201_v6 = vpop.f32.mrf.mxu1  ;;  %v1147_v7 = vpop.f32.mrf.mxu0 }
 0x11e   :  { %v551_v8 = vadd.f32 %v1146_v3, %v446_v0  ;;  %v1202_v9 = vadd.f32 %v1201_v6, %v1200_v62  ;;  %v690_v10 = vsel %vm689_vm0, %v1936_v4, 0.0 }
 0x11f   :  { %v1203_v12 = vpop.f32.mrf.mxu1  ;;  %v1148_v13 = vpop.f32.mrf.mxu0  ;;  %691 = vadd.xlane.f32.xlu0 %v690_v10 }
 0x120   :  { %v1149_v17 = vadd.f32 %v1148_v13, %v1147_v7  ;;  %v1940_v18 = vadd.f32 %v1202_v9, %v551_v8  ;;  %v371_v13 = vadd.f32 %v1052_v34, %v267_v36 }
 0x121   :  { %v1204_v20 = vpop.f32.mrf.mxu1  ;;  %v1150_v22 = vpop.f32.mrf.mxu0 }
 0x122   :  { %v556_v21 = vadd.f32 %v1149_v17, %v451_v11  ;;  %v1205_v24 = vadd.f32 %v1204_v20, %v1203_v12  ;;  %v693_v38 = vsel %vm689_vm0, %v1940_v18, 0.0  ;;  %v471_v12 = vadd.f32 %v1105_v33, %v366_v2 }
 0x123   :  { %v1206_v44 = vpop.f32.mrf.mxu1  ;;  %v1151_v45 = vpop.f32.mrf.mxu0  ;;  %694 = vadd.xlane.f32.xlu1 %v693_v38  ;;  %v476_v19 = vadd.f32 %v1108_v16, %v371_v13 }
 0x124   :  { %v1152_v28 = vadd.f32 %v1151_v45, %v1150_v22  ;;  %v1945_v48 = vadd.f32 %v1205_v24, %v556_v21 }
 0x125   :  { %v1207_v49 = vpop.f32.mrf.mxu1  ;;  %v1153_v50 = vpop.f32.mrf.mxu0 }
 0x126   :  { %v561_v25 = vadd.f32 %v1152_v28, %v456_v46  ;;  %v1208_v51 = vadd.f32 %v1207_v49, %v1206_v44  ;;  %v696_v52 = vsel %vm689_vm0, %v1945_v48, 0.0 }
 0x127   :  { %v1209_v32 = vpop.f32.mrf.mxu1  ;;  %v1154_v53 = vpop.f32.mrf.mxu0  ;;  %697 = vadd.xlane.f32.xlu0 %v696_v52 }
 0x128   :  { %v1155_v57 = vadd.f32 %v1154_v53, %v1153_v50  ;;  %v1953_v58 = vadd.f32 %v1208_v51, %v561_v25 }
 0x129   :  { %v1210_v29 = vpop.f32.mrf.mxu1  ;;  %v1156_v59 = vpop.f32.mrf.mxu0 }
 0x12a   :  { %v566_v60 = vadd.f32 %v1155_v57, %v461_v54  ;;  %v1211_v61 = vadd.f32 %v1210_v29, %v1209_v32  ;;  %v699_v62 = vsel %vm689_vm0, %v1953_v58, 0.0 }
 0x12b   :  { %v1212_v0 = vpop.f32.mrf.mxu1  ;;  %v1157_v1 = vpop.f32.mrf.mxu0  ;;  %700 = vadd.xlane.f32.xlu0 %v699_v62 }
 0x12c   :  { %v1158_v3 = vadd.f32 %v1157_v1, %v1156_v59  ;;  %v671_v5 = vadd.f32 %v1211_v61, %v566_v60 }
 0x12d   :  { %v1213_v6 = vpop.f32.mrf.mxu1  ;;  %v1159_v31 = vpop.f32.mrf.mxu0 }
 0x12e   :  { %v571_v7 = vadd.f32 %v1158_v3, %v466_v63  ;;  %v1214_v8 = vadd.f32 %v1213_v6, %v1212_v0  ;;  %v702_v9 = vsel %vm689_vm0, %v671_v5, 0.0 }
 0x12f   :  { %v1215_v10 = vpop.f32.mrf.mxu1  ;;  %v1160_v11 = vpop.f32.mrf.mxu0  ;;  %703 = vadd.xlane.f32.xlu1 %v702_v9  ;;  %v850_v9 = vld [vmem:[%s2107_s3] sm:$0xff] }
 0x130   :  { %v1161_v14 = vadd.f32 %v1160_v11, %v1159_v31  ;;  %v676_v15 = vadd.f32 %v1214_v8, %v571_v7  ;;  %v852_v11 = vld [vmem:[%s2107_s3 + $0x10] sm:$0xff] }
 0x131   :  { %v1216_v39 = vpop.f32.mrf.mxu1  ;;  %v1162_v42 = vpop.f32.mrf.mxu0 }
 0x132   :  { %v576_v17 = vadd.f32 %v1161_v14, %v471_v12  ;;  %v1217_v20 = vadd.f32 %v1216_v39, %v1215_v10  ;;  %v705_v35 = vsel %vm689_vm0, %v676_v15, 0.0  ;;  %v851_v10 = vld [vmem:[%s2107_s3 + $0x8] sm:$0xff]  ;;  %v853_v12 = vld [vmem:[%s2107_s3 + $0x18] sm:$0xff] }
 0x133   :  { %v1218_v37 = vpop.f32.mrf.mxu1  ;;  %v1163_v22 = vpop.f32.mrf.mxu0  ;;  %706 = vadd.xlane.f32.xlu0 %v705_v35 }
 0x134   :  { %v1164_v21 = vadd.f32 %v1163_v22, %v1162_v42  ;;  %v681_v24 = vadd.f32 %v1217_v20, %v576_v17 }
 0x135   :  { %v1219_v38 = vpop.f32.mrf.mxu1 }
 0x136   :  { %v581_v40 = vadd.f32 %v1164_v21, %v476_v19  ;;  %v1220_v44 = vadd.f32 %v1219_v38, %v1218_v37  ;;  %v708_v45 = vsel %vm689_vm0, %v681_v24, 0.0 }
 0x137   :  { %709 = vadd.xlane.f32.xlu1 %v708_v45 }
 0x138   :  { %v686_v46 = vadd.f32 %v1220_v44, %v581_v40 }
 0x13a   :  { %v711_v47 = vsel %vm689_vm0, %v686_v46, 0.0 }
 0x13b   :  { %712 = vadd.xlane.f32.xlu0 %v711_v47  ;;  %v771_v47 = vld [vmem:[%s2106_s2 + $0x8] sm:$0xff] }
 0x1a8   :  { %v692_v41 = vpop.xlane.xlu0 %691 }
 0x1a9   :  { %v714_v43 = vmul.f32 0.0625, %v692_v41 }
 0x1ab   :  { %v1970_v26 = vsub.f32 %v1936_v4, %v714_v43 }
 0x1ac   :  { %v695_v28 = vpop.xlane.xlu1 %694 }
 0x1ad   :  { %v715_v49 = vmul.f32 0.0625, %v695_v28  ;;  %v730_v50 = vmul.f32 %v1970_v26, %v1970_v26 }
 0x1af   :  { %v1975_v23 = vsub.f32 %v1940_v18, %v715_v49  ;;  %v738_v25 = vsel %vm689_vm0, %v730_v50, 0.0 }
 0x1b0   :  { %739 = vadd.xlane.f32.xlu1 %v738_v25  ;;  %v698_v51 = vpop.xlane.xlu0 %697  ;;  %v772_v25 = vld [vmem:[%s2106_s2 + $0x10] sm:$0xff] }
 0x1b1   :  { %v716_v52 = vmul.f32 0.0625, %v698_v51  ;;  %v731_v30 = vmul.f32 %v1975_v23, %v1975_v23 }
 0x1b3   :  { %v1981_v32 = vsub.f32 %v1945_v48, %v716_v52  ;;  %v741_v4 = vsel %vm689_vm0, %v731_v30, 0.0  ;;  %v854_v30 = vld [vmem:[%s2107_s3 + $0x20] sm:$0xff] }
 0x1b4   :  { %742 = vadd.xlane.f32.xlu0 %v741_v4  ;;  %v701_v53 = vpop.xlane.xlu0 %700 }
 0x1b5   :  { %v717_v54 = vmul.f32 0.0625, %v701_v53  ;;  %v732_v18 = vmul.f32 %v1981_v32, %v1981_v32 }
 0x1b7   :  { %v1987_v55 = vsub.f32 %v1953_v58, %v717_v54  ;;  %v744_v56 = vsel %vm689_vm0, %v732_v18, 0.0  ;;  %v773_v18 = vld [vmem:[%s2106_s2 + $0x18] sm:$0xff] }
 0x1b8   :  { %v704_v57 = vpop.xlane.xlu1 %703  ;;  %745 = vadd.xlane.f32.xlu1 %v744_v56 }
 0x1b9   :  { %v718_v27 = vmul.f32 0.0625, %v704_v57  ;;  %v733_v48 = vmul.f32 %v1987_v55, %v1987_v55 }
 0x1bb   :  { %v1992_v29 = vsub.f32 %v671_v5, %v718_v27  ;;  %v747_v59 = vsel %vm689_vm0, %v733_v48, 0.0  ;;  %v855_v27 = vld [vmem:[%s2107_s3 + $0x28] sm:$0xff] }
 0x1bc   :  { %748 = vadd.xlane.f32.xlu0 %v747_v59  ;;  %v707_v60 = vpop.xlane.xlu0 %706 }
 0x1bd   :  { %v719_v61 = vmul.f32 0.0625, %v707_v60  ;;  %v734_v62 = vmul.f32 %v1992_v29, %v1992_v29  ;;  %v774_v60 = vld [vmem:[%s2106_s2 + $0x20] sm:$0xff] }
 0x1bf   :  { %v1997_v58 = vsub.f32 %v676_v15, %v719_v61  ;;  %v750_v63 = vsel %vm689_vm0, %v734_v62, 0.0  ;;  %v856_v62 = vld [vmem:[%s2107_s3 + $0x30] sm:$0xff] }
 0x1c0   :  { %v710_v0 = vpop.xlane.xlu1 %709  ;;  %751 = vadd.xlane.f32.xlu1 %v750_v63 }
 0x1c1   :  { %v720_v1 = vmul.f32 0.0625, %v710_v0  ;;  %v735_v2 = vmul.f32 %v1997_v58, %v1997_v58  ;;  %v775_v0 = vld [vmem:[%s2106_s2 + $0x28] sm:$0xff] }
 0x1c3   :  { %v2002_v34 = vsub.f32 %v681_v24, %v720_v1  ;;  %v753_v36 = vsel %vm689_vm0, %v735_v2, 0.0  ;;  %v770_v24 = vld [vmem:[%s2106_s2] sm:$0xff] }
 0x1c4   :  { %754 = vadd.xlane.f32.xlu0 %v753_v36  ;;  %v713_v3 = vpop.xlane.xlu0 %712  ;;  %v776_v36 = vld [vmem:[%s2106_s2 + $0x30] sm:$0xff] }
 0x1c5   :  { %v721_v5 = vmul.f32 0.0625, %v713_v3  ;;  %v736_v6 = vmul.f32 %v2002_v34, %v2002_v34 }
 0x1c7   :  { %v2007_v31 = vsub.f32 %v686_v46, %v721_v5  ;;  %v756_v33 = vsel %vm689_vm0, %v736_v6, 0.0  ;;  %v777_v6 = vld [vmem:[%s2106_s2 + $0x38] sm:$0xff] }
 0x1c8   :  { %757 = vadd.xlane.f32.xlu1 %v756_v33 }
 0x1c9   :  { %v737_v7 = vmul.f32 %v2007_v31, %v2007_v31 }
 0x1cb   :  { %v759_v8 = vsel %vm689_vm0, %v737_v7, 0.0 }
 0x1cc   :  { %760 = vadd.xlane.f32.xlu0 %v759_v8  ;;  %v857_v8 = vld [vmem:[%s2107_s3 + $0x38] sm:$0xff] }
 0x1d9   :  { %860 = vperm.xlu1 %1224, %v850_v9  }
 0x1e2   :  { %865 = vperm.xlu0 %1223, %v851_v10  }
 0x1e6   :  { %870 = vperm.xlu0 %1223, %v852_v11  }
 0x1ea   :  { %875 = vperm.xlu0 %1223, %v853_v12  }
 0x239   :  { %v740_v13 = vpop.xlane.xlu1 %739 }
 0x23a   :  { %v762_v14 = vmul.f32 0.0625, %v740_v13 }
 0x23c   :  { %v778_v15 = vadd.f32 1e-05, %v762_v14 }
 0x23d   :  { %v743_v39 = vpop.xlane.xlu0 %742 }
 0x23e   :  { %1225 = vrsqrt.f32 %v778_v15  ;;  %v763_v42 = vmul.f32 0.0625, %v743_v39 }
 0x240   :  { %v779_v16 = vadd.f32 1e-05, %v763_v42 }
 0x241   :  { %v746_v17 = vpop.xlane.xlu1 %745 }
 0x242   :  { %1227 = vrsqrt.f32 %v779_v16  ;;  %v764_v20 = vmul.f32 0.0625, %v746_v17  ;;  %v922_v17 = vld [vmem:[%s2108_s4] sm:$0xff] }
 0x244   :  { %v780_v35 = vadd.f32 1e-05, %v764_v20 }
 0x245   :  { %v749_v37 = vpop.xlane.xlu0 %748 }
 0x246   :  { %1229 = vrsqrt.f32 %v780_v35  ;;  %v765_v22 = vmul.f32 0.0625, %v749_v37 }
 0x248   :  { %v781_v19 = vadd.f32 1e-05, %v765_v22 }
 0x249   :  { %v752_v21 = vpop.xlane.xlu1 %751 }
 0x24a   :  { %1231 = vrsqrt.f32 %v781_v19  ;;  %v766_v38 = vmul.f32 0.0625, %v752_v21 }
 0x24b   :  { %v1226_v40 = vpop.eup %1225 }
 0x24c   :  { %v782_v44 = vadd.f32 1e-05, %v766_v38  ;;  %v794_v45 = vmul.f32 %v1226_v40, %v770_v24 }
 0x24d   :  { %v755_v46 = vpop.xlane.xlu0 %754 }
 0x24e   :  { %1233 = vrsqrt.f32 %v782_v44  ;;  %v767_v41 = vmul.f32 0.0625, %v755_v46  ;;  %804 = vperm.xlu1 %1224, %v794_v45  }
 0x24f   :  { %v1228_v43 = vpop.eup %1227 }
 0x250   :  { %v783_v28 = vadd.f32 1e-05, %v767_v41  ;;  %v795_v49 = vmul.f32 %v1228_v43, %v771_v47 }
 0x251   :  { %v758_v50 = vpop.xlane.xlu1 %757 }
 0x252   :  { %1235 = vrsqrt.f32 %v783_v28  ;;  %v768_v51 = vmul.f32 0.0625, %v758_v50  ;;  %809 = vperm.xlu0 %1223, %v795_v49  }
 0x253   :  { %v1230_v52 = vpop.eup %1229 }
 0x254   :  { %v784_v4 = vadd.f32 1e-05, %v768_v51  ;;  %v796_v53 = vmul.f32 %v1230_v52, %v772_v25 }
 0x255   :  { %v761_v54 = vpop.xlane.xlu0 %760  ;;  %v861_v11 = vpop.permute.xlu1 %860 }
 0x256   :  { %1237 = vrsqrt.f32 %v784_v4  ;;  %v769_v56 = vmul.f32 0.0625, %v761_v54  ;;  %814 = vperm.xlu1 %1224, %v796_v53   ;;  %880 = vperm.xlu0 %1223, %v854_v30  }
 0x257   :  { %v1232_v57 = vpop.eup %1231 }
 0x258   :  { %v785_v48 = vadd.f32 1e-05, %v769_v56  ;;  %v797_v59 = vmul.f32 %v1232_v57, %v773_v18 }
 0x25a   :  { %1239 = vrsqrt.f32 %v785_v48  ;;  %885 = vperm.xlu0 %1223, %v855_v27   ;;  %819 = vperm.xlu1 %1224, %v797_v59  }
 0x25b   :  { %v1234_v61 = vpop.eup %1233 }
 0x25c   :  { %v798_v63 = vmul.f32 %v1234_v61, %v774_v60 }
 0x25d   :  { %v866_v9 = vpop.permute.xlu0 %865 }
 0x25e   :  { %890 = vperm.xlu0 %1223, %v856_v62   ;;  %824 = vperm.xlu1 %1224, %v798_v63  }
 0x25f   :  { %v1236_v1 = vpop.eup %1235 }
 0x260   :  { %v799_v2 = vmul.f32 %v1236_v1, %v775_v0 }
 0x261   :  { %v871_v10 = vpop.permute.xlu0 %870 }
 0x262   :  { %829 = vperm.xlu1 %1224, %v799_v2  }
 0x263   :  { %v1238_v3 = vpop.eup %1237 }
 0x264   :  { %v800_v5 = vmul.f32 %v1238_v3, %v776_v36 }
 0x265   :  { %v876_v12 = vpop.permute.xlu0 %875 }
 0x266   :  { %834 = vperm.xlu1 %1224, %v800_v5  }
 0x267   :  { %v1240_v33 = vpop.eup %1239 }
 0x268   :  { %v801_v7 = vmul.f32 %v1240_v33, %v777_v6  ;;  %v928_v33 = vld [vmem:[%s2108_s4 + $0x30] sm:$0xff] }
 0x26a   :  { %839 = vperm.xlu1 %1224, %v801_v7  }
 0x26e   :  { %895 = vperm.xlu1 %1224, %v857_v8  }
 0x2c9   :  { %v805_v13 = vpop.permute.xlu1 %804 }
 0x2ca   :  { %v842_v14 = vmul.f32 %v805_v13, %v1970_v26  ;;  %v923_v26 = vld [vmem:[%s2108_s4 + $0x8] sm:$0xff] }
 0x2cc   :  { %v898_v15 = vadd.f32 %v861_v11, %v842_v14  ;;  %v929_v14 = vld [vmem:[%s2108_s4 + $0x38] sm:$0xff] }
 0x2cd   :  { %v810_v39 = vpop.permute.xlu0 %809 }
 0x2ce   :  { %v906_v42 = vmul.f32 0.2, %v898_v15  ;;  %v843_v16 = vmul.f32 %v810_v39, %v1975_v23 }
 0x2d0   :  { %v899_v20 = vadd.f32 %v866_v9, %v843_v16  ;;  %v914_v35 = vmax.f32 %v898_v15, %v906_v42 }
 0x2d1   :  { %v815_v37 = vpop.permute.xlu1 %814  ;;  %v881_v47 = vpop.permute.xlu0 %880 }
 0x2d2   :  { %v907_v22 = vmul.f32 0.2, %v899_v20  ;;  %v844_v19 = vmul.f32 %v815_v37, %v1981_v32  ;;  %v930_v21 = vmul.f32 %v922_v17, %v914_v35  ;;  %v924_v32 = vld [vmem:[%s2108_s4 + $0x10] sm:$0xff] }
 0x2d4   :  { %v900_v24 = vadd.f32 %v871_v10, %v844_v19  ;;  %v938_v38 = vsel %vm689_vm0, %v930_v21, 0.0  ;;  %v915_v40 = vmax.f32 %v899_v20, %v907_v22 }
 0x2d5   :  { %939 = vadd.xlane.f32.xlu0 %v938_v38  ;;  %v820_v23 = vpop.permute.xlu1 %819  ;;  %v886_v53 = vpop.permute.xlu0 %885 }
 0x2d6   :  { %v908_v44 = vmul.f32 0.2, %v900_v24  ;;  %v845_v45 = vmul.f32 %v820_v23, %v1987_v55  ;;  %v931_v46 = vmul.f32 %v923_v26, %v915_v40  ;;  %v925_v55 = vld [vmem:[%s2108_s4 + $0x18] sm:$0xff] }
 0x2d8   :  { %v901_v41 = vadd.f32 %v876_v12, %v845_v45  ;;  %v941_v43 = vsel %vm689_vm0, %v931_v46, 0.0  ;;  %v916_v28 = vmax.f32 %v900_v24, %v908_v44 }
 0x2d9   :  { %v825_v49 = vpop.permute.xlu1 %824  ;;  %942 = vadd.xlane.f32.xlu1 %v941_v43  ;;  %v891_v0 = vpop.permute.xlu0 %890  ;;  %v975_v43 = vld [vmem:[#allocation2] sm:$0x1] }
 0x2da   :  { %v909_v50 = vmul.f32 0.2, %v901_v41  ;;  %v846_v25 = vmul.f32 %v825_v49, %v1992_v29  ;;  %v932_v51 = vmul.f32 %v924_v32, %v916_v28  ;;  %v926_v29 = vld [vmem:[%s2108_s4 + $0x20] sm:$0xff] }
 0x2dc   :  { %v902_v52 = vadd.f32 %v881_v47, %v846_v25  ;;  %v944_v30 = vsel %vm689_vm0, %v932_v51, 0.0  ;;  %v917_v4 = vmax.f32 %v901_v41, %v909_v50 }
 0x2dd   :  { %v830_v54 = vpop.permute.xlu1 %829  ;;  %945 = vadd.xlane.f32.xlu0 %v944_v30 }
 0x2de   :  { %v910_v18 = vmul.f32 0.2, %v902_v52  ;;  %v847_v56 = vmul.f32 %v830_v54, %v1997_v58  ;;  %v933_v57 = vmul.f32 %v925_v55, %v917_v4  ;;  %v927_v58 = vld [vmem:[%s2108_s4 + $0x28] sm:$0xff]  ;;  %s1266_s4 = smov [#allocation3]  }
 0x2df   :  { %s989_s30 = sshll.u32 %s1266_s4, 4  ;;  %s990_s30 = int_to_ptr.vmem [resolvable:$true] %s989_s30 }
 0x2e0   :  { %v903_v27 = vadd.f32 %v886_v53, %v847_v56  ;;  %v947_v48 = vsel %vm689_vm0, %v933_v57, 0.0  ;;  %v918_v59 = vmax.f32 %v902_v52, %v910_v18  ;;  %s1243_s8 = scalar_lea.vmem %s990_s30, 16  ;;  %s1247_s9 = scalar_lea.vmem %s990_s30, 32 }
 0x2e1   :  { %v835_v60 = vpop.permute.xlu1 %834  ;;  %948 = vadd.xlane.f32.xlu0 %v947_v48  ;;  %p1244_p0 = scmp.ne.s32.totalorder %s990_s30, %s1243_s8  ;;  %p1248_p1 = scmp.lt.s32.totalorder %s990_s30, %s990_s30 }
 0x2e2   :  { %v911_v61 = vmul.f32 0.2, %v903_v27  ;;  %v848_v62 = vmul.f32 %v835_v60, %v2002_v34  ;;  %v934_v63 = vmul.f32 %v926_v29, %v918_v59  ;;  %p1249_p2 = scmp.lt.s32.totalorder %s1247_s9, %s1243_s8 }
 0x2e4   :  { %v904_v1 = vadd.f32 %v891_v0, %v848_v62  ;;  %v950_v2 = vsel %vm689_vm0, %v934_v63, 0.0  ;;  %v919_v36 = vmax.f32 %v903_v27, %v911_v61  ;;  %p1250_p3 = por %p1249_p2, %p1248_p1 }
 0x2e5   :  { %v840_v3 = vpop.permute.xlu1 %839  ;;  %951 = vadd.xlane.f32.xlu1 %v950_v2 }
 0x2e6   :  { %v912_v5 = vmul.f32 0.2, %v904_v1  ;;  %v935_v6 = vmul.f32 %v927_v58, %v919_v36  ;;  %v849_v34 = vmul.f32 %v840_v3, %v2007_v31  ;;  %p1251_p4 = pnand %p1250_p3, %p1244_p0 }
 0x2e8   :  { %v953_v7 = vsel %vm689_vm0, %v935_v6, 0.0  ;;  %v920_v8 = vmax.f32 %v904_v1, %v912_v5 }
 0x2e9   :  { %v896_v9 = vpop.permute.xlu1 %895  ;;  %954 = vadd.xlane.f32.xlu0 %v953_v7 }
 0x2ea   :  { %v905_v10 = vadd.f32 %v896_v9, %v849_v34  ;;  %v936_v11 = vmul.f32 %v928_v33, %v920_v8 }
 0x2ec   :  { %v913_v12 = vmul.f32 0.2, %v905_v10  ;;  %v956_v13 = vsel %vm689_vm0, %v936_v11, 0.0 }
 0x2ed   :  { %957 = vadd.xlane.f32.xlu1 %v956_v13 }
 0x2ee   :  { %v921_v15 = vmax.f32 %v905_v10, %v913_v12 }
 0x2f0   :  { %v937_v39 = vmul.f32 %v929_v14, %v921_v15 }
 0x2f2   :  { %v959_v42 = vsel %vm689_vm0, %v937_v39, 0.0 }
 0x2f3   :  { %960 = vadd.xlane.f32.xlu0 %v959_v42 }
 0x35e   :  { %v940_v31 = vpop.xlane.xlu0 %939 }
 0x362   :  { %v943_v17 = vpop.xlane.xlu1 %942 }
 0x363   :  { %v962_v20 = vadd.f32 %v943_v17, %v940_v31 }
 0x366   :  { %v946_v16 = vpop.xlane.xlu0 %945 }
 0x367   :  { %v963_v37 = vadd.f32 %v962_v20, %v946_v16 }
 0x36a   :  { %v949_v35 = vpop.xlane.xlu0 %948 }
 0x36b   :  { %v964_v19 = vadd.f32 %v963_v37, %v949_v35 }
 0x36e   :  { %v952_v22 = vpop.xlane.xlu1 %951 }
 0x36f   :  { %v965_v26 = vadd.f32 %v964_v19, %v952_v22 }
 0x372   :  { %v955_v21 = vpop.xlane.xlu0 %954 }
 0x373   :  { %v966_v38 = vadd.f32 %v965_v26, %v955_v21 }
 0x376   :  { %v958_v24 = vpop.xlane.xlu1 %957 }
 0x377   :  { %v967_v40 = vadd.f32 %v966_v38, %v958_v24 }
 0x37c   :  { %v961_v23 = vpop.xlane.xlu0 %960 }
 0x37d   :  { %v968_v44 = vadd.f32 %v967_v40, %v961_v23 }
 0x37f   :  { %v969_v45 = vrot.slane %v968_v44, 4 }
 0x381   :  { %v970_v46 = vadd.f32 %v969_v45, %v968_v44 }
 0x383   :  { %v971_v47 = vrot.slane %v970_v46, 2 }
 0x385   :  { %v972_v32 = vadd.f32 %v971_v47, %v970_v46 }
 0x387   :  { %v973_v41 = vrot.slane %v972_v32, 1 }
 0x389   :  { %v974_v28 = vadd.f32 %v973_v41, %v972_v32 }
 0x38b   :  { %v976_v49 = vadd.f32 %v975_v43, %v974_v28 }
 0x38d   :  { %v977_v50 = vmul.f32 0.5, %v976_v49 }
 0x38f   :  { %1241 = vtanh.f32 %v977_v50 }
 0x39c   :  { %v1242_v25 = vpop.eup %1241 }
 0x39d   :  { %v979_v51 = vadd.f32 1.0, %v1242_v25 }
 0x39f   :  { %v980_v55 = vmul.f32 0.5, %v979_v51 }
 0x3a1   :  { %982 = vst.msk [vmem:[#allocation3] sm:$0x1] %vm981_vm1, %v980_v55 }
 0x3a2   :  { %1254 = shalt.err (!%p1251_p4)
}
 0x3a3   :  { %992 = dma.vmem_to_hbm [thread:$0]  %s990_s30, 16, %s2111_s7, [#allocation4]  }
 0x3a4   :  { %1263 = dma.done.wait [#allocation4], 16  }
 0x3a5   :  { %1264 = vsyncadd [#allocation4], 4294967280 }
 0x3a6   :  { %996 = vsyncpa [#allocation4], 1 }

</bundles_post_ra>
